<compile_context>
chip_gen: v7x
topology: tpu7x:2x2x1
jax: 0.10.0
libtpu: 0.0.40
codegen_flags: <defaults>
</compile_context>

<pallas_src>
import jax
import jax.numpy as jnp
from jax.experimental import pallas as pl
from jax.experimental.pallas import tpu as pltpu

K1P = 32            # conv1 im2col contraction: 1*5*5 = 25 -> 32
C1P = 32            # conv1 out channels: 20 -> 32 (per-tap lane group for conv2)
K2P = 25 * C1P      # conv2 dense im2col contraction: 500 real -> 800
C2P = 64            # conv2 out channels: 50 -> 64
K3P = 16 * C2P      # fc3 contraction: 800 real -> 1024
F3P = 512           # fc3 out features: 500 -> 512
F4P = 128           # fc4 out features: 10 -> 128 (lane-dense output)

DEFAULT_BATCH_TILE = 128


def _round_up(x, m):
    return (x + m - 1) // m * m


# ----------------------------- fused Pallas kernel -------------------------- #

def _lenet_fused_kernel(p1_ref, w1_ref, b1_ref, w2_ref, b2_ref,
                        w3_ref, b3_ref, w4_ref, b4_ref, o_ref,
                        h1p_ref, patch_ref, h2t_ref):
    bt = o_ref.shape[0]                           # batch-tile size (static)

    # ---- zero ONLY the conv1 halo rows of the padded activation scratch.
    # h1p row layout: (y*8 + x)*bt + b with padded coords y, x in [0, 8).
    # Done every grid step (scratch persists across steps / cores).
    zero8 = jnp.zeros((8 * bt, C1P), jnp.bfloat16)
    zero1 = jnp.zeros((bt, C1P), jnp.bfloat16)
    h1p_ref[0:8 * bt, :] = zero8                              # y == 0
    h1p_ref[56 * bt:64 * bt, :] = zero8                       # y == 7
    for y in range(1, 7):                                     # x == 0 / x == 7
        h1p_ref[(y * 8) * bt:(y * 8) * bt + bt, :] = zero1
        h1p_ref[(y * 8 + 7) * bt:(y * 8 + 7) * bt + bt, :] = zero1

    # ---- conv1 as GEMM + bias + ReLU, chunked over output rows (bounds vregs),
    # scattered into the zero-padded 8x8 activation grid.
    b1 = jnp.broadcast_to(b1_ref[...], (6 * bt, C1P))         # hoisted broadcast
    for oh1 in range(6):
        c = jnp.dot(p1_ref[oh1 * 6 * bt:(oh1 + 1) * 6 * bt, :], w1_ref[...],
                    preferred_element_type=jnp.float32)
        c = jnp.maximum(c + b1, 0.0).astype(jnp.bfloat16)     # (6*bt, 32)
        dst = ((oh1 + 1) * 8 + 1) * bt
        h1p_ref[dst:dst + 6 * bt, :] = c

    # ---- conv2 im2col: dense-K patch buffer.
    # patch rows  = (oh2*4 + ow2)*bt + b ; patch lanes = tap*32 + cin.
    # Every copy is sublane-contiguous and lands on a 32-lane-aligned offset.
    for t in range(25):
        i, j = t // 5, t % 5
        for oh2 in range(4):
            src = ((oh2 + i) * 8 + j) * bt
            dst = oh2 * 4 * bt
            patch_ref[dst:dst + 4 * bt, t * C1P:(t + 1) * C1P] = \
                h1p_ref[src:src + 4 * bt, :]

    # ---- conv2 as a dense-K GEMM (chunked over oh2), written into the
    # per-sample fc3 layout: h2t[b, (oh2*4 + ow2)*64 + cout].
    b2 = jnp.broadcast_to(b2_ref[...], (4 * bt, C2P))
    for oh2 in range(4):
        c = jnp.dot(patch_ref[oh2 * 4 * bt:(oh2 + 1) * 4 * bt, :], w2_ref[...],
                    preferred_element_type=jnp.float32)
        c = jnp.maximum(c + b2, 0.0).astype(jnp.bfloat16)     # (4*bt, 64)
        for ow2 in range(4):
            s = oh2 * 4 + ow2
            h2t_ref[:, s * C2P:(s + 1) * C2P] = c[ow2 * bt:(ow2 + 1) * bt, :]

    # ---- fc3 as a single dense GEMM (MXU accumulates over K internally).
    h3 = jnp.dot(h2t_ref[...], w3_ref[...], preferred_element_type=jnp.float32)
    h3 = jnp.maximum(h3 + b3_ref[...], 0.0).astype(jnp.bfloat16)   # (bt, 512)

    # ---- fc4 (bf16 operands, f32 accumulate) + masked log_softmax epilogue.
    z = jnp.dot(h3, w4_ref[...], preferred_element_type=jnp.float32) + b4_ref[...]
    col = jax.lax.broadcasted_iota(jnp.int32, z.shape, 1)
    z = jnp.where(col < 10, z, jnp.float32(-1e30))
    m = jnp.max(z, axis=-1, keepdims=True)
    lse = m + jnp.log(jnp.sum(jnp.exp(z - m), axis=-1, keepdims=True))
    o_ref[...] = z - lse


# ------------------------------ JAX glue ------------------------------------ #

def _conv1_patches(x, n_pad, bt):
    """im2col for conv1 (k=5, stride=5, pad=1) on the raw NCHW input.
    Rows ordered (tile, oh1*6 + ow1, sample-in-tile); 25 taps padded to 32 lanes;
    bf16 for the MXU."""
    n = x.shape[0]
    x = jnp.pad(x, ((0, n_pad - n), (0, 0), (0, 0), (0, 0)))
    xp = jnp.pad(x, ((0, 0), (0, 0), (1, 1), (1, 1)))            # (n_pad, 1, 30, 30)
    taps = [xp[:, 0, i:i + 26:5, j:j + 26:5]                     # each (n_pad, 6, 6)
            for i in range(5) for j in range(5)]
    p = jnp.stack(taps, axis=-1).reshape(n_pad, 36, 25)
    p = jnp.pad(p, ((0, 0), (0, 0), (0, K1P - 25)))              # 25 -> 32 taps
    g = n_pad // bt
    p = p.reshape(g, bt, 36, K1P).transpose(0, 2, 1, 3).reshape(g * 36 * bt, K1P)
    return p.astype(jnp.bfloat16)


def lenet5_caffe_forward(x, prepared):
    w1g, b1g, w2g, b2g, w3g, b3g, w4g, b4g = prepared
    n = x.shape[0]
    bt = min(DEFAULT_BATCH_TILE, _round_up(n, 16))   # batch tile (multiple of 16)
    n_pad = _round_up(n, bt)
    g = n_pad // bt
    p1 = _conv1_patches(x, n_pad, bt)                # (g*36*bt, 32) bf16

    out_pad = pl.pallas_call(
        _lenet_fused_kernel,
        grid=(g,),
        out_shape=jax.ShapeDtypeStruct((n_pad, F4P), jnp.float32),
        in_specs=[
            pl.BlockSpec((36 * bt, K1P), lambda i: (i, 0)),      # batch-tiled input
            pl.BlockSpec(w1g.shape, lambda i: (0, 0)),           # resident weights
            pl.BlockSpec(b1g.shape, lambda i: (0, 0)),
            pl.BlockSpec(w2g.shape, lambda i: (0, 0)),
            pl.BlockSpec(b2g.shape, lambda i: (0, 0)),
            pl.BlockSpec(w3g.shape, lambda i: (0, 0)),
            pl.BlockSpec(b3g.shape, lambda i: (0, 0)),
            pl.BlockSpec(w4g.shape, lambda i: (0, 0)),
            pl.BlockSpec(b4g.shape, lambda i: (0, 0)),
        ],
        out_specs=pl.BlockSpec((bt, F4P), lambda i: (i, 0)),
        scratch_shapes=[
            pltpu.VMEM((64 * bt, C1P), jnp.bfloat16),   # padded 8x8 conv1 activation
            pltpu.VMEM((16 * bt, K2P), jnp.bfloat16),   # conv2 dense im2col patches
            pltpu.VMEM((bt, K3P), jnp.bfloat16),        # conv2 out in fc3 (K) layout
        ],
        compiler_params=pltpu.CompilerParams(
            dimension_semantics=("parallel",),          # megacore on v7x
            vmem_limit_bytes=32 * 1024 * 1024),
    )(p1, w1g, b1g, w2g, b2g, w3g, b3g, w4g, b4g)

    return out_pad[:n, :10]


# ----------------------- one-time weight re-packing -------------------------- #

def prepare_params(params):
    """Pre-transpose / pad / cast every weight ONCE (outside the jitted forward)."""
    w1, b1, w2, b2, w3, b3, w4, b4 = params

    # conv1: (20, 1, 5, 5) -> GEMM weight (32, 32); row = kh*5 + kw, col = cout.
    w1g = jnp.zeros((K1P, C1P), jnp.float32).at[:25, :20].set(w1.reshape(20, 25).T)
    b1g = jnp.zeros((1, C1P), jnp.float32).at[0, :20].set(b1)

    # conv2: dense-K weight (800, 64); row = (kh*5 + kw)*32 + cin, col = cout.
    w2t = w2.transpose(2, 3, 1, 0).reshape(25, 20, 50)           # [tap, cin, cout]
    w2g = jnp.zeros((25, C1P, C2P), jnp.float32).at[:, :20, :50].set(w2t)
    w2g = w2g.reshape(K2P, C2P)
    b2g = jnp.zeros((1, C2P), jnp.float32).at[0, :50].set(b2)

    # fc3: (500, 800) with PyTorch flatten index c*16 + s -> kernel row s*64 + c.
    w3r = w3.reshape(500, 50, 16).transpose(2, 1, 0)             # [s, c, out]
    w3g = jnp.zeros((16, C2P, F3P), jnp.float32).at[:, :50, :500].set(w3r)
    w3g = w3g.reshape(K3P, F3P)
    b3g = jnp.zeros((1, F3P), jnp.float32).at[0, :500].set(b3)

    # fc4: (10, 500) -> (512, 128); bf16 operands, f32 accumulation + epilogue.
    w4g = jnp.zeros((F3P, F4P), jnp.float32).at[:500, :10].set(w4.T)
    b4g = jnp.zeros((1, F4P), jnp.float32).at[0, :10].set(b4)

    return (w1g.astype(jnp.bfloat16), b1g,
            w2g.astype(jnp.bfloat16), b2g,
            w3g.astype(jnp.bfloat16), b3g,
            w4g.astype(jnp.bfloat16), b4g)


# --------------------------- params & reference ------------------------------ #

def init_params(key):
    ks = jax.random.split(key, 8)

    def u(k, shape, fan_in):
        bound = float(fan_in) ** -0.5
        return jax.random.uniform(k, shape, jnp.float32, -bound, bound)

    w1 = u(ks[0], (20, 1, 5, 5), 1 * 25)
    b1 = u(ks[1], (20,), 1 * 25)
    w2 = u(ks[2], (50, 20, 5, 5), 20 * 25)
    b2 = u(ks[3], (50,), 20 * 25)
    w3 = u(ks[4], (500, 800), 800)
    b3 = u(ks[5], (500,), 800)
    w4 = u(ks[6], (10, 500), 500)
    b4 = u(ks[7], (10,), 500)
    return (w1, b1, w2, b2, w3, b3, w4, b4)


def reference_forward(x, params):
    """Pure-JAX (XLA, f32) reference matching the PyTorch forward exactly."""
    w1, b1, w2, b2, w3, b3, w4, b4 = params
    dn = ("NCHW", "OIHW", "NCHW")
    h = jax.lax.conv_general_dilated(x, w1, (5, 5), ((1, 1), (1, 1)),
                                     dimension_numbers=dn)
    h = jax.nn.relu(h + b1[None, :, None, None])
    h = jax.lax.conv_general_dilated(h, w2, (1, 1), ((1, 1), (1, 1)),
                                     dimension_numbers=dn)
    h = jax.nn.relu(h + b2[None, :, None, None])
    h = h.reshape(h.shape[0], -1)
    h = jax.nn.relu(h @ w3.T + b3)
    return jax.nn.log_softmax(h @ w4.T + b4, axis=1)


# ---------------------------------- main ------------------------------------- #

if __name__ == "__main__":
    key = jax.random.PRNGKey(0)
    k_x, k_p = jax.random.split(key)
    x = jax.random.normal(k_x, (2, 1, 28, 28), dtype=jnp.float32)
    params = init_params(k_p)
    prepared = prepare_params(params)        # one-time weight repack (outside jit)

    fwd = jax.jit(lenet5_caffe_forward)
    out = jax.block_until_ready(fwd(x, prepared))

    ref = jax.block_until_ready(reference_forward(x, params))
    assert out.shape == (2, 10)
    # bf16 MXU operands => loosened tolerance vs the f32 reference.
    assert jnp.allclose(out, ref, atol=3e-2, rtol=3e-2), (
        "mismatch vs reference, max abs err = "
        f"{float(jnp.max(jnp.abs(out - ref)))}")

    print("KERNEL_OK")
</pallas_src>

<mosaic_0001>
module attributes {stable_mosaic.version = 11 : i64} {
  func.func @_lenet_fused_kernel(%arg0: i32, %arg1: memref<576x32xbf16, #tpu.memory_space<vmem>>, %arg2: memref<32x32xbf16, #tpu.memory_space<vmem>>, %arg3: memref<1x32xf32, #tpu.memory_space<vmem>>, %arg4: memref<800x64xbf16, #tpu.memory_space<vmem>>, %arg5: memref<1x64xf32, #tpu.memory_space<vmem>>, %arg6: memref<1024x512xbf16, #tpu.memory_space<vmem>>, %arg7: memref<1x512xf32, #tpu.memory_space<vmem>>, %arg8: memref<512x128xbf16, #tpu.memory_space<vmem>>, %arg9: memref<1x128xf32, #tpu.memory_space<vmem>>, %arg10: memref<16x128xf32, #tpu.memory_space<vmem>>, %arg11: memref<1024x32xbf16, #tpu.memory_space<vmem>>, %arg12: memref<256x800xbf16, #tpu.memory_space<vmem>>, %arg13: memref<16x1024xbf16, #tpu.memory_space<vmem>>) attributes {dimension_semantics = [#tpu.dimension_semantics<parallel>], iteration_bounds = array<i64: 1>, scalar_prefetch = 0 : i64, scratch_operands = 3 : i64, tpu.core_type = #tpu.core_type<tc>, window_params = [{transform_indices = @transform_0, window_bounds = array<i64: 576, 32>}, {pipeline_mode = #tpu.pipeline_mode<synchronous>, transform_indices = @transform_1, window_bounds = array<i64: 32, 32>}, {pipeline_mode = #tpu.pipeline_mode<synchronous>, transform_indices = @transform_2, window_bounds = array<i64: 1, 32>}, {pipeline_mode = #tpu.pipeline_mode<synchronous>, transform_indices = @transform_3, window_bounds = array<i64: 800, 64>}, {pipeline_mode = #tpu.pipeline_mode<synchronous>, transform_indices = @transform_4, window_bounds = array<i64: 1, 64>}, {pipeline_mode = #tpu.pipeline_mode<synchronous>, transform_indices = @transform_5, window_bounds = array<i64: 1024, 512>}, {pipeline_mode = #tpu.pipeline_mode<synchronous>, transform_indices = @transform_6, window_bounds = array<i64: 1, 512>}, {pipeline_mode = #tpu.pipeline_mode<synchronous>, transform_indices = @transform_7, window_bounds = array<i64: 512, 128>}, {pipeline_mode = #tpu.pipeline_mode<synchronous>, transform_indices = @transform_8, window_bounds = array<i64: 1, 128>}, {transform_indices = @transform_9, window_bounds = array<i64: 16, 128>}]} {
    %cst = arith.constant 0.000000e+00 : bf16
    %0 = vector.broadcast %cst : bf16 to vector<128x32xbf16>
    %cst_0 = arith.constant 0.000000e+00 : bf16
    %1 = vector.broadcast %cst_0 : bf16 to vector<16x32xbf16>
    %c0 = arith.constant 0 : index
    %c0_1 = arith.constant 0 : index
    %2 = vector.load %arg11[%c0, %c0_1] : memref<1024x32xbf16, #tpu.memory_space<vmem>>, vector<128x32xbf16>
    tpu.vector_store %arg11[%c0, %c0_1], %0 {strides = array<i32>} : memref<1024x32xbf16, #tpu.memory_space<vmem>>, vector<128x32xbf16>,
    %c896 = arith.constant 896 : index
    %c0_2 = arith.constant 0 : index
    %3 = vector.load %arg11[%c896, %c0_2] : memref<1024x32xbf16, #tpu.memory_space<vmem>>, vector<128x32xbf16>
    tpu.vector_store %arg11[%c896, %c0_2], %0 {strides = array<i32>} : memref<1024x32xbf16, #tpu.memory_space<vmem>>, vector<128x32xbf16>,
    %c128 = arith.constant 128 : index
    %c0_3 = arith.constant 0 : index
    %4 = vector.load %arg11[%c128, %c0_3] : memref<1024x32xbf16, #tpu.memory_space<vmem>>, vector<16x32xbf16>
    tpu.vector_store %arg11[%c128, %c0_3], %1 {strides = array<i32>} : memref<1024x32xbf16, #tpu.memory_space<vmem>>, vector<16x32xbf16>,
    %c240 = arith.constant 240 : index
    %c0_4 = arith.constant 0 : index
    %5 = vector.load %arg11[%c240, %c0_4] : memref<1024x32xbf16, #tpu.memory_space<vmem>>, vector<16x32xbf16>
    tpu.vector_store %arg11[%c240, %c0_4], %1 {strides = array<i32>} : memref<1024x32xbf16, #tpu.memory_space<vmem>>, vector<16x32xbf16>,
    %c256 = arith.constant 256 : index
    %c0_5 = arith.constant 0 : index
    %6 = vector.load %arg11[%c256, %c0_5] : memref<1024x32xbf16, #tpu.memory_space<vmem>>, vector<16x32xbf16>
    tpu.vector_store %arg11[%c256, %c0_5], %1 {strides = array<i32>} : memref<1024x32xbf16, #tpu.memory_space<vmem>>, vector<16x32xbf16>,
    %c368 = arith.constant 368 : index
    %c0_6 = arith.constant 0 : index
    %7 = vector.load %arg11[%c368, %c0_6] : memref<1024x32xbf16, #tpu.memory_space<vmem>>, vector<16x32xbf16>
    tpu.vector_store %arg11[%c368, %c0_6], %1 {strides = array<i32>} : memref<1024x32xbf16, #tpu.memory_space<vmem>>, vector<16x32xbf16>,
    %c384 = arith.constant 384 : index
    %c0_7 = arith.constant 0 : index
    %8 = vector.load %arg11[%c384, %c0_7] : memref<1024x32xbf16, #tpu.memory_space<vmem>>, vector<16x32xbf16>
    tpu.vector_store %arg11[%c384, %c0_7], %1 {strides = array<i32>} : memref<1024x32xbf16, #tpu.memory_space<vmem>>, vector<16x32xbf16>,
    %c496 = arith.constant 496 : index
    %c0_8 = arith.constant 0 : index
    %9 = vector.load %arg11[%c496, %c0_8] : memref<1024x32xbf16, #tpu.memory_space<vmem>>, vector<16x32xbf16>
    tpu.vector_store %arg11[%c496, %c0_8], %1 {strides = array<i32>} : memref<1024x32xbf16, #tpu.memory_space<vmem>>, vector<16x32xbf16>,
    %c512 = arith.constant 512 : index
    %c0_9 = arith.constant 0 : index
    %10 = vector.load %arg11[%c512, %c0_9] : memref<1024x32xbf16, #tpu.memory_space<vmem>>, vector<16x32xbf16>
    tpu.vector_store %arg11[%c512, %c0_9], %1 {strides = array<i32>} : memref<1024x32xbf16, #tpu.memory_space<vmem>>, vector<16x32xbf16>,
    %c624 = arith.constant 624 : index
    %c0_10 = arith.constant 0 : index
    %11 = vector.load %arg11[%c624, %c0_10] : memref<1024x32xbf16, #tpu.memory_space<vmem>>, vector<16x32xbf16>
    tpu.vector_store %arg11[%c624, %c0_10], %1 {strides = array<i32>} : memref<1024x32xbf16, #tpu.memory_space<vmem>>, vector<16x32xbf16>,
    %c640 = arith.constant 640 : index
    %c0_11 = arith.constant 0 : index
    %12 = vector.load %arg11[%c640, %c0_11] : memref<1024x32xbf16, #tpu.memory_space<vmem>>, vector<16x32xbf16>
    tpu.vector_store %arg11[%c640, %c0_11], %1 {strides = array<i32>} : memref<1024x32xbf16, #tpu.memory_space<vmem>>, vector<16x32xbf16>,
    %c752 = arith.constant 752 : index
    %c0_12 = arith.constant 0 : index
    %13 = vector.load %arg11[%c752, %c0_12] : memref<1024x32xbf16, #tpu.memory_space<vmem>>, vector<16x32xbf16>
    tpu.vector_store %arg11[%c752, %c0_12], %1 {strides = array<i32>} : memref<1024x32xbf16, #tpu.memory_space<vmem>>, vector<16x32xbf16>,
    %c768 = arith.constant 768 : index
    %c0_13 = arith.constant 0 : index
    %14 = vector.load %arg11[%c768, %c0_13] : memref<1024x32xbf16, #tpu.memory_space<vmem>>, vector<16x32xbf16>
    tpu.vector_store %arg11[%c768, %c0_13], %1 {strides = array<i32>} : memref<1024x32xbf16, #tpu.memory_space<vmem>>, vector<16x32xbf16>,
    %c880 = arith.constant 880 : index
    %c0_14 = arith.constant 0 : index
    %15 = vector.load %arg11[%c880, %c0_14] : memref<1024x32xbf16, #tpu.memory_space<vmem>>, vector<16x32xbf16>
    tpu.vector_store %arg11[%c880, %c0_14], %1 {strides = array<i32>} : memref<1024x32xbf16, #tpu.memory_space<vmem>>, vector<16x32xbf16>,
    %c0_15 = arith.constant 0 : index
    %c0_16 = arith.constant 0 : index
    %16 = vector.load %arg3[%c0_15, %c0_16] : memref<1x32xf32, #tpu.memory_space<vmem>>, vector<1x32xf32>
    %17 = vector.shape_cast %16 : vector<1x32xf32> to vector<1x32xf32>
    %18 = vector.broadcast %17 : vector<1x32xf32> to vector<96x32xf32>
    %c0_17 = arith.constant 0 : index
    %c0_18 = arith.constant 0 : index
    %19 = vector.load %arg1[%c0_17, %c0_18] : memref<576x32xbf16, #tpu.memory_space<vmem>>, vector<96x32xbf16>
    %c0_19 = arith.constant 0 : index
    %c0_20 = arith.constant 0 : index
    %20 = vector.load %arg2[%c0_19, %c0_20] : memref<32x32xbf16, #tpu.memory_space<vmem>>, vector<32x32xbf16>
    %cst_21 = arith.constant dense<0.000000e+00> : vector<96x32xf32>
    %21 = tpu.matmul %19, %20, %cst_21 {dimension_numbers = #tpu.dot_dimension_numbers<[1], [0], [0], [1], [0, 0, 1, 1], [], []>} : vector<96x32xbf16>, vector<32x32xbf16>, vector<96x32xf32> -> vector<96x32xf32>
    %22 = arith.addf %21, %18 : vector<96x32xf32>
    %cst_22 = arith.constant 0.000000e+00 : f32
    %23 = vector.broadcast %cst_22 : f32 to vector<96x32xf32>
    %24 = arith.maximumf %22, %23 : vector<96x32xf32>
    %25 = arith.truncf %24 : vector<96x32xf32> to vector<96x32xbf16>
    %c144 = arith.constant 144 : index
    %c0_23 = arith.constant 0 : index
    %26 = vector.load %arg11[%c144, %c0_23] : memref<1024x32xbf16, #tpu.memory_space<vmem>>, vector<96x32xbf16>
    tpu.vector_store %arg11[%c144, %c0_23], %25 {strides = array<i32>} : memref<1024x32xbf16, #tpu.memory_space<vmem>>, vector<96x32xbf16>,
    %c96 = arith.constant 96 : index
    %c0_24 = arith.constant 0 : index
    %27 = vector.load %arg1[%c96, %c0_24] : memref<576x32xbf16, #tpu.memory_space<vmem>>, vector<96x32xbf16>
    %c0_25 = arith.constant 0 : index
    %c0_26 = arith.constant 0 : index
    %28 = vector.load %arg2[%c0_25, %c0_26] : memref<32x32xbf16, #tpu.memory_space<vmem>>, vector<32x32xbf16>
    %cst_27 = arith.constant dense<0.000000e+00> : vector<96x32xf32>
    %29 = tpu.matmul %27, %28, %cst_27 {dimension_numbers = #tpu.dot_dimension_numbers<[1], [0], [0], [1], [0, 0, 1, 1], [], []>} : vector<96x32xbf16>, vector<32x32xbf16>, vector<96x32xf32> -> vector<96x32xf32>
    %30 = arith.addf %29, %18 : vector<96x32xf32>
    %cst_28 = arith.constant 0.000000e+00 : f32
    %31 = vector.broadcast %cst_28 : f32 to vector<96x32xf32>
    %32 = arith.maximumf %30, %31 : vector<96x32xf32>
    %33 = arith.truncf %32 : vector<96x32xf32> to vector<96x32xbf16>
    %c272 = arith.constant 272 : index
    %c0_29 = arith.constant 0 : index
    %34 = vector.load %arg11[%c272, %c0_29] : memref<1024x32xbf16, #tpu.memory_space<vmem>>, vector<96x32xbf16>
    tpu.vector_store %arg11[%c272, %c0_29], %33 {strides = array<i32>} : memref<1024x32xbf16, #tpu.memory_space<vmem>>, vector<96x32xbf16>,
    %c192 = arith.constant 192 : index
    %c0_30 = arith.constant 0 : index
    %35 = vector.load %arg1[%c192, %c0_30] : memref<576x32xbf16, #tpu.memory_space<vmem>>, vector<96x32xbf16>
    %c0_31 = arith.constant 0 : index
    %c0_32 = arith.constant 0 : index
    %36 = vector.load %arg2[%c0_31, %c0_32] : memref<32x32xbf16, #tpu.memory_space<vmem>>, vector<32x32xbf16>
    %cst_33 = arith.constant dense<0.000000e+00> : vector<96x32xf32>
    %37 = tpu.matmul %35, %36, %cst_33 {dimension_numbers = #tpu.dot_dimension_numbers<[1], [0], [0], [1], [0, 0, 1, 1], [], []>} : vector<96x32xbf16>, vector<32x32xbf16>, vector<96x32xf32> -> vector<96x32xf32>
    %38 = arith.addf %37, %18 : vector<96x32xf32>
    %cst_34 = arith.constant 0.000000e+00 : f32
    %39 = vector.broadcast %cst_34 : f32 to vector<96x32xf32>
    %40 = arith.maximumf %38, %39 : vector<96x32xf32>
    %41 = arith.truncf %40 : vector<96x32xf32> to vector<96x32xbf16>
    %c400 = arith.constant 400 : index
    %c0_35 = arith.constant 0 : index
    %42 = vector.load %arg11[%c400, %c0_35] : memref<1024x32xbf16, #tpu.memory_space<vmem>>, vector<96x32xbf16>
    tpu.vector_store %arg11[%c400, %c0_35], %41 {strides = array<i32>} : memref<1024x32xbf16, #tpu.memory_space<vmem>>, vector<96x32xbf16>,
    %c288 = arith.constant 288 : index
    %c0_36 = arith.constant 0 : index
    %43 = vector.load %arg1[%c288, %c0_36] : memref<576x32xbf16, #tpu.memory_space<vmem>>, vector<96x32xbf16>
    %c0_37 = arith.constant 0 : index
    %c0_38 = arith.constant 0 : index
    %44 = vector.load %arg2[%c0_37, %c0_38] : memref<32x32xbf16, #tpu.memory_space<vmem>>, vector<32x32xbf16>
    %cst_39 = arith.constant dense<0.000000e+00> : vector<96x32xf32>
    %45 = tpu.matmul %43, %44, %cst_39 {dimension_numbers = #tpu.dot_dimension_numbers<[1], [0], [0], [1], [0, 0, 1, 1], [], []>} : vector<96x32xbf16>, vector<32x32xbf16>, vector<96x32xf32> -> vector<96x32xf32>
    %46 = arith.addf %45, %18 : vector<96x32xf32>
    %cst_40 = arith.constant 0.000000e+00 : f32
    %47 = vector.broadcast %cst_40 : f32 to vector<96x32xf32>
    %48 = arith.maximumf %46, %47 : vector<96x32xf32>
    %49 = arith.truncf %48 : vector<96x32xf32> to vector<96x32xbf16>
    %c528 = arith.constant 528 : index
    %c0_41 = arith.constant 0 : index
    %50 = vector.load %arg11[%c528, %c0_41] : memref<1024x32xbf16, #tpu.memory_space<vmem>>, vector<96x32xbf16>
    tpu.vector_store %arg11[%c528, %c0_41], %49 {strides = array<i32>} : memref<1024x32xbf16, #tpu.memory_space<vmem>>, vector<96x32xbf16>,
    %c384_42 = arith.constant 384 : index
    %c0_43 = arith.constant 0 : index
    %51 = vector.load %arg1[%c384_42, %c0_43] : memref<576x32xbf16, #tpu.memory_space<vmem>>, vector<96x32xbf16>
    %c0_44 = arith.constant 0 : index
    %c0_45 = arith.constant 0 : index
    %52 = vector.load %arg2[%c0_44, %c0_45] : memref<32x32xbf16, #tpu.memory_space<vmem>>, vector<32x32xbf16>
    %cst_46 = arith.constant dense<0.000000e+00> : vector<96x32xf32>
    %53 = tpu.matmul %51, %52, %cst_46 {dimension_numbers = #tpu.dot_dimension_numbers<[1], [0], [0], [1], [0, 0, 1, 1], [], []>} : vector<96x32xbf16>, vector<32x32xbf16>, vector<96x32xf32> -> vector<96x32xf32>
    %54 = arith.addf %53, %18 : vector<96x32xf32>
    %cst_47 = arith.constant 0.000000e+00 : f32
    %55 = vector.broadcast %cst_47 : f32 to vector<96x32xf32>
    %56 = arith.maximumf %54, %55 : vector<96x32xf32>
    %57 = arith.truncf %56 : vector<96x32xf32> to vector<96x32xbf16>
    %c656 = arith.constant 656 : index
    %c0_48 = arith.constant 0 : index
    %58 = vector.load %arg11[%c656, %c0_48] : memref<1024x32xbf16, #tpu.memory_space<vmem>>, vector<96x32xbf16>
    tpu.vector_store %arg11[%c656, %c0_48], %57 {strides = array<i32>} : memref<1024x32xbf16, #tpu.memory_space<vmem>>, vector<96x32xbf16>,
    %c480 = arith.constant 480 : index
    %c0_49 = arith.constant 0 : index
    %59 = vector.load %arg1[%c480, %c0_49] : memref<576x32xbf16, #tpu.memory_space<vmem>>, vector<96x32xbf16>
    %c0_50 = arith.constant 0 : index
    %c0_51 = arith.constant 0 : index
    %60 = vector.load %arg2[%c0_50, %c0_51] : memref<32x32xbf16, #tpu.memory_space<vmem>>, vector<32x32xbf16>
    %cst_52 = arith.constant dense<0.000000e+00> : vector<96x32xf32>
    %61 = tpu.matmul %59, %60, %cst_52 {dimension_numbers = #tpu.dot_dimension_numbers<[1], [0], [0], [1], [0, 0, 1, 1], [], []>} : vector<96x32xbf16>, vector<32x32xbf16>, vector<96x32xf32> -> vector<96x32xf32>
    %62 = arith.addf %61, %18 : vector<96x32xf32>
    %cst_53 = arith.constant 0.000000e+00 : f32
    %63 = vector.broadcast %cst_53 : f32 to vector<96x32xf32>
    %64 = arith.maximumf %62, %63 : vector<96x32xf32>
    %65 = arith.truncf %64 : vector<96x32xf32> to vector<96x32xbf16>
    %c784 = arith.constant 784 : index
    %c0_54 = arith.constant 0 : index
    %66 = vector.load %arg11[%c784, %c0_54] : memref<1024x32xbf16, #tpu.memory_space<vmem>>, vector<96x32xbf16>
    tpu.vector_store %arg11[%c784, %c0_54], %65 {strides = array<i32>} : memref<1024x32xbf16, #tpu.memory_space<vmem>>, vector<96x32xbf16>,
    %c0_55 = arith.constant 0 : index
    %c0_56 = arith.constant 0 : index
    %67 = vector.load %arg11[%c0_55, %c0_56] : memref<1024x32xbf16, #tpu.memory_space<vmem>>, vector<64x32xbf16>
    %c0_57 = arith.constant 0 : index
    %c0_58 = arith.constant 0 : index
    %68 = vector.load %arg12[%c0_57, %c0_58] : memref<256x800xbf16, #tpu.memory_space<vmem>>, vector<64x32xbf16>
    tpu.vector_store %arg12[%c0_57, %c0_58], %67 {strides = array<i32>} : memref<256x800xbf16, #tpu.memory_space<vmem>>, vector<64x32xbf16>,
    %c128_59 = arith.constant 128 : index
    %c0_60 = arith.constant 0 : index
    %69 = vector.load %arg11[%c128_59, %c0_60] : memref<1024x32xbf16, #tpu.memory_space<vmem>>, vector<64x32xbf16>
    %c64 = arith.constant 64 : index
    %c0_61 = arith.constant 0 : index
    %70 = vector.load %arg12[%c64, %c0_61] : memref<256x800xbf16, #tpu.memory_space<vmem>>, vector<64x32xbf16>
    tpu.vector_store %arg12[%c64, %c0_61], %69 {strides = array<i32>} : memref<256x800xbf16, #tpu.memory_space<vmem>>, vector<64x32xbf16>,
    %c256_62 = arith.constant 256 : index
    %c0_63 = arith.constant 0 : index
    %71 = vector.load %arg11[%c256_62, %c0_63] : memref<1024x32xbf16, #tpu.memory_space<vmem>>, vector<64x32xbf16>
    %c128_64 = arith.constant 128 : index
    %c0_65 = arith.constant 0 : index
    %72 = vector.load %arg12[%c128_64, %c0_65] : memref<256x800xbf16, #tpu.memory_space<vmem>>, vector<64x32xbf16>
    tpu.vector_store %arg12[%c128_64, %c0_65], %71 {strides = array<i32>} : memref<256x800xbf16, #tpu.memory_space<vmem>>, vector<64x32xbf16>,
    %c384_66 = arith.constant 384 : index
    %c0_67 = arith.constant 0 : index
    %73 = vector.load %arg11[%c384_66, %c0_67] : memref<1024x32xbf16, #tpu.memory_space<vmem>>, vector<64x32xbf16>
    %c192_68 = arith.constant 192 : index
    %c0_69 = arith.constant 0 : index
    %74 = vector.load %arg12[%c192_68, %c0_69] : memref<256x800xbf16, #tpu.memory_space<vmem>>, vector<64x32xbf16>
    tpu.vector_store %arg12[%c192_68, %c0_69], %73 {strides = array<i32>} : memref<256x800xbf16, #tpu.memory_space<vmem>>, vector<64x32xbf16>,
    %c16 = arith.constant 16 : index
    %c0_70 = arith.constant 0 : index
    %75 = vector.load %arg11[%c16, %c0_70] : memref<1024x32xbf16, #tpu.memory_space<vmem>>, vector<64x32xbf16>
    %c0_71 = arith.constant 0 : index
    %c32 = arith.constant 32 : index
    %76 = vector.load %arg12[%c0_71, %c32] : memref<256x800xbf16, #tpu.memory_space<vmem>>, vector<64x32xbf16>
    tpu.vector_store %arg12[%c0_71, %c32], %75 {strides = array<i32>} : memref<256x800xbf16, #tpu.memory_space<vmem>>, vector<64x32xbf16>,
    %c144_72 = arith.constant 144 : index
    %c0_73 = arith.constant 0 : index
    %77 = vector.load %arg11[%c144_72, %c0_73] : memref<1024x32xbf16, #tpu.memory_space<vmem>>, vector<64x32xbf16>
    %c64_74 = arith.constant 64 : index
    %c32_75 = arith.constant 32 : index
    %78 = vector.load %arg12[%c64_74, %c32_75] : memref<256x800xbf16, #tpu.memory_space<vmem>>, vector<64x32xbf16>
    tpu.vector_store %arg12[%c64_74, %c32_75], %77 {strides = array<i32>} : memref<256x800xbf16, #tpu.memory_space<vmem>>, vector<64x32xbf16>,
    %c272_76 = arith.constant 272 : index
    %c0_77 = arith.constant 0 : index
    %79 = vector.load %arg11[%c272_76, %c0_77] : memref<1024x32xbf16, #tpu.memory_space<vmem>>, vector<64x32xbf16>
    %c128_78 = arith.constant 128 : index
    %c32_79 = arith.constant 32 : index
    %80 = vector.load %arg12[%c128_78, %c32_79] : memref<256x800xbf16, #tpu.memory_space<vmem>>, vector<64x32xbf16>
    tpu.vector_store %arg12[%c128_78, %c32_79], %79 {strides = array<i32>} : memref<256x800xbf16, #tpu.memory_space<vmem>>, vector<64x32xbf16>,
    %c400_80 = arith.constant 400 : index
    %c0_81 = arith.constant 0 : index
    %81 = vector.load %arg11[%c400_80, %c0_81] : memref<1024x32xbf16, #tpu.memory_space<vmem>>, vector<64x32xbf16>
    %c192_82 = arith.constant 192 : index
    %c32_83 = arith.constant 32 : index
    %82 = vector.load %arg12[%c192_82, %c32_83] : memref<256x800xbf16, #tpu.memory_space<vmem>>, vector<64x32xbf16>
    tpu.vector_store %arg12[%c192_82, %c32_83], %81 {strides = array<i32>} : memref<256x800xbf16, #tpu.memory_space<vmem>>, vector<64x32xbf16>,
    %c32_84 = arith.constant 32 : index
    %c0_85 = arith.constant 0 : index
    %83 = vector.load %arg11[%c32_84, %c0_85] : memref<1024x32xbf16, #tpu.memory_space<vmem>>, vector<64x32xbf16>
    %c0_86 = arith.constant 0 : index
    %c64_87 = arith.constant 64 : index
    %84 = vector.load %arg12[%c0_86, %c64_87] : memref<256x800xbf16, #tpu.memory_space<vmem>>, vector<64x32xbf16>
    tpu.vector_store %arg12[%c0_86, %c64_87], %83 {strides = array<i32>} : memref<256x800xbf16, #tpu.memory_space<vmem>>, vector<64x32xbf16>,
    %c160 = arith.constant 160 : index
    %c0_88 = arith.constant 0 : index
    %85 = vector.load %arg11[%c160, %c0_88] : memref<1024x32xbf16, #tpu.memory_space<vmem>>, vector<64x32xbf16>
    %c64_89 = arith.constant 64 : index
    %c64_90 = arith.constant 64 : index
    %86 = vector.load %arg12[%c64_89, %c64_90] : memref<256x800xbf16, #tpu.memory_space<vmem>>, vector<64x32xbf16>
    tpu.vector_store %arg12[%c64_89, %c64_90], %85 {strides = array<i32>} : memref<256x800xbf16, #tpu.memory_space<vmem>>, vector<64x32xbf16>,
    %c288_91 = arith.constant 288 : index
    %c0_92 = arith.constant 0 : index
    %87 = vector.load %arg11[%c288_91, %c0_92] : memref<1024x32xbf16, #tpu.memory_space<vmem>>, vector<64x32xbf16>
    %c128_93 = arith.constant 128 : index
    %c64_94 = arith.constant 64 : index
    %88 = vector.load %arg12[%c128_93, %c64_94] : memref<256x800xbf16, #tpu.memory_space<vmem>>, vector<64x32xbf16>
    tpu.vector_store %arg12[%c128_93, %c64_94], %87 {strides = array<i32>} : memref<256x800xbf16, #tpu.memory_space<vmem>>, vector<64x32xbf16>,
    %c416 = arith.constant 416 : index
    %c0_95 = arith.constant 0 : index
    %89 = vector.load %arg11[%c416, %c0_95] : memref<1024x32xbf16, #tpu.memory_space<vmem>>, vector<64x32xbf16>
    %c192_96 = arith.constant 192 : index
    %c64_97 = arith.constant 64 : index
    %90 = vector.load %arg12[%c192_96, %c64_97] : memref<256x800xbf16, #tpu.memory_space<vmem>>, vector<64x32xbf16>
    tpu.vector_store %arg12[%c192_96, %c64_97], %89 {strides = array<i32>} : memref<256x800xbf16, #tpu.memory_space<vmem>>, vector<64x32xbf16>,
    %c48 = arith.constant 48 : index
    %c0_98 = arith.constant 0 : index
    %91 = vector.load %arg11[%c48, %c0_98] : memref<1024x32xbf16, #tpu.memory_space<vmem>>, vector<64x32xbf16>
    %c0_99 = arith.constant 0 : index
    %c96_100 = arith.constant 96 : index
    %92 = vector.load %arg12[%c0_99, %c96_100] : memref<256x800xbf16, #tpu.memory_space<vmem>>, vector<64x32xbf16>
    tpu.vector_store %arg12[%c0_99, %c96_100], %91 {strides = array<i32>} : memref<256x800xbf16, #tpu.memory_space<vmem>>, vector<64x32xbf16>,
    %c176 = arith.constant 176 : index
    %c0_101 = arith.constant 0 : index
    %93 = vector.load %arg11[%c176, %c0_101] : memref<1024x32xbf16, #tpu.memory_space<vmem>>, vector<64x32xbf16>
    %c64_102 = arith.constant 64 : index
    %c96_103 = arith.constant 96 : index
    %94 = vector.load %arg12[%c64_102, %c96_103] : memref<256x800xbf16, #tpu.memory_space<vmem>>, vector<64x32xbf16>
    tpu.vector_store %arg12[%c64_102, %c96_103], %93 {strides = array<i32>} : memref<256x800xbf16, #tpu.memory_space<vmem>>, vector<64x32xbf16>,
    %c304 = arith.constant 304 : index
    %c0_104 = arith.constant 0 : index
    %95 = vector.load %arg11[%c304, %c0_104] : memref<1024x32xbf16, #tpu.memory_space<vmem>>, vector<64x32xbf16>
    %c128_105 = arith.constant 128 : index
    %c96_106 = arith.constant 96 : index
    %96 = vector.load %arg12[%c128_105, %c96_106] : memref<256x800xbf16, #tpu.memory_space<vmem>>, vector<64x32xbf16>
    tpu.vector_store %arg12[%c128_105, %c96_106], %95 {strides = array<i32>} : memref<256x800xbf16, #tpu.memory_space<vmem>>, vector<64x32xbf16>,
    %c432 = arith.constant 432 : index
    %c0_107 = arith.constant 0 : index
    %97 = vector.load %arg11[%c432, %c0_107] : memref<1024x32xbf16, #tpu.memory_space<vmem>>, vector<64x32xbf16>
    %c192_108 = arith.constant 192 : index
    %c96_109 = arith.constant 96 : index
    %98 = vector.load %arg12[%c192_108, %c96_109] : memref<256x800xbf16, #tpu.memory_space<vmem>>, vector<64x32xbf16>
    tpu.vector_store %arg12[%c192_108, %c96_109], %97 {strides = array<i32>} : memref<256x800xbf16, #tpu.memory_space<vmem>>, vector<64x32xbf16>,
    %c64_110 = arith.constant 64 : index
    %c0_111 = arith.constant 0 : index
    %99 = vector.load %arg11[%c64_110, %c0_111] : memref<1024x32xbf16, #tpu.memory_space<vmem>>, vector<64x32xbf16>
    %c0_112 = arith.constant 0 : index
    %c128_113 = arith.constant 128 : index
    %100 = vector.load %arg12[%c0_112, %c128_113] : memref<256x800xbf16, #tpu.memory_space<vmem>>, vector<64x32xbf16>
    tpu.vector_store %arg12[%c0_112, %c128_113], %99 {strides = array<i32>} : memref<256x800xbf16, #tpu.memory_space<vmem>>, vector<64x32xbf16>,
    %c192_114 = arith.constant 192 : index
    %c0_115 = arith.constant 0 : index
    %101 = vector.load %arg11[%c192_114, %c0_115] : memref<1024x32xbf16, #tpu.memory_space<vmem>>, vector<64x32xbf16>
    %c64_116 = arith.constant 64 : index
    %c128_117 = arith.constant 128 : index
    %102 = vector.load %arg12[%c64_116, %c128_117] : memref<256x800xbf16, #tpu.memory_space<vmem>>, vector<64x32xbf16>
    tpu.vector_store %arg12[%c64_116, %c128_117], %101 {strides = array<i32>} : memref<256x800xbf16, #tpu.memory_space<vmem>>, vector<64x32xbf16>,
    %c320 = arith.constant 320 : index
    %c0_118 = arith.constant 0 : index
    %103 = vector.load %arg11[%c320, %c0_118] : memref<1024x32xbf16, #tpu.memory_space<vmem>>, vector<64x32xbf16>
    %c128_119 = arith.constant 128 : index
    %c128_120 = arith.constant 128 : index
    %104 = vector.load %arg12[%c128_119, %c128_120] : memref<256x800xbf16, #tpu.memory_space<vmem>>, vector<64x32xbf16>
    tpu.vector_store %arg12[%c128_119, %c128_120], %103 {strides = array<i32>} : memref<256x800xbf16, #tpu.memory_space<vmem>>, vector<64x32xbf16>,
    %c448 = arith.constant 448 : index
    %c0_121 = arith.constant 0 : index
    %105 = vector.load %arg11[%c448, %c0_121] : memref<1024x32xbf16, #tpu.memory_space<vmem>>, vector<64x32xbf16>
    %c192_122 = arith.constant 192 : index
    %c128_123 = arith.constant 128 : index
    %106 = vector.load %arg12[%c192_122, %c128_123] : memref<256x800xbf16, #tpu.memory_space<vmem>>, vector<64x32xbf16>
    tpu.vector_store %arg12[%c192_122, %c128_123], %105 {strides = array<i32>} : memref<256x800xbf16, #tpu.memory_space<vmem>>, vector<64x32xbf16>,
    %c128_124 = arith.constant 128 : index
    %c0_125 = arith.constant 0 : index
    %107 = vector.load %arg11[%c128_124, %c0_125] : memref<1024x32xbf16, #tpu.memory_space<vmem>>, vector<64x32xbf16>
    %c0_126 = arith.constant 0 : index
    %c160_127 = arith.constant 160 : index
    %108 = vector.load %arg12[%c0_126, %c160_127] : memref<256x800xbf16, #tpu.memory_space<vmem>>, vector<64x32xbf16>
    tpu.vector_store %arg12[%c0_126, %c160_127], %107 {strides = array<i32>} : memref<256x800xbf16, #tpu.memory_space<vmem>>, vector<64x32xbf16>,
    %c256_128 = arith.constant 256 : index
    %c0_129 = arith.constant 0 : index
    %109 = vector.load %arg11[%c256_128, %c0_129] : memref<1024x32xbf16, #tpu.memory_space<vmem>>, vector<64x32xbf16>
    %c64_130 = arith.constant 64 : index
    %c160_131 = arith.constant 160 : index
    %110 = vector.load %arg12[%c64_130, %c160_131] : memref<256x800xbf16, #tpu.memory_space<vmem>>, vector<64x32xbf16>
    tpu.vector_store %arg12[%c64_130, %c160_131], %109 {strides = array<i32>} : memref<256x800xbf16, #tpu.memory_space<vmem>>, vector<64x32xbf16>,
    %c384_132 = arith.constant 384 : index
    %c0_133 = arith.constant 0 : index
    %111 = vector.load %arg11[%c384_132, %c0_133] : memref<1024x32xbf16, #tpu.memory_space<vmem>>, vector<64x32xbf16>
    %c128_134 = arith.constant 128 : index
    %c160_135 = arith.constant 160 : index
    %112 = vector.load %arg12[%c128_134, %c160_135] : memref<256x800xbf16, #tpu.memory_space<vmem>>, vector<64x32xbf16>
    tpu.vector_store %arg12[%c128_134, %c160_135], %111 {strides = array<i32>} : memref<256x800xbf16, #tpu.memory_space<vmem>>, vector<64x32xbf16>,
    %c512_136 = arith.constant 512 : index
    %c0_137 = arith.constant 0 : index
    %113 = vector.load %arg11[%c512_136, %c0_137] : memref<1024x32xbf16, #tpu.memory_space<vmem>>, vector<64x32xbf16>
    %c192_138 = arith.constant 192 : index
    %c160_139 = arith.constant 160 : index
    %114 = vector.load %arg12[%c192_138, %c160_139] : memref<256x800xbf16, #tpu.memory_space<vmem>>, vector<64x32xbf16>
    tpu.vector_store %arg12[%c192_138, %c160_139], %113 {strides = array<i32>} : memref<256x800xbf16, #tpu.memory_space<vmem>>, vector<64x32xbf16>,
    %c144_140 = arith.constant 144 : index
    %c0_141 = arith.constant 0 : index
    %115 = vector.load %arg11[%c144_140, %c0_141] : memref<1024x32xbf16, #tpu.memory_space<vmem>>, vector<64x32xbf16>
    %c0_142 = arith.constant 0 : index
    %c192_143 = arith.constant 192 : index
    %116 = vector.load %arg12[%c0_142, %c192_143] : memref<256x800xbf16, #tpu.memory_space<vmem>>, vector<64x32xbf16>
    tpu.vector_store %arg12[%c0_142, %c192_143], %115 {strides = array<i32>} : memref<256x800xbf16, #tpu.memory_space<vmem>>, vector<64x32xbf16>,
    %c272_144 = arith.constant 272 : index
    %c0_145 = arith.constant 0 : index
    %117 = vector.load %arg11[%c272_144, %c0_145] : memref<1024x32xbf16, #tpu.memory_space<vmem>>, vector<64x32xbf16>
    %c64_146 = arith.constant 64 : index
    %c192_147 = arith.constant 192 : index
    %118 = vector.load %arg12[%c64_146, %c192_147] : memref<256x800xbf16, #tpu.memory_space<vmem>>, vector<64x32xbf16>
    tpu.vector_store %arg12[%c64_146, %c192_147], %117 {strides = array<i32>} : memref<256x800xbf16, #tpu.memory_space<vmem>>, vector<64x32xbf16>,
    %c400_148 = arith.constant 400 : index
    %c0_149 = arith.constant 0 : index
    %119 = vector.load %arg11[%c400_148, %c0_149] : memref<1024x32xbf16, #tpu.memory_space<vmem>>, vector<64x32xbf16>
    %c128_150 = arith.constant 128 : index
    %c192_151 = arith.constant 192 : index
    %120 = vector.load %arg12[%c128_150, %c192_151] : memref<256x800xbf16, #tpu.memory_space<vmem>>, vector<64x32xbf16>
    tpu.vector_store %arg12[%c128_150, %c192_151], %119 {strides = array<i32>} : memref<256x800xbf16, #tpu.memory_space<vmem>>, vector<64x32xbf16>,
    %c528_152 = arith.constant 528 : index
    %c0_153 = arith.constant 0 : index
    %121 = vector.load %arg11[%c528_152, %c0_153] : memref<1024x32xbf16, #tpu.memory_space<vmem>>, vector<64x32xbf16>
    %c192_154 = arith.constant 192 : index
    %c192_155 = arith.constant 192 : index
    %122 = vector.load %arg12[%c192_154, %c192_155] : memref<256x800xbf16, #tpu.memory_space<vmem>>, vector<64x32xbf16>
    tpu.vector_store %arg12[%c192_154, %c192_155], %121 {strides = array<i32>} : memref<256x800xbf16, #tpu.memory_space<vmem>>, vector<64x32xbf16>,
    %c160_156 = arith.constant 160 : index
    %c0_157 = arith.constant 0 : index
    %123 = vector.load %arg11[%c160_156, %c0_157] : memref<1024x32xbf16, #tpu.memory_space<vmem>>, vector<64x32xbf16>
    %c0_158 = arith.constant 0 : index
    %c224 = arith.constant 224 : index
    %124 = vector.load %arg12[%c0_158, %c224] : memref<256x800xbf16, #tpu.memory_space<vmem>>, vector<64x32xbf16>
    tpu.vector_store %arg12[%c0_158, %c224], %123 {strides = array<i32>} : memref<256x800xbf16, #tpu.memory_space<vmem>>, vector<64x32xbf16>,
    %c288_159 = arith.constant 288 : index
    %c0_160 = arith.constant 0 : index
    %125 = vector.load %arg11[%c288_159, %c0_160] : memref<1024x32xbf16, #tpu.memory_space<vmem>>, vector<64x32xbf16>
    %c64_161 = arith.constant 64 : index
    %c224_162 = arith.constant 224 : index
    %126 = vector.load %arg12[%c64_161, %c224_162] : memref<256x800xbf16, #tpu.memory_space<vmem>>, vector<64x32xbf16>
    tpu.vector_store %arg12[%c64_161, %c224_162], %125 {strides = array<i32>} : memref<256x800xbf16, #tpu.memory_space<vmem>>, vector<64x32xbf16>,
    %c416_163 = arith.constant 416 : index
    %c0_164 = arith.constant 0 : index
    %127 = vector.load %arg11[%c416_163, %c0_164] : memref<1024x32xbf16, #tpu.memory_space<vmem>>, vector<64x32xbf16>
    %c128_165 = arith.constant 128 : index
    %c224_166 = arith.constant 224 : index
    %128 = vector.load %arg12[%c128_165, %c224_166] : memref<256x800xbf16, #tpu.memory_space<vmem>>, vector<64x32xbf16>
    tpu.vector_store %arg12[%c128_165, %c224_166], %127 {strides = array<i32>} : memref<256x800xbf16, #tpu.memory_space<vmem>>, vector<64x32xbf16>,
    %c544 = arith.constant 544 : index
    %c0_167 = arith.constant 0 : index
    %129 = vector.load %arg11[%c544, %c0_167] : memref<1024x32xbf16, #tpu.memory_space<vmem>>, vector<64x32xbf16>
    %c192_168 = arith.constant 192 : index
    %c224_169 = arith.constant 224 : index
    %130 = vector.load %arg12[%c192_168, %c224_169] : memref<256x800xbf16, #tpu.memory_space<vmem>>, vector<64x32xbf16>
    tpu.vector_store %arg12[%c192_168, %c224_169], %129 {strides = array<i32>} : memref<256x800xbf16, #tpu.memory_space<vmem>>, vector<64x32xbf16>,
    %c176_170 = arith.constant 176 : index
    %c0_171 = arith.constant 0 : index
    %131 = vector.load %arg11[%c176_170, %c0_171] : memref<1024x32xbf16, #tpu.memory_space<vmem>>, vector<64x32xbf16>
    %c0_172 = arith.constant 0 : index
    %c256_173 = arith.constant 256 : index
    %132 = vector.load %arg12[%c0_172, %c256_173] : memref<256x800xbf16, #tpu.memory_space<vmem>>, vector<64x32xbf16>
    tpu.vector_store %arg12[%c0_172, %c256_173], %131 {strides = array<i32>} : memref<256x800xbf16, #tpu.memory_space<vmem>>, vector<64x32xbf16>,
    %c304_174 = arith.constant 304 : index
    %c0_175 = arith.constant 0 : index
    %133 = vector.load %arg11[%c304_174, %c0_175] : memref<1024x32xbf16, #tpu.memory_space<vmem>>, vector<64x32xbf16>
    %c64_176 = arith.constant 64 : index
    %c256_177 = arith.constant 256 : index
    %134 = vector.load %arg12[%c64_176, %c256_177] : memref<256x800xbf16, #tpu.memory_space<vmem>>, vector<64x32xbf16>
    tpu.vector_store %arg12[%c64_176, %c256_177], %133 {strides = array<i32>} : memref<256x800xbf16, #tpu.memory_space<vmem>>, vector<64x32xbf16>,
    %c432_178 = arith.constant 432 : index
    %c0_179 = arith.constant 0 : index
    %135 = vector.load %arg11[%c432_178, %c0_179] : memref<1024x32xbf16, #tpu.memory_space<vmem>>, vector<64x32xbf16>
    %c128_180 = arith.constant 128 : index
    %c256_181 = arith.constant 256 : index
    %136 = vector.load %arg12[%c128_180, %c256_181] : memref<256x800xbf16, #tpu.memory_space<vmem>>, vector<64x32xbf16>
    tpu.vector_store %arg12[%c128_180, %c256_181], %135 {strides = array<i32>} : memref<256x800xbf16, #tpu.memory_space<vmem>>, vector<64x32xbf16>,
    %c560 = arith.constant 560 : index
    %c0_182 = arith.constant 0 : index
    %137 = vector.load %arg11[%c560, %c0_182] : memref<1024x32xbf16, #tpu.memory_space<vmem>>, vector<64x32xbf16>
    %c192_183 = arith.constant 192 : index
    %c256_184 = arith.constant 256 : index
    %138 = vector.load %arg12[%c192_183, %c256_184] : memref<256x800xbf16, #tpu.memory_space<vmem>>, vector<64x32xbf16>
    tpu.vector_store %arg12[%c192_183, %c256_184], %137 {strides = array<i32>} : memref<256x800xbf16, #tpu.memory_space<vmem>>, vector<64x32xbf16>,
    %c192_185 = arith.constant 192 : index
    %c0_186 = arith.constant 0 : index
    %139 = vector.load %arg11[%c192_185, %c0_186] : memref<1024x32xbf16, #tpu.memory_space<vmem>>, vector<64x32xbf16>
    %c0_187 = arith.constant 0 : index
    %c288_188 = arith.constant 288 : index
    %140 = vector.load %arg12[%c0_187, %c288_188] : memref<256x800xbf16, #tpu.memory_space<vmem>>, vector<64x32xbf16>
    tpu.vector_store %arg12[%c0_187, %c288_188], %139 {strides = array<i32>} : memref<256x800xbf16, #tpu.memory_space<vmem>>, vector<64x32xbf16>,
    %c320_189 = arith.constant 320 : index
    %c0_190 = arith.constant 0 : index
    %141 = vector.load %arg11[%c320_189, %c0_190] : memref<1024x32xbf16, #tpu.memory_space<vmem>>, vector<64x32xbf16>
    %c64_191 = arith.constant 64 : index
    %c288_192 = arith.constant 288 : index
    %142 = vector.load %arg12[%c64_191, %c288_192] : memref<256x800xbf16, #tpu.memory_space<vmem>>, vector<64x32xbf16>
    tpu.vector_store %arg12[%c64_191, %c288_192], %141 {strides = array<i32>} : memref<256x800xbf16, #tpu.memory_space<vmem>>, vector<64x32xbf16>,
    %c448_193 = arith.constant 448 : index
    %c0_194 = arith.constant 0 : index
    %143 = vector.load %arg11[%c448_193, %c0_194] : memref<1024x32xbf16, #tpu.memory_space<vmem>>, vector<64x32xbf16>
    %c128_195 = arith.constant 128 : index
    %c288_196 = arith.constant 288 : index
    %144 = vector.load %arg12[%c128_195, %c288_196] : memref<256x800xbf16, #tpu.memory_space<vmem>>, vector<64x32xbf16>
    tpu.vector_store %arg12[%c128_195, %c288_196], %143 {strides = array<i32>} : memref<256x800xbf16, #tpu.memory_space<vmem>>, vector<64x32xbf16>,
    %c576 = arith.constant 576 : index
    %c0_197 = arith.constant 0 : index
    %145 = vector.load %arg11[%c576, %c0_197] : memref<1024x32xbf16, #tpu.memory_space<vmem>>, vector<64x32xbf16>
    %c192_198 = arith.constant 192 : index
    %c288_199 = arith.constant 288 : index
    %146 = vector.load %arg12[%c192_198, %c288_199] : memref<256x800xbf16, #tpu.memory_space<vmem>>, vector<64x32xbf16>
    tpu.vector_store %arg12[%c192_198, %c288_199], %145 {strides = array<i32>} : memref<256x800xbf16, #tpu.memory_space<vmem>>, vector<64x32xbf16>,
    %c256_200 = arith.constant 256 : index
    %c0_201 = arith.constant 0 : index
    %147 = vector.load %arg11[%c256_200, %c0_201] : memref<1024x32xbf16, #tpu.memory_space<vmem>>, vector<64x32xbf16>
    %c0_202 = arith.constant 0 : index
    %c320_203 = arith.constant 320 : index
    %148 = vector.load %arg12[%c0_202, %c320_203] : memref<256x800xbf16, #tpu.memory_space<vmem>>, vector<64x32xbf16>
    tpu.vector_store %arg12[%c0_202, %c320_203], %147 {strides = array<i32>} : memref<256x800xbf16, #tpu.memory_space<vmem>>, vector<64x32xbf16>,
    %c384_204 = arith.constant 384 : index
    %c0_205 = arith.constant 0 : index
    %149 = vector.load %arg11[%c384_204, %c0_205] : memref<1024x32xbf16, #tpu.memory_space<vmem>>, vector<64x32xbf16>
    %c64_206 = arith.constant 64 : index
    %c320_207 = arith.constant 320 : index
    %150 = vector.load %arg12[%c64_206, %c320_207] : memref<256x800xbf16, #tpu.memory_space<vmem>>, vector<64x32xbf16>
    tpu.vector_store %arg12[%c64_206, %c320_207], %149 {strides = array<i32>} : memref<256x800xbf16, #tpu.memory_space<vmem>>, vector<64x32xbf16>,
    %c512_208 = arith.constant 512 : index
    %c0_209 = arith.constant 0 : index
    %151 = vector.load %arg11[%c512_208, %c0_209] : memref<1024x32xbf16, #tpu.memory_space<vmem>>, vector<64x32xbf16>
    %c128_210 = arith.constant 128 : index
    %c320_211 = arith.constant 320 : index
    %152 = vector.load %arg12[%c128_210, %c320_211] : memref<256x800xbf16, #tpu.memory_space<vmem>>, vector<64x32xbf16>
    tpu.vector_store %arg12[%c128_210, %c320_211], %151 {strides = array<i32>} : memref<256x800xbf16, #tpu.memory_space<vmem>>, vector<64x32xbf16>,
    %c640_212 = arith.constant 640 : index
    %c0_213 = arith.constant 0 : index
    %153 = vector.load %arg11[%c640_212, %c0_213] : memref<1024x32xbf16, #tpu.memory_space<vmem>>, vector<64x32xbf16>
    %c192_214 = arith.constant 192 : index
    %c320_215 = arith.constant 320 : index
    %154 = vector.load %arg12[%c192_214, %c320_215] : memref<256x800xbf16, #tpu.memory_space<vmem>>, vector<64x32xbf16>
    tpu.vector_store %arg12[%c192_214, %c320_215], %153 {strides = array<i32>} : memref<256x800xbf16, #tpu.memory_space<vmem>>, vector<64x32xbf16>,
    %c272_216 = arith.constant 272 : index
    %c0_217 = arith.constant 0 : index
    %155 = vector.load %arg11[%c272_216, %c0_217] : memref<1024x32xbf16, #tpu.memory_space<vmem>>, vector<64x32xbf16>
    %c0_218 = arith.constant 0 : index
    %c352 = arith.constant 352 : index
    %156 = vector.load %arg12[%c0_218, %c352] : memref<256x800xbf16, #tpu.memory_space<vmem>>, vector<64x32xbf16>
    tpu.vector_store %arg12[%c0_218, %c352], %155 {strides = array<i32>} : memref<256x800xbf16, #tpu.memory_space<vmem>>, vector<64x32xbf16>,
    %c400_219 = arith.constant 400 : index
    %c0_220 = arith.constant 0 : index
    %157 = vector.load %arg11[%c400_219, %c0_220] : memref<1024x32xbf16, #tpu.memory_space<vmem>>, vector<64x32xbf16>
    %c64_221 = arith.constant 64 : index
    %c352_222 = arith.constant 352 : index
    %158 = vector.load %arg12[%c64_221, %c352_222] : memref<256x800xbf16, #tpu.memory_space<vmem>>, vector<64x32xbf16>
    tpu.vector_store %arg12[%c64_221, %c352_222], %157 {strides = array<i32>} : memref<256x800xbf16, #tpu.memory_space<vmem>>, vector<64x32xbf16>,
    %c528_223 = arith.constant 528 : index
    %c0_224 = arith.constant 0 : index
    %159 = vector.load %arg11[%c528_223, %c0_224] : memref<1024x32xbf16, #tpu.memory_space<vmem>>, vector<64x32xbf16>
    %c128_225 = arith.constant 128 : index
    %c352_226 = arith.constant 352 : index
    %160 = vector.load %arg12[%c128_225, %c352_226] : memref<256x800xbf16, #tpu.memory_space<vmem>>, vector<64x32xbf16>
    tpu.vector_store %arg12[%c128_225, %c352_226], %159 {strides = array<i32>} : memref<256x800xbf16, #tpu.memory_space<vmem>>, vector<64x32xbf16>,
    %c656_227 = arith.constant 656 : index
    %c0_228 = arith.constant 0 : index
    %161 = vector.load %arg11[%c656_227, %c0_228] : memref<1024x32xbf16, #tpu.memory_space<vmem>>, vector<64x32xbf16>
    %c192_229 = arith.constant 192 : index
    %c352_230 = arith.constant 352 : index
    %162 = vector.load %arg12[%c192_229, %c352_230] : memref<256x800xbf16, #tpu.memory_space<vmem>>, vector<64x32xbf16>
    tpu.vector_store %arg12[%c192_229, %c352_230], %161 {strides = array<i32>} : memref<256x800xbf16, #tpu.memory_space<vmem>>, vector<64x32xbf16>,
    %c288_231 = arith.constant 288 : index
    %c0_232 = arith.constant 0 : index
    %163 = vector.load %arg11[%c288_231, %c0_232] : memref<1024x32xbf16, #tpu.memory_space<vmem>>, vector<64x32xbf16>
    %c0_233 = arith.constant 0 : index
    %c384_234 = arith.constant 384 : index
    %164 = vector.load %arg12[%c0_233, %c384_234] : memref<256x800xbf16, #tpu.memory_space<vmem>>, vector<64x32xbf16>
    tpu.vector_store %arg12[%c0_233, %c384_234], %163 {strides = array<i32>} : memref<256x800xbf16, #tpu.memory_space<vmem>>, vector<64x32xbf16>,
    %c416_235 = arith.constant 416 : index
    %c0_236 = arith.constant 0 : index
    %165 = vector.load %arg11[%c416_235, %c0_236] : memref<1024x32xbf16, #tpu.memory_space<vmem>>, vector<64x32xbf16>
    %c64_237 = arith.constant 64 : index
    %c384_238 = arith.constant 384 : index
    %166 = vector.load %arg12[%c64_237, %c384_238] : memref<256x800xbf16, #tpu.memory_space<vmem>>, vector<64x32xbf16>
    tpu.vector_store %arg12[%c64_237, %c384_238], %165 {strides = array<i32>} : memref<256x800xbf16, #tpu.memory_space<vmem>>, vector<64x32xbf16>,
    %c544_239 = arith.constant 544 : index
    %c0_240 = arith.constant 0 : index
    %167 = vector.load %arg11[%c544_239, %c0_240] : memref<1024x32xbf16, #tpu.memory_space<vmem>>, vector<64x32xbf16>
    %c128_241 = arith.constant 128 : index
    %c384_242 = arith.constant 384 : index
    %168 = vector.load %arg12[%c128_241, %c384_242] : memref<256x800xbf16, #tpu.memory_space<vmem>>, vector<64x32xbf16>
    tpu.vector_store %arg12[%c128_241, %c384_242], %167 {strides = array<i32>} : memref<256x800xbf16, #tpu.memory_space<vmem>>, vector<64x32xbf16>,
    %c672 = arith.constant 672 : index
    %c0_243 = arith.constant 0 : index
    %169 = vector.load %arg11[%c672, %c0_243] : memref<1024x32xbf16, #tpu.memory_space<vmem>>, vector<64x32xbf16>
    %c192_244 = arith.constant 192 : index
    %c384_245 = arith.constant 384 : index
    %170 = vector.load %arg12[%c192_244, %c384_245] : memref<256x800xbf16, #tpu.memory_space<vmem>>, vector<64x32xbf16>
    tpu.vector_store %arg12[%c192_244, %c384_245], %169 {strides = array<i32>} : memref<256x800xbf16, #tpu.memory_space<vmem>>, vector<64x32xbf16>,
    %c304_246 = arith.constant 304 : index
    %c0_247 = arith.constant 0 : index
    %171 = vector.load %arg11[%c304_246, %c0_247] : memref<1024x32xbf16, #tpu.memory_space<vmem>>, vector<64x32xbf16>
    %c0_248 = arith.constant 0 : index
    %c416_249 = arith.constant 416 : index
    %172 = vector.load %arg12[%c0_248, %c416_249] : memref<256x800xbf16, #tpu.memory_space<vmem>>, vector<64x32xbf16>
    tpu.vector_store %arg12[%c0_248, %c416_249], %171 {strides = array<i32>} : memref<256x800xbf16, #tpu.memory_space<vmem>>, vector<64x32xbf16>,
    %c432_250 = arith.constant 432 : index
    %c0_251 = arith.constant 0 : index
    %173 = vector.load %arg11[%c432_250, %c0_251] : memref<1024x32xbf16, #tpu.memory_space<vmem>>, vector<64x32xbf16>
    %c64_252 = arith.constant 64 : index
    %c416_253 = arith.constant 416 : index
    %174 = vector.load %arg12[%c64_252, %c416_253] : memref<256x800xbf16, #tpu.memory_space<vmem>>, vector<64x32xbf16>
    tpu.vector_store %arg12[%c64_252, %c416_253], %173 {strides = array<i32>} : memref<256x800xbf16, #tpu.memory_space<vmem>>, vector<64x32xbf16>,
    %c560_254 = arith.constant 560 : index
    %c0_255 = arith.constant 0 : index
    %175 = vector.load %arg11[%c560_254, %c0_255] : memref<1024x32xbf16, #tpu.memory_space<vmem>>, vector<64x32xbf16>
    %c128_256 = arith.constant 128 : index
    %c416_257 = arith.constant 416 : index
    %176 = vector.load %arg12[%c128_256, %c416_257] : memref<256x800xbf16, #tpu.memory_space<vmem>>, vector<64x32xbf16>
    tpu.vector_store %arg12[%c128_256, %c416_257], %175 {strides = array<i32>} : memref<256x800xbf16, #tpu.memory_space<vmem>>, vector<64x32xbf16>,
    %c688 = arith.constant 688 : index
    %c0_258 = arith.constant 0 : index
    %177 = vector.load %arg11[%c688, %c0_258] : memref<1024x32xbf16, #tpu.memory_space<vmem>>, vector<64x32xbf16>
    %c192_259 = arith.constant 192 : index
    %c416_260 = arith.constant 416 : index
    %178 = vector.load %arg12[%c192_259, %c416_260] : memref<256x800xbf16, #tpu.memory_space<vmem>>, vector<64x32xbf16>
    tpu.vector_store %arg12[%c192_259, %c416_260], %177 {strides = array<i32>} : memref<256x800xbf16, #tpu.memory_space<vmem>>, vector<64x32xbf16>,
    %c320_261 = arith.constant 320 : index
    %c0_262 = arith.constant 0 : index
    %179 = vector.load %arg11[%c320_261, %c0_262] : memref<1024x32xbf16, #tpu.memory_space<vmem>>, vector<64x32xbf16>
    %c0_263 = arith.constant 0 : index
    %c448_264 = arith.constant 448 : index
    %180 = vector.load %arg12[%c0_263, %c448_264] : memref<256x800xbf16, #tpu.memory_space<vmem>>, vector<64x32xbf16>
    tpu.vector_store %arg12[%c0_263, %c448_264], %179 {strides = array<i32>} : memref<256x800xbf16, #tpu.memory_space<vmem>>, vector<64x32xbf16>,
    %c448_265 = arith.constant 448 : index
    %c0_266 = arith.constant 0 : index
    %181 = vector.load %arg11[%c448_265, %c0_266] : memref<1024x32xbf16, #tpu.memory_space<vmem>>, vector<64x32xbf16>
    %c64_267 = arith.constant 64 : index
    %c448_268 = arith.constant 448 : index
    %182 = vector.load %arg12[%c64_267, %c448_268] : memref<256x800xbf16, #tpu.memory_space<vmem>>, vector<64x32xbf16>
    tpu.vector_store %arg12[%c64_267, %c448_268], %181 {strides = array<i32>} : memref<256x800xbf16, #tpu.memory_space<vmem>>, vector<64x32xbf16>,
    %c576_269 = arith.constant 576 : index
    %c0_270 = arith.constant 0 : index
    %183 = vector.load %arg11[%c576_269, %c0_270] : memref<1024x32xbf16, #tpu.memory_space<vmem>>, vector<64x32xbf16>
    %c128_271 = arith.constant 128 : index
    %c448_272 = arith.constant 448 : index
    %184 = vector.load %arg12[%c128_271, %c448_272] : memref<256x800xbf16, #tpu.memory_space<vmem>>, vector<64x32xbf16>
    tpu.vector_store %arg12[%c128_271, %c448_272], %183 {strides = array<i32>} : memref<256x800xbf16, #tpu.memory_space<vmem>>, vector<64x32xbf16>,
    %c704 = arith.constant 704 : index
    %c0_273 = arith.constant 0 : index
    %185 = vector.load %arg11[%c704, %c0_273] : memref<1024x32xbf16, #tpu.memory_space<vmem>>, vector<64x32xbf16>
    %c192_274 = arith.constant 192 : index
    %c448_275 = arith.constant 448 : index
    %186 = vector.load %arg12[%c192_274, %c448_275] : memref<256x800xbf16, #tpu.memory_space<vmem>>, vector<64x32xbf16>
    tpu.vector_store %arg12[%c192_274, %c448_275], %185 {strides = array<i32>} : memref<256x800xbf16, #tpu.memory_space<vmem>>, vector<64x32xbf16>,
    %c384_276 = arith.constant 384 : index
    %c0_277 = arith.constant 0 : index
    %187 = vector.load %arg11[%c384_276, %c0_277] : memref<1024x32xbf16, #tpu.memory_space<vmem>>, vector<64x32xbf16>
    %c0_278 = arith.constant 0 : index
    %c480_279 = arith.constant 480 : index
    %188 = vector.load %arg12[%c0_278, %c480_279] : memref<256x800xbf16, #tpu.memory_space<vmem>>, vector<64x32xbf16>
    tpu.vector_store %arg12[%c0_278, %c480_279], %187 {strides = array<i32>} : memref<256x800xbf16, #tpu.memory_space<vmem>>, vector<64x32xbf16>,
    %c512_280 = arith.constant 512 : index
    %c0_281 = arith.constant 0 : index
    %189 = vector.load %arg11[%c512_280, %c0_281] : memref<1024x32xbf16, #tpu.memory_space<vmem>>, vector<64x32xbf16>
    %c64_282 = arith.constant 64 : index
    %c480_283 = arith.constant 480 : index
    %190 = vector.load %arg12[%c64_282, %c480_283] : memref<256x800xbf16, #tpu.memory_space<vmem>>, vector<64x32xbf16>
    tpu.vector_store %arg12[%c64_282, %c480_283], %189 {strides = array<i32>} : memref<256x800xbf16, #tpu.memory_space<vmem>>, vector<64x32xbf16>,
    %c640_284 = arith.constant 640 : index
    %c0_285 = arith.constant 0 : index
    %191 = vector.load %arg11[%c640_284, %c0_285] : memref<1024x32xbf16, #tpu.memory_space<vmem>>, vector<64x32xbf16>
    %c128_286 = arith.constant 128 : index
    %c480_287 = arith.constant 480 : index
    %192 = vector.load %arg12[%c128_286, %c480_287] : memref<256x800xbf16, #tpu.memory_space<vmem>>, vector<64x32xbf16>
    tpu.vector_store %arg12[%c128_286, %c480_287], %191 {strides = array<i32>} : memref<256x800xbf16, #tpu.memory_space<vmem>>, vector<64x32xbf16>,
    %c768_288 = arith.constant 768 : index
    %c0_289 = arith.constant 0 : index
    %193 = vector.load %arg11[%c768_288, %c0_289] : memref<1024x32xbf16, #tpu.memory_space<vmem>>, vector<64x32xbf16>
    %c192_290 = arith.constant 192 : index
    %c480_291 = arith.constant 480 : index
    %194 = vector.load %arg12[%c192_290, %c480_291] : memref<256x800xbf16, #tpu.memory_space<vmem>>, vector<64x32xbf16>
    tpu.vector_store %arg12[%c192_290, %c480_291], %193 {strides = array<i32>} : memref<256x800xbf16, #tpu.memory_space<vmem>>, vector<64x32xbf16>,
    %c400_292 = arith.constant 400 : index
    %c0_293 = arith.constant 0 : index
    %195 = vector.load %arg11[%c400_292, %c0_293] : memref<1024x32xbf16, #tpu.memory_space<vmem>>, vector<64x32xbf16>
    %c0_294 = arith.constant 0 : index
    %c512_295 = arith.constant 512 : index
    %196 = vector.load %arg12[%c0_294, %c512_295] : memref<256x800xbf16, #tpu.memory_space<vmem>>, vector<64x32xbf16>
    tpu.vector_store %arg12[%c0_294, %c512_295], %195 {strides = array<i32>} : memref<256x800xbf16, #tpu.memory_space<vmem>>, vector<64x32xbf16>,
    %c528_296 = arith.constant 528 : index
    %c0_297 = arith.constant 0 : index
    %197 = vector.load %arg11[%c528_296, %c0_297] : memref<1024x32xbf16, #tpu.memory_space<vmem>>, vector<64x32xbf16>
    %c64_298 = arith.constant 64 : index
    %c512_299 = arith.constant 512 : index
    %198 = vector.load %arg12[%c64_298, %c512_299] : memref<256x800xbf16, #tpu.memory_space<vmem>>, vector<64x32xbf16>
    tpu.vector_store %arg12[%c64_298, %c512_299], %197 {strides = array<i32>} : memref<256x800xbf16, #tpu.memory_space<vmem>>, vector<64x32xbf16>,
    %c656_300 = arith.constant 656 : index
    %c0_301 = arith.constant 0 : index
    %199 = vector.load %arg11[%c656_300, %c0_301] : memref<1024x32xbf16, #tpu.memory_space<vmem>>, vector<64x32xbf16>
    %c128_302 = arith.constant 128 : index
    %c512_303 = arith.constant 512 : index
    %200 = vector.load %arg12[%c128_302, %c512_303] : memref<256x800xbf16, #tpu.memory_space<vmem>>, vector<64x32xbf16>
    tpu.vector_store %arg12[%c128_302, %c512_303], %199 {strides = array<i32>} : memref<256x800xbf16, #tpu.memory_space<vmem>>, vector<64x32xbf16>,
    %c784_304 = arith.constant 784 : index
    %c0_305 = arith.constant 0 : index
    %201 = vector.load %arg11[%c784_304, %c0_305] : memref<1024x32xbf16, #tpu.memory_space<vmem>>, vector<64x32xbf16>
    %c192_306 = arith.constant 192 : index
    %c512_307 = arith.constant 512 : index
    %202 = vector.load %arg12[%c192_306, %c512_307] : memref<256x800xbf16, #tpu.memory_space<vmem>>, vector<64x32xbf16>
    tpu.vector_store %arg12[%c192_306, %c512_307], %201 {strides = array<i32>} : memref<256x800xbf16, #tpu.memory_space<vmem>>, vector<64x32xbf16>,
    %c416_308 = arith.constant 416 : index
    %c0_309 = arith.constant 0 : index
    %203 = vector.load %arg11[%c416_308, %c0_309] : memref<1024x32xbf16, #tpu.memory_space<vmem>>, vector<64x32xbf16>
    %c0_310 = arith.constant 0 : index
    %c544_311 = arith.constant 544 : index
    %204 = vector.load %arg12[%c0_310, %c544_311] : memref<256x800xbf16, #tpu.memory_space<vmem>>, vector<64x32xbf16>
    tpu.vector_store %arg12[%c0_310, %c544_311], %203 {strides = array<i32>} : memref<256x800xbf16, #tpu.memory_space<vmem>>, vector<64x32xbf16>,
    %c544_312 = arith.constant 544 : index
    %c0_313 = arith.constant 0 : index
    %205 = vector.load %arg11[%c544_312, %c0_313] : memref<1024x32xbf16, #tpu.memory_space<vmem>>, vector<64x32xbf16>
    %c64_314 = arith.constant 64 : index
    %c544_315 = arith.constant 544 : index
    %206 = vector.load %arg12[%c64_314, %c544_315] : memref<256x800xbf16, #tpu.memory_space<vmem>>, vector<64x32xbf16>
    tpu.vector_store %arg12[%c64_314, %c544_315], %205 {strides = array<i32>} : memref<256x800xbf16, #tpu.memory_space<vmem>>, vector<64x32xbf16>,
    %c672_316 = arith.constant 672 : index
    %c0_317 = arith.constant 0 : index
    %207 = vector.load %arg11[%c672_316, %c0_317] : memref<1024x32xbf16, #tpu.memory_space<vmem>>, vector<64x32xbf16>
    %c128_318 = arith.constant 128 : index
    %c544_319 = arith.constant 544 : index
    %208 = vector.load %arg12[%c128_318, %c544_319] : memref<256x800xbf16, #tpu.memory_space<vmem>>, vector<64x32xbf16>
    tpu.vector_store %arg12[%c128_318, %c544_319], %207 {strides = array<i32>} : memref<256x800xbf16, #tpu.memory_space<vmem>>, vector<64x32xbf16>,
    %c800 = arith.constant 800 : index
    %c0_320 = arith.constant 0 : index
    %209 = vector.load %arg11[%c800, %c0_320] : memref<1024x32xbf16, #tpu.memory_space<vmem>>, vector<64x32xbf16>
    %c192_321 = arith.constant 192 : index
    %c544_322 = arith.constant 544 : index
    %210 = vector.load %arg12[%c192_321, %c544_322] : memref<256x800xbf16, #tpu.memory_space<vmem>>, vector<64x32xbf16>
    tpu.vector_store %arg12[%c192_321, %c544_322], %209 {strides = array<i32>} : memref<256x800xbf16, #tpu.memory_space<vmem>>, vector<64x32xbf16>,
    %c432_323 = arith.constant 432 : index
    %c0_324 = arith.constant 0 : index
    %211 = vector.load %arg11[%c432_323, %c0_324] : memref<1024x32xbf16, #tpu.memory_space<vmem>>, vector<64x32xbf16>
    %c0_325 = arith.constant 0 : index
    %c576_326 = arith.constant 576 : index
    %212 = vector.load %arg12[%c0_325, %c576_326] : memref<256x800xbf16, #tpu.memory_space<vmem>>, vector<64x32xbf16>
    tpu.vector_store %arg12[%c0_325, %c576_326], %211 {strides = array<i32>} : memref<256x800xbf16, #tpu.memory_space<vmem>>, vector<64x32xbf16>,
    %c560_327 = arith.constant 560 : index
    %c0_328 = arith.constant 0 : index
    %213 = vector.load %arg11[%c560_327, %c0_328] : memref<1024x32xbf16, #tpu.memory_space<vmem>>, vector<64x32xbf16>
    %c64_329 = arith.constant 64 : index
    %c576_330 = arith.constant 576 : index
    %214 = vector.load %arg12[%c64_329, %c576_330] : memref<256x800xbf16, #tpu.memory_space<vmem>>, vector<64x32xbf16>
    tpu.vector_store %arg12[%c64_329, %c576_330], %213 {strides = array<i32>} : memref<256x800xbf16, #tpu.memory_space<vmem>>, vector<64x32xbf16>,
    %c688_331 = arith.constant 688 : index
    %c0_332 = arith.constant 0 : index
    %215 = vector.load %arg11[%c688_331, %c0_332] : memref<1024x32xbf16, #tpu.memory_space<vmem>>, vector<64x32xbf16>
    %c128_333 = arith.constant 128 : index
    %c576_334 = arith.constant 576 : index
    %216 = vector.load %arg12[%c128_333, %c576_334] : memref<256x800xbf16, #tpu.memory_space<vmem>>, vector<64x32xbf16>
    tpu.vector_store %arg12[%c128_333, %c576_334], %215 {strides = array<i32>} : memref<256x800xbf16, #tpu.memory_space<vmem>>, vector<64x32xbf16>,
    %c816 = arith.constant 816 : index
    %c0_335 = arith.constant 0 : index
    %217 = vector.load %arg11[%c816, %c0_335] : memref<1024x32xbf16, #tpu.memory_space<vmem>>, vector<64x32xbf16>
    %c192_336 = arith.constant 192 : index
    %c576_337 = arith.constant 576 : index
    %218 = vector.load %arg12[%c192_336, %c576_337] : memref<256x800xbf16, #tpu.memory_space<vmem>>, vector<64x32xbf16>
    tpu.vector_store %arg12[%c192_336, %c576_337], %217 {strides = array<i32>} : memref<256x800xbf16, #tpu.memory_space<vmem>>, vector<64x32xbf16>,
    %c448_338 = arith.constant 448 : index
    %c0_339 = arith.constant 0 : index
    %219 = vector.load %arg11[%c448_338, %c0_339] : memref<1024x32xbf16, #tpu.memory_space<vmem>>, vector<64x32xbf16>
    %c0_340 = arith.constant 0 : index
    %c608 = arith.constant 608 : index
    %220 = vector.load %arg12[%c0_340, %c608] : memref<256x800xbf16, #tpu.memory_space<vmem>>, vector<64x32xbf16>
    tpu.vector_store %arg12[%c0_340, %c608], %219 {strides = array<i32>} : memref<256x800xbf16, #tpu.memory_space<vmem>>, vector<64x32xbf16>,
    %c576_341 = arith.constant 576 : index
    %c0_342 = arith.constant 0 : index
    %221 = vector.load %arg11[%c576_341, %c0_342] : memref<1024x32xbf16, #tpu.memory_space<vmem>>, vector<64x32xbf16>
    %c64_343 = arith.constant 64 : index
    %c608_344 = arith.constant 608 : index
    %222 = vector.load %arg12[%c64_343, %c608_344] : memref<256x800xbf16, #tpu.memory_space<vmem>>, vector<64x32xbf16>
    tpu.vector_store %arg12[%c64_343, %c608_344], %221 {strides = array<i32>} : memref<256x800xbf16, #tpu.memory_space<vmem>>, vector<64x32xbf16>,
    %c704_345 = arith.constant 704 : index
    %c0_346 = arith.constant 0 : index
    %223 = vector.load %arg11[%c704_345, %c0_346] : memref<1024x32xbf16, #tpu.memory_space<vmem>>, vector<64x32xbf16>
    %c128_347 = arith.constant 128 : index
    %c608_348 = arith.constant 608 : index
    %224 = vector.load %arg12[%c128_347, %c608_348] : memref<256x800xbf16, #tpu.memory_space<vmem>>, vector<64x32xbf16>
    tpu.vector_store %arg12[%c128_347, %c608_348], %223 {strides = array<i32>} : memref<256x800xbf16, #tpu.memory_space<vmem>>, vector<64x32xbf16>,
    %c832 = arith.constant 832 : index
    %c0_349 = arith.constant 0 : index
    %225 = vector.load %arg11[%c832, %c0_349] : memref<1024x32xbf16, #tpu.memory_space<vmem>>, vector<64x32xbf16>
    %c192_350 = arith.constant 192 : index
    %c608_351 = arith.constant 608 : index
    %226 = vector.load %arg12[%c192_350, %c608_351] : memref<256x800xbf16, #tpu.memory_space<vmem>>, vector<64x32xbf16>
    tpu.vector_store %arg12[%c192_350, %c608_351], %225 {strides = array<i32>} : memref<256x800xbf16, #tpu.memory_space<vmem>>, vector<64x32xbf16>,
    %c512_352 = arith.constant 512 : index
    %c0_353 = arith.constant 0 : index
    %227 = vector.load %arg11[%c512_352, %c0_353] : memref<1024x32xbf16, #tpu.memory_space<vmem>>, vector<64x32xbf16>
    %c0_354 = arith.constant 0 : index
    %c640_355 = arith.constant 640 : index
    %228 = vector.load %arg12[%c0_354, %c640_355] : memref<256x800xbf16, #tpu.memory_space<vmem>>, vector<64x32xbf16>
    tpu.vector_store %arg12[%c0_354, %c640_355], %227 {strides = array<i32>} : memref<256x800xbf16, #tpu.memory_space<vmem>>, vector<64x32xbf16>,
    %c640_356 = arith.constant 640 : index
    %c0_357 = arith.constant 0 : index
    %229 = vector.load %arg11[%c640_356, %c0_357] : memref<1024x32xbf16, #tpu.memory_space<vmem>>, vector<64x32xbf16>
    %c64_358 = arith.constant 64 : index
    %c640_359 = arith.constant 640 : index
    %230 = vector.load %arg12[%c64_358, %c640_359] : memref<256x800xbf16, #tpu.memory_space<vmem>>, vector<64x32xbf16>
    tpu.vector_store %arg12[%c64_358, %c640_359], %229 {strides = array<i32>} : memref<256x800xbf16, #tpu.memory_space<vmem>>, vector<64x32xbf16>,
    %c768_360 = arith.constant 768 : index
    %c0_361 = arith.constant 0 : index
    %231 = vector.load %arg11[%c768_360, %c0_361] : memref<1024x32xbf16, #tpu.memory_space<vmem>>, vector<64x32xbf16>
    %c128_362 = arith.constant 128 : index
    %c640_363 = arith.constant 640 : index
    %232 = vector.load %arg12[%c128_362, %c640_363] : memref<256x800xbf16, #tpu.memory_space<vmem>>, vector<64x32xbf16>
    tpu.vector_store %arg12[%c128_362, %c640_363], %231 {strides = array<i32>} : memref<256x800xbf16, #tpu.memory_space<vmem>>, vector<64x32xbf16>,
    %c896_364 = arith.constant 896 : index
    %c0_365 = arith.constant 0 : index
    %233 = vector.load %arg11[%c896_364, %c0_365] : memref<1024x32xbf16, #tpu.memory_space<vmem>>, vector<64x32xbf16>
    %c192_366 = arith.constant 192 : index
    %c640_367 = arith.constant 640 : index
    %234 = vector.load %arg12[%c192_366, %c640_367] : memref<256x800xbf16, #tpu.memory_space<vmem>>, vector<64x32xbf16>
    tpu.vector_store %arg12[%c192_366, %c640_367], %233 {strides = array<i32>} : memref<256x800xbf16, #tpu.memory_space<vmem>>, vector<64x32xbf16>,
    %c528_368 = arith.constant 528 : index
    %c0_369 = arith.constant 0 : index
    %235 = vector.load %arg11[%c528_368, %c0_369] : memref<1024x32xbf16, #tpu.memory_space<vmem>>, vector<64x32xbf16>
    %c0_370 = arith.constant 0 : index
    %c672_371 = arith.constant 672 : index
    %236 = vector.load %arg12[%c0_370, %c672_371] : memref<256x800xbf16, #tpu.memory_space<vmem>>, vector<64x32xbf16>
    tpu.vector_store %arg12[%c0_370, %c672_371], %235 {strides = array<i32>} : memref<256x800xbf16, #tpu.memory_space<vmem>>, vector<64x32xbf16>,
    %c656_372 = arith.constant 656 : index
    %c0_373 = arith.constant 0 : index
    %237 = vector.load %arg11[%c656_372, %c0_373] : memref<1024x32xbf16, #tpu.memory_space<vmem>>, vector<64x32xbf16>
    %c64_374 = arith.constant 64 : index
    %c672_375 = arith.constant 672 : index
    %238 = vector.load %arg12[%c64_374, %c672_375] : memref<256x800xbf16, #tpu.memory_space<vmem>>, vector<64x32xbf16>
    tpu.vector_store %arg12[%c64_374, %c672_375], %237 {strides = array<i32>} : memref<256x800xbf16, #tpu.memory_space<vmem>>, vector<64x32xbf16>,
    %c784_376 = arith.constant 784 : index
    %c0_377 = arith.constant 0 : index
    %239 = vector.load %arg11[%c784_376, %c0_377] : memref<1024x32xbf16, #tpu.memory_space<vmem>>, vector<64x32xbf16>
    %c128_378 = arith.constant 128 : index
    %c672_379 = arith.constant 672 : index
    %240 = vector.load %arg12[%c128_378, %c672_379] : memref<256x800xbf16, #tpu.memory_space<vmem>>, vector<64x32xbf16>
    tpu.vector_store %arg12[%c128_378, %c672_379], %239 {strides = array<i32>} : memref<256x800xbf16, #tpu.memory_space<vmem>>, vector<64x32xbf16>,
    %c912 = arith.constant 912 : index
    %c0_380 = arith.constant 0 : index
    %241 = vector.load %arg11[%c912, %c0_380] : memref<1024x32xbf16, #tpu.memory_space<vmem>>, vector<64x32xbf16>
    %c192_381 = arith.constant 192 : index
    %c672_382 = arith.constant 672 : index
    %242 = vector.load %arg12[%c192_381, %c672_382] : memref<256x800xbf16, #tpu.memory_space<vmem>>, vector<64x32xbf16>
    tpu.vector_store %arg12[%c192_381, %c672_382], %241 {strides = array<i32>} : memref<256x800xbf16, #tpu.memory_space<vmem>>, vector<64x32xbf16>,
    %c544_383 = arith.constant 544 : index
    %c0_384 = arith.constant 0 : index
    %243 = vector.load %arg11[%c544_383, %c0_384] : memref<1024x32xbf16, #tpu.memory_space<vmem>>, vector<64x32xbf16>
    %c0_385 = arith.constant 0 : index
    %c704_386 = arith.constant 704 : index
    %244 = vector.load %arg12[%c0_385, %c704_386] : memref<256x800xbf16, #tpu.memory_space<vmem>>, vector<64x32xbf16>
    tpu.vector_store %arg12[%c0_385, %c704_386], %243 {strides = array<i32>} : memref<256x800xbf16, #tpu.memory_space<vmem>>, vector<64x32xbf16>,
    %c672_387 = arith.constant 672 : index
    %c0_388 = arith.constant 0 : index
    %245 = vector.load %arg11[%c672_387, %c0_388] : memref<1024x32xbf16, #tpu.memory_space<vmem>>, vector<64x32xbf16>
    %c64_389 = arith.constant 64 : index
    %c704_390 = arith.constant 704 : index
    %246 = vector.load %arg12[%c64_389, %c704_390] : memref<256x800xbf16, #tpu.memory_space<vmem>>, vector<64x32xbf16>
    tpu.vector_store %arg12[%c64_389, %c704_390], %245 {strides = array<i32>} : memref<256x800xbf16, #tpu.memory_space<vmem>>, vector<64x32xbf16>,
    %c800_391 = arith.constant 800 : index
    %c0_392 = arith.constant 0 : index
    %247 = vector.load %arg11[%c800_391, %c0_392] : memref<1024x32xbf16, #tpu.memory_space<vmem>>, vector<64x32xbf16>
    %c128_393 = arith.constant 128 : index
    %c704_394 = arith.constant 704 : index
    %248 = vector.load %arg12[%c128_393, %c704_394] : memref<256x800xbf16, #tpu.memory_space<vmem>>, vector<64x32xbf16>
    tpu.vector_store %arg12[%c128_393, %c704_394], %247 {strides = array<i32>} : memref<256x800xbf16, #tpu.memory_space<vmem>>, vector<64x32xbf16>,
    %c928 = arith.constant 928 : index
    %c0_395 = arith.constant 0 : index
    %249 = vector.load %arg11[%c928, %c0_395] : memref<1024x32xbf16, #tpu.memory_space<vmem>>, vector<64x32xbf16>
    %c192_396 = arith.constant 192 : index
    %c704_397 = arith.constant 704 : index
    %250 = vector.load %arg12[%c192_396, %c704_397] : memref<256x800xbf16, #tpu.memory_space<vmem>>, vector<64x32xbf16>
    tpu.vector_store %arg12[%c192_396, %c704_397], %249 {strides = array<i32>} : memref<256x800xbf16, #tpu.memory_space<vmem>>, vector<64x32xbf16>,
    %c560_398 = arith.constant 560 : index
    %c0_399 = arith.constant 0 : index
    %251 = vector.load %arg11[%c560_398, %c0_399] : memref<1024x32xbf16, #tpu.memory_space<vmem>>, vector<64x32xbf16>
    %c0_400 = arith.constant 0 : index
    %c736 = arith.constant 736 : index
    %252 = vector.load %arg12[%c0_400, %c736] : memref<256x800xbf16, #tpu.memory_space<vmem>>, vector<64x32xbf16>
    tpu.vector_store %arg12[%c0_400, %c736], %251 {strides = array<i32>} : memref<256x800xbf16, #tpu.memory_space<vmem>>, vector<64x32xbf16>,
    %c688_401 = arith.constant 688 : index
    %c0_402 = arith.constant 0 : index
    %253 = vector.load %arg11[%c688_401, %c0_402] : memref<1024x32xbf16, #tpu.memory_space<vmem>>, vector<64x32xbf16>
    %c64_403 = arith.constant 64 : index
    %c736_404 = arith.constant 736 : index
    %254 = vector.load %arg12[%c64_403, %c736_404] : memref<256x800xbf16, #tpu.memory_space<vmem>>, vector<64x32xbf16>
    tpu.vector_store %arg12[%c64_403, %c736_404], %253 {strides = array<i32>} : memref<256x800xbf16, #tpu.memory_space<vmem>>, vector<64x32xbf16>,
    %c816_405 = arith.constant 816 : index
    %c0_406 = arith.constant 0 : index
    %255 = vector.load %arg11[%c816_405, %c0_406] : memref<1024x32xbf16, #tpu.memory_space<vmem>>, vector<64x32xbf16>
    %c128_407 = arith.constant 128 : index
    %c736_408 = arith.constant 736 : index
    %256 = vector.load %arg12[%c128_407, %c736_408] : memref<256x800xbf16, #tpu.memory_space<vmem>>, vector<64x32xbf16>
    tpu.vector_store %arg12[%c128_407, %c736_408], %255 {strides = array<i32>} : memref<256x800xbf16, #tpu.memory_space<vmem>>, vector<64x32xbf16>,
    %c944 = arith.constant 944 : index
    %c0_409 = arith.constant 0 : index
    %257 = vector.load %arg11[%c944, %c0_409] : memref<1024x32xbf16, #tpu.memory_space<vmem>>, vector<64x32xbf16>
    %c192_410 = arith.constant 192 : index
    %c736_411 = arith.constant 736 : index
    %258 = vector.load %arg12[%c192_410, %c736_411] : memref<256x800xbf16, #tpu.memory_space<vmem>>, vector<64x32xbf16>
    tpu.vector_store %arg12[%c192_410, %c736_411], %257 {strides = array<i32>} : memref<256x800xbf16, #tpu.memory_space<vmem>>, vector<64x32xbf16>,
    %c576_412 = arith.constant 576 : index
    %c0_413 = arith.constant 0 : index
    %259 = vector.load %arg11[%c576_412, %c0_413] : memref<1024x32xbf16, #tpu.memory_space<vmem>>, vector<64x32xbf16>
    %c0_414 = arith.constant 0 : index
    %c768_415 = arith.constant 768 : index
    %260 = vector.load %arg12[%c0_414, %c768_415] : memref<256x800xbf16, #tpu.memory_space<vmem>>, vector<64x32xbf16>
    tpu.vector_store %arg12[%c0_414, %c768_415], %259 {strides = array<i32>} : memref<256x800xbf16, #tpu.memory_space<vmem>>, vector<64x32xbf16>,
    %c704_416 = arith.constant 704 : index
    %c0_417 = arith.constant 0 : index
    %261 = vector.load %arg11[%c704_416, %c0_417] : memref<1024x32xbf16, #tpu.memory_space<vmem>>, vector<64x32xbf16>
    %c64_418 = arith.constant 64 : index
    %c768_419 = arith.constant 768 : index
    %262 = vector.load %arg12[%c64_418, %c768_419] : memref<256x800xbf16, #tpu.memory_space<vmem>>, vector<64x32xbf16>
    tpu.vector_store %arg12[%c64_418, %c768_419], %261 {strides = array<i32>} : memref<256x800xbf16, #tpu.memory_space<vmem>>, vector<64x32xbf16>,
    %c832_420 = arith.constant 832 : index
    %c0_421 = arith.constant 0 : index
    %263 = vector.load %arg11[%c832_420, %c0_421] : memref<1024x32xbf16, #tpu.memory_space<vmem>>, vector<64x32xbf16>
    %c128_422 = arith.constant 128 : index
    %c768_423 = arith.constant 768 : index
    %264 = vector.load %arg12[%c128_422, %c768_423] : memref<256x800xbf16, #tpu.memory_space<vmem>>, vector<64x32xbf16>
    tpu.vector_store %arg12[%c128_422, %c768_423], %263 {strides = array<i32>} : memref<256x800xbf16, #tpu.memory_space<vmem>>, vector<64x32xbf16>,
    %c960 = arith.constant 960 : index
    %c0_424 = arith.constant 0 : index
    %265 = vector.load %arg11[%c960, %c0_424] : memref<1024x32xbf16, #tpu.memory_space<vmem>>, vector<64x32xbf16>
    %c192_425 = arith.constant 192 : index
    %c768_426 = arith.constant 768 : index
    %266 = vector.load %arg12[%c192_425, %c768_426] : memref<256x800xbf16, #tpu.memory_space<vmem>>, vector<64x32xbf16>
    tpu.vector_store %arg12[%c192_425, %c768_426], %265 {strides = array<i32>} : memref<256x800xbf16, #tpu.memory_space<vmem>>, vector<64x32xbf16>,
    %c0_427 = arith.constant 0 : index
    %c0_428 = arith.constant 0 : index
    %267 = vector.load %arg5[%c0_427, %c0_428] : memref<1x64xf32, #tpu.memory_space<vmem>>, vector<1x64xf32>
    %268 = vector.shape_cast %267 : vector<1x64xf32> to vector<1x64xf32>
    %269 = vector.broadcast %268 : vector<1x64xf32> to vector<64x64xf32>
    %c0_429 = arith.constant 0 : index
    %c0_430 = arith.constant 0 : index
    %270 = vector.load %arg12[%c0_429, %c0_430] : memref<256x800xbf16, #tpu.memory_space<vmem>>, vector<64x800xbf16>
    %c0_431 = arith.constant 0 : index
    %c0_432 = arith.constant 0 : index
    %271 = vector.load %arg4[%c0_431, %c0_432] : memref<800x64xbf16, #tpu.memory_space<vmem>>, vector<800x64xbf16>
    %cst_433 = arith.constant dense<0.000000e+00> : vector<64x64xf32>
    %272 = tpu.matmul %270, %271, %cst_433 {dimension_numbers = #tpu.dot_dimension_numbers<[1], [0], [0], [1], [0, 0, 1, 1], [], []>} : vector<64x800xbf16>, vector<800x64xbf16>, vector<64x64xf32> -> vector<64x64xf32>
    %273 = arith.addf %272, %269 : vector<64x64xf32>
    %cst_434 = arith.constant 0.000000e+00 : f32
    %274 = vector.broadcast %cst_434 : f32 to vector<64x64xf32>
    %275 = arith.maximumf %273, %274 : vector<64x64xf32>
    %276 = arith.truncf %275 : vector<64x64xf32> to vector<64x64xbf16>
    %277 = vector.extract_strided_slice %276 {offsets = [0, 0], sizes = [16, 64], strides = [1, 1]} : vector<64x64xbf16> to vector<16x64xbf16>
    %c0_435 = arith.constant 0 : index
    %c0_436 = arith.constant 0 : index
    %278 = vector.load %arg13[%c0_435, %c0_436] : memref<16x1024xbf16, #tpu.memory_space<vmem>>, vector<16x64xbf16>
    tpu.vector_store %arg13[%c0_435, %c0_436], %277 {strides = array<i32>} : memref<16x1024xbf16, #tpu.memory_space<vmem>>, vector<16x64xbf16>,
    %279 = vector.extract_strided_slice %276 {offsets = [16, 0], sizes = [16, 64], strides = [1, 1]} : vector<64x64xbf16> to vector<16x64xbf16>
    %c0_437 = arith.constant 0 : index
    %c64_438 = arith.constant 64 : index
    %280 = vector.load %arg13[%c0_437, %c64_438] : memref<16x1024xbf16, #tpu.memory_space<vmem>>, vector<16x64xbf16>
    tpu.vector_store %arg13[%c0_437, %c64_438], %279 {strides = array<i32>} : memref<16x1024xbf16, #tpu.memory_space<vmem>>, vector<16x64xbf16>,
    %281 = vector.extract_strided_slice %276 {offsets = [32, 0], sizes = [16, 64], strides = [1, 1]} : vector<64x64xbf16> to vector<16x64xbf16>
    %c0_439 = arith.constant 0 : index
    %c128_440 = arith.constant 128 : index
    %282 = vector.load %arg13[%c0_439, %c128_440] : memref<16x1024xbf16, #tpu.memory_space<vmem>>, vector<16x64xbf16>
    tpu.vector_store %arg13[%c0_439, %c128_440], %281 {strides = array<i32>} : memref<16x1024xbf16, #tpu.memory_space<vmem>>, vector<16x64xbf16>,
    %283 = vector.extract_strided_slice %276 {offsets = [48, 0], sizes = [16, 64], strides = [1, 1]} : vector<64x64xbf16> to vector<16x64xbf16>
    %c0_441 = arith.constant 0 : index
    %c192_442 = arith.constant 192 : index
    %284 = vector.load %arg13[%c0_441, %c192_442] : memref<16x1024xbf16, #tpu.memory_space<vmem>>, vector<16x64xbf16>
    tpu.vector_store %arg13[%c0_441, %c192_442], %283 {strides = array<i32>} : memref<16x1024xbf16, #tpu.memory_space<vmem>>, vector<16x64xbf16>,
    %c64_443 = arith.constant 64 : index
    %c0_444 = arith.constant 0 : index
    %285 = vector.load %arg12[%c64_443, %c0_444] : memref<256x800xbf16, #tpu.memory_space<vmem>>, vector<64x800xbf16>
    %c0_445 = arith.constant 0 : index
    %c0_446 = arith.constant 0 : index
    %286 = vector.load %arg4[%c0_445, %c0_446] : memref<800x64xbf16, #tpu.memory_space<vmem>>, vector<800x64xbf16>
    %cst_447 = arith.constant dense<0.000000e+00> : vector<64x64xf32>
    %287 = tpu.matmul %285, %286, %cst_447 {dimension_numbers = #tpu.dot_dimension_numbers<[1], [0], [0], [1], [0, 0, 1, 1], [], []>} : vector<64x800xbf16>, vector<800x64xbf16>, vector<64x64xf32> -> vector<64x64xf32>
    %288 = arith.addf %287, %269 : vector<64x64xf32>
    %cst_448 = arith.constant 0.000000e+00 : f32
    %289 = vector.broadcast %cst_448 : f32 to vector<64x64xf32>
    %290 = arith.maximumf %288, %289 : vector<64x64xf32>
    %291 = arith.truncf %290 : vector<64x64xf32> to vector<64x64xbf16>
    %292 = vector.extract_strided_slice %291 {offsets = [0, 0], sizes = [16, 64], strides = [1, 1]} : vector<64x64xbf16> to vector<16x64xbf16>
    %c0_449 = arith.constant 0 : index
    %c256_450 = arith.constant 256 : index
    %293 = vector.load %arg13[%c0_449, %c256_450] : memref<16x1024xbf16, #tpu.memory_space<vmem>>, vector<16x64xbf16>
    tpu.vector_store %arg13[%c0_449, %c256_450], %292 {strides = array<i32>} : memref<16x1024xbf16, #tpu.memory_space<vmem>>, vector<16x64xbf16>,
    %294 = vector.extract_strided_slice %291 {offsets = [16, 0], sizes = [16, 64], strides = [1, 1]} : vector<64x64xbf16> to vector<16x64xbf16>
    %c0_451 = arith.constant 0 : index
    %c320_452 = arith.constant 320 : index
    %295 = vector.load %arg13[%c0_451, %c320_452] : memref<16x1024xbf16, #tpu.memory_space<vmem>>, vector<16x64xbf16>
    tpu.vector_store %arg13[%c0_451, %c320_452], %294 {strides = array<i32>} : memref<16x1024xbf16, #tpu.memory_space<vmem>>, vector<16x64xbf16>,
    %296 = vector.extract_strided_slice %291 {offsets = [32, 0], sizes = [16, 64], strides = [1, 1]} : vector<64x64xbf16> to vector<16x64xbf16>
    %c0_453 = arith.constant 0 : index
    %c384_454 = arith.constant 384 : index
    %297 = vector.load %arg13[%c0_453, %c384_454] : memref<16x1024xbf16, #tpu.memory_space<vmem>>, vector<16x64xbf16>
    tpu.vector_store %arg13[%c0_453, %c384_454], %296 {strides = array<i32>} : memref<16x1024xbf16, #tpu.memory_space<vmem>>, vector<16x64xbf16>,
    %298 = vector.extract_strided_slice %291 {offsets = [48, 0], sizes = [16, 64], strides = [1, 1]} : vector<64x64xbf16> to vector<16x64xbf16>
    %c0_455 = arith.constant 0 : index
    %c448_456 = arith.constant 448 : index
    %299 = vector.load %arg13[%c0_455, %c448_456] : memref<16x1024xbf16, #tpu.memory_space<vmem>>, vector<16x64xbf16>
    tpu.vector_store %arg13[%c0_455, %c448_456], %298 {strides = array<i32>} : memref<16x1024xbf16, #tpu.memory_space<vmem>>, vector<16x64xbf16>,
    %c128_457 = arith.constant 128 : index
    %c0_458 = arith.constant 0 : index
    %300 = vector.load %arg12[%c128_457, %c0_458] : memref<256x800xbf16, #tpu.memory_space<vmem>>, vector<64x800xbf16>
    %c0_459 = arith.constant 0 : index
    %c0_460 = arith.constant 0 : index
    %301 = vector.load %arg4[%c0_459, %c0_460] : memref<800x64xbf16, #tpu.memory_space<vmem>>, vector<800x64xbf16>
    %cst_461 = arith.constant dense<0.000000e+00> : vector<64x64xf32>
    %302 = tpu.matmul %300, %301, %cst_461 {dimension_numbers = #tpu.dot_dimension_numbers<[1], [0], [0], [1], [0, 0, 1, 1], [], []>} : vector<64x800xbf16>, vector<800x64xbf16>, vector<64x64xf32> -> vector<64x64xf32>
    %303 = arith.addf %302, %269 : vector<64x64xf32>
    %cst_462 = arith.constant 0.000000e+00 : f32
    %304 = vector.broadcast %cst_462 : f32 to vector<64x64xf32>
    %305 = arith.maximumf %303, %304 : vector<64x64xf32>
    %306 = arith.truncf %305 : vector<64x64xf32> to vector<64x64xbf16>
    %307 = vector.extract_strided_slice %306 {offsets = [0, 0], sizes = [16, 64], strides = [1, 1]} : vector<64x64xbf16> to vector<16x64xbf16>
    %c0_463 = arith.constant 0 : index
    %c512_464 = arith.constant 512 : index
    %308 = vector.load %arg13[%c0_463, %c512_464] : memref<16x1024xbf16, #tpu.memory_space<vmem>>, vector<16x64xbf16>
    tpu.vector_store %arg13[%c0_463, %c512_464], %307 {strides = array<i32>} : memref<16x1024xbf16, #tpu.memory_space<vmem>>, vector<16x64xbf16>,
    %309 = vector.extract_strided_slice %306 {offsets = [16, 0], sizes = [16, 64], strides = [1, 1]} : vector<64x64xbf16> to vector<16x64xbf16>
    %c0_465 = arith.constant 0 : index
    %c576_466 = arith.constant 576 : index
    %310 = vector.load %arg13[%c0_465, %c576_466] : memref<16x1024xbf16, #tpu.memory_space<vmem>>, vector<16x64xbf16>
    tpu.vector_store %arg13[%c0_465, %c576_466], %309 {strides = array<i32>} : memref<16x1024xbf16, #tpu.memory_space<vmem>>, vector<16x64xbf16>,
    %311 = vector.extract_strided_slice %306 {offsets = [32, 0], sizes = [16, 64], strides = [1, 1]} : vector<64x64xbf16> to vector<16x64xbf16>
    %c0_467 = arith.constant 0 : index
    %c640_468 = arith.constant 640 : index
    %312 = vector.load %arg13[%c0_467, %c640_468] : memref<16x1024xbf16, #tpu.memory_space<vmem>>, vector<16x64xbf16>
    tpu.vector_store %arg13[%c0_467, %c640_468], %311 {strides = array<i32>} : memref<16x1024xbf16, #tpu.memory_space<vmem>>, vector<16x64xbf16>,
    %313 = vector.extract_strided_slice %306 {offsets = [48, 0], sizes = [16, 64], strides = [1, 1]} : vector<64x64xbf16> to vector<16x64xbf16>
    %c0_469 = arith.constant 0 : index
    %c704_470 = arith.constant 704 : index
    %314 = vector.load %arg13[%c0_469, %c704_470] : memref<16x1024xbf16, #tpu.memory_space<vmem>>, vector<16x64xbf16>
    tpu.vector_store %arg13[%c0_469, %c704_470], %313 {strides = array<i32>} : memref<16x1024xbf16, #tpu.memory_space<vmem>>, vector<16x64xbf16>,
    %c192_471 = arith.constant 192 : index
    %c0_472 = arith.constant 0 : index
    %315 = vector.load %arg12[%c192_471, %c0_472] : memref<256x800xbf16, #tpu.memory_space<vmem>>, vector<64x800xbf16>
    %c0_473 = arith.constant 0 : index
    %c0_474 = arith.constant 0 : index
    %316 = vector.load %arg4[%c0_473, %c0_474] : memref<800x64xbf16, #tpu.memory_space<vmem>>, vector<800x64xbf16>
    %cst_475 = arith.constant dense<0.000000e+00> : vector<64x64xf32>
    %317 = tpu.matmul %315, %316, %cst_475 {dimension_numbers = #tpu.dot_dimension_numbers<[1], [0], [0], [1], [0, 0, 1, 1], [], []>} : vector<64x800xbf16>, vector<800x64xbf16>, vector<64x64xf32> -> vector<64x64xf32>
    %318 = arith.addf %317, %269 : vector<64x64xf32>
    %cst_476 = arith.constant 0.000000e+00 : f32
    %319 = vector.broadcast %cst_476 : f32 to vector<64x64xf32>
    %320 = arith.maximumf %318, %319 : vector<64x64xf32>
    %321 = arith.truncf %320 : vector<64x64xf32> to vector<64x64xbf16>
    %322 = vector.extract_strided_slice %321 {offsets = [0, 0], sizes = [16, 64], strides = [1, 1]} : vector<64x64xbf16> to vector<16x64xbf16>
    %c0_477 = arith.constant 0 : index
    %c768_478 = arith.constant 768 : index
    %323 = vector.load %arg13[%c0_477, %c768_478] : memref<16x1024xbf16, #tpu.memory_space<vmem>>, vector<16x64xbf16>
    tpu.vector_store %arg13[%c0_477, %c768_478], %322 {strides = array<i32>} : memref<16x1024xbf16, #tpu.memory_space<vmem>>, vector<16x64xbf16>,
    %324 = vector.extract_strided_slice %321 {offsets = [16, 0], sizes = [16, 64], strides = [1, 1]} : vector<64x64xbf16> to vector<16x64xbf16>
    %c0_479 = arith.constant 0 : index
    %c832_480 = arith.constant 832 : index
    %325 = vector.load %arg13[%c0_479, %c832_480] : memref<16x1024xbf16, #tpu.memory_space<vmem>>, vector<16x64xbf16>
    tpu.vector_store %arg13[%c0_479, %c832_480], %324 {strides = array<i32>} : memref<16x1024xbf16, #tpu.memory_space<vmem>>, vector<16x64xbf16>,
    %326 = vector.extract_strided_slice %321 {offsets = [32, 0], sizes = [16, 64], strides = [1, 1]} : vector<64x64xbf16> to vector<16x64xbf16>
    %c0_481 = arith.constant 0 : index
    %c896_482 = arith.constant 896 : index
    %327 = vector.load %arg13[%c0_481, %c896_482] : memref<16x1024xbf16, #tpu.memory_space<vmem>>, vector<16x64xbf16>
    tpu.vector_store %arg13[%c0_481, %c896_482], %326 {strides = array<i32>} : memref<16x1024xbf16, #tpu.memory_space<vmem>>, vector<16x64xbf16>,
    %328 = vector.extract_strided_slice %321 {offsets = [48, 0], sizes = [16, 64], strides = [1, 1]} : vector<64x64xbf16> to vector<16x64xbf16>
    %c0_483 = arith.constant 0 : index
    %c960_484 = arith.constant 960 : index
    %329 = vector.load %arg13[%c0_483, %c960_484] : memref<16x1024xbf16, #tpu.memory_space<vmem>>, vector<16x64xbf16>
    tpu.vector_store %arg13[%c0_483, %c960_484], %328 {strides = array<i32>} : memref<16x1024xbf16, #tpu.memory_space<vmem>>, vector<16x64xbf16>,
    %c0_485 = arith.constant 0 : index
    %c0_486 = arith.constant 0 : index
    %330 = vector.load %arg13[%c0_485, %c0_486] : memref<16x1024xbf16, #tpu.memory_space<vmem>>, vector<16x1024xbf16>
    %c0_487 = arith.constant 0 : index
    %c0_488 = arith.constant 0 : index
    %331 = vector.load %arg6[%c0_487, %c0_488] : memref<1024x512xbf16, #tpu.memory_space<vmem>>, vector<1024x512xbf16>
    %cst_489 = arith.constant dense<0.000000e+00> : vector<16x512xf32>
    %332 = tpu.matmul %330, %331, %cst_489 {dimension_numbers = #tpu.dot_dimension_numbers<[1], [0], [0], [1], [0, 0, 1, 1], [], []>} : vector<16x1024xbf16>, vector<1024x512xbf16>, vector<16x512xf32> -> vector<16x512xf32>
    %c0_490 = arith.constant 0 : index
    %c0_491 = arith.constant 0 : index
    %333 = vector.load %arg7[%c0_490, %c0_491] : memref<1x512xf32, #tpu.memory_space<vmem>>, vector<1x512xf32>
    %334 = vector.broadcast %333 : vector<1x512xf32> to vector<16x512xf32>
    %335 = arith.addf %332, %334 : vector<16x512xf32>
    %cst_492 = arith.constant 0.000000e+00 : f32
    %336 = vector.broadcast %cst_492 : f32 to vector<16x512xf32>
    %337 = arith.maximumf %335, %336 : vector<16x512xf32>
    %338 = arith.truncf %337 : vector<16x512xf32> to vector<16x512xbf16>
    %c0_493 = arith.constant 0 : index
    %c0_494 = arith.constant 0 : index
    %339 = vector.load %arg8[%c0_493, %c0_494] : memref<512x128xbf16, #tpu.memory_space<vmem>>, vector<512x128xbf16>
    %cst_495 = arith.constant dense<0.000000e+00> : vector<16x128xf32>
    %340 = tpu.matmul %338, %339, %cst_495 {dimension_numbers = #tpu.dot_dimension_numbers<[1], [0], [0], [1], [0, 0, 1, 1], [], []>} : vector<16x512xbf16>, vector<512x128xbf16>, vector<16x128xf32> -> vector<16x128xf32>
    %c0_496 = arith.constant 0 : index
    %c0_497 = arith.constant 0 : index
    %341 = vector.load %arg9[%c0_496, %c0_497] : memref<1x128xf32, #tpu.memory_space<vmem>>, vector<1x128xf32>
    %342 = vector.broadcast %341 : vector<1x128xf32> to vector<16x128xf32>
    %343 = arith.addf %340, %342 : vector<16x128xf32>
    %344 = tpu.iota {dimensions = array<i32: 1>} : vector<16x128xi32>
    %c10_i32 = arith.constant 10 : i32
    %345 = vector.broadcast %c10_i32 : i32 to vector<16x128xi32>
    %346 = arith.cmpi slt, %344, %345 : vector<16x128xi32>
    %cst_498 = arith.constant -1.000000e+30 : f32
    %347 = vector.broadcast %cst_498 : f32 to vector<16x128xf32>
    %348 = arith.select %346, %343, %347 : vector<16x128xi1>, vector<16x128xf32>
    %cst_499 = arith.constant dense<0xFF800000> : vector<16xf32>
    %349 = vector.multi_reduction <maximumf>, %348, %cst_499 [1] : vector<16x128xf32> to vector<16xf32>
    %350 = vector.shape_cast %349 : vector<16xf32> to vector<16x1xf32>
    %351 = vector.broadcast %350 : vector<16x1xf32> to vector<16x128xf32>
    %352 = arith.subf %348, %351 : vector<16x128xf32>
    %353 = math.exp %352 : vector<16x128xf32>
    %cst_500 = arith.constant dense<0.000000e+00> : vector<16xf32>
    %354 = vector.multi_reduction <add>, %353, %cst_500 [1] : vector<16x128xf32> to vector<16xf32>
    %355 = vector.shape_cast %354 : vector<16xf32> to vector<16x1xf32>
    %356 = math.log %355 : vector<16x1xf32>
    %357 = arith.addf %350, %356 : vector<16x1xf32>
    %358 = vector.broadcast %357 : vector<16x1xf32> to vector<16x128xf32>
    %359 = arith.subf %348, %358 : vector<16x128xf32>
    %c0_501 = arith.constant 0 : index
    %c0_502 = arith.constant 0 : index
    %360 = vector.load %arg10[%c0_501, %c0_502] : memref<16x128xf32, #tpu.memory_space<vmem>>, vector<16x128xf32>
    tpu.vector_store %arg10[%c0_501, %c0_502], %359 {strides = array<i32>} : memref<16x128xf32, #tpu.memory_space<vmem>>, vector<16x128xf32>,
    return
  }
  func.func @transform_0(%arg0: i32) -> (i32, i32) {
    %c0_i32 = arith.constant 0 : i32
    %c0_i32_0 = arith.constant 0 : i32
    return %arg0, %c0_i32 : i32, i32
  }
  func.func @transform_1(%arg0: i32) -> (i32, i32) {
    %c0_i32 = arith.constant 0 : i32
    %c0_i32_0 = arith.constant 0 : i32
    %c0_i32_1 = arith.constant 0 : i32
    return %c0_i32, %c0_i32_0 : i32, i32
  }
  func.func @transform_2(%arg0: i32) -> (i32, i32) {
    %c0_i32 = arith.constant 0 : i32
    %c0_i32_0 = arith.constant 0 : i32
    %c0_i32_1 = arith.constant 0 : i32
    return %c0_i32, %c0_i32_0 : i32, i32
  }
  func.func @transform_3(%arg0: i32) -> (i32, i32) {
    %c0_i32 = arith.constant 0 : i32
    %c0_i32_0 = arith.constant 0 : i32
    %c0_i32_1 = arith.constant 0 : i32
    return %c0_i32, %c0_i32_0 : i32, i32
  }
  func.func @transform_4(%arg0: i32) -> (i32, i32) {
    %c0_i32 = arith.constant 0 : i32
    %c0_i32_0 = arith.constant 0 : i32
    %c0_i32_1 = arith.constant 0 : i32
    return %c0_i32, %c0_i32_0 : i32, i32
  }
  func.func @transform_5(%arg0: i32) -> (i32, i32) {
    %c0_i32 = arith.constant 0 : i32
    %c0_i32_0 = arith.constant 0 : i32
    %c0_i32_1 = arith.constant 0 : i32
    return %c0_i32, %c0_i32_0 : i32, i32
  }
  func.func @transform_6(%arg0: i32) -> (i32, i32) {
    %c0_i32 = arith.constant 0 : i32
    %c0_i32_0 = arith.constant 0 : i32
    %c0_i32_1 = arith.constant 0 : i32
    return %c0_i32, %c0_i32_0 : i32, i32
  }
  func.func @transform_7(%arg0: i32) -> (i32, i32) {
    %c0_i32 = arith.constant 0 : i32
    %c0_i32_0 = arith.constant 0 : i32
    %c0_i32_1 = arith.constant 0 : i32
    return %c0_i32, %c0_i32_0 : i32, i32
  }
  func.func @transform_8(%arg0: i32) -> (i32, i32) {
    %c0_i32 = arith.constant 0 : i32
    %c0_i32_0 = arith.constant 0 : i32
    %c0_i32_1 = arith.constant 0 : i32
    return %c0_i32, %c0_i32_0 : i32, i32
  }
  func.func @transform_9(%arg0: i32) -> (i32, i32) {
    %c0_i32 = arith.constant 0 : i32
    %c0_i32_0 = arith.constant 0 : i32
    return %arg0, %c0_i32 : i32, i32
  }
}

</mosaic_0001>

<bundles_post_ra>
// kernel: lenet5_caffe_forward.1
= control target key start
LH: loop header
LB: loop body
LE: loop exit
PB: predicated region body
PF: predicated region fallthrough
CT: control target
= control target key end

     0   :  { %vm33_vm0 = vcmask 261120   ;;  %v10358_v1 = vmov 0   ;;  %s10359_s15 = smov 64   ;;  %s10360_s20 = smov 96   ;;  %vm1207_vm1 = vcmask 523520   ;;  %vm1304_vm2 = vcmask 785920   ;;  %s13744_s1 = inlined_call_operand.vmem [shape: bf16[32,32], index: 1, kind: input, shape index: {}]   ;;  %s13745_s0 = inlined_call_operand.vmem [shape: bf16[576,32], index: 0, kind: input, shape index: {}]   ;;  %s13746_s2 = inlined_call_operand.vmem [shape: f32[1,32], index: 2, kind: input, shape index: {}]   ;;  %s13747_s3 = inlined_call_operand.vmem [shape: bf16[800,64], index: 3, kind: input, shape index: {}]   ;;  %s13748_s4 = inlined_call_operand.vmem [shape: f32[1,64], index: 4, kind: input, shape index: {}]   ;;  %s13749_s5 = inlined_call_operand.vmem [shape: bf16[1024,512], index: 5, kind: input, shape index: {}]   ;;  %s13750_s7 = inlined_call_operand.vmem [shape: bf16[512,128], index: 7, kind: input, shape index: {}]   ;;  %s13751_s6 = inlined_call_operand.vmem [shape: f32[1,512], index: 6, kind: input, shape index: {}]   ;;  %s13752_s8 = inlined_call_operand.vmem [shape: f32[1,128], index: 8, kind: input, shape index: {}]   ;;  %s13753_s9 = inlined_call_operand.vmem [shape: f32[16,128], index: 9, kind: output, shape index: {}]  }
   0x1   :  { %v9682_v0 = vld [vmem:[%s13744_s1] sm:$0xff]   ;;  %36 = vst.msk [vmem:[#allocation2 + $0x10] sm:$0xff] %vm33_vm0, %v10358_v1  ;;  %34 = vst.msk [vmem:[#allocation2] sm:$0xff] %vm33_vm0, %v10358_v1  ;;  %v9684_v3 = vld [vmem:[%s13744_s1 + $0x8] sm:$0xff]   ;;  %s10361_s21 = smov 32   ;;  %vm1401_vm3 = vcmask 1048320  }
   0x2   :  { %35 = vst.msk [vmem:[#allocation2 + $0x8] sm:$0xff] %vm33_vm0, %v10358_v1  ;;  %37 = vst.msk [vmem:[#allocation2 + $0x18] sm:$0xff] %vm33_vm0, %v10358_v1  ;;  %v9683_v2 = vld [vmem:[%s13744_s1] sm:$0xff]   ;;  %9502 = vmatprep.subr.bf16.mxu0 %v9682_v0  ;;  %v9685_v4 = vld [vmem:[%s13744_s1 + $0x8] sm:$0xff]   ;;  %vm3829_vm4 = vcmask 523264   ;;  %vm3835_vm5 = vcmask 1048064  }
   0x3   :  { %38 = vst.msk [vmem:[#allocation2 + $0x20] sm:$0xff] %vm33_vm0, %v10358_v1  ;;  %39 = vst.msk [vmem:[#allocation2 + $0x28] sm:$0xff] %vm33_vm0, %v10358_v1  ;;  %9518 = vmatprep.subr.bf16.mxu1 %v9683_v2  ;;  %9503 = vmatpush3.bf16.msra.mxu0 %v9682_v0  ;;  %v9686_v5 = vld [vmem:[%s13745_s0] sm:$0xff]   ;;  %v9687_v6 = vld [vmem:[%s13745_s0 + $0x30] sm:$0xff]  }
   0x4   :  { %40 = vst.msk [vmem:[#allocation2 + $0x30] sm:$0xff] %vm33_vm0, %v10358_v1  ;;  %41 = vst.msk [vmem:[#allocation2 + $0x38] sm:$0xff] %vm33_vm0, %v10358_v1  ;;  %9519 = vmatpush3.bf16.msra.mxu1 %v9683_v2  ;;  %9504 = vmatprep.subr.bf16.mxu0 %v9684_v3  ;;  %v9688_v7 = vld [vmem:[%s13745_s0 + $0x8] sm:$0xff]   ;;  %v9689_v8 = vld [vmem:[%s13745_s0 + $0x38] sm:$0xff]  }
   0x5   :  { %42 = vst.msk [vmem:[#allocation2 + $0x1c0] sm:$0xff] %vm33_vm0, %v10358_v1  ;;  %43 = vst.msk [vmem:[#allocation2 + $0x1c8] sm:$0xff] %vm33_vm0, %v10358_v1  ;;  %9520 = vmatprep.subr.bf16.mxu1 %v9685_v4  ;;  %9506 = vmatprep.mubr.msk.bf16.mxu0 %vm33_vm0, %v9686_v5  ;;  %v9690_v9 = vld [vmem:[%s13745_s0 + $0x10] sm:$0xff]   ;;  %v9692_v10 = vld [vmem:[%s13745_s0 + $0x40] sm:$0xff]  }
   0x6   :  { %44 = vst.msk [vmem:[#allocation2 + $0x1d0] sm:$0xff] %vm33_vm0, %v10358_v1  ;;  %45 = vst.msk [vmem:[#allocation2 + $0x1d8] sm:$0xff] %vm33_vm0, %v10358_v1  ;;  %9522 = vmatprep.mubr.msk.bf16.mxu1 %vm33_vm0, %v9687_v6  ;;  %v9691_v11 = vld [vmem:[%s13745_s0 + $0x18] sm:$0xff]   ;;  %v9693_v12 = vld [vmem:[%s13745_s0 + $0x48] sm:$0xff]  }
   0x7   :  { %46 = vst.msk [vmem:[#allocation2 + $0x1e0] sm:$0xff] %vm33_vm0, %v10358_v1  ;;  %47 = vst.msk [vmem:[#allocation2 + $0x1e8] sm:$0xff] %vm33_vm0, %v10358_v1  ;;  %9505 = vmatpush3.bf16.msra.mxu0 %v9684_v3  ;;  %v9694_v13 = vld [vmem:[%s13745_s0 + $0x20] sm:$0xff]   ;;  %v9696_v14 = vld [vmem:[%s13745_s0 + $0x50] sm:$0xff]  }
   0x8   :  { %48 = vst.msk [vmem:[#allocation2 + $0x1f0] sm:$0xff] %vm33_vm0, %v10358_v1  ;;  %49 = vst.msk [vmem:[#allocation2 + $0x1f8] sm:$0xff] %vm33_vm0, %v10358_v1  ;;  %9521 = vmatpush3.bf16.msra.mxu1 %v9685_v4  ;;  %v9698_v15 = vld [vmem:[%s13744_s1] sm:$0xff]   ;;  %v9700_v17 = vld [vmem:[%s13744_s1 + $0x8] sm:$0xff]  }
   0x9   :  { %50 = vst.msk [vmem:[#allocation2 + $0x40] sm:$0xff] %vm33_vm0, %v10358_v1  ;;  %51 = vst.msk [vmem:[#allocation2 + $0x78] sm:$0xff] %vm33_vm0, %v10358_v1  ;;  %v9699_v16 = vld [vmem:[%s13744_s1] sm:$0xff]   ;;  %9550 = vmatprep.subr.bf16.mxu1 %v9698_v15  ;;  %v9701_v18 = vld [vmem:[%s13744_s1 + $0x8] sm:$0xff]  }
   0xa   :  { %52 = vst.msk [vmem:[#allocation2 + $0x80] sm:$0xff] %vm33_vm0, %v10358_v1  ;;  %53 = vst.msk [vmem:[#allocation2 + $0xb8] sm:$0xff] %vm33_vm0, %v10358_v1  ;;  %9507 = vmatmul.mubr.msk.bf16.vlgmr.msra.gmra.mrb[0].mxu0 %vm33_vm0, %v9688_v7  ;;  %v9695_v19 = vld [vmem:[%s13745_s0 + $0x28] sm:$0xff]   ;;  %9534 = vmatprep.subr.bf16.mxu0 %v9699_v16  ;;  %v9697_v20 = vld [vmem:[%s13745_s0 + $0x58] sm:$0xff]  }
   0xb   :  { %54 = vst.msk [vmem:[#allocation2 + $0xc0] sm:$0xff] %vm33_vm0, %v10358_v1  ;;  %55 = vst.msk [vmem:[#allocation2 + $0xf8] sm:$0xff] %vm33_vm0, %v10358_v1  ;;  %9523 = vmatmul.mubr.msk.bf16.vlgmr.msra.gmra.mrb[0].mxu1 %vm33_vm0, %v9689_v8  ;;  %9510 = vmatprep.mubr.msk.bf16.mxu0 %vm33_vm0, %v9690_v9  ;;  %v9702_v21 = vld [vmem:[%s13745_s0 + $0x60] sm:$0xff]   ;;  %v9704_v22 = vld [vmem:[%s13745_s0 + $0x90] sm:$0xff]  }
   0xc   :  { %56 = vst.msk [vmem:[#allocation2 + $0x100] sm:$0xff] %vm33_vm0, %v10358_v1  ;;  %57 = vst.msk [vmem:[#allocation2 + $0x138] sm:$0xff] %vm33_vm0, %v10358_v1  ;;  %9526 = vmatprep.mubr.msk.bf16.mxu1 %vm33_vm0, %v9692_v10  ;;  %9551 = vmatpush3.bf16.msra.mxu1 %v9698_v15  ;;  %v9703_v23 = vld [vmem:[%s13745_s0 + $0x68] sm:$0xff]   ;;  %v1284_v24 = vld [vmem:[#allocation2 + $0x10] sm:$0xff] }
   0xd   :  { %58 = vst.msk [vmem:[#allocation2 + $0x140] sm:$0xff] %vm33_vm0, %v10358_v1  ;;  %59 = vst.msk [vmem:[#allocation2 + $0x178] sm:$0xff] %vm33_vm0, %v10358_v1  ;;  %9552 = vmatprep.subr.bf16.mxu1 %v9700_v17  ;;  %9535 = vmatpush3.bf16.msra.mxu0 %v9699_v16  ;;  %v1381_v25 = vld [vmem:[#allocation2 + $0x18] sm:$0xff]  ;;  %v1382_v27 = vld [vmem:[#allocation2 + $0x20] sm:$0xff] }
   0xe   :  { %60 = vst.msk [vmem:[#allocation2 + $0x180] sm:$0xff] %vm33_vm0, %v10358_v1  ;;  %61 = vst.msk [vmem:[#allocation2 + $0x1b8] sm:$0xff] %vm33_vm0, %v10358_v1  ;;  %9536 = vmatprep.subr.bf16.mxu0 %v9701_v18  ;;  %v9705_v26 = vld [vmem:[%s13745_s0 + $0x98] sm:$0xff]   ;;  %1292 = vrot.lane.b32.xlu1 %v1284_v24, %s10359_s15  ;;  %v9706_v28 = vld [vmem:[%s13745_s0 + $0x70] sm:$0xff]  }
   0xf   :  { %1161 = vst.msk [vmem:[#allocation3 + $0x70] sm:$0xff] %vm33_vm0, %v1284_v24  ;;  %1162 = vst.msk [vmem:[#allocation3 + $0xa8] sm:$0xff] %vm33_vm0, %v1381_v25  ;;  %v9708_v29 = vld [vmem:[%s13745_s0 + $0xa0] sm:$0xff]   ;;  %v1187_v31 = vld [vmem:[#allocation2 + $0x8] sm:$0xff] }
  0x10   :  { %9553 = vmatpush3.bf16.msra.mxu1 %v9700_v17  ;;  %1482 = vst.msk [vmem:[#allocation3 + $0x8] sm:$0xff] %vm33_vm0, %v1382_v27  ;;  %v1510_v30 = vld [vmem:[#allocation2 + $0x40] sm:$0xff]  ;;  %1160 = vst.msk [vmem:[#allocation3 + $0x38] sm:$0xff] %vm33_vm0, %v1187_v31  ;;  %v1384_v33 = vld [vmem:[#allocation2 + $0x30] sm:$0xff] }
  0x11   :  { %9537 = vmatpush3.bf16.msra.mxu0 %v9701_v18  ;;  %1518 = vrot.lane.b32.xlu0 %v1510_v30, %s10361_s21  ;;  %v9714_v32 = vld [vmem:[%s13744_s1] sm:$0xff]   ;;  %v9707_v34 = vld [vmem:[%s13745_s0 + $0x78] sm:$0xff]   ;;  %1484 = vst.msk [vmem:[#allocation3 + $0x78] sm:$0xff] %vm33_vm0, %v1384_v33  ;;  %v9709_v35 = vld [vmem:[%s13745_s0 + $0xa8] sm:$0xff]  }
  0x12   :  { %9511 = vmatmul.mubr.msk.bf16.gmra.mrb[4].mxu0 %vm33_vm0, %v9691_v11  ;;  %1389 = vrot.lane.b32.xlu1 %v1381_v25, %s10360_s20  ;;  %v9710_v36 = vld [vmem:[%s13745_s0 + $0x80] sm:$0xff]   ;;  %v9712_v38 = vld [vmem:[%s13745_s0 + $0xb0] sm:$0xff]   ;;  %v9711_v39 = vld [vmem:[%s13745_s0 + $0x88] sm:$0xff]  }
  0x13   :  { %9527 = vmatmul.mubr.msk.bf16.gmra.mrb[4].mxu1 %vm33_vm0, %v9693_v12  ;;  %9514 = vmatprep.mubr.msk.bf16.mxu0 %vm33_vm0, %v9694_v13  ;;  %v1926_v37 = vld [vmem:[#allocation2 + $0x80] sm:$0xff]  ;;  %v2249_v40 = vld [vmem:[#allocation2 + $0xb8] sm:$0xff]  ;;  %v1383_v42 = vld [vmem:[#allocation2 + $0x28] sm:$0xff] }
  0x14   :  { %9530 = vmatprep.mubr.msk.bf16.mxu1 %vm33_vm0, %v9696_v14  ;;  %9566 = vmatprep.subr.bf16.mxu0 %v9714_v32  ;;  %v9713_v41 = vld [vmem:[%s13745_s0 + $0xb8] sm:$0xff]   ;;  %v2342_v43 = vld [vmem:[#allocation2 + $0xc0] sm:$0xff]  ;;  %v9715_v46 = vld [vmem:[%s13744_s1 + $0x8] sm:$0xff]  }
  0x15   :  { %1195 = vrot.lane.b32.xlu0 %v1187_v31, %s10361_s21  ;;  %v1833_v44 = vld [vmem:[#allocation2 + $0x78] sm:$0xff]  ;;  %v2366_v47 = vld [vmem:[#allocation2 + $0x100] sm:$0xff]  ;;  %v9717_v49 = vld [vmem:[%s13745_s0 + $0xc8] sm:$0xff]  }
  0x16   :  { %1197 = vrot.lane.b32.xlu1 %v1284_v24, %s10361_s21  ;;  %v2665_v45 = vld [vmem:[#allocation2 + $0xf8] sm:$0xff]  ;;  %v9716_v48 = vld [vmem:[%s13745_s0 + $0xc0] sm:$0xff]   ;;  %v9718_v51 = vld [vmem:[%s13745_s0 + $0xd0] sm:$0xff]  }
  0x17   :  { %v2689_v50 = vld [vmem:[#allocation2 + $0x138] sm:$0xff]  ;;  %v9720_v53 = vld [vmem:[%s13745_s0 + $0xe0] sm:$0xff]   ;;  %v9721_v54 = vld [vmem:[%s13745_s0 + $0xe8] sm:$0xff]  }
  0x18   :  { %v9719_v52 = vld [vmem:[%s13745_s0 + $0xd8] sm:$0xff]   ;;  %v9722_v57 = vld [vmem:[%s13744_s1] sm:$0xff]   ;;  %v9723_v59 = vld [vmem:[%s13744_s1 + $0x8] sm:$0xff]  }
  0x19   :  { %1934 = vrot.lane.b32.xlu0 %v1926_v37, %s10359_s15  ;;  %9582 = vmatprep.subr.bf16.mxu1 %v9722_v57  ;;  %v9724_v61 = vld [vmem:[%s13745_s0 + $0xf0] sm:$0xff]   ;;  %v9725_v62 = vld [vmem:[%s13745_s0 + $0xf8] sm:$0xff]   ;;  %v1155_v5 = vld [vmem:[#allocation2] sm:$0xff] }
  0x1a   :  { %9515 = vmatmul.mubr.msk.bf16.gmra.mrb[8].mxu0 %vm33_vm0, %v9695_v19  ;;  %1294 = vrot.lane.b32.xlu1 %v1381_v25, %s10359_s15  ;;  %1159 = vst.msk [vmem:[#allocation3] sm:$0xff] %vm33_vm0, %v1155_v5  ;;  %v9726_v11 = vld [vmem:[%s13745_s0 + $0x100] sm:$0xff]   ;;  %v9727_v12 = vld [vmem:[%s13745_s0 + $0x108] sm:$0xff]  }
  0x1b   :  { %9531 = vmatmul.mubr.msk.bf16.gmra.mrb[8].mxu1 %vm33_vm0, %v9697_v20  ;;  %9538 = vmatprep.mubr.msk.bf16.mxu0 %vm33_vm0, %v9702_v21  ;;  %v10665_v14 = vld [vmem:[%s13746_s2] ss:$0 sm:$0xff] }
  0x1c   :  { %9554 = vmatprep.mubr.msk.bf16.mxu1 %vm33_vm0, %v9704_v22  ;;  %v9728_v15 = vld [vmem:[%s13747_s3 + $0x40] sm:$0xff]   ;;  %v9730_v22 = vld [vmem:[%s13747_s3 + $0x48] sm:$0xff]  }
  0x1d   :  { %1201 = vrot.lane.b32.xlu0 %v1382_v27, %s10361_s21  ;;  %v9729_v16 = vld [vmem:[%s13747_s3] sm:$0xff]  }
  0x1e   :  { %1391 = vrot.lane.b32.xlu1 %v1382_v27, %s10360_s20 }
  0x21   :  { %2260 = vrot.lane.b32.xlu0 %v2249_v40, %s10359_s15 }
  0x22   :  { %9539 = vmatmul.mubr.msk.bf16.vlgmr.msra.gmra.mrb[12].mxu0 %vm33_vm0, %v9703_v23  ;;  %1199 = vrot.lane.b32.xlu1 %v1381_v25, %s10361_s21 }
  0x23   :  { %9555 = vmatmul.mubr.msk.bf16.vlgmr.msra.gmra.mrb[12].mxu1 %vm33_vm0, %v9705_v26  ;;  %9542 = vmatprep.mubr.msk.bf16.mxu0 %vm33_vm0, %v9706_v28 }
  0x24   :  { %9558 = vmatprep.mubr.msk.bf16.mxu1 %vm33_vm0, %v9708_v29  ;;  %9567 = vmatpush3.bf16.msra.mxu0 %v9714_v32 }
  0x25   :  { %1542 = vrot.lane.b32.xlu0 %v1926_v37, %s10361_s21  ;;  %9568 = vmatprep.subr.bf16.mxu0 %v9715_v46 }
  0x26   :  { %1296 = vrot.lane.b32.xlu1 %v1382_v27, %s10359_s15  ;;  %9583 = vmatpush3.bf16.msra.mxu1 %v9722_v57  ;;  %v9731_v27 = vld [vmem:[%s13747_s3 + $0x8] sm:$0xff]  }
  0x27   :  { %9584 = vmatprep.subr.bf16.mxu1 %v9723_v59 }
  0x28   :  { %9569 = vmatpush3.bf16.msra.mxu0 %v9715_v46 }
  0x29   :  { %1958 = vrot.lane.b32.xlu0 %v2342_v43, %s10359_s15  ;;  %8954 = vmatprep.subr.bf16.mxu0 %v9728_v15  ;;  %v9736_v15 = vld [vmem:[%s13747_s3 + $0x60] sm:$0xff]  }
  0x2a   :  { %9543 = vmatmul.mubr.msk.bf16.gmra.mrb[16].mxu0 %vm33_vm0, %v9707_v34  ;;  %1393 = vrot.lane.b32.xlu1 %v1383_v42, %s10360_s20 }
  0x2b   :  { %9559 = vmatmul.mubr.msk.bf16.gmra.mrb[16].mxu1 %vm33_vm0, %v9709_v35  ;;  %9546 = vmatprep.mubr.msk.bf16.mxu0 %vm33_vm0, %v9710_v36 }
  0x2c   :  { %9562 = vmatprep.mubr.msk.bf16.mxu1 %vm33_vm0, %v9712_v38  ;;  %9585 = vmatpush3.bf16.msra.mxu1 %v9723_v59 }
  0x2d   :  { %2284 = vrot.lane.b32.xlu0 %v2665_v45, %s10359_s15 }
  0x2e   :  { %2350 = vrot.lane.b32.xlu1 %v2342_v43, %s10360_s20 }
  0x31   :  { %1566 = vrot.lane.b32.xlu0 %v2342_v43, %s10361_s21 }
  0x32   :  { %9547 = vmatmul.mubr.msk.bf16.gmra.mrb[20].mxu0 %vm33_vm0, %v9711_v39  ;;  %1298 = vrot.lane.b32.xlu1 %v1383_v42, %s10359_s15 }
  0x33   :  { %9563 = vmatmul.mubr.msk.bf16.gmra.mrb[20].mxu1 %vm33_vm0, %v9713_v41  ;;  %9570 = vmatprep.mubr.msk.bf16.mxu0 %vm33_vm0, %v9716_v48 }
  0x34   :  { %9586 = vmatprep.mubr.msk.bf16.mxu1 %vm33_vm0, %v9724_v61  ;;  %v9735_v61 = vld [vmem:[%s13747_s3 + $0x18] sm:$0xff]  }
  0x36   :  { %1395 = vrot.lane.b32.xlu1 %v1384_v33, %s10360_s20 }
  0x3a   :  { %1844 = vrot.lane.b32.xlu1 %v1833_v44, %s10361_s21  ;;  %9571 = vmatmul.mubr.msk.bf16.vlgmr.msra.gmra.mrb[24].mxu0 %vm33_vm0, %v9717_v49  ;;  %v9733_v44 = vld [vmem:[%s13747_s3 + $0x10] sm:$0xff]  }
  0x3b   :  { %9574 = vmatprep.mubr.msk.bf16.mxu0 %vm33_vm0, %v9718_v51  ;;  %9587 = vmatmul.mubr.msk.bf16.vlgmr.msra.gmra.mrb[24].mxu1 %vm33_vm0, %v9725_v62 }
  0x3c   :  { %9590 = vmatprep.mubr.msk.bf16.mxu1 %vm33_vm0, %v9726_v11  ;;  %8955 = vmatpush3.bf16.msra.mxu0 %v9729_v16 }
  0x3d   :  { %8956 = vmatprep.subr.bf16.mxu0 %v9730_v22 }
  0x3e   :  { %2676 = vrot.lane.b32.xlu1 %v2665_v45, %s10360_s20 }
  0x40   :  { %8957 = vmatpush3.bf16.msra.mxu0 %v9731_v27 }
  0x42   :  { %2374 = vrot.lane.b32.xlu1 %v2366_v47, %s10360_s20  ;;  %9575 = vmatmul.mubr.msk.bf16.gmra.mrb[28].mxu0 %vm33_vm0, %v9719_v52 }
  0x43   :  { %9578 = vmatprep.mubr.msk.bf16.mxu0 %vm33_vm0, %v9720_v53  ;;  %9591 = vmatmul.mubr.msk.bf16.gmra.mrb[28].mxu1 %vm33_vm0, %v9727_v12 }
  0x46   :  { %1868 = vrot.lane.b32.xlu1 %v2249_v40, %s10361_s21  ;;  %v9732_v40 = vld [vmem:[%s13747_s3 + $0x50] sm:$0xff]  }
  0x47   :  { %8958 = vmatprep.subr.bf16.mxu0 %v9732_v40 }
  0x48   :  { %8959 = vmatpush3.bf16.msra.mxu0 %v9733_v44 }
  0x4a   :  { %2700 = vrot.lane.b32.xlu1 %v2689_v50, %s10360_s20  ;;  %9579 = vmatmul.mubr.msk.bf16.gmra.mrb[32].mxu0 %vm33_vm0, %v9721_v54 }
  0x80   :  { %v1293_v55 = vpop.permute.xlu1 %1292 }
  0x83   :  { %v1519_v1 = vpop.permute.xlu0 %1518 }
  0x84   :  { %v1390_v56 = vpop.permute.xlu1 %1389  ;;  %1530 = vst.msk [vmem:[#allocation3 + $0x8] sm:$0xff] %vm1207_vm1, %v1519_v1 }
  0x87   :  { %v1196_v4 = vpop.permute.xlu0 %1195 }
  0x88   :  { %v1198_v58 = vpop.permute.xlu1 %1197  ;;  %1208 = vst.msk [vmem:[#allocation3] sm:$0xff] %vm1207_vm1, %v1196_v4 }
  0x89   :  { %1209 = vst.msk [vmem:[#allocation3 + $0x38] sm:$0xff] %vm1207_vm1, %v1198_v58 }
  0x8a   :  { %1305 = vst.msk [vmem:[#allocation3] sm:$0xff] %vm1304_vm2, %v1293_v55 }
  0x8b   :  { %1402 = vst.msk [vmem:[#allocation3] sm:$0xff] %vm1401_vm3, %v1390_v56  ;;  %v10647_v8 = vpop.permute.xlu0 %1934  ;;  %v9734_v56 = vld [vmem:[%s13747_s3 + $0x58] sm:$0xff]  }
  0x8c   :  { %v1295_v60 = vpop.permute.xlu1 %1294  ;;  %8960 = vmatprep.subr.bf16.mxu0 %v9734_v56 }
  0x8d   :  { %1306 = vst.msk [vmem:[#allocation3 + $0x38] sm:$0xff] %vm1304_vm2, %v1295_v60  ;;  %8961 = vmatpush3.bf16.msra.mxu0 %v9735_v61 }
  0x8e   :  { %8962 = vmatprep.subr.bf16.mxu0 %v9736_v15 }
  0x8f   :  { %v1202_v9 = vpop.permute.xlu0 %1201 }
  0x90   :  { %v1392_v63 = vpop.permute.xlu1 %1391  ;;  %1211 = vst.msk [vmem:[#allocation3 + $0xa8] sm:$0xff] %vm1207_vm1, %v1202_v9 }
  0x91   :  { %1403 = vst.msk [vmem:[#allocation3 + $0x38] sm:$0xff] %vm1401_vm3, %v1392_v63 }
  0x93   :  { %v10660_v13 = vpop.permute.xlu0 %2260 }
  0x94   :  { %v1200_v0 = vpop.permute.xlu1 %1199 }
  0x95   :  { %1210 = vst.msk [vmem:[#allocation3 + $0x70] sm:$0xff] %vm1207_vm1, %v1200_v0 }
  0x97   :  { %v10673_v18 = vpop.permute.xlu0 %1542 }
  0x98   :  { %v1297_v2 = vpop.permute.xlu1 %1296 }
  0x99   :  { %1307 = vst.msk [vmem:[#allocation3 + $0x70] sm:$0xff] %vm1304_vm2, %v1297_v2 }
  0x9b   :  { %v10697_v51 = vpop.permute.xlu0 %1958 }
  0x9c   :  { %v1394_v3 = vpop.permute.xlu1 %1393 }
  0x9d   :  { %1404 = vst.msk [vmem:[#allocation3 + $0x70] sm:$0xff] %vm1401_vm3, %v1394_v3 }
  0x9f   :  { %v10727_v27 = vpop.permute.xlu0 %2284 }
  0xa0   :  { %v10645_v6 = vpop.permute.xlu1 %2350 }
  0xa4   :  { %v1299_v7 = vpop.permute.xlu1 %1298 }
  0xa5   :  { %1308 = vst.msk [vmem:[#allocation3 + $0xa8] sm:$0xff] %vm1304_vm2, %v1299_v7 }
  0xa8   :  { %v1396_v10 = vpop.permute.xlu1 %1395 }
  0xa9   :  { %1405 = vst.msk [vmem:[#allocation3 + $0xa8] sm:$0xff] %vm1401_vm3, %v1396_v10 }
  0xac   :  { %v10695_v47 = vpop.permute.xlu1 %1844 }
  0xb0   :  { %v10723_v22 = vpop.permute.xlu1 %2676 }
  0xdd   :  { %v9508_v17 = vpop.f32.mrb[0].mxu0 }
  0xde   :  { %v188_v19 = vadd.f32 %v9508_v17, %v10665_v14  ;;  %v9524_v20 = vpop.f32.mrb[0].mxu1  ;;  %v179_v21 = vpop.f32.mrb[1].mxu0 }
  0xdf   :  { %v369_v23 = vadd.f32 %v9524_v20, %v10665_v14  ;;  %v180_v24 = vadd.f32 %v10665_v14, %v179_v21  ;;  %v360_v25 = vpop.f32.mrb[1].mxu1  ;;  %v9509_v26 = vpop.f32.mrb[2].mxu0 }
  0xe0   :  { %v361_v28 = vadd.f32 %v10665_v14, %v360_v25  ;;  %v191_v29 = vadd.f32 %v9509_v26, %v10665_v14  ;;  %v9525_v30 = vpop.f32.mrb[2].mxu1  ;;  %v182_v31 = vpop.f32.mrb[3].mxu0  ;;  %v228_v36 = vmax.f32 %v188_v19, 0.0  ;;  %v9737_v19 = vld [vmem:[%s13747_s3 + $0x20] sm:$0xff]  }
  0xe1   :  { %v409_v32 = vmax.f32 %v369_v23, 0.0  ;;  %v372_v33 = vadd.f32 %v9525_v30, %v10665_v14  ;;  %v183_v34 = vadd.f32 %v10665_v14, %v182_v31  ;;  %v363_v35 = vpop.f32.mrb[3].mxu1  ;;  %v226_v41 = vmax.f32 %v180_v24, 0.0  ;;  %8963 = vmatpush3.bf16.msra.mxu0 %v9737_v19 }
  0xe2   :  { %v407_v37 = vmax.f32 %v361_v28, 0.0  ;;  %v229_v38 = vmax.f32 %v191_v29, 0.0  ;;  %v364_v39 = vadd.f32 %v10665_v14, %v363_v35 }
  0xe3   :  { %v410_v42 = vmax.f32 %v372_v33, 0.0  ;;  %v227_v43 = vmax.f32 %v183_v34, 0.0  ;;  %v9738_v34 = vld [vmem:[%s13747_s3 + $0x68] sm:$0xff]  }
  0xe4   :  { %v239_v45 = vpack.c.bf16 %v229_v38, %v228_v36  ;;  %v408_v46 = vmax.f32 %v364_v39, 0.0  ;;  %v9739_v39 = vld [vmem:[%s13747_s3 + $0x28] sm:$0xff]   ;;  %8964 = vmatprep.subr.bf16.mxu0 %v9738_v34 }
  0xe5   :  { %v420_v48 = vpack.c.bf16 %v410_v42, %v409_v32  ;;  %v238_v49 = vpack.c.bf16 %v227_v43, %v226_v41  ;;  %v9512_v50 = vpop.f32.mrb[4].mxu0  ;;  %8965 = vmatpush3.bf16.msra.mxu0 %v9739_v39 }
  0xe6   :  { %245 = vst.msk [vmem:[#allocation2 + $0x50] sm:$0xff] %vm33_vm0, %v239_v45  ;;  %v419_v52 = vpack.c.bf16 %v408_v46, %v407_v37  ;;  %v204_v53 = vadd.f32 %v9512_v50, %v10665_v14  ;;  %v195_v54 = vpop.f32.mrb[5].mxu0  ;;  %v9528_v55 = vpop.f32.mrb[4].mxu1 }
  0xe7   :  { %426 = vst.msk [vmem:[#allocation2 + $0x90] sm:$0xff] %vm33_vm0, %v420_v48  ;;  %244 = vst.msk [vmem:[#allocation2 + $0x48] sm:$0xff] %vm33_vm0, %v238_v49  ;;  %v196_v57 = vadd.f32 %v10665_v14, %v195_v54  ;;  %v9513_v58 = vpop.f32.mrb[6].mxu0  ;;  %v385_v59 = vadd.f32 %v9528_v55, %v10665_v14  ;;  %v376_v60 = vpop.f32.mrb[5].mxu1 }
  0xe8   :  { %425 = vst.msk [vmem:[#allocation2 + $0x88] sm:$0xff] %vm33_vm0, %v419_v52  ;;  %v232_v62 = vmax.f32 %v204_v53, 0.0  ;;  %v207_v63 = vadd.f32 %v9513_v58, %v10665_v14  ;;  %v198_v0 = vpop.f32.mrb[7].mxu0  ;;  %v377_v1 = vadd.f32 %v10665_v14, %v376_v60  ;;  %v9529_v2 = vpop.f32.mrb[6].mxu1  ;;  %v9741_v60 = vld [vmem:[%s13747_s3 + $0x30] sm:$0xff]  }
  0xe9   :  { %v230_v3 = vmax.f32 %v196_v57, 0.0  ;;  %v199_v4 = vadd.f32 %v10665_v14, %v198_v0  ;;  %v413_v5 = vmax.f32 %v385_v59, 0.0  ;;  %v388_v7 = vadd.f32 %v9529_v2, %v10665_v14  ;;  %v379_v9 = vpop.f32.mrb[7].mxu1  ;;  %v9740_v57 = vld [vmem:[%s13747_s3 + $0x70] sm:$0xff]   ;;  %v10772_v0 = vpop.permute.xlu1 %2374 }
  0xea   :  { %v233_v10 = vmax.f32 %v207_v63, 0.0  ;;  %v411_v11 = vmax.f32 %v377_v1, 0.0  ;;  %v380_v12 = vadd.f32 %v10665_v14, %v379_v9  ;;  %8966 = vmatprep.subr.bf16.mxu0 %v9740_v57 }
  0xeb   :  { %v231_v16 = vmax.f32 %v199_v4, 0.0  ;;  %v414_v17 = vmax.f32 %v388_v7, 0.0  ;;  %v1567_v7 = vpop.permute.xlu0 %1566  ;;  %8967 = vmatpush3.bf16.msra.mxu0 %v9741_v60 }
  0xec   :  { %v241_v20 = vpack.c.bf16 %v233_v10, %v232_v62  ;;  %v412_v21 = vmax.f32 %v380_v12, 0.0 }
  0xed   :  { %v10725_v23 = vld [vmem:[#allocation2 + $0x50] sm:$0xff]  ;;  %v240_v24 = vpack.c.bf16 %v231_v16, %v230_v3  ;;  %v422_v25 = vpack.c.bf16 %v414_v17, %v413_v5  ;;  %v9516_v26 = vpop.f32.mrb[8].mxu0  ;;  %v9742_v17 = vld [vmem:[%s13747_s3 + $0x78] sm:$0xff]  }
  0xee   :  { %v10729_v28 = vld [vmem:[#allocation2 + $0x90] sm:$0xff]  ;;  %1710 = vrot.lane.b32.xlu0 %v10725_v23, %s10360_s20  ;;  %v10733_v29 = vld [vmem:[#allocation2 + $0x48] sm:$0xff]  ;;  %247 = vst.msk [vmem:[#allocation2 + $0x60] sm:$0xff] %vm33_vm0, %v241_v20  ;;  %v421_v30 = vpack.c.bf16 %v412_v21, %v411_v11  ;;  %v220_v31 = vadd.f32 %v9516_v26, %v10665_v14  ;;  %v211_v32 = vpop.f32.mrb[9].mxu0  ;;  %v9532_v33 = vpop.f32.mrb[8].mxu1  ;;  %8968 = vmatprep.subr.bf16.mxu0 %v9742_v17 }
  0xef   :  { %1938 = vrot.lane.b32.xlu1 %v10729_v28, %s10359_s15  ;;  %246 = vst.msk [vmem:[#allocation2 + $0x58] sm:$0xff] %vm33_vm0, %v240_v24  ;;  %428 = vst.msk [vmem:[#allocation2 + $0xa0] sm:$0xff] %vm33_vm0, %v422_v25  ;;  %v212_v35 = vadd.f32 %v10665_v14, %v211_v32  ;;  %v9517_v36 = vpop.f32.mrb[10].mxu0  ;;  %v401_v37 = vadd.f32 %v9532_v33, %v10665_v14  ;;  %v392_v38 = vpop.f32.mrb[9].mxu1  ;;  %v1165_v45 = vld [vmem:[#allocation2 + $0x50] sm:$0xff]  ;;  %v1172_v61 = vld [vmem:[#allocation2 + $0x88] sm:$0xff] }
  0xf0   :  { %1168 = vst.msk [vmem:[#allocation3 + $0x118] sm:$0xff] %vm33_vm0, %v10733_v29  ;;  %427 = vst.msk [vmem:[#allocation2 + $0x98] sm:$0xff] %vm33_vm0, %v421_v30  ;;  %v236_v40 = vmax.f32 %v220_v31, 0.0  ;;  %v223_v41 = vadd.f32 %v9517_v36, %v10665_v14  ;;  %v393_v42 = vadd.f32 %v10665_v14, %v392_v38  ;;  %v9533_v43 = vpop.f32.mrb[10].mxu1  ;;  %v214_v44 = vpop.f32.mrb[11].mxu0  ;;  %v10757_v53 = vld [vmem:[#allocation2 + $0x90] sm:$0xff] }
  0xf1   :  { %v234_v46 = vmax.f32 %v212_v35, 0.0  ;;  %v417_v48 = vmax.f32 %v401_v37, 0.0  ;;  %v404_v49 = vadd.f32 %v9533_v43, %v10665_v14  ;;  %v395_v50 = vpop.f32.mrb[11].mxu1  ;;  %v215_v52 = vadd.f32 %v10665_v14, %v214_v44  ;;  %1169 = vst.msk [vmem:[#allocation3 + $0x150] sm:$0xff] %vm33_vm0, %v1165_v45  ;;  %2122 = vst.msk [vmem:[#allocation3 + $0x18] sm:$0xff] %vm33_vm0, %v10757_v53  ;;  %v1173_v1 = vld [vmem:[#allocation2 + $0x90] sm:$0xff] }
  0xf2   :  { %1616 = vrot.lane.b32.xlu0 %v10725_v23, %s10359_s15  ;;  %v237_v54 = vmax.f32 %v223_v41, 0.0  ;;  %v415_v55 = vmax.f32 %v393_v42, 0.0  ;;  %v396_v56 = vadd.f32 %v10665_v14, %v395_v50  ;;  %1176 = vst.msk [vmem:[#allocation3 + $0x1f8] sm:$0xff] %vm33_vm0, %v1172_v61  ;;  %1177 = vst.msk [vmem:[#allocation3 + $0x230] sm:$0xff] %vm33_vm0, %v1173_v1  ;;  %v1163_v33 = vld [vmem:[#allocation2 + $0x40] sm:$0xff] }
  0xf3   :  { %1317 = vrot.lane.b32.xlu1 %v10725_v23, %s10359_s15  ;;  %v418_v58 = vmax.f32 %v404_v49, 0.0  ;;  %v235_v59 = vmax.f32 %v215_v52, 0.0  ;;  %1167 = vst.msk [vmem:[#allocation3 + $0xe0] sm:$0xff] %vm33_vm0, %v1163_v33  ;;  %v1171_v49 = vld [vmem:[#allocation2 + $0x80] sm:$0xff] }
  0xf4   :  { %v243_v62 = vpack.c.bf16 %v237_v54, %v236_v40  ;;  %v416_v63 = vmax.f32 %v396_v56, 0.0  ;;  %1175 = vst.msk [vmem:[#allocation3 + $0x1c0] sm:$0xff] %vm33_vm0, %v1171_v49 }
  0xf5   :  { %v10775_v2 = vld [vmem:[#allocation2 + $0x60] sm:$0xff]  ;;  %v424_v3 = vpack.c.bf16 %v418_v58, %v417_v48  ;;  %v242_v4 = vpack.c.bf16 %v235_v59, %v234_v46  ;;  %v9540_v5 = vpop.f32.mrb[12].mxu0  ;;  %v1479_v48 = vld [vmem:[#allocation2 + $0x28] sm:$0xff] }
  0xf6   :  { %1522 = vrot.lane.b32.xlu0 %v10725_v23, %s10361_s21  ;;  %v10780_v9 = vld [vmem:[#allocation2 + $0xa0] sm:$0xff]  ;;  %v10782_v10 = vld [vmem:[#allocation2 + $0x58] sm:$0xff]  ;;  %249 = vst.msk [vmem:[#allocation2 + $0x70] sm:$0xff] %vm33_vm0, %v243_v62  ;;  %v423_v11 = vpack.c.bf16 %v416_v63, %v415_v55  ;;  %v550_v12 = vadd.f32 %v9540_v5, %v10665_v14  ;;  %v541_v15 = vpop.f32.mrb[13].mxu0  ;;  %v9556_v16 = vpop.f32.mrb[12].mxu1  ;;  %1490 = vst.msk [vmem:[#allocation3 + $0xe8] sm:$0xff] %vm33_vm0, %v10775_v2 }
  0xf7   :  { %1222 = vrot.lane.b32.xlu1 %v10725_v23, %s10361_s21  ;;  %v10793_v19 = vld [vmem:[#allocation2 + $0x98] sm:$0xff]  ;;  %430 = vst.msk [vmem:[#allocation2 + $0xb0] sm:$0xff] %vm33_vm0, %v424_v3  ;;  %248 = vst.msk [vmem:[#allocation2 + $0x68] sm:$0xff] %vm33_vm0, %v242_v4  ;;  %v542_v20 = vadd.f32 %v10665_v14, %v541_v15  ;;  %v9541_v21 = vpop.f32.mrb[14].mxu0  ;;  %v731_v24 = vadd.f32 %v9556_v16, %v10665_v14  ;;  %v722_v25 = vpop.f32.mrb[13].mxu1  ;;  %v1799_v39 = vld [vmem:[#allocation2 + $0x60] sm:$0xff] }
  0xf8   :  { %1554 = vst.msk [vmem:[#allocation3 + $0xe8] sm:$0xff] %vm1207_vm1, %v10673_v18  ;;  %v9743_v23 = vld [vmem:[%s13747_s3 + $0x38] sm:$0xff]   ;;  %v590_v26 = vmax.f32 %v550_v12, 0.0  ;;  %v553_v30 = vadd.f32 %v9541_v21, %v10665_v14  ;;  %v723_v18 = vadd.f32 %v10665_v14, %v722_v25  ;;  %v9557_v31 = vpop.f32.mrb[14].mxu1  ;;  %v544_v32 = vpop.f32.mrb[15].mxu0 }
  0xf9   :  { %1498 = vst.msk [vmem:[#allocation3 + $0x1c8] sm:$0xff] %vm33_vm0, %v10780_v9  ;;  %1802 = vst.msk [vmem:[#allocation3 + $0x10] sm:$0xff] %vm33_vm0, %v10782_v10  ;;  %v588_v34 = vmax.f32 %v542_v20, 0.0  ;;  %v771_v35 = vmax.f32 %v731_v24, 0.0  ;;  %v734_v36 = vadd.f32 %v9557_v31, %v10665_v14  ;;  %v725_v37 = vpop.f32.mrb[15].mxu1  ;;  %v545_v38 = vadd.f32 %v10665_v14, %v544_v32  ;;  %8969 = vmatpush3.bf16.msra.mxu0 %v9743_v23  ;;  %v1869_v55 = vpop.permute.xlu1 %1868  ;;  %v9744_v20 = vld [vmem:[%s13745_s0 + $0x110] sm:$0xff]  }
  0xfa   :  { %1170 = vst.msk [vmem:[#allocation3 + $0x188] sm:$0xff] %vm33_vm0, %v10782_v10  ;;  %429 = vst.msk [vmem:[#allocation2 + $0xa8] sm:$0xff] %vm33_vm0, %v423_v11  ;;  %2032 = vrot.lane.b32.xlu0 %v10729_v28, %s10360_s20  ;;  %v591_v40 = vmax.f32 %v553_v30, 0.0  ;;  %v769_v41 = vmax.f32 %v723_v18, 0.0  ;;  %v726_v42 = vadd.f32 %v10665_v14, %v725_v37  ;;  %v9745_v30 = vld [vmem:[%s13745_s0 + $0x118] sm:$0xff]   ;;  %9594 = vmatprep.mubr.msk.bf16.mxu1 %vm33_vm0, %v9744_v20 }
  0xfb   :  { %1578 = vst.msk [vmem:[#allocation3 + $0x1c8] sm:$0xff] %vm1207_vm1, %v1567_v7  ;;  %1341 = vrot.lane.b32.xlu1 %v10729_v28, %s10359_s15  ;;  %v772_v43 = vmax.f32 %v734_v36, 0.0  ;;  %v589_v44 = vmax.f32 %v545_v38, 0.0  ;;  %v10861_v7 = vld [vmem:[#allocation2 + $0x88] sm:$0xff]  ;;  %9595 = vmatmul.mubr.msk.bf16.gmra.mrb[32].mxu1 %vm33_vm0, %v9745_v30  ;;  %v9751_v30 = vld [vmem:[%s13747_s3 + $0x90] sm:$0xff]  }
  0xfc   :  { %1810 = vst.msk [vmem:[#allocation3 + $0xf0] sm:$0xff] %vm33_vm0, %v10793_v19  ;;  %2123 = vst.msk [vmem:[#allocation3 + $0x50] sm:$0xff] %vm33_vm0, %v10793_v19  ;;  %v601_v45 = vpack.c.bf16 %v591_v40, %v590_v26  ;;  %v770_v46 = vmax.f32 %v726_v42, 0.0 }
  0xfd   :  { %1803 = vst.msk [vmem:[#allocation3 + $0x48] sm:$0xff] %vm33_vm0, %v1799_v39  ;;  %v10827_v50 = vld [vmem:[#allocation2 + $0x70] sm:$0xff]  ;;  %v782_v52 = vpack.c.bf16 %v772_v43, %v771_v35  ;;  %v600_v54 = vpack.c.bf16 %v589_v44, %v588_v34  ;;  %v9544_v56 = vpop.f32.mrb[16].mxu0  ;;  %1483 = vst.msk [vmem:[#allocation3 + $0x40] sm:$0xff] %vm33_vm0, %v1479_v48 }
  0xfe   :  { %1734 = vrot.lane.b32.xlu0 %v10729_v28, %s10360_s20  ;;  %v10833_v57 = vld [vmem:[#allocation2 + $0xb0] sm:$0xff]  ;;  %v10835_v58 = vld [vmem:[#allocation2 + $0x68] sm:$0xff]  ;;  %607 = vst.msk [vmem:[#allocation2 + $0xd0] sm:$0xff] %vm33_vm0, %v601_v45  ;;  %1805 = vst.msk [vmem:[#allocation3 + $0xb8] sm:$0xff] %vm33_vm0, %v10827_v50  ;;  %v781_v59 = vpack.c.bf16 %v770_v46, %v769_v41  ;;  %v566_v60 = vadd.f32 %v9544_v56, %v10665_v14  ;;  %v557_v61 = vpop.f32.mrb[17].mxu0  ;;  %v9560_v62 = vpop.f32.mrb[16].mxu1 }
  0xff   :  { %1492 = vst.msk [vmem:[#allocation3 + $0x158] sm:$0xff] %vm33_vm0, %v10827_v50  ;;  %1614 = vrot.lane.b32.xlu1 %v10733_v29, %s10359_s15  ;;  %788 = vst.msk [vmem:[#allocation2 + $0x110] sm:$0xff] %vm33_vm0, %v782_v52  ;;  %v558_v1 = vadd.f32 %v10665_v14, %v557_v61  ;;  %v9545_v3 = vpop.f32.mrb[18].mxu0  ;;  %v747_v4 = vadd.f32 %v9560_v62, %v10665_v14  ;;  %v738_v5 = vpop.f32.mrb[17].mxu1  ;;  %v9746_v61 = vld [vmem:[%s13747_s3 + $0xc0] sm:$0xff]   ;;  %v1481_v62 = vld [vmem:[#allocation2 + $0x38] sm:$0xff] }
 0x100   :  { %1853 = vst.msk [vmem:[#allocation3 + $0xb8] sm:$0xff] %vm1207_vm1, %v10695_v47  ;;  %v10859_v47 = vld [vmem:[#allocation2 + $0xa0] sm:$0xff]  ;;  %v594_v11 = vmax.f32 %v566_v60, 0.0  ;;  %v569_v12 = vadd.f32 %v9545_v3, %v10665_v14  ;;  %v739_v15 = vadd.f32 %v10665_v14, %v738_v5  ;;  %v9561_v16 = vpop.f32.mrb[18].mxu1  ;;  %v560_v17 = vpop.f32.mrb[19].mxu0  ;;  %8994 = vmatprep.subr.bf16.mxu1 %v9746_v61 }
 0x101   :  { %606 = vst.msk [vmem:[#allocation2 + $0xc8] sm:$0xff] %vm33_vm0, %v600_v54  ;;  %v10849_v63 = vld [vmem:[#allocation2 + $0xa8] sm:$0xff]  ;;  %1813 = vst.msk [vmem:[#allocation3 + $0x198] sm:$0xff] %vm33_vm0, %v10833_v57  ;;  %v592_v21 = vmax.f32 %v558_v1, 0.0  ;;  %v775_v24 = vmax.f32 %v747_v4, 0.0  ;;  %v750_v25 = vadd.f32 %v9561_v16, %v10665_v14  ;;  %v741_v23 = vpop.f32.mrb[19].mxu1  ;;  %v561_v26 = vadd.f32 %v10665_v14, %v560_v17 }
 0x102   :  { %1491 = vst.msk [vmem:[#allocation3 + $0x120] sm:$0xff] %vm33_vm0, %v10835_v58  ;;  %1804 = vst.msk [vmem:[#allocation3 + $0x80] sm:$0xff] %vm33_vm0, %v10835_v58  ;;  %1640 = vrot.lane.b32.xlu0 %v10729_v28, %s10359_s15  ;;  %v595_v18 = vmax.f32 %v569_v12, 0.0  ;;  %v773_v31 = vmax.f32 %v739_v15, 0.0  ;;  %v742_v32 = vadd.f32 %v10665_v14, %v741_v23  ;;  %v10910_v42 = vld [vmem:[#allocation2 + $0xa8] sm:$0xff]  ;;  %v9747_v1 = vld [vmem:[%s13747_s3 + $0x80] sm:$0xff]  }
 0x103   :  { %787 = vst.msk [vmem:[#allocation2 + $0x108] sm:$0xff] %vm33_vm0, %v781_v59  ;;  %1812 = vst.msk [vmem:[#allocation3 + $0x160] sm:$0xff] %vm33_vm0, %v10849_v63  ;;  %1936 = vrot.lane.b32.xlu1 %v10861_v7, %s10359_s15  ;;  %v776_v33 = vmax.f32 %v750_v25, 0.0  ;;  %v593_v34 = vmax.f32 %v561_v26, 0.0  ;;  %8995 = vmatpush3.bf16.msra.mxu1 %v9747_v1  ;;  %v9748_v12 = vld [vmem:[%s13747_s3 + $0xc8] sm:$0xff]   ;;  %v9750_v23 = vld [vmem:[%s13747_s3 + $0xd0] sm:$0xff]  }
 0x104   :  { %1877 = vst.msk [vmem:[#allocation3 + $0x198] sm:$0xff] %vm1207_vm1, %v1869_v55  ;;  %v603_v35 = vpack.c.bf16 %v595_v18, %v594_v11  ;;  %v774_v36 = vmax.f32 %v742_v32, 0.0  ;;  %v9749_v16 = vld [vmem:[%s13747_s3 + $0x88] sm:$0xff]   ;;  %8996 = vmatprep.subr.bf16.mxu1 %v9748_v12  ;;  %v9761_v1 = vld [vmem:[%s13747_s3 + $0xb8] sm:$0xff]  }
 0x105   :  { %2125 = vst.msk [vmem:[#allocation3 + $0xc0] sm:$0xff] %vm33_vm0, %v10849_v63  ;;  %1811 = vst.msk [vmem:[#allocation3 + $0x128] sm:$0xff] %vm33_vm0, %v10859_v47  ;;  %v784_v37 = vpack.c.bf16 %v776_v33, %v775_v24  ;;  %v602_v38 = vpack.c.bf16 %v593_v34, %v592_v21  ;;  %v9548_v48 = vpop.f32.mrb[20].mxu0  ;;  %v1496_v24 = vld [vmem:[#allocation2 + $0xb0] sm:$0xff]  ;;  %v9752_v33 = vld [vmem:[%s13747_s3 + $0xd8] sm:$0xff]  }
 0x106   :  { %2124 = vst.msk [vmem:[#allocation3 + $0x88] sm:$0xff] %vm33_vm0, %v10859_v47  ;;  %1546 = vrot.lane.b32.xlu0 %v10729_v28, %s10361_s21  ;;  %609 = vst.msk [vmem:[#allocation2 + $0xe0] sm:$0xff] %vm33_vm0, %v603_v35  ;;  %v783_v40 = vpack.c.bf16 %v774_v36, %v773_v31  ;;  %v10908_v28 = vld [vmem:[#allocation2 + $0xd0] sm:$0xff]  ;;  %v582_v49 = vadd.f32 %v9548_v48, %v10665_v14  ;;  %v573_v52 = vpop.f32.mrb[21].mxu0  ;;  %v9564_v4 = vpop.f32.mrb[20].mxu1  ;;  %v9753_v36 = vld [vmem:[%s13747_s3 + $0x98] sm:$0xff]  }
 0x107   :  { %1220 = vrot.lane.b32.xlu1 %v10733_v29, %s10361_s21  ;;  %790 = vst.msk [vmem:[#allocation2 + $0x120] sm:$0xff] %vm33_vm0, %v784_v37  ;;  %608 = vst.msk [vmem:[#allocation2 + $0xd8] sm:$0xff] %vm33_vm0, %v602_v38  ;;  %v10922_v43 = vld [vmem:[#allocation2 + $0x110] sm:$0xff]  ;;  %v9549_v54 = vpop.f32.mrb[22].mxu0  ;;  %v754_v11 = vpop.f32.mrb[21].mxu1  ;;  %8997 = vmatpush3.bf16.msra.mxu1 %v9749_v16  ;;  %v574_v26 = vadd.f32 %v10665_v14, %v573_v52  ;;  %v9754_v48 = vld [vmem:[%s13747_s3 + $0xe0] sm:$0xff]  }
 0x108   :  { %v10893_v39 = vld [vmem:[#allocation2 + $0xc8] sm:$0xff]  ;;  %789 = vst.msk [vmem:[#allocation2 + $0x118] sm:$0xff] %vm33_vm0, %v783_v40  ;;  %2443 = vst.msk [vmem:[#allocation3 + $0x58] sm:$0xff] %vm33_vm0, %v10908_v28  ;;  %v598_v56 = vmax.f32 %v582_v49, 0.0  ;;  %v585_v59 = vadd.f32 %v9549_v54, %v10665_v14  ;;  %v9565_v15 = vpop.f32.mrb[22].mxu1  ;;  %8998 = vmatprep.subr.bf16.mxu1 %v9750_v23  ;;  %v755_v31 = vadd.f32 %v10665_v14, %v754_v11  ;;  %v576_v32 = vpop.f32.mrb[23].mxu0 }
 0x109   :  { %2442 = vst.msk [vmem:[#allocation3 + $0x20] sm:$0xff] %vm33_vm0, %v10893_v39  ;;  %2130 = vst.msk [vmem:[#allocation3 + $0xf8] sm:$0xff] %vm33_vm0, %v10908_v28  ;;  %v766_v20 = vadd.f32 %v9565_v15, %v10665_v14  ;;  %v596_v34 = vmax.f32 %v574_v26, 0.0  ;;  %v577_v35 = vadd.f32 %v10665_v14, %v576_v32  ;;  %v757_v38 = vpop.f32.mrb[23].mxu1  ;;  %v9755_v54 = vld [vmem:[%s13747_s3 + $0xa0] sm:$0xff]   ;;  %v11088_v15 = vld [vmem:[#allocation2 + $0x110] sm:$0xff] }
 0x10a   :  { %v10897_v41 = vld [vmem:[#allocation2 + $0x108] sm:$0xff]  ;;  %1499 = vst.msk [vmem:[#allocation3 + $0x200] sm:$0xff] %vm33_vm0, %v10910_v42  ;;  %1520 = vrot.lane.b32.xlu0 %v10733_v29, %s10361_s21  ;;  %2764 = vst.msk [vmem:[#allocation3 + $0x98] sm:$0xff] %vm33_vm0, %v10922_v43  ;;  %v599_v60 = vmax.f32 %v585_v59, 0.0  ;;  %v777_v40 = vmax.f32 %v755_v31, 0.0 }
 0x10b   :  { %2763 = vst.msk [vmem:[#allocation3 + $0x60] sm:$0xff] %vm33_vm0, %v10897_v41  ;;  %2450 = vst.msk [vmem:[#allocation3 + $0x100] sm:$0xff] %vm33_vm0, %v10897_v41  ;;  %1244 = vrot.lane.b32.xlu1 %v10861_v7, %s10361_s21  ;;  %v780_v25 = vmax.f32 %v766_v20, 0.0  ;;  %8999 = vmatpush3.bf16.msra.mxu1 %v9751_v30  ;;  %v597_v37 = vmax.f32 %v577_v35, 0.0  ;;  %v9757_v59 = vld [vmem:[%s13747_s3 + $0xa8] sm:$0xff]  }
 0x10c   :  { %2451 = vst.msk [vmem:[#allocation3 + $0x138] sm:$0xff] %vm33_vm0, %v10922_v43  ;;  %v605_v3 = vpack.c.bf16 %v599_v60, %v598_v56  ;;  %1485 = vst.msk [vmem:[#allocation3 + $0xb0] sm:$0xff] %vm33_vm0, %v1481_v62  ;;  %9000 = vmatprep.subr.bf16.mxu1 %v9752_v33  ;;  %v9756_v56 = vld [vmem:[%s13747_s3 + $0xe8] sm:$0xff]   ;;  %v9758_v60 = vld [vmem:[%s13747_s3 + $0xf0] sm:$0xff]  }
 0x10d   :  { %v10938_v45 = vld [vmem:[#allocation2 + $0xe0] sm:$0xff]  ;;  %1500 = vst.msk [vmem:[#allocation3 + $0x238] sm:$0xff] %vm33_vm0, %v1496_v24  ;;  %v604_v49 = vpack.c.bf16 %v597_v37, %v596_v34  ;;  %v9760_v62 = vld [vmem:[%s13747_s3 + $0xf8] sm:$0xff]   ;;  %2138 = vst.msk [vmem:[#allocation3 + $0x1d8] sm:$0xff] %vm33_vm0, %v11088_v15 }
 0x10e   :  { %2030 = vrot.lane.b32.xlu0 %v10861_v7, %s10360_s20  ;;  %v10926_v44 = vld [vmem:[#allocation2 + $0xd8] sm:$0xff]  ;;  %2445 = vst.msk [vmem:[#allocation3 + $0xc8] sm:$0xff] %vm33_vm0, %v10938_v45  ;;  %2132 = vst.msk [vmem:[#allocation3 + $0x168] sm:$0xff] %vm33_vm0, %v10938_v45  ;;  %v10954_v55 = vld [vmem:[#allocation2 + $0x120] sm:$0xff] }
 0x10f   :  { %1838 = vrot.lane.b32.xlu1 %v10775_v2, %s10361_s21  ;;  %v10934_v29 = vld [vmem:[#allocation2 + $0x118] sm:$0xff]  ;;  %2444 = vst.msk [vmem:[#allocation3 + $0x90] sm:$0xff] %vm33_vm0, %v10926_v44  ;;  %3082 = vst.msk [vmem:[#allocation3 + $0x30] sm:$0xff] %vm33_vm0, %v10954_v55  ;;  %v10989_v21 = vld [vmem:[#allocation2 + $0xe0] sm:$0xff]  ;;  %9001 = vmatpush3.bf16.msra.mxu1 %v9753_v36 }
 0x110   :  { %2452 = vst.msk [vmem:[#allocation3 + $0x170] sm:$0xff] %vm33_vm0, %v10934_v29  ;;  %2765 = vst.msk [vmem:[#allocation3 + $0xd0] sm:$0xff] %vm33_vm0, %v10934_v29  ;;  %v2127_v46 = vld [vmem:[#allocation2 + $0xd8] sm:$0xff]  ;;  %9002 = vmatprep.subr.bf16.mxu1 %v9754_v48  ;;  %v11083_v11 = vld [vmem:[%s13746_s2] ss:$0 sm:$0xff] }
 0x111   :  { %2131 = vst.msk [vmem:[#allocation3 + $0x130] sm:$0xff] %vm33_vm0, %v2127_v46  ;;  %2453 = vst.msk [vmem:[#allocation3 + $0x1a8] sm:$0xff] %vm33_vm0, %v10954_v55  ;;  %v10974_v5 = vld [vmem:[#allocation2 + $0xd8] sm:$0xff]  ;;  %v758_v46 = vadd.f32 %v10665_v14, %v757_v38  ;;  %v11093_v20 = vld [vmem:[#allocation2 + $0x120] sm:$0xff] }
 0x112   :  { %1638 = vrot.lane.b32.xlu0 %v10861_v7, %s10359_s15  ;;  %611 = vst.msk [vmem:[#allocation2 + $0xf0] sm:$0xff] %vm33_vm0, %v605_v3  ;;  %1818 = vst.msk [vmem:[#allocation3 + $0x1d0] sm:$0xff] %vm33_vm0, %v10974_v5  ;;  %v11096_v23 = vld [vmem:[#allocation2 + $0x118] sm:$0xff]  ;;  %v1180_v32 = vld [vmem:[#allocation2 + $0xc8] sm:$0xff] }
 0x113   :  { %1620 = vrot.lane.b32.xlu1 %v10775_v2, %s10359_s15  ;;  %1819 = vst.msk [vmem:[#allocation3 + $0x208] sm:$0xff] %vm33_vm0, %v10989_v21  ;;  %v778_v52 = vmax.f32 %v758_v46, 0.0  ;;  %610 = vst.msk [vmem:[#allocation2 + $0xe8] sm:$0xff] %vm33_vm0, %v604_v49  ;;  %9003 = vmatpush3.bf16.msra.mxu1 %v9755_v54  ;;  %v1181_v36 = vld [vmem:[#allocation2 + $0xd0] sm:$0xff]  ;;  %v1182_v48 = vld [vmem:[#allocation2 + $0xd8] sm:$0xff] }
 0x114   :  { %9004 = vmatprep.subr.bf16.mxu1 %v9756_v56  ;;  %2140 = vst.msk [vmem:[#allocation3 + $0x248] sm:$0xff] %vm33_vm0, %v11093_v20  ;;  %2139 = vst.msk [vmem:[#allocation3 + $0x210] sm:$0xff] %vm33_vm0, %v11096_v23  ;;  %v1823_v56 = vld [vmem:[#allocation2 + $0x120] sm:$0xff] }
 0x115   :  { %1826 = vst.msk [vmem:[#allocation3 + $0x2b0] sm:$0xff] %vm33_vm0, %v11096_v23  ;;  %1184 = vst.msk [vmem:[#allocation3 + $0x2d8] sm:$0xff] %vm33_vm0, %v1180_v32 }
 0x116   :  { %1544 = vrot.lane.b32.xlu0 %v10861_v7, %s10361_s21  ;;  %v763_v7 = vadd.f32 %v9564_v4, %v10665_v14  ;;  %v785_v14 = vpack.c.bf16 %v778_v52, %v777_v40  ;;  %v9572_v4 = vpop.f32.mrb[24].mxu0  ;;  %1185 = vst.msk [vmem:[#allocation3 + $0x310] sm:$0xff] %vm33_vm0, %v1181_v36  ;;  %v1502_v40 = vld [vmem:[#allocation2 + $0xe0] sm:$0xff]  ;;  %1186 = vst.msk [vmem:[#allocation3 + $0x348] sm:$0xff] %vm33_vm0, %v1182_v48 }
 0x117   :  { %1416 = vrot.lane.b32.xlu1 %v10775_v2, %s10360_s20  ;;  %9005 = vmatpush3.bf16.msra.mxu1 %v9757_v59  ;;  %v903_v12 = vpop.f32.mrb[25].mxu0  ;;  %1506 = vst.msk [vmem:[#allocation3 + $0x2a8] sm:$0xff] %vm33_vm0, %v1502_v40  ;;  %1827 = vst.msk [vmem:[#allocation3 + $0x2e8] sm:$0xff] %vm33_vm0, %v1823_v56 }
 0x118   :  { %v779_v17 = vmax.f32 %v763_v7, 0.0  ;;  %791 = vst.msk [vmem:[#allocation2 + $0x128] sm:$0xff] %vm33_vm0, %v785_v14  ;;  %9006 = vmatprep.subr.bf16.mxu1 %v9758_v60  ;;  %v904_v16 = vadd.f32 %v11083_v11, %v903_v12  ;;  %v2791_v12 = vld [vmem:[#allocation2 + $0x110] sm:$0xff] }
 0x11a   :  { %1714 = vrot.lane.b32.xlu0 %v10775_v2, %s10360_s20  ;;  %v786_v18 = vpack.c.bf16 %v780_v25, %v779_v17  ;;  %v11076_v7 = vld [vmem:[#allocation2 + $0xe8] sm:$0xff]  ;;  %v9573_v17 = vpop.f32.mrb[26].mxu0  ;;  %v950_v26 = vmax.f32 %v904_v16, 0.0 }
 0x11b   :  { %1321 = vrot.lane.b32.xlu1 %v10775_v2, %s10359_s15  ;;  %2133 = vst.msk [vmem:[#allocation3 + $0x1a0] sm:$0xff] %vm33_vm0, %v11076_v7  ;;  %v915_v25 = vadd.f32 %v11083_v11, %v9573_v17  ;;  %v906_v31 = vpop.f32.mrb[27].mxu0 }
 0x11c   :  { %792 = vst.msk [vmem:[#allocation2 + $0x130] sm:$0xff] %vm33_vm0, %v786_v18  ;;  %v1174_v18 = vld [vmem:[#allocation2 + $0x98] sm:$0xff]  ;;  %v907_v34 = vadd.f32 %v11083_v11, %v906_v31  ;;  %v9576_v38 = vpop.f32.mrb[28].mxu0 }
 0x11d   :  { %v953_v30 = vmax.f32 %v915_v25, 0.0  ;;  %1178 = vst.msk [vmem:[#allocation3 + $0x268] sm:$0xff] %vm33_vm0, %v1174_v18  ;;  %v928_v46 = vadd.f32 %v11083_v11, %v9576_v38  ;;  %v11173_v25 = vld [vmem:[#allocation2 + $0x100] sm:$0xff] }
 0x11e   :  { %2254 = vrot.lane.b32.xlu0 %v10780_v9, %s10359_s15  ;;  %v951_v35 = vmax.f32 %v907_v34, 0.0  ;;  %2762 = vst.msk [vmem:[#allocation3 + $0x28] sm:$0xff] %vm33_vm0, %v11173_v25 }
 0x11f   :  { %1862 = vrot.lane.b32.xlu1 %v10780_v9, %s10361_s21  ;;  %v11056_v61 = vld [vmem:[#allocation2 + $0x128] sm:$0xff]  ;;  %v956_v49 = vmax.f32 %v928_v46, 0.0 }
 0x120   :  { %3083 = vst.msk [vmem:[#allocation3 + $0x68] sm:$0xff] %vm33_vm0, %v11056_v61  ;;  %v962_v37 = vpack.c.bf16 %v951_v35, %v950_v26  ;;  %v11194_v36 = vld [vmem:[#allocation2 + $0x128] sm:$0xff] }
 0x121   :  { %2141 = vst.msk [vmem:[#allocation3 + $0x280] sm:$0xff] %vm33_vm0, %v11194_v36 }
 0x122   :  { %2160 = vrot.lane.b32.xlu0 %v10780_v9, %s10361_s21  ;;  %968 = vst.msk [vmem:[#allocation2 + $0x148] sm:$0xff] %vm33_vm0, %v962_v37 }
 0x123   :  { %1644 = vrot.lane.b32.xlu1 %v10780_v9, %s10359_s15  ;;  %v11068_v3 = vld [vmem:[#allocation2 + $0x130] sm:$0xff] }
 0x124   :  { %3084 = vst.msk [vmem:[#allocation3 + $0xa0] sm:$0xff] %vm33_vm0, %v11068_v3 }
 0x126   :  { %2036 = vrot.lane.b32.xlu0 %v10780_v9, %s10360_s20 }
 0x127   :  { %1524 = vrot.lane.b32.xlu1 %v10782_v10, %s10361_s21 }
 0x12a   :  { %1738 = vrot.lane.b32.xlu0 %v10780_v9, %s10360_s20  ;;  %v1489_v9 = vld [vmem:[#allocation2 + $0x78] sm:$0xff] }
 0x12b   :  { %1940 = vrot.lane.b32.xlu1 %v10793_v19, %s10359_s15  ;;  %1493 = vst.msk [vmem:[#allocation3 + $0x190] sm:$0xff] %vm33_vm0, %v1489_v9 }
 0x12e   :  { %1226 = vrot.lane.b32.xlu0 %v10775_v2, %s10361_s21  ;;  %v9759_v2 = vld [vmem:[%s13747_s3 + $0xb0] sm:$0xff]  }
 0x12f   :  { %1414 = vrot.lane.b32.xlu1 %v10782_v10, %s10360_s20  ;;  %9007 = vmatpush3.bf16.msra.mxu1 %v9759_v2 }
 0x130   :  { %9008 = vmatprep.subr.bf16.mxu1 %v9760_v62 }
 0x132   :  { %1712 = vrot.lane.b32.xlu0 %v10782_v10, %s10360_s20 }
 0x133   :  { %1319 = vrot.lane.b32.xlu1 %v10782_v10, %s10359_s15  ;;  %9009 = vmatpush3.bf16.msra.mxu1 %v9761_v1 }
 0x136   :  { %1618 = vrot.lane.b32.xlu0 %v10782_v10, %s10359_s15 }
 0x137   :  { %1224 = vrot.lane.b32.xlu1 %v10782_v10, %s10361_s21  ;;  %v912_v10 = vadd.f32 %v11083_v11, %v9572_v4  ;;  %v11135_v4 = vld [vmem:[#allocation2 + $0x148] sm:$0xff] }
 0x138   :  { %2771 = vst.msk [vmem:[#allocation3 + $0x140] sm:$0xff] %vm33_vm0, %v11135_v4 }
 0x139   :  { %v952_v24 = vmax.f32 %v912_v10, 0.0 }
 0x13a   :  { %2158 = vrot.lane.b32.xlu0 %v10793_v19, %s10361_s21 }
 0x13b   :  { %1548 = vrot.lane.b32.xlu1 %v10793_v19, %s10361_s21  ;;  %v963_v33 = vpack.c.bf16 %v953_v30, %v952_v24  ;;  %v11171_v24 = vld [vmem:[#allocation2 + $0x148] sm:$0xff] }
 0x13c   :  { %2458 = vst.msk [vmem:[#allocation3 + $0x1e0] sm:$0xff] %vm33_vm0, %v11171_v24  ;;  %v11182_v30 = vld [vmem:[#allocation2 + $0xe8] sm:$0xff] }
 0x13d   :  { %969 = vst.msk [vmem:[#allocation2 + $0x150] sm:$0xff] %vm33_vm0, %v963_v33  ;;  %1820 = vst.msk [vmem:[#allocation3 + $0x240] sm:$0xff] %vm33_vm0, %v11182_v30  ;;  %v11187_v33 = vld [vmem:[#allocation2 + $0xf0] sm:$0xff] }
 0x13e   :  { %2034 = vrot.lane.b32.xlu0 %v10793_v19, %s10360_s20  ;;  %1507 = vst.msk [vmem:[#allocation3 + $0x2e0] sm:$0xff] %vm33_vm0, %v11182_v30  ;;  %1821 = vst.msk [vmem:[#allocation3 + $0x278] sm:$0xff] %vm33_vm0, %v11187_v33 }
 0x13f   :  { %1842 = vrot.lane.b32.xlu1 %v10827_v50, %s10361_s21  ;;  %1508 = vst.msk [vmem:[#allocation3 + $0x318] sm:$0xff] %vm33_vm0, %v11187_v33 }
 0x142   :  { %1736 = vrot.lane.b32.xlu0 %v10793_v19, %s10360_s20 }
 0x143   :  { %1420 = vrot.lane.b32.xlu1 %v10827_v50, %s10360_s20  ;;  %v919_v50 = vpop.f32.mrb[29].mxu0 }
 0x144   :  { %v920_v52 = vadd.f32 %v11083_v11, %v919_v50  ;;  %v9577_v54 = vpop.f32.mrb[30].mxu0  ;;  %v11145_v10 = vld [vmem:[#allocation2 + $0x150] sm:$0xff] }
 0x145   :  { %v931_v14 = vadd.f32 %v11083_v11, %v9577_v54  ;;  %2772 = vst.msk [vmem:[#allocation3 + $0x178] sm:$0xff] %vm33_vm0, %v11145_v10 }
 0x146   :  { %1642 = vrot.lane.b32.xlu0 %v10793_v19, %s10359_s15  ;;  %v922_v19 = vpop.f32.mrb[31].mxu0  ;;  %v954_v9 = vmax.f32 %v920_v52, 0.0 }
 0x147   :  { %1866 = vrot.lane.b32.xlu1 %v10833_v57, %s10361_s21  ;;  %v923_v59 = vadd.f32 %v11083_v11, %v922_v19  ;;  %v957_v60 = vmax.f32 %v931_v14, 0.0  ;;  %v9580_v26 = vpop.f32.mrb[32].mxu0  ;;  %v1824_v19 = vld [vmem:[#allocation2 + $0x128] sm:$0xff] }
 0x148   :  { %v944_v31 = vadd.f32 %v11083_v11, %v9580_v26  ;;  %v935_v32 = vpop.f32.mrb[33].mxu0  ;;  %1828 = vst.msk [vmem:[#allocation3 + $0x320] sm:$0xff] %vm33_vm0, %v1824_v19 }
 0x149   :  { %v955_v2 = vmax.f32 %v923_v59, 0.0  ;;  %v965_v62 = vpack.c.bf16 %v957_v60, %v956_v49  ;;  %v9581_v35 = vpop.f32.mrb[34].mxu0 }
 0x14a   :  { %2258 = vrot.lane.b32.xlu0 %v10833_v57, %s10359_s15  ;;  %v960_v37 = vmax.f32 %v944_v31, 0.0  ;;  %v947_v38 = vadd.f32 %v11083_v11, %v9581_v35  ;;  %v938_v40 = vpop.f32.mrb[35].mxu0 }
 0x14b   :  { %1840 = vrot.lane.b32.xlu1 %v10835_v58, %s10361_s21  ;;  %v964_v1 = vpack.c.bf16 %v955_v2, %v954_v9  ;;  %971 = vst.msk [vmem:[#allocation2 + $0x160] sm:$0xff] %vm33_vm0, %v965_v62  ;;  %v939_v49 = vadd.f32 %v11083_v11, %v938_v40  ;;  %v11224_v62 = vld [vmem:[#allocation2 + $0xe0] sm:$0xff] }
 0x14c   :  { %v961_v48 = vmax.f32 %v947_v38, 0.0  ;;  %v9762_v38 = vld [vmem:[%s13747_s3 + $0x140] sm:$0xff]  }
 0x14d   :  { %970 = vst.msk [vmem:[#allocation2 + $0x158] sm:$0xff] %vm33_vm0, %v964_v1  ;;  %v959_v14 = vmax.f32 %v939_v49, 0.0  ;;  %v11265_v40 = vld [vmem:[#allocation2 + $0x140] sm:$0xff]  ;;  %9034 = vmatprep.subr.bf16.mxu0 %v9762_v38 }
 0x14e   :  { %2164 = vrot.lane.b32.xlu0 %v10833_v57, %s10361_s21  ;;  %v11155_v57 = vld [vmem:[#allocation2 + $0xd0] sm:$0xff]  ;;  %v967_v54 = vpack.c.bf16 %v961_v48, %v960_v37  ;;  %v11270_v48 = vld [vmem:[#allocation2 + $0x120] sm:$0xff]  ;;  %2770 = vst.msk [vmem:[#allocation3 + $0x108] sm:$0xff] %vm33_vm0, %v11265_v40 }
 0x14f   :  { %1418 = vrot.lane.b32.xlu1 %v10835_v58, %s10360_s20  ;;  %v9763_v49 = vld [vmem:[%s13747_s3 + $0x100] sm:$0xff]  }
 0x150   :  { %973 = vst.msk [vmem:[#allocation2 + $0x170] sm:$0xff] %vm33_vm0, %v967_v54 }
 0x152   :  { %1716 = vrot.lane.b32.xlu0 %v10835_v58, %s10360_s20  ;;  %v11159_v16 = vld [vmem:[#allocation2 + $0x160] sm:$0xff] }
 0x153   :  { %1323 = vrot.lane.b32.xlu1 %v10835_v58, %s10359_s15  ;;  %v11165_v58 = vpop.permute.xlu1 %2700  ;;  %3090 = vst.msk [vmem:[#allocation3 + $0x110] sm:$0xff] %vm33_vm0, %v11159_v16 }
 0x154   :  { %v11161_v17 = vld [vmem:[#allocation2 + $0x158] sm:$0xff] }
 0x155   :  { %2773 = vst.msk [vmem:[#allocation3 + $0x1b0] sm:$0xff] %vm33_vm0, %v11161_v17 }
 0x156   :  { %2256 = vrot.lane.b32.xlu0 %v10849_v63, %s10359_s15 }
 0x157   :  { %1864 = vrot.lane.b32.xlu1 %v10849_v63, %s10361_s21 }
 0x15a   :  { %2162 = vrot.lane.b32.xlu0 %v10849_v63, %s10361_s21 }
 0x15b   :  { %2478 = vrot.lane.b32.xlu1 %v11155_v57, %s10361_s21 }
 0x15e   :  { %1740 = vrot.lane.b32.xlu0 %v10849_v63, %s10360_s20  ;;  %v936_v63 = vadd.f32 %v11083_v11, %v935_v32  ;;  %v11237_v32 = vld [vmem:[#allocation2 + $0x170] sm:$0xff] }
 0x15f   :  { %2800 = vrot.lane.b32.xlu1 %v2791_v12, %s10361_s21  ;;  %3092 = vst.msk [vmem:[#allocation3 + $0x180] sm:$0xff] %vm33_vm0, %v11237_v32 }
 0x160   :  { %v1711_v18 = vpop.permute.xlu0 %1710  ;;  %v958_v50 = vmax.f32 %v936_v63, 0.0 }
 0x161   :  { %v11191_v34 = vpop.permute.xlu1 %1938 }
 0x162   :  { %2894 = vrot.lane.b32.xlu0 %v2791_v12, %s10359_s15  ;;  %v966_v9 = vpack.c.bf16 %v959_v14, %v958_v50  ;;  %v3117_v50 = vld [vmem:[#allocation3] sm:$0xff] }
 0x163   :  { %2502 = vrot.lane.b32.xlu1 %v2791_v12, %s10361_s21  ;;  %v11277_v14 = vld [vmem:[#allocation2 + $0x160] sm:$0xff] }
 0x164   :  { %v11205_v46 = vpop.permute.xlu0 %1616  ;;  %972 = vst.msk [vmem:[#allocation2 + $0x168] sm:$0xff] %vm33_vm0, %v966_v9  ;;  %2461 = vst.msk [vmem:[#allocation3 + $0x288] sm:$0xff] %vm33_vm0, %v11277_v14  ;;  %v9765_v9 = vld [vmem:[%s13747_s3 + $0x108] sm:$0xff]  }
 0x165   :  { %v1318_v52 = vpop.permute.xlu1 %1317 }
 0x166   :  { %2354 = vrot.lane.b32.xlu0 %v11155_v57, %s10360_s20 }
 0x167   :  { %1962 = vrot.lane.b32.xlu1 %v11155_v57, %s10359_s15 }
 0x168   :  { %v1523_v56 = vpop.permute.xlu0 %1522 }
 0x169   :  { %1532 = vst.msk [vmem:[#allocation3 + $0x78] sm:$0xff] %vm1207_vm1, %v1523_v56  ;;  %v1223_v59 = vpop.permute.xlu1 %1222  ;;  %v9764_v56 = vld [vmem:[%s13747_s3 + $0x148] sm:$0xff]  }
 0x16a   :  { %1233 = vst.msk [vmem:[#allocation3 + $0x118] sm:$0xff] %vm1207_vm1, %v1223_v59  ;;  %2056 = vrot.lane.b32.xlu0 %v11155_v57, %s10360_s20 }
 0x16b   :  { %2798 = vrot.lane.b32.xlu1 %v10897_v41, %s10361_s21  ;;  %v11230_v31 = vld [vmem:[#allocation2 + $0x168] sm:$0xff] }
 0x16c   :  { %v11221_v60 = vpop.permute.xlu0 %2032  ;;  %3091 = vst.msk [vmem:[#allocation3 + $0x148] sm:$0xff] %vm33_vm0, %v11230_v31 }
 0x16d   :  { %v1342_v2 = vpop.permute.xlu1 %1341 }
 0x16e   :  { %2378 = vrot.lane.b32.xlu0 %v2791_v12, %s10360_s20  ;;  %v11244_v12 = vld [vmem:[#allocation2 + $0x150] sm:$0xff] }
 0x16f   :  { %1960 = vrot.lane.b32.xlu1 %v10893_v39, %s10359_s15  ;;  %2459 = vst.msk [vmem:[#allocation3 + $0x218] sm:$0xff] %vm33_vm0, %v11244_v12  ;;  %2146 = vst.msk [vmem:[#allocation3 + $0x2b8] sm:$0xff] %vm33_vm0, %v11244_v12 }
 0x170   :  { %v11228_v1 = vpop.permute.xlu0 %1734 }
 0x171   :  { %v1615_v26 = vpop.permute.xlu1 %1614 }
 0x172   :  { %1626 = vst.msk [vmem:[#allocation3 + $0x8] sm:$0xff] %vm1304_vm2, %v1615_v26  ;;  %1758 = vrot.lane.b32.xlu0 %v11155_v57, %s10360_s20  ;;  %v9588_v26 = vpop.f32.mrb[24].mxu1 }
 0x173   :  { %1722 = vst.msk [vmem:[#allocation3 + $0x8] sm:$0xff] %vm1401_vm3, %v1711_v18  ;;  %2670 = vrot.lane.b32.xlu1 %v11224_v62, %s10360_s20 }
 0x174   :  { %v11246_v63 = vpop.permute.xlu0 %1640 }
 0x175   :  { %v11252_v57 = vpop.permute.xlu1 %1936 }
 0x176   :  { %2352 = vrot.lane.b32.xlu0 %v10893_v39, %s10360_s20 }
 0x177   :  { %2576 = vrot.lane.b32.xlu1 %v11224_v62, %s10359_s15 }
 0x178   :  { %v1547_v18 = vpop.permute.xlu0 %1546 }
 0x179   :  { %1556 = vst.msk [vmem:[#allocation3 + $0x158] sm:$0xff] %vm1207_vm1, %v1547_v18  ;;  %v1221_v35 = vpop.permute.xlu1 %1220  ;;  %v1825_v18 = vld [vmem:[#allocation2 + $0x130] sm:$0xff] }
 0x17a   :  { %1232 = vst.msk [vmem:[#allocation3 + $0xe0] sm:$0xff] %vm1207_vm1, %v1221_v35  ;;  %v3118_v37 = vld [vmem:[#allocation3 + $0x8] sm:$0xff]  ;;  %2054 = vrot.lane.b32.xlu0 %v10893_v39, %s10360_s20  ;;  %v9766_v35 = vld [vmem:[%s13747_s3 + $0x150] sm:$0xff]  }
 0x17b   :  { %1329 = vst.msk [vmem:[#allocation3 + $0xe0] sm:$0xff] %vm1304_vm2, %v1318_v52  ;;  %3589 = vmatprep.mubr.bf16.mxu0 %v3118_v37  ;;  %2482 = vrot.lane.b32.xlu1 %v11224_v62, %s10361_s21  ;;  %v11279_v52 = vld [vmem:[#allocation2 + $0x158] sm:$0xff]  ;;  %v9767_v37 = vld [vmem:[%s13747_s3 + $0x110] sm:$0xff]  }
 0x17c   :  { %3590 = vmatmul.mubr.bf16.vlgmr.msra.gmra.mrb[36].mxu0 %v3117_v50  ;;  %v1521_v54 = vpop.permute.xlu0 %1520  ;;  %13756 = vst [vmem:[#allocation5_spill] sm:$0xff] %v11279_v52  ;;  %2460 = vst.msk [vmem:[#allocation3 + $0x250] sm:$0xff] %vm33_vm0, %v11279_v52 }
 0x17d   :  { %1531 = vst.msk [vmem:[#allocation3 + $0x40] sm:$0xff] %vm1207_vm1, %v1521_v54  ;;  %v1245_v19 = vpop.permute.xlu1 %1244  ;;  %9035 = vmatpush3.bf16.msra.mxu0 %v9763_v49 }
 0x17e   :  { %2147 = vst.msk [vmem:[#allocation3 + $0x2f0] sm:$0xff] %vm33_vm0, %v11279_v52  ;;  %2376 = vrot.lane.b32.xlu0 %v10897_v41, %s10360_s20  ;;  %9036 = vmatprep.subr.bf16.mxu0 %v9764_v56  ;;  %v1093_v41 = vadd.f32 %v11083_v11, %v9588_v26  ;;  %1829 = vst.msk [vmem:[#allocation3 + $0x358] sm:$0xff] %vm33_vm0, %v1825_v18  ;;  %v9768_v18 = vld [vmem:[%s13747_s3 + $0x158] sm:$0xff]  }
 0x17f   :  { %1627 = vst.msk [vmem:[#allocation3 + $0x40] sm:$0xff] %vm1304_vm2, %v11205_v46  ;;  %2694 = vrot.lane.b32.xlu1 %v11270_v48, %s10360_s20 }
 0x180   :  { %1256 = vst.msk [vmem:[#allocation3 + $0x1c0] sm:$0xff] %vm1207_vm1, %v1245_v19  ;;  %v2031_v59 = vpop.permute.xlu0 %2030  ;;  %v1133_v50 = vmax.f32 %v1093_v41, 0.0 }
 0x181   :  { %1353 = vst.msk [vmem:[#allocation3 + $0x1c0] sm:$0xff] %vm1304_vm2, %v1342_v2  ;;  %v1839_v46 = vpop.permute.xlu1 %1838  ;;  %9037 = vmatpush3.bf16.msra.mxu0 %v9765_v9  ;;  %v1084_v2 = vpop.f32.mrb[25].mxu1  ;;  %v2144_v9 = vld [vmem:[#allocation2 + $0x160] sm:$0xff] }
 0x182   :  { %1850 = vst.msk [vmem:[#allocation3 + $0x10] sm:$0xff] %vm1207_vm1, %v1839_v46  ;;  %1662 = vrot.lane.b32.xlu0 %v10893_v39, %s10359_s15  ;;  %v1085_v49 = vadd.f32 %v11083_v11, %v1084_v2  ;;  %v9589_v54 = vpop.f32.mrb[26].mxu1  ;;  %9038 = vmatprep.subr.bf16.mxu0 %v9766_v35 }
 0x183   :  { %1946 = vst.msk [vmem:[#allocation3 + $0x10] sm:$0xff] %vm1304_vm2, %v10647_v8  ;;  %2600 = vrot.lane.b32.xlu1 %v11270_v48, %s10359_s15  ;;  %v1096_v19 = vadd.f32 %v11083_v11, %v9589_v54  ;;  %v1087_v56 = vpop.f32.mrb[27].mxu1  ;;  %v9772_v54 = vld [vmem:[%s13747_s3 + $0x168] sm:$0xff]  }
 0x184   :  { %2042 = vst.msk [vmem:[#allocation3 + $0x10] sm:$0xff] %vm1401_vm3, %v2031_v59  ;;  %v1639_v38 = vpop.permute.xlu0 %1638  ;;  %v1131_v59 = vmax.f32 %v1085_v49, 0.0  ;;  %v1088_v46 = vadd.f32 %v11083_v11, %v1087_v56 }
 0x185   :  { %1650 = vst.msk [vmem:[#allocation3 + $0xe8] sm:$0xff] %vm1304_vm2, %v1639_v38  ;;  %v11320_v8 = vpop.permute.xlu1 %1620  ;;  %9039 = vmatpush3.bf16.msra.mxu0 %v9767_v37  ;;  %v1134_v26 = vmax.f32 %v1096_v19, 0.0  ;;  %v9770_v38 = vld [vmem:[%s13747_s3 + $0x160] sm:$0xff]   ;;  %v9773_v19 = vld [vmem:[%s13747_s3 + $0x128] sm:$0xff]  }
 0x186   :  { %1746 = vst.msk [vmem:[#allocation3 + $0xe8] sm:$0xff] %vm1401_vm3, %v11228_v1  ;;  %2992 = vrot.lane.b32.xlu0 %v11270_v48, %s10360_s20  ;;  %v9769_v1 = vld [vmem:[%s13747_s3 + $0x118] sm:$0xff]   ;;  %v1132_v2 = vmax.f32 %v1088_v46, 0.0  ;;  %9040 = vmatprep.subr.bf16.mxu0 %v9768_v18 }
 0x187   :  { %2148 = vst.msk [vmem:[#allocation3 + $0x328] sm:$0xff] %vm33_vm0, %v2144_v9  ;;  %2506 = vrot.lane.b32.xlu1 %v11270_v48, %s10361_s21  ;;  %v1144_v35 = vpack.c.bf16 %v1134_v26, %v1133_v50  ;;  %v9771_v50 = vld [vmem:[%s13747_s3 + $0x120] sm:$0xff]   ;;  %v9777_v18 = vld [vmem:[%s13747_s3 + $0x138] sm:$0xff]  }
 0x188   :  { %v1545_v41 = vpop.permute.xlu0 %1544  ;;  %v1143_v37 = vpack.c.bf16 %v1132_v2, %v1131_v59  ;;  %v9775_v59 = vld [vmem:[%s13747_s3 + $0x130] sm:$0xff]  }
 0x189   :  { %1555 = vst.msk [vmem:[#allocation3 + $0x120] sm:$0xff] %vm1207_vm1, %v1545_v41  ;;  %v11338_v11 = vpop.permute.xlu1 %1416  ;;  %9041 = vmatpush3.bf16.msra.mxu0 %v9769_v1 }
 0x18a   :  { %1651 = vst.msk [vmem:[#allocation3 + $0x120] sm:$0xff] %vm1304_vm2, %v11246_v63  ;;  %2898 = vrot.lane.b32.xlu0 %v11270_v48, %s10359_s15  ;;  %9042 = vmatprep.subr.bf16.mxu0 %v9770_v38  ;;  %v11412_v38 = vld [vmem:[#allocation2 + $0xf0] sm:$0xff] }
 0x18b   :  { %2574 = vrot.lane.b32.xlu1 %v10926_v44, %s10359_s15  ;;  %1150 = vst.msk [vmem:[#allocation2 + $0x190] sm:$0xff] %vm33_vm0, %v1144_v35  ;;  %1149 = vst.msk [vmem:[#allocation2 + $0x188] sm:$0xff] %vm33_vm0, %v1143_v37  ;;  %v2145_v37 = vld [vmem:[#allocation2 + $0x168] sm:$0xff] }
 0x18c   :  { %v11353_v49 = vpop.permute.xlu0 %1714  ;;  %2149 = vst.msk [vmem:[#allocation3 + $0x360] sm:$0xff] %vm33_vm0, %v2145_v37 }
 0x18d   :  { %v11356_v63 = vpop.permute.xlu1 %1321  ;;  %9043 = vmatpush3.bf16.msra.mxu0 %v9771_v50 }
 0x18e   :  { %2804 = vrot.lane.b32.xlu0 %v11270_v48, %s10361_s21  ;;  %9044 = vmatprep.subr.bf16.mxu0 %v9772_v54  ;;  %v9774_v48 = vld [vmem:[%s13747_s3 + $0x170] sm:$0xff]   ;;  %v11418_v54 = vld [vmem:[%s13747_s3 + $0x180] sm:$0xff]  }
 0x18f   :  { %2480 = vrot.lane.b32.xlu1 %v10926_v44, %s10361_s21  ;;  %9598 = vmatprep.subr.bf16.mxu1 %v11418_v54 }
 0x190   :  { %v11368_v56 = vpop.permute.xlu0 %2254 }
 0x191   :  { %v1863_v9 = vpop.permute.xlu1 %1862  ;;  %9045 = vmatpush3.bf16.msra.mxu0 %v9773_v19 }
 0x192   :  { %1874 = vst.msk [vmem:[#allocation3 + $0xf0] sm:$0xff] %vm1207_vm1, %v1863_v9  ;;  %2278 = vrot.lane.b32.xlu0 %v11224_v62, %s10359_s15  ;;  %9046 = vmatprep.subr.bf16.mxu0 %v9774_v48  ;;  %v9592_v48 = vpop.f32.mrb[28].mxu1 }
 0x193   :  { %1970 = vst.msk [vmem:[#allocation3 + $0xf0] sm:$0xff] %vm1304_vm2, %v10697_v51  ;;  %2802 = vrot.lane.b32.xlu1 %v10934_v29, %s10361_s21  ;;  %v9776_v51 = vld [vmem:[%s13747_s3 + $0x178] sm:$0xff]  }
 0x194   :  { %v2161_v46 = vpop.permute.xlu0 %2160 }
 0x195   :  { %2171 = vst.msk [vmem:[#allocation3 + $0x50] sm:$0xff] %vm1207_vm1, %v2161_v46  ;;  %v11384_v26 = vpop.permute.xlu1 %1644  ;;  %9047 = vmatpush3.bf16.msra.mxu0 %v9775_v59  ;;  %v11437_v59 = vld [vmem:[%s13746_s2] ss:$0 sm:$0xff] }
 0x196   :  { %2184 = vrot.lane.b32.xlu0 %v11224_v62, %s10361_s21  ;;  %9048 = vmatprep.subr.bf16.mxu0 %v9776_v51  ;;  %v1109_v46 = vadd.f32 %v11437_v59, %v9592_v48  ;;  %v1100_v51 = vpop.f32.mrb[29].mxu1 }
 0x197   :  { %2598 = vrot.lane.b32.xlu1 %v10934_v29, %s10359_s15 }
 0x198   :  { %v2037_v1 = vpop.permute.xlu0 %2036 }
 0x199   :  { %v1525_v41 = vpop.permute.xlu1 %1524  ;;  %9049 = vmatpush3.bf16.msra.mxu0 %v9777_v18 }
 0x19a   :  { %1533 = vst.msk [vmem:[#allocation3 + $0xb0] sm:$0xff] %vm1207_vm1, %v1525_v41  ;;  %2060 = vrot.lane.b32.xlu0 %v11224_v62, %s10360_s20  ;;  %v1101_v41 = vadd.f32 %v11437_v59, %v1100_v51 }
 0x19b   :  { %1629 = vst.msk [vmem:[#allocation3 + $0xb0] sm:$0xff] %vm1304_vm2, %v11320_v8  ;;  %2504 = vrot.lane.b32.xlu1 %v10934_v29, %s10361_s21 }
 0x19c   :  { %v11403_v2 = vpop.permute.xlu0 %1738 }
 0x19d   :  { %v1941_v35 = vpop.permute.xlu1 %1940 }
 0x19e   :  { %1949 = vst.msk [vmem:[#allocation3 + $0xb8] sm:$0xff] %vm1304_vm2, %v1941_v35  ;;  %2990 = vrot.lane.b32.xlu0 %v10934_v29, %s10360_s20  ;;  %v9593_v35 = vpop.f32.mrb[30].mxu1 }
 0x19f   :  { %2045 = vst.msk [vmem:[#allocation3 + $0xb8] sm:$0xff] %vm1401_vm3, %v2037_v1  ;;  %1964 = vrot.lane.b32.xlu1 %v10926_v44, %s10359_s15  ;;  %v2688_v1 = vld [vmem:[#allocation2 + $0x130] sm:$0xff] }
 0x1a0   :  { %v1227_v8 = vpop.permute.xlu0 %1226 }
 0x1a1   :  { %1235 = vst.msk [vmem:[#allocation3 + $0x188] sm:$0xff] %vm1207_vm1, %v1227_v8  ;;  %v1415_v50 = vpop.permute.xlu1 %1414  ;;  %v1112_v8 = vadd.f32 %v11437_v59, %v9593_v35  ;;  %v11452_v35 = vld [vmem:[#allocation2 + $0x138] sm:$0xff] }
 0x1a2   :  { %1426 = vst.msk [vmem:[#allocation3 + $0xe0] sm:$0xff] %vm1401_vm3, %v1415_v50  ;;  %2896 = vrot.lane.b32.xlu0 %v10934_v29, %s10359_s15  ;;  %v1103_v50 = vpop.f32.mrb[31].mxu1 }
 0x1a3   :  { %2674 = vrot.lane.b32.xlu1 %v11412_v38, %s10360_s20  ;;  %v1138_v48 = vmax.f32 %v1112_v8, 0.0  ;;  %3085 = vst.msk [vmem:[#allocation3 + $0xd8] sm:$0xff] %vm33_vm0, %v11452_v35 }
 0x1a4   :  { %v1713_v19 = vpop.permute.xlu0 %1712 }
 0x1a5   :  { %1723 = vst.msk [vmem:[#allocation3 + $0x40] sm:$0xff] %vm1401_vm3, %v1713_v19  ;;  %v1320_v9 = vpop.permute.xlu1 %1319  ;;  %v1135_v19 = vmax.f32 %v1101_v41, 0.0 }
 0x1a6   :  { %1330 = vst.msk [vmem:[#allocation3 + $0x118] sm:$0xff] %vm1304_vm2, %v1320_v9  ;;  %2356 = vrot.lane.b32.xlu0 %v10926_v44, %s10360_s20  ;;  %v1104_v9 = vadd.f32 %v11437_v59, %v1103_v50 }
 0x1a7   :  { %1427 = vst.msk [vmem:[#allocation3 + $0x118] sm:$0xff] %vm1401_vm3, %v11338_v11  ;;  %2580 = vrot.lane.b32.xlu1 %v11412_v38, %s10359_s15  ;;  %v1137_v11 = vmax.f32 %v1109_v46, 0.0 }
 0x1a8   :  { %v1619_v18 = vpop.permute.xlu0 %1618 }
 0x1a9   :  { %1628 = vst.msk [vmem:[#allocation3 + $0x78] sm:$0xff] %vm1304_vm2, %v1619_v18  ;;  %v1225_v37 = vpop.permute.xlu1 %1224  ;;  %v1136_v18 = vmax.f32 %v1104_v9, 0.0  ;;  %v1146_v52 = vpack.c.bf16 %v1138_v48, %v1137_v11  ;;  %v11471_v11 = vld [vmem:[#allocation2 + $0xe8] sm:$0xff] }
 0x1aa   :  { %1724 = vst.msk [vmem:[#allocation3 + $0x78] sm:$0xff] %vm1401_vm3, %v11353_v49  ;;  %2182 = vrot.lane.b32.xlu0 %v10926_v44, %s10361_s21 }
 0x1ab   :  { %1234 = vst.msk [vmem:[#allocation3 + $0x150] sm:$0xff] %vm1207_vm1, %v1225_v37  ;;  %2698 = vrot.lane.b32.xlu1 %v2688_v1, %s10360_s20  ;;  %v3124_v37 = vld [vmem:[#allocation3 + $0x38] sm:$0xff] }
 0x1ac   :  { %1331 = vst.msk [vmem:[#allocation3 + $0x150] sm:$0xff] %vm1304_vm2, %v11356_v63  ;;  %v2159_v46 = vpop.permute.xlu0 %2158  ;;  %v3125_v51 = vld [vmem:[#allocation3 + $0x40] sm:$0xff]  ;;  %v1145_v63 = vpack.c.bf16 %v1136_v18, %v1135_v19 }
 0x1ad   :  { %2170 = vst.msk [vmem:[#allocation3 + $0x18] sm:$0xff] %vm1207_vm1, %v2159_v46  ;;  %v1549_v49 = vpop.permute.xlu1 %1548  ;;  %3597 = vmatprep.mubr.bf16.mxu0 %v3125_v51 }
 0x1ae   :  { %2266 = vst.msk [vmem:[#allocation3 + $0x18] sm:$0xff] %vm1304_vm2, %v11368_v56  ;;  %2058 = vrot.lane.b32.xlu0 %v10926_v44, %s10360_s20  ;;  %3598 = vmatmul.mubr.bf16.gmra.mrb[40].mxu0 %v3124_v37  ;;  %v9783_v56 = vld [vmem:[%s13747_s3 + $0x40] sm:$0xff]  }
 0x1af   :  { %1557 = vst.msk [vmem:[#allocation3 + $0x190] sm:$0xff] %vm1207_vm1, %v1549_v49  ;;  %2604 = vrot.lane.b32.xlu1 %v2688_v1, %s10359_s15  ;;  %9080 = vmatprep.subr.bf16.mxu0 %v9783_v56  ;;  %v11540_v56 = vld [vmem:[#allocation2 + $0x188] sm:$0xff] }
 0x1b0   :  { %2362 = vst.msk [vmem:[#allocation3 + $0x18] sm:$0xff] %vm1401_vm3, %v10645_v6  ;;  %v2035_v41 = vpop.permute.xlu0 %2034 }
 0x1b1   :  { %1653 = vst.msk [vmem:[#allocation3 + $0x190] sm:$0xff] %vm1304_vm2, %v11384_v26  ;;  %v1843_v8 = vpop.permute.xlu1 %1842  ;;  %v3132_v50 = vld [vmem:[#allocation3 + $0x78] sm:$0xff]  ;;  %v3131_v26 = vld [vmem:[#allocation3 + $0x70] sm:$0xff] }
 0x1b2   :  { %1152 = vst.msk [vmem:[#allocation2 + $0x1a0] sm:$0xff] %vm33_vm0, %v1146_v52  ;;  %1151 = vst.msk [vmem:[#allocation2 + $0x198] sm:$0xff] %vm33_vm0, %v1145_v63  ;;  %2380 = vrot.lane.b32.xlu0 %v10934_v29, %s10360_s20  ;;  %3605 = vmatprep.mubr.bf16.mxu0 %v3132_v50  ;;  %v9779_v29 = vld [vmem:[%s13747_s3 + $0x188] sm:$0xff]  }
 0x1b3   :  { %1852 = vst.msk [vmem:[#allocation3 + $0x80] sm:$0xff] %vm1207_vm1, %v1843_v8  ;;  %2672 = vrot.lane.b32.xlu1 %v11471_v11, %s10360_s20  ;;  %v2462_v50 = vld [vmem:[#allocation2 + $0x188] sm:$0xff] }
 0x1b4   :  { %1948 = vst.msk [vmem:[#allocation3 + $0x80] sm:$0xff] %vm1304_vm2, %v11191_v34  ;;  %v1737_v6 = vpop.permute.xlu0 %1736  ;;  %v3119_v34 = vld [vmem:[#allocation3 + $0x10] sm:$0xff] }
 0x1b5   :  { %2044 = vst.msk [vmem:[#allocation3 + $0x80] sm:$0xff] %vm1401_vm3, %v2035_v41  ;;  %1747 = vst.msk [vmem:[#allocation3 + $0x120] sm:$0xff] %vm1401_vm3, %v1737_v6  ;;  %v1421_v52 = vpop.permute.xlu1 %1420  ;;  %v11542_v41 = vld [vmem:[#allocation2 + $0x190] sm:$0xff] }
 0x1b6   :  { %2996 = vrot.lane.b32.xlu0 %v2688_v1, %s10360_s20  ;;  %3606 = vmatmul.mubr.bf16.gmra.mrb[44].mxu0 %v3131_v26  ;;  %v9780_v1 = vld [vmem:[%s13747_s3 + $0xc0] sm:$0xff]   ;;  %2779 = vst.msk [vmem:[#allocation3 + $0x220] sm:$0xff] %vm33_vm0, %v11540_v56  ;;  %2780 = vst.msk [vmem:[#allocation3 + $0x258] sm:$0xff] %vm33_vm0, %v11542_v41  ;;  %v1430_v26 = vld [vmem:[#allocation2 + $0x98] sm:$0xff] }
 0x1b7   :  { %v3120_v19 = vld [vmem:[#allocation3 + $0x18] sm:$0xff]  ;;  %2578 = vrot.lane.b32.xlu1 %v11471_v11, %s10359_s15  ;;  %2466 = vst.msk [vmem:[#allocation3 + $0x2c0] sm:$0xff] %vm33_vm0, %v2462_v50 }
 0x1b8   :  { %3654 = vmatprep.mubr.bf16.mxu1 %v3120_v19  ;;  %v1643_v9 = vpop.permute.xlu0 %1642  ;;  %v11578_v50 = vld [vmem:[#allocation2 + $0x178] sm:$0xff] }
 0x1b9   :  { %3655 = vmatmul.mubr.bf16.vlgmr.msra.gmra.mrb[36].mxu1 %v3119_v34  ;;  %1652 = vst.msk [vmem:[#allocation3 + $0x158] sm:$0xff] %vm1304_vm2, %v1643_v9  ;;  %v1867_v48 = vpop.permute.xlu1 %1866 }
 0x1ba   :  { %9599 = vmatpush3.bf16.msra.mxu1 %v11418_v54  ;;  %1748 = vst.msk [vmem:[#allocation3 + $0x158] sm:$0xff] %vm1401_vm3, %v11403_v2  ;;  %2282 = vrot.lane.b32.xlu0 %v11412_v38, %s10359_s15 }
 0x1bb   :  { %1876 = vst.msk [vmem:[#allocation3 + $0x160] sm:$0xff] %vm1207_vm1, %v1867_v48  ;;  %9600 = vmatprep.subr.bf16.mxu1 %v9779_v29  ;;  %2484 = vrot.lane.b32.xlu1 %v11471_v11, %s10361_s21 }
 0x1bc   :  { %v2259_v46 = vpop.permute.xlu0 %2258  ;;  %3093 = vst.msk [vmem:[#allocation3 + $0x1b8] sm:$0xff] %vm33_vm0, %v11578_v50 }
 0x1bd   :  { %v1841_v51 = vpop.permute.xlu1 %1840 }
 0x1be   :  { %9601 = vmatpush3.bf16.msra.mxu1 %v9779_v29  ;;  %1851 = vst.msk [vmem:[#allocation3 + $0x48] sm:$0xff] %vm1207_vm1, %v1841_v51  ;;  %2188 = vrot.lane.b32.xlu0 %v11412_v38, %s10361_s21  ;;  %v11555_v29 = vld [vmem:[#allocation2 + $0x158] sm:$0xff] }
 0x1bf   :  { %9120 = vmatprep.subr.bf16.mxu1 %v9780_v1  ;;  %1947 = vst.msk [vmem:[#allocation3 + $0x48] sm:$0xff] %vm1304_vm2, %v11252_v57  ;;  %2696 = vrot.lane.b32.xlu1 %v11056_v61, %s10360_s20 }
 0x1c0   :  { %2043 = vst.msk [vmem:[#allocation3 + $0x48] sm:$0xff] %vm1401_vm3, %v11221_v60  ;;  %v2165_v2 = vpop.permute.xlu0 %2164  ;;  %v11525_v60 = vld [vmem:[#allocation2 + $0x150] sm:$0xff] }
 0x1c1   :  { %2173 = vst.msk [vmem:[#allocation3 + $0xc0] sm:$0xff] %vm1207_vm1, %v2165_v2  ;;  %v1419_v54 = vpop.permute.xlu1 %1418 }
 0x1c2   :  { %2269 = vst.msk [vmem:[#allocation3 + $0xc0] sm:$0xff] %vm1304_vm2, %v10660_v13  ;;  %2994 = vrot.lane.b32.xlu0 %v11056_v61, %s10360_s20 }
 0x1c3   :  { %1428 = vst.msk [vmem:[#allocation3 + $0x150] sm:$0xff] %vm1401_vm3, %v1419_v54  ;;  %2602 = vrot.lane.b32.xlu1 %v11056_v61, %s10359_s15 }
 0x1c4   :  { %v1717_v57 = vpop.permute.xlu0 %1716 }
 0x1c5   :  { %1725 = vst.msk [vmem:[#allocation3 + $0xb0] sm:$0xff] %vm1401_vm3, %v1717_v57  ;;  %v1324_v38 = vpop.permute.xlu1 %1323  ;;  %v11565_v57 = vld [vmem:[#allocation2 + $0x160] sm:$0xff] }
 0x1c6   :  { %1332 = vst.msk [vmem:[#allocation3 + $0x188] sm:$0xff] %vm1304_vm2, %v1324_v38  ;;  %2900 = vrot.lane.b32.xlu0 %v11056_v61, %s10359_s15 }
 0x1c7   :  { %1429 = vst.msk [vmem:[#allocation3 + $0x188] sm:$0xff] %vm1401_vm3, %v1421_v52  ;;  %2508 = vrot.lane.b32.xlu1 %v11056_v61, %s10361_s21  ;;  %v3138_v61 = vld [vmem:[#allocation3 + $0xa8] sm:$0xff]  ;;  %v2463_v52 = vld [vmem:[#allocation2 + $0x190] sm:$0xff] }
 0x1c8   :  { %v2257_v13 = vpop.permute.xlu0 %2256  ;;  %2467 = vst.msk [vmem:[#allocation3 + $0x2f8] sm:$0xff] %vm33_vm0, %v2463_v52  ;;  %v2465_v52 = vld [vmem:[#allocation2 + $0x1a0] sm:$0xff] }
 0x1c9   :  { %2267 = vst.msk [vmem:[#allocation3 + $0x50] sm:$0xff] %vm1304_vm2, %v2257_v13  ;;  %v1865_v18 = vpop.permute.xlu1 %1864 }
 0x1ca   :  { %1875 = vst.msk [vmem:[#allocation3 + $0x128] sm:$0xff] %vm1207_vm1, %v1865_v18  ;;  %2280 = vrot.lane.b32.xlu0 %v11471_v11, %s10359_s15 }
 0x1cb   :  { %2824 = vrot.lane.b32.xlu1 %v11525_v60, %s10361_s21  ;;  %2469 = vst.msk [vmem:[#allocation3 + $0x368] sm:$0xff] %vm33_vm0, %v2465_v52 }
 0x1cc   :  { %v2163_v49 = vpop.permute.xlu0 %2162  ;;  %v3139_v37 = vld [vmem:[#allocation3 + $0xb0] sm:$0xff] }
 0x1cd   :  { %2172 = vst.msk [vmem:[#allocation3 + $0x88] sm:$0xff] %vm1207_vm1, %v2163_v49  ;;  %v2479_v63 = vpop.permute.xlu1 %2478  ;;  %3613 = vmatprep.mubr.bf16.mxu0 %v3139_v37  ;;  %v11572_v37 = vld [vmem:[#allocation2 + $0x198] sm:$0xff] }
 0x1ce   :  { %2268 = vst.msk [vmem:[#allocation3 + $0x88] sm:$0xff] %vm1304_vm2, %v2259_v46  ;;  %2186 = vrot.lane.b32.xlu0 %v11471_v11, %s10361_s21  ;;  %3614 = vmatmul.mubr.bf16.gmra.mrb[48].mxu0 %v3138_v61  ;;  %v9596_v9 = vpop.f32.mrb[32].mxu1  ;;  %v2464_v61 = vld [vmem:[#allocation2 + $0x198] sm:$0xff] }
 0x1cf   :  { %2490 = vst.msk [vmem:[#allocation3 + $0x20] sm:$0xff] %vm1207_vm1, %v2479_v63  ;;  %2822 = vrot.lane.b32.xlu1 %v11135_v4, %s10361_s21  ;;  %v1125_v48 = vadd.f32 %v11437_v59, %v9596_v9  ;;  %v1116_v1 = vpop.f32.mrb[33].mxu1  ;;  %v11574_v63 = vld [vmem:[#allocation2 + $0x1a0] sm:$0xff] }
 0x1d0   :  { %v1741_v8 = vpop.permute.xlu0 %1740  ;;  %v1117_v51 = vadd.f32 %v11437_v59, %v1116_v1  ;;  %v9597_v2 = vpop.f32.mrb[34].mxu1  ;;  %3098 = vst.msk [vmem:[#allocation3 + $0x1f0] sm:$0xff] %vm33_vm0, %v11574_v63  ;;  %2781 = vst.msk [vmem:[#allocation3 + $0x290] sm:$0xff] %vm33_vm0, %v11572_v37 }
 0x1d1   :  { %1749 = vst.msk [vmem:[#allocation3 + $0x190] sm:$0xff] %vm1401_vm3, %v1741_v8  ;;  %v2801_v6 = vpop.permute.xlu1 %2800  ;;  %v1141_v38 = vmax.f32 %v1125_v48, 0.0  ;;  %v1128_v13 = vadd.f32 %v11437_v59, %v9597_v2 }
 0x1d2   :  { %2811 = vst.msk [vmem:[#allocation3 + $0x60] sm:$0xff] %vm1207_vm1, %v2801_v6  ;;  %2918 = vrot.lane.b32.xlu0 %v11525_v60, %s10359_s15  ;;  %v1139_v18 = vmax.f32 %v1117_v51, 0.0 }
 0x1d3   :  { %1438 = vrot.lane.b32.xlu1 %v1430_v26, %s10360_s20  ;;  %v1142_v8 = vmax.f32 %v1128_v13, 0.0  ;;  %2468 = vst.msk [vmem:[#allocation3 + $0x330] sm:$0xff] %vm33_vm0, %v2464_v61  ;;  %v3009_v61 = vld [vmem:[#allocation2 + $0x170] sm:$0xff] }
 0x1d4   :  { %v2895_v19 = vpop.permute.xlu0 %2894 }
 0x1d5   :  { %v2503_v34 = vpop.permute.xlu1 %2502  ;;  %v1148_v9 = vpack.c.bf16 %v1142_v8, %v1141_v38  ;;  %v1497_v38 = vld [vmem:[#allocation2 + $0xb8] sm:$0xff]  ;;  %v3126_v8 = vld [vmem:[#allocation3 + $0x48] sm:$0xff] }
 0x1d6   :  { %2514 = vst.msk [vmem:[#allocation3 + $0x100] sm:$0xff] %vm1207_vm1, %v2503_v34  ;;  %1568 = vrot.lane.b32.xlu0 %v10893_v39, %s10361_s21  ;;  %v1119_v39 = vpop.f32.mrb[35].mxu1 }
 0x1d7   :  { %2826 = vrot.lane.b32.xlu1 %v11555_v29, %s10361_s21  ;;  %v1120_v49 = vadd.f32 %v11437_v59, %v1119_v39  ;;  %1154 = vst.msk [vmem:[#allocation2 + $0x1b0] sm:$0xff] %vm33_vm0, %v1148_v9  ;;  %1501 = vst.msk [vmem:[#allocation3 + $0x270] sm:$0xff] %vm33_vm0, %v1497_v38 }
 0x1d8   :  { %v2355_v46 = vpop.permute.xlu0 %2354 }
 0x1d9   :  { %2364 = vst.msk [vmem:[#allocation3 + $0x88] sm:$0xff] %vm1401_vm3, %v2355_v46  ;;  %v1963_v54 = vpop.permute.xlu1 %1962  ;;  %v1140_v6 = vmax.f32 %v1120_v49, 0.0 }
 0x1da   :  { %1972 = vst.msk [vmem:[#allocation3 + $0x160] sm:$0xff] %vm1304_vm2, %v1963_v54  ;;  %3016 = vrot.lane.b32.xlu0 %v11565_v57, %s10360_s20 }
 0x1db   :  { %1246 = vrot.lane.b32.xlu1 %v10757_v53, %s10361_s21  ;;  %v1147_v53 = vpack.c.bf16 %v1140_v6, %v1139_v18 }
 0x1dc   :  { %v2057_v59 = vpop.permute.xlu0 %2056 }
 0x1dd   :  { %v2799_v34 = vpop.permute.xlu1 %2798  ;;  %1153 = vst.msk [vmem:[#allocation2 + $0x1a8] sm:$0xff] %vm33_vm0, %v1147_v53  ;;  %v3133_v53 = vld [vmem:[#allocation3 + $0x80] sm:$0xff] }
 0x1de   :  { %2810 = vst.msk [vmem:[#allocation3 + $0x28] sm:$0xff] %vm1207_vm1, %v2799_v34  ;;  %2922 = vrot.lane.b32.xlu0 %v11565_v57, %s10359_s15 }
 0x1df   :  { %2906 = vst.msk [vmem:[#allocation3 + $0x28] sm:$0xff] %vm1304_vm2, %v2895_v19  ;;  %1343 = vrot.lane.b32.xlu1 %v1430_v26, %s10359_s15 }
 0x1e0   :  { %v11594_v48 = vpop.permute.xlu0 %2378 }
 0x1e1   :  { %v1961_v1 = vpop.permute.xlu1 %1960 }
 0x1e2   :  { %1971 = vst.msk [vmem:[#allocation3 + $0x128] sm:$0xff] %vm1304_vm2, %v1961_v1  ;;  %2828 = vrot.lane.b32.xlu0 %v11565_v57, %s10361_s21 }
 0x1e3   :  { %2067 = vst.msk [vmem:[#allocation3 + $0x128] sm:$0xff] %vm1401_vm3, %v2057_v59  ;;  %1440 = vrot.lane.b32.xlu1 %v10859_v47, %s10360_s20  ;;  %v3134_v59 = vld [vmem:[#allocation3 + $0x88] sm:$0xff] }
 0x1e4   :  { %v1759_v19 = vpop.permute.xlu0 %1758  ;;  %v11606_v51 = vld [vmem:[#allocation2 + $0x1a8] sm:$0xff] }
 0x1e5   :  { %v2671_v46 = vpop.permute.xlu1 %2670  ;;  %3099 = vst.msk [vmem:[#allocation3 + $0x228] sm:$0xff] %vm33_vm0, %v11606_v51 }
 0x1e6   :  { %3014 = vrot.lane.b32.xlu0 %v11555_v29, %s10360_s20 }
 0x1e7   :  { %1248 = vrot.lane.b32.xlu1 %v1430_v26, %s10361_s21 }
 0x1e8   :  { %v2353_v2 = vpop.permute.xlu0 %2352 }
 0x1e9   :  { %2363 = vst.msk [vmem:[#allocation3 + $0x50] sm:$0xff] %vm1401_vm3, %v2353_v2  ;;  %v2577_v54 = vpop.permute.xlu1 %2576 }
 0x1ea   :  { %2920 = vrot.lane.b32.xlu0 %v11555_v29, %s10359_s15 }
 0x1eb   :  { %1345 = vrot.lane.b32.xlu1 %v10859_v47, %s10359_s15 }
 0x1ec   :  { %v2055_v13 = vpop.permute.xlu0 %2054 }
 0x1ed   :  { %2066 = vst.msk [vmem:[#allocation3 + $0xf0] sm:$0xff] %vm1401_vm3, %v2055_v13  ;;  %v2483_v26 = vpop.permute.xlu1 %2482  ;;  %v11656_v13 = vld [vmem:[#allocation2 + $0x180] sm:$0xff] }
 0x1ee   :  { %2492 = vst.msk [vmem:[#allocation3 + $0x90] sm:$0xff] %vm1207_vm1, %v2483_v26  ;;  %1664 = vrot.lane.b32.xlu0 %v10908_v28, %s10359_s15 }
 0x1ef   :  { %1442 = vrot.lane.b32.xlu1 %v10910_v42, %s10360_s20  ;;  %2778 = vst.msk [vmem:[#allocation3 + $0x1e8] sm:$0xff] %vm33_vm0, %v11656_v13 }
 0x1f0   :  { %v11622_v39 = vpop.permute.xlu0 %2376  ;;  %v3127_v18 = vld [vmem:[#allocation3 + $0x50] sm:$0xff] }
 0x1f1   :  { %v2695_v49 = vpop.permute.xlu1 %2694  ;;  %3662 = vmatprep.mubr.bf16.mxu1 %v3127_v18  ;;  %v11671_v18 = vld [vmem:[#allocation2 + $0x118] sm:$0xff] }
 0x1f2   :  { %3020 = vrot.lane.b32.xlu0 %v3009_v61, %s10360_s20  ;;  %3663 = vmatmul.mubr.bf16.gmra.mrb[40].mxu1 %v3126_v8  ;;  %v2838_v61 = vld [vmem:[#allocation2 + $0x188] sm:$0xff] }
 0x1f3   :  { %1886 = vrot.lane.b32.xlu1 %v11224_v62, %s10361_s21  ;;  %3670 = vmatprep.mubr.bf16.mxu1 %v3134_v59 }
 0x1f4   :  { %v1663_v6 = vpop.permute.xlu0 %1662 }
 0x1f5   :  { %1674 = vst.msk [vmem:[#allocation3 + $0x1c8] sm:$0xff] %vm1304_vm2, %v1663_v6  ;;  %v2601_v52 = vpop.permute.xlu1 %2600 }
 0x1f6   :  { %1770 = vst.msk [vmem:[#allocation3 + $0x1c8] sm:$0xff] %vm1401_vm3, %v1759_v19  ;;  %3018 = vrot.lane.b32.xlu0 %v11230_v31, %s10360_s20 }
 0x1f7   :  { %1572 = vrot.lane.b32.xlu1 %v10926_v44, %s10361_s21 }
 0x1f8   :  { %v2993_v34 = vpop.permute.xlu0 %2992 }
 0x1f9   :  { %v2507_v9 = vpop.permute.xlu1 %2506 }
 0x1fa   :  { %2516 = vst.msk [vmem:[#allocation3 + $0x170] sm:$0xff] %vm1207_vm1, %v2507_v9  ;;  %2924 = vrot.lane.b32.xlu0 %v11230_v31, %s10359_s15  ;;  %3671 = vmatmul.mubr.bf16.gmra.mrb[44].mxu1 %v3133_v53 }
 0x1fb   :  { %2398 = vrot.lane.b32.xlu1 %v11265_v40, %s10360_s20 }
 0x1fc   :  { %v2899_v62 = vpop.permute.xlu0 %2898 }
 0x1fd   :  { %v2575_v1 = vpop.permute.xlu1 %2574 }
 0x1fe   :  { %2586 = vst.msk [vmem:[#allocation3 + $0x20] sm:$0xff] %vm1304_vm2, %v2575_v1  ;;  %1760 = vrot.lane.b32.xlu0 %v10926_v44, %s10360_s20 }
 0x1ff   :  { %2682 = vst.msk [vmem:[#allocation3 + $0x20] sm:$0xff] %vm1401_vm3, %v2671_v46  ;;  %1668 = vrot.lane.b32.xlu1 %v10938_v45, %s10359_s15  ;;  %v1433_v46 = vld [vmem:[#allocation2 + $0xb0] sm:$0xff] }
 0x200   :  { %v2805_v19 = vpop.permute.xlu0 %2804 }
 0x201   :  { %2813 = vst.msk [vmem:[#allocation3 + $0xd0] sm:$0xff] %vm1207_vm1, %v2805_v19  ;;  %v2481_v2 = vpop.permute.xlu1 %2480  ;;  %v9792_v19 = vld [vmem:[%s13747_s3 + $0x50] sm:$0xff]  }
 0x202   :  { %2491 = vst.msk [vmem:[#allocation3 + $0x58] sm:$0xff] %vm1207_vm1, %v2481_v2  ;;  %1570 = vrot.lane.b32.xlu0 %v10908_v28, %s10361_s21 }
 0x203   :  { %2587 = vst.msk [vmem:[#allocation3 + $0x58] sm:$0xff] %vm1304_vm2, %v2577_v54  ;;  %1347 = vrot.lane.b32.xlu1 %v10910_v42, %s10359_s15 }
 0x204   :  { %v2279_v40 = vpop.permute.xlu0 %2278 }
 0x205   :  { %v2803_v38 = vpop.permute.xlu1 %2802 }
 0x206   :  { %2812 = vst.msk [vmem:[#allocation3 + $0x98] sm:$0xff] %vm1207_vm1, %v2803_v38  ;;  %1666 = vrot.lane.b32.xlu0 %v10926_v44, %s10359_s15  ;;  %v11664_v44 = vld [vmem:[#allocation2 + $0x1b0] sm:$0xff] }
 0x207   :  { %2908 = vst.msk [vmem:[#allocation3 + $0x98] sm:$0xff] %vm1304_vm2, %v2899_v62  ;;  %1444 = vrot.lane.b32.xlu1 %v1433_v46, %s10360_s20  ;;  %v9788_v62 = vld [vmem:[%s13747_s3 + $0x48] sm:$0xff]  }
 0x208   :  { %v2185_v28 = vpop.permute.xlu0 %2184  ;;  %3100 = vst.msk [vmem:[#allocation3 + $0x260] sm:$0xff] %vm33_vm0, %v11664_v44 }
 0x209   :  { %2195 = vst.msk [vmem:[#allocation3 + $0x130] sm:$0xff] %vm1207_vm1, %v2185_v28  ;;  %v2599_v42 = vpop.permute.xlu1 %2598  ;;  %v9793_v28 = vld [vmem:[%s13747_s3 + $0x10] sm:$0xff]  }
 0x20a   :  { %2610 = vst.msk [vmem:[#allocation3 + $0x100] sm:$0xff] %vm1304_vm2, %v2599_v42  ;;  %1762 = vrot.lane.b32.xlu0 %v10938_v45, %s10360_s20  ;;  %v1975_v45 = vld [vmem:[#allocation2 + $0x108] sm:$0xff]  ;;  %v3140_v42 = vld [vmem:[#allocation3 + $0xb8] sm:$0xff] }
 0x20b   :  { %2706 = vst.msk [vmem:[#allocation3 + $0x100] sm:$0xff] %vm1401_vm3, %v2695_v49  ;;  %1888 = vrot.lane.b32.xlu1 %v11471_v11, %s10361_s21 }
 0x20c   :  { %v2061_v54 = vpop.permute.xlu0 %2060 }
 0x20d   :  { %v2505_v26 = vpop.permute.xlu1 %2504 }
 0x20e   :  { %2515 = vst.msk [vmem:[#allocation3 + $0x138] sm:$0xff] %vm1207_vm1, %v2505_v26  ;;  %2206 = vrot.lane.b32.xlu0 %v11671_v18, %s10361_s21  ;;  %v3123_v26 = vld [vmem:[#allocation3 + $0x30] sm:$0xff] }
 0x20f   :  { %2611 = vst.msk [vmem:[#allocation3 + $0x138] sm:$0xff] %vm1304_vm2, %v2601_v52  ;;  %1984 = vrot.lane.b32.xlu1 %v1975_v45, %s10359_s15  ;;  %v9785_v52 = vld [vmem:[%s13747_s3] sm:$0xff]  }
 0x210   :  { %v2991_v49 = vpop.permute.xlu0 %2990 }
 0x211   :  { %3002 = vst.msk [vmem:[#allocation3 + $0x28] sm:$0xff] %vm1401_vm3, %v2991_v49  ;;  %v1965_v8 = vpop.permute.xlu1 %1964  ;;  %v9797_v49 = vld [vmem:[%s13747_s3 + $0x18] sm:$0xff]  }
 0x212   :  { %1973 = vst.msk [vmem:[#allocation3 + $0x198] sm:$0xff] %vm1304_vm2, %v1965_v8  ;;  %2302 = vrot.lane.b32.xlu0 %v10954_v55, %s10359_s15  ;;  %v9800_v8 = vld [vmem:[%s13747_s3 + $0x60] sm:$0xff]  }
 0x213   :  { %2069 = vst.msk [vmem:[#allocation3 + $0x198] sm:$0xff] %vm1401_vm3, %v2061_v54  ;;  %2846 = vrot.lane.b32.xlu1 %v2838_v61, %s10361_s21  ;;  %v1880_v54 = vld [vmem:[#allocation2 + $0xf0] sm:$0xff] }
 0x214   :  { %v2897_v59 = vpop.permute.xlu0 %2896 }
 0x215   :  { %2907 = vst.msk [vmem:[#allocation3 + $0x60] sm:$0xff] %vm1304_vm2, %v2897_v59  ;;  %v11685_v6 = vpop.permute.xlu1 %2674 }
 0x216   :  { %3003 = vst.msk [vmem:[#allocation3 + $0x60] sm:$0xff] %vm1401_vm3, %v2993_v34  ;;  %1982 = vrot.lane.b32.xlu0 %v11173_v25, %s10359_s15  ;;  %v3121_v34 = vld [vmem:[#allocation3 + $0x20] sm:$0xff]  ;;  %v9789_v25 = vld [vmem:[%s13747_s3 + $0x8] sm:$0xff]  }
 0x217   :  { %2526 = vrot.lane.b32.xlu1 %v11525_v60, %s10361_s21 }
 0x218   :  { %v2357_v9 = vpop.permute.xlu0 %2356  ;;  %v3122_v53 = vld [vmem:[#allocation3 + $0x28] sm:$0xff] }
 0x219   :  { %2365 = vst.msk [vmem:[#allocation3 + $0xc0] sm:$0xff] %vm1401_vm3, %v2357_v9  ;;  %v11699_v1 = vpop.permute.xlu1 %2580  ;;  %3719 = vmatprep.mubr.bf16.mxu0 %v3122_v53  ;;  %v9782_v9 = vld [vmem:[%s13747_s3 + $0xc8] sm:$0xff]  }
 0x21a   :  { %1250 = vrot.lane.b32.xlu0 %v10859_v47, %s10361_s21  ;;  %3720 = vmatmul.mubr.bf16.vlgmr.msra.gmra.mrb[52].mxu0 %v3121_v34  ;;  %v3130_v34 = vld [vmem:[#allocation3 + $0x68] sm:$0xff] }
 0x21b   :  { %2622 = vrot.lane.b32.xlu1 %v11555_v29, %s10359_s15  ;;  %9081 = vmatpush3.bf16.msra.mxu0 %v9785_v52  ;;  %v2839_v52 = vld [vmem:[#allocation2 + $0x190] sm:$0xff] }
 0x21c   :  { %v2183_v60 = vpop.permute.xlu0 %2182  ;;  %9082 = vmatprep.subr.bf16.mxu0 %v9788_v62  ;;  %v11752_v62 = vld [vmem:[#allocation2 + $0x128] sm:$0xff] }
 0x21d   :  { %2194 = vst.msk [vmem:[#allocation3 + $0xf8] sm:$0xff] %vm1207_vm1, %v2183_v60  ;;  %v11712_v2 = vpop.permute.xlu1 %2698  ;;  %v3129_v47 = vld [vmem:[#allocation3 + $0x60] sm:$0xff] }
 0x21e   :  { %2290 = vst.msk [vmem:[#allocation3 + $0xf8] sm:$0xff] %vm1304_vm2, %v2279_v40  ;;  %2078 = vrot.lane.b32.xlu0 %v1975_v45, %s10360_s20  ;;  %3727 = vmatprep.mubr.bf16.mxu0 %v3129_v47  ;;  %v3137_v60 = vld [vmem:[#allocation3 + $0xa0] sm:$0xff] }
 0x21f   :  { %2386 = vst.msk [vmem:[#allocation3 + $0xf8] sm:$0xff] %vm1401_vm3, %v10772_v0  ;;  %2718 = vrot.lane.b32.xlu1 %v11565_v57, %s10360_s20  ;;  %9083 = vmatpush3.bf16.msra.mxu0 %v9789_v25  ;;  %v9796_v0 = vld [vmem:[%s13747_s3 + $0x58] sm:$0xff]   ;;  %v9801_v25 = vld [vmem:[%s13747_s3 + $0x20] sm:$0xff]  }
 0x220   :  { %v2059_v38 = vpop.permute.xlu0 %2058  ;;  %v3141_v46 = vld [vmem:[#allocation3 + $0xc0] sm:$0xff]  ;;  %9084 = vmatprep.subr.bf16.mxu0 %v9792_v19  ;;  %v9784_v19 = vld [vmem:[%s13747_s3 + $0x88] sm:$0xff]  }
 0x221   :  { %2068 = vst.msk [vmem:[#allocation3 + $0x160] sm:$0xff] %vm1401_vm3, %v2059_v38  ;;  %v11724_v40 = vpop.permute.xlu1 %2604  ;;  %3678 = vmatprep.mubr.bf16.mxu1 %v3141_v46  ;;  %v9786_v38 = vld [vmem:[%s13747_s3 + $0xd0] sm:$0xff]  }
 0x222   :  { %1764 = vrot.lane.b32.xlu0 %v11471_v11, %s10360_s20  ;;  %3679 = vmatmul.mubr.bf16.gmra.mrb[48].mxu1 %v3140_v42  ;;  %v9781_v11 = vld [vmem:[%s13747_s3 + $0x80] sm:$0xff]   ;;  %v9805_v42 = vld [vmem:[%s13747_s3 + $0x28] sm:$0xff]  }
 0x223   :  { %1890 = vrot.lane.b32.xlu1 %v1880_v54, %s10361_s21  ;;  %9602 = vmatprep.mubr.msk.bf16.mxu1 %vm33_vm0, %v3123_v26  ;;  %v9787_v54 = vld [vmem:[%s13747_s3 + $0x90] sm:$0xff]  }
 0x224   :  { %v2381_v45 = vpop.permute.xlu0 %2380  ;;  %9085 = vmatpush3.bf16.msra.mxu0 %v9793_v28 }
 0x225   :  { %v2673_v61 = vpop.permute.xlu1 %2672  ;;  %9086 = vmatprep.subr.bf16.mxu0 %v9796_v0  ;;  %v3144_v0 = vld [vmem:[#allocation3 + $0xd8] sm:$0xff] }
 0x226   :  { %2683 = vst.msk [vmem:[#allocation3 + $0x58] sm:$0xff] %vm1401_vm3, %v2673_v61  ;;  %2208 = vrot.lane.b32.xlu0 %v10954_v55, %s10361_s21 }
 0x227   :  { %1986 = vrot.lane.b32.xlu1 %v10922_v43, %s10359_s15 }
 0x228   :  { %v11747_v59 = vpop.permute.xlu0 %2996  ;;  %9087 = vmatpush3.bf16.msra.mxu0 %v9797_v49  ;;  %v3846_v49 = vld [vmem:[#allocation3 + $0xf8] sm:$0xff] }
 0x229   :  { %v2579_v53 = vpop.permute.xlu1 %2578  ;;  %9088 = vmatprep.subr.bf16.mxu0 %v9800_v8 }
 0x22a   :  { %2588 = vst.msk [vmem:[#allocation3 + $0x90] sm:$0xff] %vm1304_vm2, %v2579_v53  ;;  %2304 = vrot.lane.b32.xlu0 %v11752_v62, %s10359_s15  ;;  %9603 = vmatmul.mubr.msk.bf16.vlgmr.msra.gmra.mrb[52].mxu1 %vm33_vm0, %v3130_v34  ;;  %v1881_v53 = vld [vmem:[#allocation2 + $0xf8] sm:$0xff] }
 0x22b   :  { %2684 = vst.msk [vmem:[#allocation3 + $0x90] sm:$0xff] %vm1401_vm3, %v11685_v6  ;;  %9121 = vmatpush3.bf16.msra.mxu1 %v9781_v11  ;;  %2848 = vrot.lane.b32.xlu1 %v2839_v52, %s10361_s21  ;;  %v9804_v6 = vld [vmem:[%s13747_s3 + $0x68] sm:$0xff]   ;;  %v9795_v11 = vld [vmem:[%s13747_s3 + $0xa0] sm:$0xff]  }
 0x22c   :  { %9606 = vmatprep.mubr.msk.bf16.mxu1 %vm33_vm0, %v3137_v60  ;;  %v11768_v47 = vpop.permute.xlu0 %2282  ;;  %9122 = vmatprep.subr.bf16.mxu1 %v9782_v9 }
 0x22d   :  { %v2485_v46 = vpop.permute.xlu1 %2484  ;;  %v3128_v28 = vld [vmem:[#allocation3 + $0x58] sm:$0xff]  ;;  %9089 = vmatpush3.bf16.msra.mxu0 %v9801_v25  ;;  %v9799_v25 = vld [vmem:[%s13747_s3 + $0xa8] sm:$0xff]  }
 0x22e   :  { %2493 = vst.msk [vmem:[#allocation3 + $0xc8] sm:$0xff] %vm1207_vm1, %v2485_v46  ;;  %3728 = vmatmul.mubr.bf16.gmra.mrb[56].mxu0 %v3128_v28  ;;  %2400 = vrot.lane.b32.xlu0 %v11135_v4, %s10360_s20  ;;  %v9790_v4 = vld [vmem:[%s13747_s3 + $0xd8] sm:$0xff]  }
 0x22f   :  { %2589 = vst.msk [vmem:[#allocation3 + $0xc8] sm:$0xff] %vm1304_vm2, %v11699_v1  ;;  %9123 = vmatpush3.bf16.msra.mxu1 %v9784_v19  ;;  %2528 = vrot.lane.b32.xlu1 %v11555_v29, %s10361_s21  ;;  %v9808_v29 = vld [vmem:[%s13747_s3 + $0x70] sm:$0xff]  }
 0x230   :  { %2685 = vst.msk [vmem:[#allocation3 + $0xc8] sm:$0xff] %vm1401_vm3, %v10723_v22  ;;  %v2189_v26 = vpop.permute.xlu0 %2188  ;;  %9124 = vmatprep.subr.bf16.mxu1 %v9786_v38  ;;  %9090 = vmatprep.subr.bf16.mxu0 %v9804_v6  ;;  %v9809_v22 = vld [vmem:[%s13747_s3 + $0x30] sm:$0xff]  }
 0x231   :  { %2197 = vst.msk [vmem:[#allocation3 + $0x1a0] sm:$0xff] %vm1207_vm1, %v2189_v26  ;;  %v2697_v1 = vpop.permute.xlu1 %2696  ;;  %9091 = vmatpush3.bf16.msra.mxu0 %v9805_v42  ;;  %v9802_v19 = vld [vmem:[%s13747_s3 + $0xf0] sm:$0xff]  }
 0x232   :  { %2293 = vst.msk [vmem:[#allocation3 + $0x1a0] sm:$0xff] %vm1304_vm2, %v10727_v27  ;;  %2080 = vrot.lane.b32.xlu0 %v10922_v43, %s10360_s20  ;;  %9607 = vmatmul.mubr.msk.bf16.gmra.mrb[56].mxu1 %vm33_vm0, %v3144_v0  ;;  %v9791_v27 = vld [vmem:[%s13747_s3 + $0x98] sm:$0xff]   ;;  %v9794_v43 = vld [vmem:[%s13747_s3 + $0xe0] sm:$0xff]   ;;  %v3135_v38 = vld [vmem:[#allocation3 + $0x90] sm:$0xff] }
 0x233   :  { %2707 = vst.msk [vmem:[#allocation3 + $0x138] sm:$0xff] %vm1401_vm3, %v2697_v1  ;;  %2389 = vst.msk [vmem:[#allocation3 + $0x1a0] sm:$0xff] %vm1401_vm3, %v2381_v45  ;;  %9125 = vmatpush3.bf16.msra.mxu1 %v9787_v54  ;;  %2624 = vrot.lane.b32.xlu1 %v11565_v57, %s10359_s15  ;;  %v9810_v45 = vld [vmem:[%s13747_s3 + $0x78] sm:$0xff]   ;;  %v3845_v1 = vld [vmem:[#allocation3 + $0xf0] sm:$0xff] }
 0x234   :  { %4380 = vmatprep.mubr.bf16.mxu1 %v3846_v49  ;;  %v2995_v61 = vpop.permute.xlu0 %2994  ;;  %9126 = vmatprep.subr.bf16.mxu1 %v9790_v4  ;;  %v9811_v57 = vld [vmem:[%s13747_s3 + $0x38] sm:$0xff]   ;;  %v9813_v49 = vld [vmem:[%s13747_s3 + $0x100] sm:$0xff]  }
 0x235   :  { %3004 = vst.msk [vmem:[#allocation3 + $0x98] sm:$0xff] %vm1401_vm3, %v2995_v61  ;;  %v2603_v8 = vpop.permute.xlu1 %2602  ;;  %9092 = vmatprep.subr.bf16.mxu0 %v9808_v29  ;;  %v9825_v29 = vld [vmem:[%s13747_s3 + $0x188] sm:$0xff]   ;;  %v3843_v61 = vld [vmem:[#allocation3 + $0xe0] sm:$0xff] }
 0x236   :  { %2612 = vst.msk [vmem:[#allocation3 + $0x170] sm:$0xff] %vm1304_vm2, %v2603_v8  ;;  %2942 = vrot.lane.b32.xlu0 %v2839_v52, %s10359_s15  ;;  %9093 = vmatpush3.bf16.msra.mxu0 %v9809_v22  ;;  %v9798_v52 = vld [vmem:[%s13747_s3 + $0xe8] sm:$0xff]  }
 0x237   :  { %2708 = vst.msk [vmem:[#allocation3 + $0x170] sm:$0xff] %vm1401_vm3, %v11712_v2  ;;  %9127 = vmatpush3.bf16.msra.mxu1 %v9791_v27  ;;  %2720 = vrot.lane.b32.xlu1 %v11230_v31, %s10360_s20  ;;  %v9812_v2 = vld [vmem:[%s13747_s3 + $0x140] sm:$0xff]   ;;  %v11839_v31 = vld [vmem:[#allocation2 + $0x198] sm:$0xff]  ;;  %v3142_v54 = vld [vmem:[#allocation3 + $0xc8] sm:$0xff] }
 0x238   :  { %v2901_v9 = vpop.permute.xlu0 %2900  ;;  %9128 = vmatprep.subr.bf16.mxu1 %v9794_v43  ;;  %9094 = vmatprep.subr.bf16.mxu0 %v9810_v45  ;;  %v9814_v43 = vld [vmem:[%s13747_s3 + $0x148] sm:$0xff]   ;;  %v3851_v45 = vld [vmem:[#allocation3 + $0x120] sm:$0xff] }
 0x239   :  { %2909 = vst.msk [vmem:[#allocation3 + $0xd0] sm:$0xff] %vm1304_vm2, %v2901_v9  ;;  %v2509_v34 = vpop.permute.xlu1 %2508  ;;  %v9815_v9 = vld [vmem:[%s13747_s3 + $0x108] sm:$0xff]  }
 0x23a   :  { %3005 = vst.msk [vmem:[#allocation3 + $0xd0] sm:$0xff] %vm1401_vm3, %v11747_v59  ;;  %3038 = vrot.lane.b32.xlu0 %v11839_v31, %s10360_s20  ;;  %9095 = vmatpush3.bf16.msra.mxu0 %v9811_v57 }
 0x23b   :  { %2517 = vst.msk [vmem:[#allocation3 + $0x1a8] sm:$0xff] %vm1207_vm1, %v2509_v34  ;;  %9129 = vmatpush3.bf16.msra.mxu1 %v9795_v11  ;;  %1892 = vrot.lane.b32.xlu1 %v1881_v53, %s10361_s21  ;;  %v3852_v34 = vld [vmem:[#allocation3 + $0x128] sm:$0xff] }
 0x23c   :  { %2613 = vst.msk [vmem:[#allocation3 + $0x1a8] sm:$0xff] %vm1304_vm2, %v11724_v40  ;;  %v2281_v59 = vpop.permute.xlu0 %2280  ;;  %v3136_v60 = vld [vmem:[#allocation3 + $0x98] sm:$0xff]  ;;  %9130 = vmatprep.subr.bf16.mxu1 %v9798_v52  ;;  %9160 = vmatprep.subr.bf16.mxu0 %v9812_v2 }
 0x23d   :  { %2709 = vst.msk [vmem:[#allocation3 + $0x1a8] sm:$0xff] %vm1401_vm3, %v11165_v58  ;;  %v2825_v40 = vpop.permute.xlu1 %2824  ;;  %3735 = vmatprep.mubr.bf16.mxu0 %v3136_v60  ;;  %v9803_v58 = vld [vmem:[%s13747_s3 + $0xb0] sm:$0xff]  }
 0x23e   :  { %2291 = vst.msk [vmem:[#allocation3 + $0x130] sm:$0xff] %vm1304_vm2, %v2281_v59  ;;  %2210 = vrot.lane.b32.xlu0 %v11752_v62, %s10361_s21  ;;  %3736 = vmatmul.mubr.bf16.gmra.mrb[60].mxu0 %v3135_v38  ;;  %v9807_v62 = vld [vmem:[%s13747_s3 + $0xb8] sm:$0xff]  }
 0x23f   :  { %2387 = vst.msk [vmem:[#allocation3 + $0x130] sm:$0xff] %vm1401_vm3, %v11622_v39  ;;  %9131 = vmatpush3.bf16.msra.mxu1 %v9799_v25  ;;  %1988 = vrot.lane.b32.xlu1 %v11671_v18, %s10359_s15  ;;  %v9806_v39 = vld [vmem:[%s13747_s3 + $0xf8] sm:$0xff]   ;;  %v9816_v25 = vld [vmem:[%s13747_s3 + $0x150] sm:$0xff]  }
 0x240   :  { %2835 = vst.msk [vmem:[#allocation3 + $0x140] sm:$0xff] %vm1207_vm1, %v2825_v40  ;;  %v2187_v6 = vpop.permute.xlu0 %2186  ;;  %9132 = vmatprep.subr.bf16.mxu1 %v9802_v19  ;;  %v1179_v40 = vld [vmem:[#allocation2 + $0xc0] sm:$0xff] }
 0x241   :  { %2196 = vst.msk [vmem:[#allocation3 + $0x168] sm:$0xff] %vm1207_vm1, %v2187_v6  ;;  %v2823_v46 = vpop.permute.xlu1 %2822  ;;  %v3143_v28 = vld [vmem:[#allocation3 + $0xd0] sm:$0xff] }
 0x242   :  { %2292 = vst.msk [vmem:[#allocation3 + $0x168] sm:$0xff] %vm1304_vm2, %v11768_v47  ;;  %2306 = vrot.lane.b32.xlu0 %v11068_v3, %s10359_s15  ;;  %3743 = vmatprep.mubr.bf16.mxu0 %v3143_v28  ;;  %v9822_v47 = vld [vmem:[%s13747_s3 + $0x180] sm:$0xff]   ;;  %v3858_v28 = vld [vmem:[#allocation3 + $0x158] sm:$0xff] }
 0x243   :  { %2834 = vst.msk [vmem:[#allocation3 + $0x108] sm:$0xff] %vm1207_vm1, %v2823_v46  ;;  %9133 = vmatpush3.bf16.msra.mxu1 %v9803_v58  ;;  %2850 = vrot.lane.b32.xlu1 %v11839_v31, %s10361_s21  ;;  %v9817_v58 = vld [vmem:[%s13747_s3 + $0x110] sm:$0xff]   ;;  %v9818_v46 = vld [vmem:[%s13747_s3 + $0x158] sm:$0xff]  }
 0x244   :  { %2388 = vst.msk [vmem:[#allocation3 + $0x168] sm:$0xff] %vm1401_vm3, %v11594_v48  ;;  %v2919_v42 = vpop.permute.xlu0 %2918  ;;  %9134 = vmatprep.subr.bf16.mxu1 %v9806_v39  ;;  %v3844_v48 = vld [vmem:[#allocation3 + $0xe8] sm:$0xff]  ;;  %v3850_v39 = vld [vmem:[#allocation3 + $0x118] sm:$0xff] }
 0x245   :  { %2930 = vst.msk [vmem:[#allocation3 + $0x108] sm:$0xff] %vm1304_vm2, %v2919_v42  ;;  %v1439_v0 = vpop.permute.xlu1 %1438  ;;  %v9819_v42 = vld [vmem:[%s13747_s3 + $0x118] sm:$0xff]  }
 0x246   :  { %1450 = vst.msk [vmem:[#allocation3 + $0x1c0] sm:$0xff] %vm1401_vm3, %v1439_v0  ;;  %2402 = vrot.lane.b32.xlu0 %v11145_v10, %s10360_s20  ;;  %3744 = vmatmul.mubr.bf16.gmra.mrb[64].mxu0 %v3142_v54  ;;  %v3853_v10 = vld [vmem:[#allocation3 + $0x130] sm:$0xff]  ;;  %v3859_v0 = vld [vmem:[#allocation3 + $0x160] sm:$0xff] }
 0x247   :  { %9135 = vmatpush3.bf16.msra.mxu1 %v9807_v62  ;;  %2530 = vrot.lane.b32.xlu1 %v11159_v16, %s10361_s21  ;;  %v2616_v16 = vld [vmem:[#allocation2 + $0x168] sm:$0xff]  ;;  %1183 = vst.msk [vmem:[#allocation3 + $0x2a0] sm:$0xff] %vm33_vm0, %v1179_v40 }
 0x248   :  { %4315 = vmatprep.mubr.bf16.mxu0 %v3844_v48  ;;  %v1569_v26 = vpop.permute.xlu0 %1568  ;;  %9610 = vmatprep.subr.bf16.mxu1 %v9822_v47  ;;  %v9821_v48 = vld [vmem:[%s13747_s3 + $0x120] sm:$0xff]  }
 0x249   :  { %1579 = vst.msk [vmem:[#allocation3 + $0x200] sm:$0xff] %vm1207_vm1, %v1569_v26  ;;  %v2827_v4 = vpop.permute.xlu1 %2826 }
 0x24a   :  { %2836 = vst.msk [vmem:[#allocation3 + $0x178] sm:$0xff] %vm1207_vm1, %v2827_v4  ;;  %4381 = vmatmul.mubr.bf16.vlgmr.msra.gmra.mrb[60].mxu1 %v3845_v1  ;;  %2082 = vrot.lane.b32.xlu0 %v11671_v18, %s10360_s20  ;;  %v9836_v18 = vld [vmem:[%s13747_s3 + $0xc0] sm:$0xff]   ;;  %v3857_v4 = vld [vmem:[#allocation3 + $0x150] sm:$0xff] }
 0x24b   :  { %4388 = vmatprep.mubr.bf16.mxu1 %v3853_v10  ;;  %2626 = vrot.lane.b32.xlu1 %v2616_v16, %s10359_s15  ;;  %v3860_v60 = vld [vmem:[#allocation3 + $0x168] sm:$0xff]  ;;  %v3865_v1 = vld [vmem:[#allocation3 + $0x190] sm:$0xff] }
 0x24c   :  { %v11901_v22 = vpop.permute.xlu0 %3016  ;;  %9611 = vmatpush3.bf16.msra.mxu1 %v9822_v47  ;;  %v9824_v10 = vld [vmem:[%s13747_s3 + $0x128] sm:$0xff]  }
 0x24d   :  { %v1247_v27 = vpop.permute.xlu1 %1246  ;;  %9612 = vmatprep.subr.bf16.mxu1 %v9825_v29 }
 0x24e   :  { %1257 = vst.msk [vmem:[#allocation3 + $0x1f8] sm:$0xff] %vm1207_vm1, %v1247_v27  ;;  %2944 = vrot.lane.b32.xlu0 %v11839_v31, %s10359_s15  ;;  %4316 = vmatmul.mubr.bf16.vlgmr.msra.gmra.mrb[68].mxu0 %v3843_v61  ;;  %v11923_v31 = vld [vmem:[#allocation2 + $0x1a0] sm:$0xff]  ;;  %v3849_v27 = vld [vmem:[#allocation3 + $0x110] sm:$0xff] }
 0x24f   :  { %v8970_v8 = vpop.f32.mrb[36].mxu0  ;;  %2722 = vrot.lane.b32.xlu1 %v11237_v32, %s10360_s20  ;;  %4323 = vmatprep.mubr.bf16.mxu0 %v3851_v45  ;;  %v1357_v61 = vld [vmem:[#allocation2 + $0xd0] sm:$0xff] }
 0x250   :  { %v8971_v57 = vpop.f32.mrb[37].mxu0  ;;  %9161 = vmatpush3.bf16.msra.mxu0 %v9813_v49  ;;  %v2923_v11 = vpop.permute.xlu0 %2922  ;;  %9613 = vmatpush3.bf16.msra.mxu1 %v9825_v29  ;;  %v9826_v49 = vld [vmem:[%s13747_s3 + $0x170] sm:$0xff]  }
 0x251   :  { %v11920_v53 = vadd.f32 %v8971_v57, %v8970_v8  ;;  %v8973_v52 = vpop.f32.mrb[38].mxu0  ;;  %2932 = vst.msk [vmem:[#allocation3 + $0x178] sm:$0xff] %vm1304_vm2, %v2923_v11  ;;  %v1344_v2 = vpop.permute.xlu1 %1343  ;;  %9162 = vmatprep.subr.bf16.mxu0 %v9814_v43  ;;  %9246 = vmatprep.subr.bf16.mxu1 %v9836_v18  ;;  %v9827_v18 = vld [vmem:[%s13747_s3 + $0x130] sm:$0xff]   ;;  %v3864_v8 = vld [vmem:[#allocation3 + $0x188] sm:$0xff]  ;;  %v9828_v57 = vld [vmem:[%s13747_s3 + $0x178] sm:$0xff]  }
 0x252   :  { %1354 = vst.msk [vmem:[#allocation3 + $0x1f8] sm:$0xff] %vm1304_vm2, %v1344_v2  ;;  %v8974_v59 = vpop.f32.mrb[39].mxu0  ;;  %4389 = vmatmul.mubr.bf16.gmra.mrb[64].mxu1 %v3852_v34  ;;  %3040 = vrot.lane.b32.xlu0 %v11923_v31, %s10360_s20  ;;  %v3856_v34 = vld [vmem:[#allocation3 + $0x148] sm:$0xff] }
 0x253   :  { %v11931_v19 = vadd.f32 %v8974_v59, %v8973_v52  ;;  %4396 = vmatprep.mubr.bf16.mxu1 %v3860_v60  ;;  %2532 = vrot.lane.b32.xlu1 %v2616_v16, %s10361_s21  ;;  %v9837_v52 = vld [vmem:[%s13747_s3 + $0x80] sm:$0xff]   ;;  %v9840_v59 = vld [vmem:[%s13747_s3 + $0xc8] sm:$0xff]  }
 0x254   :  { %9163 = vmatpush3.bf16.msra.mxu0 %v9815_v9  ;;  %v2829_v38 = vpop.permute.xlu0 %2828  ;;  %v9829_v9 = vld [vmem:[%s13747_s3 + $0x138] sm:$0xff]   ;;  %v3863_v60 = vld [vmem:[#allocation3 + $0x180] sm:$0xff] }
 0x255   :  { %2837 = vst.msk [vmem:[#allocation3 + $0x1b0] sm:$0xff] %vm1207_vm1, %v2829_v38  ;;  %v1441_v6 = vpop.permute.xlu1 %1440  ;;  %9164 = vmatprep.subr.bf16.mxu0 %v9816_v25  ;;  %v9830_v25 = vld [vmem:[%s13747_s3 + $0x40] sm:$0xff]  }
 0x256   :  { %1451 = vst.msk [vmem:[#allocation3 + $0x1f8] sm:$0xff] %vm1401_vm3, %v1441_v6  ;;  %2212 = vrot.lane.b32.xlu0 %v11068_v3, %s10361_s21  ;;  %4324 = vmatmul.mubr.bf16.gmra.mrb[72].mxu0 %v3850_v39  ;;  %v9820_v3 = vld [vmem:[%s13747_s3 + $0x160] sm:$0xff]   ;;  %v9832_v6 = vld [vmem:[%s13747_s3 + $0x48] sm:$0xff]  }
 0x257   :  { %2628 = vrot.lane.b32.xlu1 %v11237_v32, %s10359_s15  ;;  %4331 = vmatprep.mubr.bf16.mxu0 %v3858_v28  ;;  %v3867_v32 = vld [vmem:[#allocation3 + $0x1a0] sm:$0xff]  ;;  %v9841_v39 = vld [vmem:[%s13747_s3 + $0x88] sm:$0xff]   ;;  %v9844_v28 = vld [vmem:[%s13747_s3 + $0xd0] sm:$0xff]  }
 0x258   :  { %9165 = vmatpush3.bf16.msra.mxu0 %v9817_v58  ;;  %v3015_v62 = vpop.permute.xlu0 %3014  ;;  %v9831_v38 = vld [vmem:[%s13747_s3] sm:$0xff]  }
 0x259   :  { %3026 = vst.msk [vmem:[#allocation3 + $0x108] sm:$0xff] %vm1401_vm3, %v3015_v62  ;;  %v1249_v47 = vpop.permute.xlu1 %1248  ;;  %9166 = vmatprep.subr.bf16.mxu0 %v9818_v46  ;;  %v3847_v46 = vld [vmem:[#allocation3 + $0x100] sm:$0xff]  ;;  %v12032_v62 = vld [vmem:[#allocation2 + $0x1b8] sm:$0xff] }
 0x25a   :  { %1258 = vst.msk [vmem:[#allocation3 + $0x230] sm:$0xff] %vm1207_vm1, %v1249_v47  ;;  %4397 = vmatmul.mubr.bf16.gmra.mrb[68].mxu1 %v3859_v0  ;;  %2308 = vrot.lane.b32.xlu0 %v11452_v35, %s10359_s15  ;;  %v9823_v35 = vld [vmem:[%s13747_s3 + $0x168] sm:$0xff]   ;;  %v3870_v0 = vld [vmem:[#allocation3 + $0x1b8] sm:$0xff] }
 0x25b   :  { %4404 = vmatprep.mubr.bf16.mxu1 %v3867_v32  ;;  %2724 = vrot.lane.b32.xlu1 %v11578_v50, %s10360_s20  ;;  %v1260_v50 = vld [vmem:[#allocation2 + $0xc8] sm:$0xff]  ;;  %3101 = vst.msk [vmem:[#allocation3 + $0x298] sm:$0xff] %vm33_vm0, %v12032_v62  ;;  %v9834_v32 = vld [vmem:[%s13747_s3 + $0x50] sm:$0xff]  }
 0x25c   :  { %9167 = vmatpush3.bf16.msra.mxu0 %v9819_v42  ;;  %v2921_v54 = vpop.permute.xlu0 %2920 }
 0x25d   :  { %2931 = vst.msk [vmem:[#allocation3 + $0x140] sm:$0xff] %vm1304_vm2, %v2921_v54  ;;  %v1346_v26 = vpop.permute.xlu1 %1345  ;;  %9168 = vmatprep.subr.bf16.mxu0 %v9820_v3  ;;  %v9845_v54 = vld [vmem:[%s13747_s3 + $0x90] sm:$0xff]  }
 0x25e   :  { %3027 = vst.msk [vmem:[#allocation3 + $0x140] sm:$0xff] %vm1401_vm3, %v11901_v22  ;;  %2404 = vrot.lane.b32.xlu0 %v11161_v17, %s10360_s20  ;;  %4332 = vmatmul.mubr.bf16.gmra.mrb[76].mxu0 %v3857_v4  ;;  %v3866_v22 = vld [vmem:[#allocation3 + $0x198] sm:$0xff]  ;;  %v9835_v4 = vld [vmem:[%s13747_s3 + $0x10] sm:$0xff]  }
 0x25f   :  { %1355 = vst.msk [vmem:[#allocation3 + $0x230] sm:$0xff] %vm1304_vm2, %v1346_v26  ;;  %1268 = vrot.lane.b32.xlu1 %v1260_v50, %s10361_s21  ;;  %4339 = vmatprep.mubr.bf16.mxu0 %v3865_v1  ;;  %v9838_v50 = vld [vmem:[%s13747_s3 + $0x58] sm:$0xff]  }
 0x260   :  { %9169 = vmatpush3.bf16.msra.mxu0 %v9821_v48  ;;  %v1665_v29 = vpop.permute.xlu0 %1664  ;;  %v9848_v48 = vld [vmem:[%s13747_s3 + $0xd8] sm:$0xff]  }
 0x261   :  { %1675 = vst.msk [vmem:[#allocation3 + $0x200] sm:$0xff] %vm1304_vm2, %v1665_v29  ;;  %v1443_v16 = vpop.permute.xlu1 %1442  ;;  %9170 = vmatprep.subr.bf16.mxu0 %v9823_v35  ;;  %v9849_v1 = vld [vmem:[%s13747_s3 + $0x98] sm:$0xff]  }
 0x262   :  { %1452 = vst.msk [vmem:[#allocation3 + $0x230] sm:$0xff] %vm1401_vm3, %v1443_v16  ;;  %4405 = vmatmul.mubr.bf16.gmra.mrb[72].mxu1 %v3866_v22  ;;  %2084 = vrot.lane.b32.xlu0 %v10954_v55, %s10360_s20  ;;  %v3848_v55 = vld [vmem:[#allocation3 + $0x108] sm:$0xff]  ;;  %v3854_v29 = vld [vmem:[#allocation3 + $0x138] sm:$0xff]  ;;  %v1582_v22 = vld [vmem:[#allocation2 + $0x100] sm:$0xff] }
 0x263   :  { %9614 = vmatprep.mubr.msk.bf16.mxu1 %vm33_vm0, %v3849_v27  ;;  %1365 = vrot.lane.b32.xlu1 %v1357_v61, %s10359_s15  ;;  %v9839_v27 = vld [vmem:[%s13747_s3 + $0x18] sm:$0xff]  }
 0x264   :  { %9171 = vmatpush3.bf16.msra.mxu0 %v9824_v10  ;;  %v3021_v43 = vpop.permute.xlu0 %3020  ;;  %v9852_v10 = vld [vmem:[%s13747_s3 + $0xe0] sm:$0xff]  }
 0x265   :  { %v1887_v45 = vpop.permute.xlu1 %1886  ;;  %9172 = vmatprep.subr.bf16.mxu0 %v9826_v49  ;;  %v3855_v42 = vld [vmem:[#allocation3 + $0x140] sm:$0xff] }
 0x266   :  { %1898 = vst.msk [vmem:[#allocation3 + $0x1d0] sm:$0xff] %vm1207_vm1, %v1887_v45  ;;  %2946 = vrot.lane.b32.xlu0 %v11923_v31, %s10359_s15  ;;  %4340 = vmatmul.mubr.bf16.gmra.mrb[80].mxu0 %v3864_v8  ;;  %v1678_v8 = vld [vmem:[#allocation2 + $0x108] sm:$0xff] }
 0x267   :  { %1462 = vrot.lane.b32.xlu1 %v10974_v5, %s10360_s20  ;;  %4445 = vmatprep.mubr.bf16.mxu0 %v3848_v55 }
 0x268   :  { %9173 = vmatpush3.bf16.msra.mxu0 %v9827_v18  ;;  %v3019_v11 = vpop.permute.xlu0 %3018  ;;  %v9856_v18 = vld [vmem:[%s13747_s3 + $0xe8] sm:$0xff]  }
 0x269   :  { %3028 = vst.msk [vmem:[#allocation3 + $0x178] sm:$0xff] %vm1401_vm3, %v3019_v11  ;;  %v1573_v2 = vpop.permute.xlu1 %1572  ;;  %9174 = vmatprep.subr.bf16.mxu0 %v9828_v57  ;;  %v9843_v57 = vld [vmem:[%s13747_s3 + $0x20] sm:$0xff]   ;;  %v9846_v11 = vld [vmem:[%s13747_s3 + $0x68] sm:$0xff]  }
 0x26a   :  { %1581 = vst.msk [vmem:[#allocation3 + $0x270] sm:$0xff] %vm1207_vm1, %v1573_v2  ;;  %9615 = vmatmul.mubr.msk.bf16.vlgmr.msra.gmra.mrb[76].mxu1 %vm33_vm0, %v3856_v34  ;;  %3042 = vrot.lane.b32.xlu0 %v11606_v51, %s10360_s20  ;;  %v3861_v2 = vld [vmem:[#allocation3 + $0x170] sm:$0xff] }
 0x26b   :  { %9618 = vmatprep.mubr.msk.bf16.mxu1 %vm33_vm0, %v3863_v60  ;;  %1270 = vrot.lane.b32.xlu1 %v1357_v61, %s10361_s21  ;;  %v9858_v34 = vld [vmem:[%s13747_s3 + $0xf0] sm:$0xff]   ;;  %v9847_v60 = vld [vmem:[%s13747_s3 + $0x28] sm:$0xff]  }
 0x26c   :  { %9175 = vmatpush3.bf16.msra.mxu0 %v9829_v9  ;;  %v2925_v40 = vpop.permute.xlu0 %2924  ;;  %9247 = vmatpush3.bf16.msra.mxu1 %v9837_v52  ;;  %v9857_v9 = vld [vmem:[%s13747_s3 + $0xa8] sm:$0xff]   ;;  %v1505_v52 = vld [vmem:[#allocation2 + $0xf8] sm:$0xff] }
 0x26d   :  { %2933 = vst.msk [vmem:[#allocation3 + $0x1b0] sm:$0xff] %vm1304_vm2, %v2925_v40  ;;  %v12018_v58 = vpop.permute.xlu1 %2398  ;;  %9206 = vmatprep.subr.bf16.mxu0 %v9830_v25  ;;  %9248 = vmatprep.subr.bf16.mxu1 %v9840_v59 }
 0x26e   :  { %3029 = vst.msk [vmem:[#allocation3 + $0x1b0] sm:$0xff] %vm1401_vm3, %v3021_v43  ;;  %2852 = vrot.lane.b32.xlu0 %v11923_v31, %s10361_s21  ;;  %v9833_v31 = vld [vmem:[%s13747_s3 + $0x8] sm:$0xff]   ;;  %v9842_v43 = vld [vmem:[%s13747_s3 + $0x60] sm:$0xff]  }
 0x26f   :  { %1367 = vrot.lane.b32.xlu1 %v10974_v5, %s10359_s15  ;;  %4446 = vmatmul.mubr.bf16.vlgmr.msra.gmra.mrb[84].mxu0 %v3847_v46  ;;  %1509 = vst.msk [vmem:[#allocation3 + $0x350] sm:$0xff] %vm33_vm0, %v1505_v52  ;;  %v9860_v46 = vld [vmem:[%s13747_s3 + $0xf8] sm:$0xff]   ;;  %v9864_v52 = vld [vmem:[%s13747_s3 + $0x148] sm:$0xff]  }
 0x270   :  { %4453 = vmatprep.mubr.bf16.mxu0 %v3855_v42  ;;  %9207 = vmatpush3.bf16.msra.mxu0 %v9831_v38  ;;  %v1761_v47 = vpop.permute.xlu0 %1760  ;;  %v3862_v16 = vld [vmem:[#allocation3 + $0x178] sm:$0xff] }
 0x271   :  { %1771 = vst.msk [vmem:[#allocation3 + $0x200] sm:$0xff] %vm1401_vm3, %v1761_v47  ;;  %v1669_v3 = vpop.permute.xlu1 %1668  ;;  %9208 = vmatprep.subr.bf16.mxu0 %v9832_v6  ;;  %9249 = vmatpush3.bf16.msra.mxu1 %v9841_v39  ;;  %v9850_v6 = vld [vmem:[%s13747_s3 + $0x70] sm:$0xff]  }
 0x272   :  { %1677 = vst.msk [vmem:[#allocation3 + $0x270] sm:$0xff] %vm1304_vm2, %v1669_v3  ;;  %2948 = vrot.lane.b32.xlu0 %v11606_v51, %s10359_s15  ;;  %9250 = vmatprep.subr.bf16.mxu1 %v9844_v28  ;;  %v3033_v51 = vld [vmem:[#allocation2 + $0x1b0] sm:$0xff] }
 0x273   :  { %1464 = vrot.lane.b32.xlu1 %v10989_v21, %s10360_s20  ;;  %9619 = vmatmul.mubr.msk.bf16.gmra.mrb[80].mxu1 %vm33_vm0, %v3870_v0  ;;  %v1998_v0 = vld [vmem:[#allocation2 + $0x140] sm:$0xff]  ;;  %v9851_v3 = vld [vmem:[%s13747_s3 + $0x30] sm:$0xff]  }
 0x274   :  { %9209 = vmatpush3.bf16.msra.mxu0 %v9833_v31  ;;  %v1571_v26 = vpop.permute.xlu0 %1570 }
 0x275   :  { %1580 = vst.msk [vmem:[#allocation3 + $0x238] sm:$0xff] %vm1207_vm1, %v1571_v26  ;;  %v12061_v35 = vpop.permute.xlu1 %1347  ;;  %9210 = vmatprep.subr.bf16.mxu0 %v9834_v32  ;;  %9251 = vmatpush3.bf16.msra.mxu1 %v9845_v54  ;;  %v3869_v25 = vld [vmem:[#allocation3 + $0x1b0] sm:$0xff]  ;;  %v9861_v26 = vld [vmem:[%s13747_s3 + $0xb8] sm:$0xff]  }
 0x276   :  { %3044 = vrot.lane.b32.xlu0 %v3033_v51, %s10360_s20  ;;  %9252 = vmatprep.subr.bf16.mxu1 %v9848_v48  ;;  %v9854_v48 = vld [vmem:[%s13747_s3 + $0x78] sm:$0xff]   ;;  %v12150_v51 = vld [vmem:[%s13747_s3 + $0x180] sm:$0xff]  }
 0x277   :  { %1272 = vrot.lane.b32.xlu1 %v10974_v5, %s10361_s21  ;;  %4454 = vmatmul.mubr.bf16.gmra.mrb[88].mxu0 %v3854_v29  ;;  %v9853_v5 = vld [vmem:[%s13747_s3 + $0xa0] sm:$0xff]  }
 0x278   :  { %4461 = vmatprep.mubr.bf16.mxu0 %v3862_v16  ;;  %9211 = vmatpush3.bf16.msra.mxu0 %v9835_v4  ;;  %v1667_v49 = vpop.permute.xlu0 %1666  ;;  %v3868_v4 = vld [vmem:[#allocation3 + $0x1a8] sm:$0xff]  ;;  %v9862_v16 = vld [vmem:[%s13747_s3 + $0x140] sm:$0xff]  }
 0x279   :  { %1676 = vst.msk [vmem:[#allocation3 + $0x238] sm:$0xff] %vm1304_vm2, %v1667_v49  ;;  %v12079_v61 = vpop.permute.xlu1 %1444  ;;  %9212 = vmatprep.subr.bf16.mxu0 %v9838_v50  ;;  %9253 = vmatpush3.bf16.msra.mxu1 %v9849_v1  ;;  %v4568_v50 = vld [vmem:[#allocation3 + $0x1c8] sm:$0xff]  ;;  %v12167_v49 = vld [vmem:[%s13748_s4] ss:$0 sm:$0xff] }
 0x27a   :  { %1590 = vrot.lane.b32.xlu0 %v1582_v22, %s10361_s21  ;;  %9254 = vmatprep.subr.bf16.mxu1 %v9852_v10 }
 0x27b   :  { %1369 = vrot.lane.b32.xlu1 %v10989_v21, %s10359_s15 }
 0x27c   :  { %9213 = vmatpush3.bf16.msra.mxu0 %v9839_v27  ;;  %v1763_v45 = vpop.permute.xlu0 %1762 }
 0x27d   :  { %1772 = vst.msk [vmem:[#allocation3 + $0x238] sm:$0xff] %vm1401_vm3, %v1763_v45  ;;  %v1889_v55 = vpop.permute.xlu1 %1888  ;;  %9214 = vmatprep.subr.bf16.mxu0 %v9842_v43  ;;  %9255 = vmatpush3.bf16.msra.mxu1 %v9853_v5 }
 0x27e   :  { %1899 = vst.msk [vmem:[#allocation3 + $0x208] sm:$0xff] %vm1207_vm1, %v1889_v55  ;;  %1686 = vrot.lane.b32.xlu0 %v1678_v8, %s10359_s15  ;;  %9256 = vmatprep.subr.bf16.mxu1 %v9856_v18 }
 0x27f   :  { %1466 = vrot.lane.b32.xlu1 %v11076_v7, %s10360_s20  ;;  %4462 = vmatmul.mubr.bf16.gmra.mrb[92].mxu0 %v3861_v2  ;;  %v9859_v7 = vld [vmem:[%s13747_s3 + $0xb0] sm:$0xff]   ;;  %v3592_v2 = vadd.f32 %v11920_v53, %v12167_v49  ;;  %v4575_v53 = vld [vmem:[#allocation3 + $0x200] sm:$0xff] }
 0x280   :  { %4469 = vmatprep.mubr.bf16.mxu0 %v3869_v25  ;;  %9215 = vmatpush3.bf16.msra.mxu0 %v9843_v57  ;;  %v2207_v59 = vpop.permute.xlu0 %2206 }
 0x281   :  { %2218 = vst.msk [vmem:[#allocation3 + $0x1d8] sm:$0xff] %vm1207_vm1, %v2207_v59  ;;  %v1985_v40 = vpop.permute.xlu1 %1984  ;;  %v8976_v38 = vpop.f32.mrb[40].mxu0  ;;  %9216 = vmatprep.subr.bf16.mxu0 %v9846_v11  ;;  %9257 = vmatpush3.bf16.msra.mxu1 %v9857_v9  ;;  %v4567_v59 = vld [vmem:[#allocation3 + $0x1c0] sm:$0xff] }
 0x282   :  { %1995 = vst.msk [vmem:[#allocation3 + $0x208] sm:$0xff] %vm1304_vm2, %v1985_v40  ;;  %v8977_v39 = vpop.f32.mrb[41].mxu0  ;;  %1782 = vrot.lane.b32.xlu0 %v11088_v15, %s10360_s20  ;;  %9258 = vmatprep.subr.bf16.mxu1 %v9858_v34 }
 0x283   :  { %v12127_v28 = vadd.f32 %v8977_v39, %v8976_v38  ;;  %1910 = vrot.lane.b32.xlu1 %v11093_v20, %s10361_s21  ;;  %v8979_v42 = vpop.f32.mrb[42].mxu0 }
 0x284   :  { %9217 = vmatpush3.bf16.msra.mxu0 %v9847_v60  ;;  %v8980_v47 = vpop.f32.mrb[43].mxu0  ;;  %v2303_v31 = vpop.permute.xlu0 %2302 }
 0x285   :  { %v12134_v32 = vadd.f32 %v8980_v47, %v8979_v42  ;;  %2314 = vst.msk [vmem:[#allocation3 + $0x1d8] sm:$0xff] %vm1304_vm2, %v2303_v31  ;;  %v2847_v54 = vpop.permute.xlu1 %2846  ;;  %9218 = vmatprep.subr.bf16.mxu0 %v9850_v6  ;;  %9259 = vmatpush3.bf16.msra.mxu1 %v9859_v7  ;;  %v9865_v7 = vld [vmem:[%s13747_s3 + $0x108] sm:$0xff]   ;;  %v9868_v47 = vld [vmem:[%s13747_s3 + $0x158] sm:$0xff]  }
 0x286   :  { %2410 = vst.msk [vmem:[#allocation3 + $0x1d8] sm:$0xff] %vm1401_vm3, %v12018_v58  ;;  %1592 = vrot.lane.b32.xlu0 %v1678_v8, %s10361_s21  ;;  %9260 = vmatprep.subr.bf16.mxu1 %v9860_v46  ;;  %v9855_v58 = vld [vmem:[%s13747_s3 + $0x38] sm:$0xff]   ;;  %v9863_v8 = vld [vmem:[%s13747_s3 + $0x100] sm:$0xff]   ;;  %v9867_v46 = vld [vmem:[%s13747_s3 + $0x110] sm:$0xff]  }
 0x287   :  { %2858 = vst.msk [vmem:[#allocation3 + $0x1e8] sm:$0xff] %vm1207_vm1, %v2847_v54  ;;  %2006 = vrot.lane.b32.xlu1 %v1998_v0, %s10359_s15  ;;  %4470 = vmatmul.mubr.bf16.gmra.mrb[96].mxu0 %v3868_v4  ;;  %v9881_v31 = vld [vmem:[%s13747_s3 + $0x188] sm:$0xff]   ;;  %v9869_v54 = vld [vmem:[%s13747_s3 + $0x118] sm:$0xff]  }
 0x288   :  { %9219 = vmatpush3.bf16.msra.mxu0 %v9851_v3  ;;  %5039 = vmatprep.mubr.bf16.mxu0 %v4568_v50  ;;  %v1983_v1 = vpop.permute.xlu0 %1982  ;;  %v9872_v50 = vld [vmem:[%s13747_s3 + $0x168] sm:$0xff]  }
 0x289   :  { %1994 = vst.msk [vmem:[#allocation3 + $0x1d0] sm:$0xff] %vm1304_vm2, %v1983_v1  ;;  %v2527_v29 = vpop.permute.xlu1 %2526  ;;  %v8982_v10 = vpop.f32.mrb[44].mxu0  ;;  %9220 = vmatprep.subr.bf16.mxu0 %v9854_v48  ;;  %9261 = vmatpush3.bf16.msra.mxu1 %v9861_v26  ;;  %v9871_v26 = vld [vmem:[%s13747_s3 + $0x120] sm:$0xff]   ;;  %v4581_v1 = vld [vmem:[#allocation3 + $0x230] sm:$0xff] }
 0x28a   :  { %2538 = vst.msk [vmem:[#allocation3 + $0x1e0] sm:$0xff] %vm1207_vm1, %v2527_v29  ;;  %v8983_v22 = vpop.f32.mrb[45].mxu0  ;;  %1688 = vrot.lane.b32.xlu0 %v11088_v15, %s10359_s15  ;;  %9622 = vmatprep.subr.bf16.mxu1 %v12150_v51 }
 0x28b   :  { %v12169_v27 = vadd.f32 %v8983_v22, %v8982_v10  ;;  %1596 = vrot.lane.b32.xlu1 %v11096_v23, %s10361_s21  ;;  %v8985_v43 = vpop.f32.mrb[46].mxu0  ;;  %v9873_v10 = vld [vmem:[%s13747_s3 + $0x128] sm:$0xff]  }
 0x28c   :  { %v9010_v5 = vpop.f32.mrb[36].mxu1  ;;  %9221 = vmatpush3.bf16.msra.mxu0 %v9855_v58  ;;  %v8986_v18 = vpop.f32.mrb[47].mxu0 }
 0x28d   :  { %v1251_v45 = vpop.permute.xlu0 %1250  ;;  %v12176_v57 = vadd.f32 %v8986_v18, %v8985_v43  ;;  %v9011_v55 = vpop.f32.mrb[37].mxu1  ;;  %v4570_v9 = vld [vmem:[#allocation3 + $0x1d8] sm:$0xff]  ;;  %9286 = vmatprep.subr.bf16.mxu0 %v9862_v16 }
 0x28e   :  { %1259 = vst.msk [vmem:[#allocation3 + $0x268] sm:$0xff] %vm1207_vm1, %v1251_v45  ;;  %v2623_v11 = vpop.permute.xlu1 %2622  ;;  %v9012_v34 = vadd.f32 %v9011_v55, %v9010_v5  ;;  %v9013_v25 = vpop.f32.mrb[38].mxu1  ;;  %1784 = vrot.lane.b32.xlu0 %v11096_v23, %s10360_s20  ;;  %5104 = vmatprep.mubr.bf16.mxu1 %v4570_v9  ;;  %v9875_v55 = vld [vmem:[%s13747_s3 + $0x130] sm:$0xff]  }
 0x28f   :  { %1356 = vst.msk [vmem:[#allocation3 + $0x268] sm:$0xff] %vm1304_vm2, %v12061_v35  ;;  %2634 = vst.msk [vmem:[#allocation3 + $0x1e0] sm:$0xff] %vm1304_vm2, %v2623_v11  ;;  %v9014_v60 = vpop.f32.mrb[39].mxu1  ;;  %1274 = vrot.lane.b32.xlu1 %v10989_v21, %s10361_s21  ;;  %5040 = vmatmul.mubr.bf16.vlgmr.msra.gmra.mrb[100].mxu0 %v4567_v59  ;;  %v3595_v35 = vadd.f32 %v11931_v19, %v12167_v49  ;;  %v9866_v21 = vld [vmem:[%s13747_s3 + $0x150] sm:$0xff]   ;;  %v9877_v59 = vld [vmem:[%s13747_s3 + $0x138] sm:$0xff]  }
 0x290   :  { %1453 = vst.msk [vmem:[#allocation3 + $0x268] sm:$0xff] %vm1401_vm3, %v12079_v61  ;;  %v12195_v40 = vadd.f32 %v9012_v34, %v3592_v2  ;;  %v9015_v38 = vadd.f32 %v9014_v60, %v9013_v25  ;;  %5047 = vmatprep.mubr.bf16.mxu0 %v4575_v53  ;;  %9287 = vmatpush3.bf16.msra.mxu0 %v9863_v8 }
 0x291   :  { %v2079_v6 = vpop.permute.xlu0 %2078  ;;  %9288 = vmatprep.subr.bf16.mxu0 %v9864_v52  ;;  %v9876_v52 = vld [vmem:[%s13747_s3 + $0x178] sm:$0xff]  }
 0x292   :  { %2090 = vst.msk [vmem:[#allocation3 + $0x1d0] sm:$0xff] %vm1401_vm3, %v2079_v6  ;;  %v2719_v61 = vpop.permute.xlu1 %2718  ;;  %v12204_v39 = vadd.f32 %v9015_v38, %v3595_v35  ;;  %1594 = vrot.lane.b32.xlu0 %v11088_v15, %s10361_s21  ;;  %v4574_v15 = vld [vmem:[#allocation3 + $0x1f8] sm:$0xff] }
 0x293   :  { %2730 = vst.msk [vmem:[#allocation3 + $0x1e0] sm:$0xff] %vm1401_vm3, %v2719_v61  ;;  %1371 = vrot.lane.b32.xlu1 %v11182_v30, %s10359_s15  ;;  %v4582_v30 = vld [vmem:[#allocation3 + $0x238] sm:$0xff]  ;;  %v9880_v61 = vld [vmem:[%s13747_s3] sm:$0xff]  }
 0x294   :  { %9289 = vmatpush3.bf16.msra.mxu0 %v9865_v7  ;;  %v1904_v7 = vld [vmem:[#allocation2 + $0x130] sm:$0xff] }
 0x295   :  { %v1765_v19 = vpop.permute.xlu0 %1764  ;;  %9290 = vmatprep.subr.bf16.mxu0 %v9866_v21 }
 0x296   :  { %1773 = vst.msk [vmem:[#allocation3 + $0x270] sm:$0xff] %vm1401_vm3, %v1765_v19  ;;  %v1891_v42 = vpop.permute.xlu1 %1890  ;;  %1690 = vrot.lane.b32.xlu0 %v11096_v23, %s10359_s15  ;;  %v9882_v19 = vld [vmem:[%s13747_s3 + $0x48] sm:$0xff]  }
 0x297   :  { %1900 = vst.msk [vmem:[#allocation3 + $0x240] sm:$0xff] %vm1207_vm1, %v1891_v42  ;;  %1468 = vrot.lane.b32.xlu1 %v11187_v33, %s10360_s20  ;;  %5048 = vmatmul.mubr.bf16.gmra.mrb[104].mxu0 %v4574_v15  ;;  %v9870_v33 = vld [vmem:[%s13747_s3 + $0x160] sm:$0xff]   ;;  %v4588_v2 = vld [vmem:[#allocation3 + $0x268] sm:$0xff] }
 0x298   :  { %5055 = vmatprep.mubr.bf16.mxu0 %v4582_v30  ;;  %9291 = vmatpush3.bf16.msra.mxu0 %v9867_v46  ;;  %v9884_v30 = vld [vmem:[%s13747_s3 + $0x50] sm:$0xff]  }
 0x299   :  { %v2209_v0 = vpop.permute.xlu0 %2208  ;;  %v4569_v3 = vld [vmem:[#allocation3 + $0x1d0] sm:$0xff]  ;;  %9292 = vmatprep.subr.bf16.mxu0 %v9868_v47  ;;  %v2782_v47 = vld [vmem:[#allocation2 + $0x1c0] sm:$0xff] }
 0x29a   :  { %2219 = vst.msk [vmem:[#allocation3 + $0x210] sm:$0xff] %vm1207_vm1, %v2209_v0  ;;  %v1987_v23 = vpop.permute.xlu1 %1986  ;;  %5105 = vmatmul.mubr.bf16.vlgmr.msra.gmra.mrb[84].mxu1 %v4569_v3  ;;  %1786 = vrot.lane.b32.xlu0 %v11093_v20, %s10360_s20  ;;  %v4571_v42 = vld [vmem:[#allocation3 + $0x1e0] sm:$0xff]  ;;  %v12325_v0 = vld [vmem:[#allocation2 + $0x168] sm:$0xff]  ;;  %v9885_v3 = vld [vmem:[%s13747_s3 + $0x10] sm:$0xff]  }
 0x29b   :  { %1996 = vst.msk [vmem:[#allocation3 + $0x240] sm:$0xff] %vm1304_vm2, %v1987_v23  ;;  %9623 = vmatpush3.bf16.msra.mxu1 %v12150_v51  ;;  %1912 = vrot.lane.b32.xlu1 %v11194_v36, %s10361_s21  ;;  %v9896_v51 = vld [vmem:[%s13747_s3 + $0xc0] sm:$0xff]   ;;  %v9886_v23 = vld [vmem:[%s13747_s3 + $0x58] sm:$0xff]  }
 0x29c   :  { %9624 = vmatprep.subr.bf16.mxu1 %v9881_v31  ;;  %9293 = vmatpush3.bf16.msra.mxu0 %v9869_v54  ;;  %2786 = vst.msk [vmem:[#allocation3 + $0x2c8] sm:$0xff] %vm33_vm0, %v2782_v47  ;;  %v9895_v47 = vld [vmem:[%s13747_s3 + $0x38] sm:$0xff]  }
 0x29d   :  { %v2305_v48 = vpop.permute.xlu0 %2304  ;;  %9294 = vmatprep.subr.bf16.mxu0 %v9870_v33  ;;  %v4589_v58 = vld [vmem:[#allocation3 + $0x270] sm:$0xff] }
 0x29e   :  { %2315 = vst.msk [vmem:[#allocation3 + $0x210] sm:$0xff] %vm1304_vm2, %v2305_v48  ;;  %v2849_v4 = vpop.permute.xlu1 %2848  ;;  %2230 = vrot.lane.b32.xlu0 %v11161_v17, %s10361_s21  ;;  %v9874_v17 = vld [vmem:[%s13747_s3 + $0x170] sm:$0xff]   ;;  %v2862_v48 = vld [vmem:[#allocation2 + $0x1c8] sm:$0xff] }
 0x29f   :  { %2859 = vst.msk [vmem:[#allocation3 + $0x220] sm:$0xff] %vm1207_vm1, %v2849_v4  ;;  %9625 = vmatpush3.bf16.msra.mxu1 %v9881_v31  ;;  %2008 = vrot.lane.b32.xlu1 %v11171_v24, %s10359_s15 }
 0x2a0   :  { %5056 = vmatmul.mubr.bf16.gmra.mrb[108].mxu0 %v4581_v1  ;;  %9372 = vmatprep.subr.bf16.mxu1 %v9896_v51  ;;  %v9888_v51 = vld [vmem:[%s13747_s3 + $0x60] sm:$0xff]  }
 0x2a1   :  { %5063 = vmatprep.mubr.bf16.mxu0 %v4589_v58  ;;  %v2401_v29 = vpop.permute.xlu0 %2400  ;;  %9295 = vmatpush3.bf16.msra.mxu0 %v9871_v26  ;;  %v8988_v22 = vpop.f32.mrb[48].mxu0  ;;  %v9887_v26 = vld [vmem:[%s13747_s3 + $0x18] sm:$0xff]   ;;  %v9889_v58 = vld [vmem:[%s13747_s3 + $0x20] sm:$0xff]  }
 0x2a2   :  { %2411 = vst.msk [vmem:[#allocation3 + $0x210] sm:$0xff] %vm1401_vm3, %v2401_v29  ;;  %v2529_v16 = vpop.permute.xlu1 %2528  ;;  %9296 = vmatprep.subr.bf16.mxu0 %v9872_v50  ;;  %2326 = vrot.lane.b32.xlu0 %v11277_v14, %s10359_s15  ;;  %v8989_v43 = vpop.f32.mrb[49].mxu0 }
 0x2a3   :  { %2539 = vst.msk [vmem:[#allocation3 + $0x218] sm:$0xff] %vm1207_vm1, %v2529_v16  ;;  %v12264_v5 = vadd.f32 %v8989_v43, %v8988_v22  ;;  %2104 = vrot.lane.b32.xlu1 %v11244_v12, %s10360_s20  ;;  %v8991_v18 = vpop.f32.mrb[50].mxu0  ;;  %v9890_v16 = vld [vmem:[%s13747_s3 + $0x68] sm:$0xff]  }
 0x2a4   :  { %v8992_v8 = vpop.f32.mrb[51].mxu0 }
 0x2a5   :  { %v2081_v45 = vpop.permute.xlu0 %2080  ;;  %9297 = vmatpush3.bf16.msra.mxu0 %v9873_v10  ;;  %v12272_v11 = vadd.f32 %v8992_v8, %v8991_v18  ;;  %v12367_v18 = vld [vmem:[#allocation2 + $0x1a8] sm:$0xff] }
 0x2a6   :  { %2091 = vst.msk [vmem:[#allocation3 + $0x208] sm:$0xff] %vm1401_vm3, %v2081_v45  ;;  %v2625_v9 = vpop.permute.xlu1 %2624  ;;  %9298 = vmatprep.subr.bf16.mxu0 %v9874_v17  ;;  %2422 = vrot.lane.b32.xlu0 %v11656_v13, %s10360_s20  ;;  %v9879_v13 = vld [vmem:[%s13747_s3 + $0x40] sm:$0xff]   ;;  %v3600_v45 = vadd.f32 %v12127_v28, %v12167_v49  ;;  %v9892_v28 = vld [vmem:[%s13747_s3 + $0x70] sm:$0xff]  }
 0x2a7   :  { %2635 = vst.msk [vmem:[#allocation3 + $0x218] sm:$0xff] %vm1304_vm2, %v2625_v9  ;;  %2550 = vrot.lane.b32.xlu1 %v11542_v41, %s10361_s21  ;;  %v12373_v9 = vld [vmem:[#allocation2 + $0x1d8] sm:$0xff] }
 0x2a8   :  { %5064 = vmatmul.mubr.bf16.gmra.mrb[112].mxu0 %v4588_v2 }
 0x2a9   :  { %v2943_v34 = vpop.permute.xlu0 %2942  ;;  %v4577_v25 = vld [vmem:[#allocation3 + $0x210] sm:$0xff]  ;;  %9299 = vmatpush3.bf16.msra.mxu0 %v9875_v55 }
 0x2aa   :  { %2954 = vst.msk [vmem:[#allocation3 + $0x1e8] sm:$0xff] %vm1304_vm2, %v2943_v34  ;;  %v2721_v60 = vpop.permute.xlu1 %2720  ;;  %5112 = vmatprep.mubr.bf16.mxu1 %v4577_v25  ;;  %9300 = vmatprep.subr.bf16.mxu0 %v9876_v52  ;;  %v9891_v52 = vld [vmem:[%s13747_s3 + $0x28] sm:$0xff]   ;;  %v1905_v25 = vld [vmem:[#allocation2 + $0x138] sm:$0xff] }
 0x2ab   :  { %2731 = vst.msk [vmem:[#allocation3 + $0x218] sm:$0xff] %vm1401_vm3, %v2721_v60  ;;  %2102 = vrot.lane.b32.xlu0 %v11171_v24, %s10360_s20  ;;  %2646 = vrot.lane.b32.xlu1 %v11572_v37, %s10359_s15 }
 0x2ad   :  { %v3039_v53 = vpop.permute.xlu0 %3038  ;;  %v4576_v35 = vld [vmem:[#allocation3 + $0x208] sm:$0xff]  ;;  %9301 = vmatpush3.bf16.msra.mxu0 %v9877_v59  ;;  %v3603_v59 = vadd.f32 %v12134_v32, %v12167_v49  ;;  %v9893_v32 = vld [vmem:[%s13747_s3 + $0x30] sm:$0xff]  }
 0x2ae   :  { %3050 = vst.msk [vmem:[#allocation3 + $0x1e8] sm:$0xff] %vm1401_vm3, %v3039_v53  ;;  %v1893_v38 = vpop.permute.xlu1 %1892  ;;  %5113 = vmatmul.mubr.bf16.gmra.mrb[88].mxu1 %v4576_v35  ;;  %9332 = vmatprep.subr.bf16.mxu0 %v9879_v13 }
 0x2af   :  { %1901 = vst.msk [vmem:[#allocation3 + $0x278] sm:$0xff] %vm1207_vm1, %v1893_v38  ;;  %1692 = vrot.lane.b32.xlu0 %v11093_v20, %s10359_s15  ;;  %2742 = vrot.lane.b32.xlu1 %v11574_v63, %s10360_s20 }
 0x2b1   :  { %v2211_v24 = vpop.permute.xlu0 %2210 }
 0x2b2   :  { %2220 = vst.msk [vmem:[#allocation3 + $0x248] sm:$0xff] %vm1207_vm1, %v2211_v24  ;;  %v1989_v6 = vpop.permute.xlu1 %1988 }
 0x2b3   :  { %1997 = vst.msk [vmem:[#allocation3 + $0x278] sm:$0xff] %vm1304_vm2, %v1989_v6  ;;  %1788 = vrot.lane.b32.xlu0 %v11194_v36, %s10360_s20  ;;  %1914 = vrot.lane.b32.xlu1 %v1904_v7, %s10361_s21  ;;  %v9883_v36 = vld [vmem:[%s13747_s3 + $0x8] sm:$0xff]   ;;  %v9894_v6 = vld [vmem:[%s13747_s3 + $0x78] sm:$0xff]  }
 0x2b5   :  { %v2307_v20 = vpop.permute.xlu0 %2306  ;;  %v4572_v21 = vld [vmem:[#allocation3 + $0x1e8] sm:$0xff] }
 0x2b6   :  { %2316 = vst.msk [vmem:[#allocation3 + $0x248] sm:$0xff] %vm1304_vm2, %v2307_v20  ;;  %v2851_v46 = vpop.permute.xlu1 %2850  ;;  %5169 = vmatprep.mubr.bf16.mxu0 %v4572_v21  ;;  %v4578_v20 = vld [vmem:[#allocation3 + $0x218] sm:$0xff] }
 0x2b7   :  { %2860 = vst.msk [vmem:[#allocation3 + $0x258] sm:$0xff] %vm1207_vm1, %v2851_v46  ;;  %2232 = vrot.lane.b32.xlu0 %v11277_v14, %s10361_s21  ;;  %5170 = vmatmul.mubr.bf16.vlgmr.msra.gmra.mrb[116].mxu0 %v4571_v42 }
 0x2b8   :  { %2010 = vrot.lane.b32.xlu1 %v11244_v12, %s10359_s15  ;;  %9333 = vmatpush3.bf16.msra.mxu0 %v9880_v61  ;;  %v13757_v12 = vld [vmem:[#allocation5_spill] sm:$0xff] }
 0x2b9   :  { %v2403_v15 = vpop.permute.xlu0 %2402  ;;  %9334 = vmatprep.subr.bf16.mxu0 %v9882_v19  ;;  %v3608_v19 = vadd.f32 %v12169_v27, %v12167_v49  ;;  %v3611_v27 = vadd.f32 %v12176_v57, %v12167_v49 }
 0x2ba   :  { %2412 = vst.msk [vmem:[#allocation3 + $0x248] sm:$0xff] %vm1401_vm3, %v2403_v15  ;;  %v2531_v31 = vpop.permute.xlu1 %2530 }
 0x2bb   :  { %2540 = vst.msk [vmem:[#allocation3 + $0x250] sm:$0xff] %vm1207_vm1, %v2531_v31  ;;  %2328 = vrot.lane.b32.xlu0 %v12325_v0, %s10359_s15 }
 0x2bc   :  { %2106 = vrot.lane.b32.xlu1 %v13757_v12, %s10360_s20  ;;  %9335 = vmatpush3.bf16.msra.mxu0 %v9883_v36 }
 0x2bd   :  { %v2083_v54 = vpop.permute.xlu0 %2082  ;;  %9336 = vmatprep.subr.bf16.mxu0 %v9884_v30  ;;  %v9912_v30 = vld [vmem:[%s13747_s3 + $0x140] sm:$0xff]  }
 0x2be   :  { %2092 = vst.msk [vmem:[#allocation3 + $0x240] sm:$0xff] %vm1401_vm3, %v2083_v54  ;;  %v2627_v33 = vpop.permute.xlu1 %2626  ;;  %v2783_v54 = vld [vmem:[#allocation2 + $0x1c8] sm:$0xff] }
 0x2bf   :  { %2636 = vst.msk [vmem:[#allocation3 + $0x250] sm:$0xff] %vm1304_vm2, %v2627_v33  ;;  %2424 = vrot.lane.b32.xlu0 %v11540_v56, %s10360_s20  ;;  %v12355_v56 = vld [vmem:[#allocation2 + $0x1d0] sm:$0xff] }
 0x2c0   :  { %2552 = vrot.lane.b32.xlu1 %v11572_v37, %s10361_s21  ;;  %9337 = vmatpush3.bf16.msra.mxu0 %v9885_v3  ;;  %v2320_v3 = vld [vmem:[#allocation2 + $0x170] sm:$0xff]  ;;  %2787 = vst.msk [vmem:[#allocation3 + $0x300] sm:$0xff] %vm33_vm0, %v2783_v54 }
 0x2c1   :  { %v2945_v4 = vpop.permute.xlu0 %2944  ;;  %v4584_v50 = vld [vmem:[#allocation3 + $0x248] sm:$0xff]  ;;  %9338 = vmatprep.subr.bf16.mxu0 %v9886_v23 }
 0x2c2   :  { %2955 = vst.msk [vmem:[#allocation3 + $0x220] sm:$0xff] %vm1304_vm2, %v2945_v4  ;;  %v2723_v1 = vpop.permute.xlu1 %2722  ;;  %5120 = vmatprep.mubr.bf16.mxu1 %v4584_v50 }
 0x2c3   :  { %2732 = vst.msk [vmem:[#allocation3 + $0x250] sm:$0xff] %vm1401_vm3, %v2723_v1  ;;  %2870 = vrot.lane.b32.xlu0 %v2862_v48, %s10361_s21 }
 0x2c4   :  { %2648 = vrot.lane.b32.xlu1 %v11574_v63, %s10359_s15  ;;  %9339 = vmatpush3.bf16.msra.mxu0 %v9887_v26 }
 0x2c5   :  { %v3041_v29 = vpop.permute.xlu0 %3040  ;;  %v4583_v10 = vld [vmem:[#allocation3 + $0x240] sm:$0xff]  ;;  %9340 = vmatprep.subr.bf16.mxu0 %v9888_v51  ;;  %v9016_v17 = vpop.f32.mrb[40].mxu1 }
 0x2c6   :  { %3051 = vst.msk [vmem:[#allocation3 + $0x220] sm:$0xff] %vm1401_vm3, %v3041_v29  ;;  %v2533_v22 = vpop.permute.xlu1 %2532  ;;  %5121 = vmatmul.mubr.bf16.gmra.mrb[92].mxu1 %v4583_v10  ;;  %v9017_v43 = vpop.f32.mrb[41].mxu1  ;;  %v12443_v51 = vld [vmem:[#allocation2 + $0x1e0] sm:$0xff]  ;;  %v4580_v10 = vld [vmem:[#allocation3 + $0x228] sm:$0xff] }
 0x2c7   :  { %2541 = vst.msk [vmem:[#allocation3 + $0x288] sm:$0xff] %vm1207_vm1, %v2533_v22  ;;  %2966 = vrot.lane.b32.xlu0 %v12355_v56, %s10359_s15  ;;  %v9018_v8 = vadd.f32 %v9017_v43, %v9016_v17  ;;  %v9019_v55 = vpop.f32.mrb[42].mxu1  ;;  %v9898_v43 = vld [vmem:[%s13747_s3 + $0xc8] sm:$0xff]  }
 0x2c8   :  { %2744 = vrot.lane.b32.xlu1 %v12367_v18, %s10360_s20  ;;  %9341 = vmatpush3.bf16.msra.mxu0 %v9889_v58  ;;  %v9020_v34 = vpop.f32.mrb[43].mxu1 }
 0x2c9   :  { %v2213_v2 = vpop.permute.xlu0 %2212  ;;  %9342 = vmatprep.subr.bf16.mxu0 %v9890_v16  ;;  %v12383_v60 = vadd.f32 %v9018_v8, %v3600_v45  ;;  %v9021_v13 = vadd.f32 %v9020_v34, %v9019_v55  ;;  %v9897_v16 = vld [vmem:[%s13747_s3 + $0x80] sm:$0xff]   ;;  %v2784_v45 = vld [vmem:[#allocation2 + $0x1d0] sm:$0xff]  ;;  %v2321_v8 = vld [vmem:[#allocation2 + $0x178] sm:$0xff] }
 0x2ca   :  { %2221 = vst.msk [vmem:[#allocation3 + $0x280] sm:$0xff] %vm1207_vm1, %v2213_v2  ;;  %v2629_v53 = vpop.permute.xlu1 %2628  ;;  %v4585_v17 = vld [vmem:[#allocation3 + $0x250] sm:$0xff]  ;;  %v4594_v34 = vld [vmem:[#allocation3 + $0x298] sm:$0xff] }
 0x2cb   :  { %2637 = vst.msk [vmem:[#allocation3 + $0x288] sm:$0xff] %vm1304_vm2, %v2629_v53  ;;  %3062 = vrot.lane.b32.xlu0 %v12373_v9, %s10360_s20  ;;  %v12389_v35 = vadd.f32 %v9021_v13, %v3603_v59  ;;  %v9902_v53 = vld [vmem:[%s13747_s3 + $0xd8] sm:$0xff]  }
 0x2cc   :  { %1916 = vrot.lane.b32.xlu1 %v1905_v25, %s10361_s21  ;;  %9343 = vmatpush3.bf16.msra.mxu0 %v9891_v52  ;;  %2788 = vst.msk [vmem:[#allocation3 + $0x338] sm:$0xff] %vm33_vm0, %v2784_v45  ;;  %v9899_v52 = vld [vmem:[%s13747_s3 + $0x88] sm:$0xff]   ;;  %v9901_v25 = vld [vmem:[%s13747_s3 + $0x90] sm:$0xff]  }
 0x2cd   :  { %v2309_v38 = vpop.permute.xlu0 %2308  ;;  %v4579_v24 = vld [vmem:[#allocation3 + $0x220] sm:$0xff]  ;;  %9344 = vmatprep.subr.bf16.mxu0 %v9892_v28  ;;  %v9022_v61 = vpop.f32.mrb[44].mxu1 }
 0x2ce   :  { %2317 = vst.msk [vmem:[#allocation3 + $0x280] sm:$0xff] %vm1304_vm2, %v2309_v38  ;;  %v2725_v7 = vpop.permute.xlu1 %2724  ;;  %5177 = vmatprep.mubr.bf16.mxu0 %v4579_v24  ;;  %v9023_v21 = vpop.f32.mrb[45].mxu1  ;;  %v9903_v38 = vld [vmem:[%s13747_s3 + $0x98] sm:$0xff]  }
 0x2cf   :  { %2733 = vst.msk [vmem:[#allocation3 + $0x288] sm:$0xff] %vm1401_vm3, %v2725_v7  ;;  %2234 = vrot.lane.b32.xlu0 %v12325_v0, %s10361_s21  ;;  %5178 = vmatmul.mubr.bf16.gmra.mrb[120].mxu0 %v4578_v20  ;;  %v9024_v46 = vadd.f32 %v9023_v21, %v9022_v61  ;;  %v9025_v42 = vpop.f32.mrb[46].mxu1 }
 0x2d0   :  { %2012 = vrot.lane.b32.xlu1 %v13757_v12, %s10359_s15  ;;  %9345 = vmatpush3.bf16.msra.mxu0 %v9893_v32  ;;  %v9026_v15 = vpop.f32.mrb[47].mxu1 }
 0x2d1   :  { %v2405_v36 = vpop.permute.xlu0 %2404  ;;  %9346 = vmatprep.subr.bf16.mxu0 %v9894_v6  ;;  %v12414_v31 = vadd.f32 %v9024_v46, %v3608_v19  ;;  %v9027_v0 = vadd.f32 %v9026_v15, %v9025_v42  ;;  %v9906_v15 = vld [vmem:[%s13747_s3 + $0xe8] sm:$0xff]  }
 0x2d2   :  { %2413 = vst.msk [vmem:[#allocation3 + $0x280] sm:$0xff] %vm1401_vm3, %v2405_v36  ;;  %v1269_v12 = vpop.permute.xlu1 %1268 }
 0x2d3   :  { %1280 = vst.msk [vmem:[#allocation3 + $0x2a0] sm:$0xff] %vm1207_vm1, %v1269_v12  ;;  %2330 = vrot.lane.b32.xlu0 %v2320_v3, %s10359_s15  ;;  %v12419_v23 = vadd.f32 %v9027_v0, %v3611_v27  ;;  %v3056_v0 = vld [vmem:[#allocation2 + $0x1e8] sm:$0xff] }
 0x2d4   :  { %2108 = vrot.lane.b32.xlu1 %v11277_v14, %s10360_s20  ;;  %9347 = vmatpush3.bf16.msra.mxu0 %v9895_v47  ;;  %v2785_v47 = vld [vmem:[#allocation2 + $0x1d8] sm:$0xff]  ;;  %v3103_v12 = vld [vmem:[#allocation2 + $0x1e8] sm:$0xff] }
 0x2d5   :  { %v2085_v57 = vpop.permute.xlu0 %2084  ;;  %9412 = vmatprep.subr.bf16.mxu0 %v9912_v30  ;;  %2789 = vst.msk [vmem:[#allocation3 + $0x370] sm:$0xff] %vm33_vm0, %v2785_v47  ;;  %v3102_v30 = vld [vmem:[#allocation2 + $0x1e0] sm:$0xff]  ;;  %3107 = vst.msk [vmem:[#allocation3 + $0x308] sm:$0xff] %vm33_vm0, %v3103_v12 }
 0x2d6   :  { %2093 = vst.msk [vmem:[#allocation3 + $0x278] sm:$0xff] %vm1401_vm3, %v2085_v57  ;;  %v1366_v33 = vpop.permute.xlu1 %1365 }
 0x2d7   :  { %1377 = vst.msk [vmem:[#allocation3 + $0x2a0] sm:$0xff] %vm1304_vm2, %v1366_v33  ;;  %2426 = vrot.lane.b32.xlu0 %v11542_v41, %s10360_s20 }
 0x2d8   :  { %2554 = vrot.lane.b32.xlu1 %v11574_v63, %s10361_s21  ;;  %v4573_v63 = vld [vmem:[#allocation3 + $0x1f0] sm:$0xff]  ;;  %3106 = vst.msk [vmem:[#allocation3 + $0x2d0] sm:$0xff] %vm33_vm0, %v3102_v30 }
 0x2d9   :  { %v2947_v48 = vpop.permute.xlu0 %2946  ;;  %v4591_v26 = vld [vmem:[#allocation3 + $0x280] sm:$0xff] }
 0x2da   :  { %2956 = vst.msk [vmem:[#allocation3 + $0x258] sm:$0xff] %vm1304_vm2, %v2947_v48  ;;  %v1463_v14 = vpop.permute.xlu1 %1462  ;;  %5128 = vmatprep.mubr.bf16.mxu1 %v4591_v26  ;;  %v9907_v26 = vld [vmem:[%s13747_s3 + $0xa8] sm:$0xff]  }
 0x2db   :  { %1474 = vst.msk [vmem:[#allocation3 + $0x2a0] sm:$0xff] %vm1401_vm3, %v1463_v14  ;;  %2872 = vrot.lane.b32.xlu0 %v12355_v56, %s10361_s21  ;;  %v3619_v14 = vadd.f32 %v12272_v11, %v12167_v49  ;;  %v9914_v11 = vld [vmem:[%s13747_s3 + $0x148] sm:$0xff]  }
 0x2dc   :  { %2650 = vrot.lane.b32.xlu1 %v12367_v18, %s10359_s15 }
 0x2dd   :  { %v3043_v4 = vpop.permute.xlu0 %3042  ;;  %v4590_v50 = vld [vmem:[#allocation3 + $0x278] sm:$0xff] }
 0x2de   :  { %3052 = vst.msk [vmem:[#allocation3 + $0x258] sm:$0xff] %vm1401_vm3, %v3043_v4  ;;  %v1271_v41 = vpop.permute.xlu1 %1270  ;;  %5129 = vmatmul.mubr.bf16.gmra.mrb[96].mxu1 %v4590_v50 }
 0x2df   :  { %1281 = vst.msk [vmem:[#allocation3 + $0x2d8] sm:$0xff] %vm1207_vm1, %v1271_v41  ;;  %2968 = vrot.lane.b32.xlu0 %v12373_v9, %s10359_s15  ;;  %9626 = vmatprep.mubr.msk.bf16.mxu1 %vm33_vm0, %v4573_v63  ;;  %v9908_v41 = vld [vmem:[%s13747_s3 + $0xf0] sm:$0xff]  }
 0x2e0   :  { %2746 = vrot.lane.b32.xlu1 %v11664_v44, %s10360_s20  ;;  %v9909_v63 = vld [vmem:[%s13747_s3 + $0xb0] sm:$0xff]  }
 0x2e1   :  { %v2853_v1 = vpop.permute.xlu0 %2852 }
 0x2e2   :  { %2861 = vst.msk [vmem:[#allocation3 + $0x290] sm:$0xff] %vm1207_vm1, %v2853_v1  ;;  %v1368_v56 = vpop.permute.xlu1 %1367  ;;  %v3104_v1 = vld [vmem:[#allocation2 + $0x1f0] sm:$0xff] }
 0x2e3   :  { %1378 = vst.msk [vmem:[#allocation3 + $0x2d8] sm:$0xff] %vm1304_vm2, %v1368_v56  ;;  %3064 = vrot.lane.b32.xlu0 %v12443_v51, %s10360_s20 }
 0x2e4   :  { %2556 = vrot.lane.b32.xlu1 %v12367_v18, %s10361_s21  ;;  %v4587_v18 = vld [vmem:[#allocation3 + $0x260] sm:$0xff]  ;;  %3108 = vst.msk [vmem:[#allocation3 + $0x340] sm:$0xff] %vm33_vm0, %v3104_v1 }
 0x2e5   :  { %v2949_v58 = vpop.permute.xlu0 %2948  ;;  %v4586_v29 = vld [vmem:[#allocation3 + $0x258] sm:$0xff] }
 0x2e6   :  { %2957 = vst.msk [vmem:[#allocation3 + $0x290] sm:$0xff] %vm1304_vm2, %v2949_v58  ;;  %v1465_v22 = vpop.permute.xlu1 %1464  ;;  %5185 = vmatprep.mubr.bf16.mxu0 %v4586_v29  ;;  %9627 = vmatmul.mubr.msk.bf16.vlgmr.msra.gmra.mrb[100].mxu1 %vm33_vm0, %v4580_v10  ;;  %v9910_v58 = vld [vmem:[%s13747_s3 + $0xf8] sm:$0xff]  }
 0x2e7   :  { %1475 = vst.msk [vmem:[#allocation3 + $0x2d8] sm:$0xff] %vm1401_vm3, %v1465_v22  ;;  %2236 = vrot.lane.b32.xlu0 %v2320_v3, %s10361_s21  ;;  %5186 = vmatmul.mubr.bf16.gmra.mrb[124].mxu0 %v4585_v17  ;;  %v3616_v3 = vadd.f32 %v12264_v5, %v12167_v49  ;;  %v9913_v49 = vld [vmem:[%s13747_s3 + $0x100] sm:$0xff]  }
 0x2e8   :  { %2652 = vrot.lane.b32.xlu1 %v11664_v44, %s10359_s15  ;;  %9630 = vmatprep.mubr.msk.bf16.mxu1 %vm33_vm0, %v4587_v18  ;;  %v9900_v44 = vld [vmem:[%s13747_s3 + $0xd0] sm:$0xff]   ;;  %v3105_v18 = vld [vmem:[#allocation2 + $0x1f8] sm:$0xff] }
 0x2e9   :  { %v3045_v55 = vpop.permute.xlu0 %3044  ;;  %9373 = vmatpush3.bf16.msra.mxu1 %v9897_v16  ;;  %v5291_v16 = vld [vmem:[#allocation3 + $0x2a0] sm:$0xff]  ;;  %3109 = vst.msk [vmem:[#allocation3 + $0x378] sm:$0xff] %vm33_vm0, %v3105_v18 }
 0x2ea   :  { %3053 = vst.msk [vmem:[#allocation3 + $0x290] sm:$0xff] %vm1401_vm3, %v3045_v55  ;;  %v1273_v2 = vpop.permute.xlu1 %1272  ;;  %9374 = vmatprep.subr.bf16.mxu1 %v9898_v43  ;;  %v9915_v55 = vld [vmem:[%s13747_s3 + $0x108] sm:$0xff]  }
 0x2eb   :  { %1282 = vst.msk [vmem:[#allocation3 + $0x310] sm:$0xff] %vm1207_vm1, %v1273_v2  ;;  %2332 = vrot.lane.b32.xlu0 %v2321_v8, %s10359_s15 }
 0x2ec   :  { %2748 = vrot.lane.b32.xlu1 %v12032_v62, %s10360_s20  ;;  %v4592_v62 = vld [vmem:[#allocation3 + $0x288] sm:$0xff] }
 0x2ed   :  { %v1591_v28 = vpop.permute.xlu0 %1590  ;;  %9375 = vmatpush3.bf16.msra.mxu1 %v9899_v52  ;;  %v9050_v13 = vpop.f32.mrb[52].mxu0 }
 0x2ee   :  { %1602 = vst.msk [vmem:[#allocation3 + $0x2a8] sm:$0xff] %vm1207_vm1, %v1591_v28  ;;  %v1370_v59 = vpop.permute.xlu1 %1369  ;;  %9631 = vmatmul.mubr.msk.bf16.gmra.mrb[104].mxu1 %vm33_vm0, %v4594_v34  ;;  %9376 = vmatprep.subr.bf16.mxu1 %v9900_v44  ;;  %v9051_v32 = vpop.f32.mrb[53].mxu0  ;;  %v9911_v34 = vld [vmem:[%s13747_s3 + $0xb8] sm:$0xff]  }
 0x2ef   :  { %1379 = vst.msk [vmem:[#allocation3 + $0x310] sm:$0xff] %vm1304_vm2, %v1370_v59  ;;  %2428 = vrot.lane.b32.xlu0 %v11572_v37, %s10360_s20  ;;  %v9052_v24 = vadd.f32 %v9051_v32, %v9050_v13  ;;  %v9053_v6 = vpop.f32.mrb[54].mxu0  ;;  %v9904_v37 = vld [vmem:[%s13747_s3 + $0xe0] sm:$0xff]   ;;  %v3057_v59 = vld [vmem:[#allocation2 + $0x1f0] sm:$0xff]  ;;  %v5298_v12 = vld [vmem:[#allocation3 + $0x2d8] sm:$0xff] }
 0x2f0   :  { %v9054_v61 = vpop.f32.mrb[55].mxu0  ;;  %v12563_v13 = vld [vmem:[%s13747_s3 + $0x180] sm:$0xff]   ;;  %v9917_v32 = vld [vmem:[%s13747_s3 + $0x110] sm:$0xff]  }
 0x2f1   :  { %v1687_v7 = vpop.permute.xlu0 %1686  ;;  %v4593_v20 = vld [vmem:[#allocation3 + $0x290] sm:$0xff]  ;;  %9377 = vmatpush3.bf16.msra.mxu1 %v9901_v25  ;;  %v9055_v21 = vadd.f32 %v9054_v61, %v9053_v6  ;;  %v3722_v46 = vadd.f32 %v9052_v24, %v12195_v40  ;;  %v9905_v40 = vld [vmem:[%s13747_s3 + $0xa0] sm:$0xff]  }
 0x2f2   :  { %1698 = vst.msk [vmem:[#allocation3 + $0x2a8] sm:$0xff] %vm1304_vm2, %v1687_v7  ;;  %v1467_v19 = vpop.permute.xlu1 %1466  ;;  %5193 = vmatprep.mubr.bf16.mxu0 %v4593_v20  ;;  %9378 = vmatprep.subr.bf16.mxu1 %v9902_v53  ;;  %v9918_v20 = vld [vmem:[%s13747_s3 + $0x158] sm:$0xff]  }
 0x2f3   :  { %1476 = vst.msk [vmem:[#allocation3 + $0x310] sm:$0xff] %vm1401_vm3, %v1467_v19  ;;  %2874 = vrot.lane.b32.xlu0 %v12373_v9, %s10361_s21  ;;  %5194 = vmatmul.mubr.bf16.gmra.mrb[128].mxu0 %v4592_v62  ;;  %v12499_v42 = vadd.f32 %v9055_v21, %v12204_v39 }
 0x2f5   :  { %v1783_v36 = vpop.permute.xlu0 %1782  ;;  %9379 = vmatpush3.bf16.msra.mxu1 %v9903_v38  ;;  %v9028_v27 = vpop.f32.mrb[48].mxu1 }
 0x2f6   :  { %1794 = vst.msk [vmem:[#allocation3 + $0x2a8] sm:$0xff] %vm1401_vm3, %v1783_v36  ;;  %v1911_v9 = vpop.permute.xlu1 %1910  ;;  %9380 = vmatprep.subr.bf16.mxu1 %v9904_v37  ;;  %v9029_v39 = vpop.f32.mrb[49].mxu1 }
 0x2f7   :  { %1922 = vst.msk [vmem:[#allocation3 + $0x2b0] sm:$0xff] %vm1207_vm1, %v1911_v9  ;;  %2970 = vrot.lane.b32.xlu0 %v12443_v51, %s10359_s15  ;;  %v9030_v54 = vadd.f32 %v9029_v39, %v9028_v27  ;;  %v9031_v57 = vpop.f32.mrb[50].mxu1  ;;  %v9920_v39 = vld [vmem:[%s13747_s3 + $0x160] sm:$0xff]  }
 0x2f8   :  { %v9032_v48 = vpop.f32.mrb[51].mxu1 }
 0x2f9   :  { %v1593_v33 = vpop.permute.xlu0 %1592  ;;  %9381 = vmatpush3.bf16.msra.mxu1 %v9905_v40  ;;  %v12521_v4 = vadd.f32 %v9030_v54, %v3616_v3  ;;  %v9033_v50 = vadd.f32 %v9032_v48, %v9031_v57  ;;  %v9921_v57 = vld [vmem:[%s13747_s3 + $0x120] sm:$0xff]  }
 0x2fa   :  { %1603 = vst.msk [vmem:[#allocation3 + $0x2e0] sm:$0xff] %vm1207_vm1, %v1593_v33  ;;  %v2007_v5 = vpop.permute.xlu1 %2006  ;;  %9382 = vmatprep.subr.bf16.mxu1 %v9906_v15  ;;  %v9922_v33 = vld [vmem:[%s13747_s3 + $0x168] sm:$0xff]  }
 0x2fb   :  { %2018 = vst.msk [vmem:[#allocation3 + $0x2b0] sm:$0xff] %vm1304_vm2, %v2007_v5  ;;  %3066 = vrot.lane.b32.xlu0 %v3056_v0, %s10360_s20  ;;  %v12538_v56 = vadd.f32 %v9033_v50, %v3619_v14  ;;  %v9923_v50 = vld [vmem:[%s13747_s3 + $0x128] sm:$0xff]  }
 0x2fd   :  { %v1689_v29 = vpop.permute.xlu0 %1688  ;;  %v5292_v10 = vld [vmem:[#allocation3 + $0x2a8] sm:$0xff]  ;;  %9383 = vmatpush3.bf16.msra.mxu1 %v9907_v26  ;;  %v9604_v17 = vpop.f32.mrb[52].mxu1 }
 0x2fe   :  { %1699 = vst.msk [vmem:[#allocation3 + $0x2e0] sm:$0xff] %vm1304_vm2, %v1689_v29  ;;  %v1597_v22 = vpop.permute.xlu1 %1596  ;;  %5763 = vmatprep.mubr.bf16.mxu0 %v5292_v10  ;;  %9384 = vmatprep.subr.bf16.mxu1 %v9908_v41  ;;  %v3786_v43 = vpop.f32.mrb[53].mxu1  ;;  %v9924_v41 = vld [vmem:[%s13747_s3 + $0x170] sm:$0xff]  }
 0x2ff   :  { %1605 = vst.msk [vmem:[#allocation3 + $0x350] sm:$0xff] %vm1207_vm1, %v1597_v22  ;;  %2876 = vrot.lane.b32.xlu0 %v12443_v51, %s10361_s21  ;;  %5764 = vmatmul.mubr.bf16.vlgmr.msra.gmra.mrb[132].mxu0 %v5291_v16  ;;  %v3787_v45 = vadd.f32 %v3786_v43, %v3722_v46  ;;  %v9605_v8 = vpop.f32.mrb[54].mxu1  ;;  %v9916_v51 = vld [vmem:[%s13747_s3 + $0x150] sm:$0xff]   ;;  %v9926_v43 = vld [vmem:[%s13747_s3 + $0x178] sm:$0xff]  }
 0x300   :  { %9413 = vmatpush3.bf16.msra.mxu0 %v9913_v49  ;;  %v3789_v2 = vpop.f32.mrb[55].mxu1  ;;  %v9925_v29 = vld [vmem:[%s13747_s3 + $0x130] sm:$0xff]  }
 0x301   :  { %v1785_v52 = vpop.permute.xlu0 %1784  ;;  %9385 = vmatpush3.bf16.msra.mxu1 %v9909_v63  ;;  %9414 = vmatprep.subr.bf16.mxu0 %v9914_v11  ;;  %v9056_v44 = vpop.f32.mrb[56].mxu0  ;;  %v3790_v25 = vadd.f32 %v3789_v2, %v12499_v42  ;;  %v3817_v62 = vmax.f32 %v3787_v45, 0.0  ;;  %v9927_v2 = vld [vmem:[%s13747_s3 + $0x138] sm:$0xff]  }
 0x302   :  { %1795 = vst.msk [vmem:[#allocation3 + $0x2e0] sm:$0xff] %vm1401_vm3, %v1785_v52  ;;  %v1275_v28 = vpop.permute.xlu1 %1274  ;;  %9386 = vmatprep.subr.bf16.mxu1 %v9910_v58  ;;  %v9057_v53 = vpop.f32.mrb[57].mxu0 }
 0x303   :  { %1283 = vst.msk [vmem:[#allocation3 + $0x348] sm:$0xff] %vm1207_vm1, %v1275_v28  ;;  %2972 = vrot.lane.b32.xlu0 %v3056_v0, %s10359_s15  ;;  %v3818_v38 = vmax.f32 %v3790_v25, 0.0  ;;  %v9058_v24 = vadd.f32 %v9057_v53, %v9056_v44  ;;  %v9059_v6 = vpop.f32.mrb[58].mxu0 }
 0x304   :  { %9415 = vmatpush3.bf16.msra.mxu0 %v9915_v55  ;;  %v9060_v7 = vpop.f32.mrb[59].mxu0 }
 0x305   :  { %v1595_v61 = vpop.permute.xlu0 %1594  ;;  %9387 = vmatpush3.bf16.msra.mxu1 %v9911_v34  ;;  %9416 = vmatprep.subr.bf16.mxu0 %v9916_v51  ;;  %v3825_v21 = vpack.c.bf16 %v3818_v38, %v3817_v62  ;;  %v3730_v19 = vadd.f32 %v9058_v24, %v12383_v60  ;;  %v9061_v46 = vadd.f32 %v9060_v7, %v9059_v6  ;;  %v12575_v42 = vpop.f32.mrb[56].mxu1  ;;  %v9919_v60 = vld [vmem:[%s13747_s3 + $0x118] sm:$0xff]   ;;  %v9931_v34 = vld [vmem:[%s13749_s5 + $0x4] ss:$16 sps:$4 sm:$0xff]  }
 0x306   :  { %1604 = vst.msk [vmem:[#allocation3 + $0x318] sm:$0xff] %vm1207_vm1, %v1595_v61  ;;  %v1372_v37 = vpop.permute.xlu1 %1371  ;;  %9634 = vmatprep.subr.bf16.mxu1 %v12563_v13  ;;  %v3802_v47 = vpop.f32.mrb[57].mxu1 }
 0x307   :  { %1380 = vst.msk [vmem:[#allocation3 + $0x348] sm:$0xff] %vm1304_vm2, %v1372_v37  ;;  %3068 = vrot.lane.b32.xlu0 %v3057_v59, %s10360_s20  ;;  %v3795_v36 = vadd.f32 %v9604_v17, %v3730_v19  ;;  %v3733_v40 = vadd.f32 %v9061_v46, %v12389_v35  ;;  %v12581_v15 = vpop.f32.mrb[58].mxu1  ;;  %v5305_v17 = vld [vmem:[#allocation3 + $0x310] sm:$0xff] }
 0x308   :  { %9417 = vmatpush3.bf16.msra.mxu0 %v9917_v32  ;;  %3830 = vst.msk [vmem:[#allocation4] sm:$0xff] %vm3829_vm4, %v3825_v21  ;;  %v3805_v27 = vpop.f32.mrb[59].mxu1 }
 0x309   :  { %v1691_v30 = vpop.permute.xlu0 %1690  ;;  %v5299_v9 = vld [vmem:[#allocation3 + $0x2e0] sm:$0xff]  ;;  %9418 = vmatprep.subr.bf16.mxu0 %v9918_v20  ;;  %v3798_v0 = vadd.f32 %v9605_v8, %v3733_v40  ;;  %v3819_v3 = vmax.f32 %v3795_v36, 0.0 }
 0x30a   :  { %1700 = vst.msk [vmem:[#allocation3 + $0x318] sm:$0xff] %vm1304_vm2, %v1691_v30  ;;  %v1469_v35 = vpop.permute.xlu1 %1468  ;;  %5771 = vmatprep.mubr.bf16.mxu0 %v5299_v9 }
 0x30b   :  { %1477 = vst.msk [vmem:[#allocation3 + $0x348] sm:$0xff] %vm1401_vm3, %v1469_v35  ;;  %5772 = vmatmul.mubr.bf16.gmra.mrb[136].mxu0 %v5298_v12  ;;  %v3820_v54 = vmax.f32 %v3798_v0, 0.0  ;;  %v9938_v12 = vld [vmem:[%s13747_s3 + $0x188] sm:$0xff]  }
 0x30c   :  { %9419 = vmatpush3.bf16.msra.mxu0 %v9919_v60 }
 0x30d   :  { %v1787_v48 = vpop.permute.xlu0 %1786  ;;  %9420 = vmatprep.subr.bf16.mxu0 %v9920_v39  ;;  %v3826_v26 = vpack.c.bf16 %v3820_v54, %v3819_v3 }
 0x30e   :  { %1796 = vst.msk [vmem:[#allocation3 + $0x318] sm:$0xff] %vm1401_vm3, %v1787_v48  ;;  %v1913_v14 = vpop.permute.xlu1 %1912 }
 0x30f   :  { %1923 = vst.msk [vmem:[#allocation3 + $0x2e8] sm:$0xff] %vm1207_vm1, %v1913_v14  ;;  %3832 = vrot.lane.b32.xlu1 %v3826_v26, %s10359_s15 }
 0x310   :  { %9421 = vmatpush3.bf16.msra.mxu0 %v9921_v57 }
 0x311   :  { %v2231_v5 = vpop.permute.xlu0 %2230  ;;  %9422 = vmatprep.subr.bf16.mxu0 %v9922_v33  ;;  %v9062_v49 = vpop.f32.mrb[60].mxu0  ;;  %v12642_v33 = vld [vmem:[%s13748_s4] ss:$0 sm:$0xff] }
 0x312   :  { %2242 = vst.msk [vmem:[#allocation3 + $0x2b8] sm:$0xff] %vm1207_vm1, %v2231_v5  ;;  %v2009_v63 = vpop.permute.xlu1 %2008  ;;  %v9063_v11 = vpop.f32.mrb[61].mxu0 }
 0x313   :  { %2019 = vst.msk [vmem:[#allocation3 + $0x2e8] sm:$0xff] %vm1304_vm2, %v2009_v63  ;;  %v9064_v1 = vadd.f32 %v9063_v11, %v9062_v49  ;;  %v9065_v58 = vpop.f32.mrb[62].mxu0 }
 0x314   :  { %9423 = vmatpush3.bf16.msra.mxu0 %v9923_v50  ;;  %v9066_v16 = vpop.f32.mrb[63].mxu0 }
 0x315   :  { %v2327_v10 = vpop.permute.xlu0 %2326  ;;  %v5306_v22 = vld [vmem:[#allocation3 + $0x318] sm:$0xff]  ;;  %9424 = vmatprep.subr.bf16.mxu0 %v9924_v41  ;;  %v9067_v18 = vadd.f32 %v9066_v16, %v9065_v58  ;;  %v3738_v8 = vadd.f32 %v9064_v1, %v12414_v31 }
 0x316   :  { %2338 = vst.msk [vmem:[#allocation3 + $0x2b8] sm:$0xff] %vm1304_vm2, %v2327_v10  ;;  %v2105_v45 = vpop.permute.xlu1 %2104  ;;  %5779 = vmatprep.mubr.bf16.mxu0 %v5306_v22  ;;  %v9944_v1 = vld [vmem:[%s13749_s5 + $0xc] ss:$16 sps:$4 sm:$0xff]  }
 0x317   :  { %2115 = vst.msk [vmem:[#allocation3 + $0x2e8] sm:$0xff] %vm1401_vm3, %v2105_v45  ;;  %5780 = vmatmul.mubr.bf16.gmra.mrb[140].mxu0 %v5305_v17  ;;  %v3803_v55 = vadd.f32 %v3802_v47, %v3738_v8  ;;  %v3741_v52 = vadd.f32 %v9067_v18, %v12419_v23 }
 0x318   :  { %9425 = vmatpush3.bf16.msra.mxu0 %v9925_v29 }
 0x319   :  { %v2423_v51 = vpop.permute.xlu0 %2422  ;;  %9426 = vmatprep.subr.bf16.mxu0 %v9926_v43  ;;  %v3806_v31 = vadd.f32 %v3805_v27, %v3741_v52  ;;  %v9068_v25 = vpop.f32.mrb[64].mxu0  ;;  %v3821_v23 = vmax.f32 %v3803_v55, 0.0  ;;  %v5312_v52 = vld [vmem:[#allocation3 + $0x348] sm:$0xff] }
 0x31a   :  { %2434 = vst.msk [vmem:[#allocation3 + $0x2b8] sm:$0xff] %vm1401_vm3, %v2423_v51  ;;  %v2551_v44 = vpop.permute.xlu1 %2550  ;;  %v9069_v28 = vpop.f32.mrb[65].mxu0 }
 0x31b   :  { %2562 = vst.msk [vmem:[#allocation3 + $0x2c0] sm:$0xff] %vm1207_vm1, %v2551_v44  ;;  %v3822_v59 = vmax.f32 %v3806_v31, 0.0  ;;  %v9070_v53 = vadd.f32 %v9069_v28, %v9068_v25  ;;  %v9071_v32 = vpop.f32.mrb[66].mxu0 }
 0x31c   :  { %9427 = vmatpush3.bf16.msra.mxu0 %v9927_v2  ;;  %v9072_v38 = vpop.f32.mrb[67].mxu0 }
 0x31d   :  { %v2103_v62 = vpop.permute.xlu0 %2102  ;;  %7581 = vmatprep.subr.bf16.mxu0 %v9931_v34  ;;  %v3827_v24 = vpack.c.bf16 %v3822_v59, %v3821_v23  ;;  %v3746_v6 = vadd.f32 %v9070_v53, %v12521_v4  ;;  %v9073_v7 = vadd.f32 %v9072_v38, %v9071_v32  ;;  %v9136_v61 = vpop.f32.mrb[60].mxu1 }
 0x31e   :  { %2114 = vst.msk [vmem:[#allocation3 + $0x2b0] sm:$0xff] %vm1401_vm3, %v2103_v62  ;;  %v2647_v20 = vpop.permute.xlu1 %2646  ;;  %v9137_v21 = vpop.f32.mrb[61].mxu1 }
 0x31f   :  { %2658 = vst.msk [vmem:[#allocation3 + $0x2c0] sm:$0xff] %vm1304_vm2, %v2647_v20  ;;  %v3811_v19 = vadd.f32 %v12575_v42, %v3746_v6  ;;  %v3749_v46 = vadd.f32 %v9073_v7, %v12538_v56  ;;  %v9138_v37 = vadd.f32 %v9137_v21, %v9136_v61  ;;  %v9139_v47 = vpop.f32.mrb[62].mxu1 }
 0x320   :  { %3837 = vst.msk [vmem:[#allocation4 + $0x8] sm:$0xff] %vm3829_vm4, %v3827_v24  ;;  %v9140_v36 = vpop.f32.mrb[63].mxu1 }
 0x321   :  { %v1693_v40 = vpop.permute.xlu0 %1692  ;;  %v5294_v60 = vld [vmem:[#allocation3 + $0x2b8] sm:$0xff]  ;;  %v3814_v4 = vadd.f32 %v12581_v15, %v3749_v46  ;;  %v9141_v30 = vadd.f32 %v9140_v36, %v9139_v47  ;;  %v9096_v27 = vpop.f32.mrb[68].mxu0  ;;  %v3823_v39 = vmax.f32 %v3811_v19, 0.0 }
 0x322   :  { %1701 = vst.msk [vmem:[#allocation3 + $0x350] sm:$0xff] %vm1304_vm2, %v1693_v40  ;;  %v2743_v9 = vpop.permute.xlu1 %2742  ;;  %5828 = vmatprep.mubr.bf16.mxu1 %v5294_v60  ;;  %v9097_v42 = vpop.f32.mrb[69].mxu0 }
 0x323   :  { %2754 = vst.msk [vmem:[#allocation3 + $0x2c0] sm:$0xff] %vm1401_vm3, %v2743_v9  ;;  %v3824_v56 = vmax.f32 %v3814_v4, 0.0  ;;  %v9098_v0 = vadd.f32 %v9097_v42, %v9096_v27  ;;  %v9099_v35 = vpop.f32.mrb[70].mxu0 }
 0x324   :  { %v9100_v54 = vpop.f32.mrb[71].mxu0 }
 0x325   :  { %v1789_v3 = vpop.permute.xlu0 %1788  ;;  %v5293_v15 = vld [vmem:[#allocation3 + $0x2b0] sm:$0xff]  ;;  %v3828_v57 = vpack.c.bf16 %v3824_v56, %v3823_v39  ;;  %v4318_v48 = vadd.f32 %v12642_v33, %v9098_v0  ;;  %v9101_v26 = vadd.f32 %v9100_v54, %v9099_v35  ;;  %v9142_v14 = vpop.f32.mrb[64].mxu1  ;;  %v5300_v56 = vld [vmem:[#allocation3 + $0x2e8] sm:$0xff] }
 0x326   :  { %1797 = vst.msk [vmem:[#allocation3 + $0x350] sm:$0xff] %vm1401_vm3, %v1789_v3  ;;  %v1915_v50 = vpop.permute.xlu1 %1914  ;;  %5829 = vmatmul.mubr.bf16.vlgmr.msra.gmra.mrb[108].mxu1 %v5293_v15  ;;  %v9143_v5 = vpop.f32.mrb[65].mxu1 }
 0x327   :  { %1924 = vst.msk [vmem:[#allocation3 + $0x320] sm:$0xff] %vm1207_vm1, %v1915_v50  ;;  %9635 = vmatpush3.bf16.msra.mxu1 %v12563_v13  ;;  %v4321_v41 = vadd.f32 %v12642_v33, %v9101_v26  ;;  %v9144_v63 = vadd.f32 %v9143_v5, %v9142_v14  ;;  %v9145_v49 = vpop.f32.mrb[66].mxu1  ;;  %3839 = vrot.lane.b32.xlu0 %v3828_v57, %s10359_s15 }
 0x328   :  { %v12650_v11 = vadd.f32 %v9138_v37, %v4318_v48  ;;  %9636 = vmatprep.subr.bf16.mxu1 %v9938_v12  ;;  %v9146_v58 = vpop.f32.mrb[67].mxu1 }
 0x329   :  { %v2233_v29 = vpop.permute.xlu0 %2232  ;;  %v9147_v10 = vadd.f32 %v9146_v58, %v9145_v49  ;;  %v9102_v13 = vpop.f32.mrb[72].mxu0  ;;  %v12656_v22 = vadd.f32 %v9141_v30, %v4321_v41 }
 0x32a   :  { %2243 = vst.msk [vmem:[#allocation3 + $0x2f0] sm:$0xff] %vm1207_vm1, %v2233_v29  ;;  %v2011_v16 = vpop.permute.xlu1 %2010  ;;  %v9103_v17 = vpop.f32.mrb[73].mxu0 }
 0x32b   :  { %2020 = vst.msk [vmem:[#allocation3 + $0x320] sm:$0xff] %vm1304_vm2, %v2011_v16  ;;  %9637 = vmatpush3.bf16.msra.mxu1 %v9938_v12  ;;  %v9104_v43 = vadd.f32 %v9103_v17, %v9102_v13  ;;  %v9105_v18 = vpop.f32.mrb[74].mxu0 }
 0x32c   :  { %7753 = vmatprep.subr.bf16.mxu1 %v9944_v1  ;;  %v9106_v8 = vpop.f32.mrb[75].mxu0 }
 0x32d   :  { %v2329_v45 = vpop.permute.xlu0 %2328  ;;  %v5313_v55 = vld [vmem:[#allocation3 + $0x350] sm:$0xff]  ;;  %v4326_v2 = vadd.f32 %v12642_v33, %v9104_v43  ;;  %v9148_v34 = vpop.f32.mrb[68].mxu1  ;;  %v9107_v31 = vadd.f32 %v9106_v8, %v9105_v18 }
 0x32e   :  { %2339 = vst.msk [vmem:[#allocation3 + $0x2f0] sm:$0xff] %vm1304_vm2, %v2329_v45  ;;  %v2107_v51 = vpop.permute.xlu1 %2106  ;;  %5787 = vmatprep.mubr.bf16.mxu0 %v5313_v55  ;;  %v9149_v44 = vpop.f32.mrb[69].mxu1  ;;  %v9929_v18 = vld [vmem:[%s13749_s5] ss:$16 sps:$4 sm:$0xff]  }
 0x32f   :  { %2116 = vst.msk [vmem:[#allocation3 + $0x320] sm:$0xff] %vm1401_vm3, %v2107_v51  ;;  %5788 = vmatmul.mubr.bf16.gmra.mrb[144].mxu0 %v5312_v52  ;;  %v4329_v25 = vadd.f32 %v12642_v33, %v9107_v31  ;;  %v9150_v28 = vadd.f32 %v9149_v44, %v9148_v34  ;;  %v9151_v23 = vpop.f32.mrb[70].mxu1  ;;  %v12663_v59 = vadd.f32 %v9144_v63, %v4326_v2  ;;  %v9934_v2 = vld [vmem:[%s13749_s5 + $0x24] ss:$16 sps:$4 sm:$0xff]   ;;  %v9932_v44 = vld [vmem:[%s13749_s5 + $0x20] ss:$16 sps:$4 sm:$0xff]  }
 0x330   :  { %v9152_v53 = vpop.f32.mrb[71].mxu1  ;;  %v5295_v31 = vld [vmem:[#allocation3 + $0x2c0] sm:$0xff] }
 0x331   :  { %v2425_v32 = vpop.permute.xlu0 %2424  ;;  %v9153_v62 = vadd.f32 %v9152_v53, %v9151_v23  ;;  %v9108_v24 = vpop.f32.mrb[76].mxu0  ;;  %v12666_v6 = vadd.f32 %v9147_v10, %v4329_v25  ;;  %v9937_v53 = vld [vmem:[%s13749_s5 + $0x44] ss:$16 sps:$4 sm:$0xff]  }
 0x332   :  { %2435 = vst.msk [vmem:[#allocation3 + $0x2f0] sm:$0xff] %vm1401_vm3, %v2425_v32  ;;  %v2553_v38 = vpop.permute.xlu1 %2552  ;;  %v9109_v7 = vpop.f32.mrb[77].mxu0 }
 0x333   :  { %2563 = vst.msk [vmem:[#allocation3 + $0x2f8] sm:$0xff] %vm1207_vm1, %v2553_v38  ;;  %v9110_v61 = vadd.f32 %v9109_v7, %v9108_v24  ;;  %v9111_v20 = vpop.f32.mrb[78].mxu0 }
 0x334   :  { %v9112_v19 = vpop.f32.mrb[79].mxu0 }
 0x335   :  { %v2871_v21 = vpop.permute.xlu0 %2870  ;;  %v4334_v46 = vadd.f32 %v12642_v33, %v9110_v61  ;;  %v9154_v37 = vpop.f32.mrb[72].mxu1  ;;  %v9113_v36 = vadd.f32 %v9112_v19, %v9111_v20 }
 0x336   :  { %2882 = vst.msk [vmem:[#allocation3 + $0x2c8] sm:$0xff] %vm1207_vm1, %v2871_v21  ;;  %v2649_v47 = vpop.permute.xlu1 %2648  ;;  %v9155_v40 = vpop.f32.mrb[73].mxu1 }
 0x337   :  { %2659 = vst.msk [vmem:[#allocation3 + $0x2f8] sm:$0xff] %vm1304_vm2, %v2649_v47  ;;  %v4337_v60 = vadd.f32 %v12642_v33, %v9113_v36  ;;  %v9156_v4 = vadd.f32 %v9155_v40, %v9154_v37  ;;  %v9157_v30 = vpop.f32.mrb[74].mxu1  ;;  %v12673_v9 = vadd.f32 %v9150_v28, %v4334_v46  ;;  %v9935_v46 = vld [vmem:[%s13749_s5 + $0x40] ss:$16 sps:$4 sm:$0xff]  }
 0x338   :  { %v9158_v27 = vpop.f32.mrb[75].mxu1 }
 0x339   :  { %v2967_v42 = vpop.permute.xlu0 %2966  ;;  %v5301_v39 = vld [vmem:[#allocation3 + $0x2f0] sm:$0xff]  ;;  %v9159_v0 = vadd.f32 %v9158_v27, %v9157_v30  ;;  %v9114_v12 = vpop.f32.mrb[80].mxu0  ;;  %v12676_v3 = vadd.f32 %v9153_v62, %v4337_v60 }
 0x33a   :  { %2978 = vst.msk [vmem:[#allocation3 + $0x2c8] sm:$0xff] %vm1304_vm2, %v2967_v42  ;;  %v2745_v35 = vpop.permute.xlu1 %2744  ;;  %5836 = vmatprep.mubr.bf16.mxu1 %v5301_v39  ;;  %v9115_v54 = vpop.f32.mrb[81].mxu0  ;;  %v9939_v27 = vld [vmem:[%s13749_s5 + $0x60] ss:$16 sps:$4 sm:$0xff]  }
 0x33b   :  { %2755 = vst.msk [vmem:[#allocation3 + $0x2f8] sm:$0xff] %vm1401_vm3, %v2745_v35  ;;  %5837 = vmatmul.mubr.bf16.gmra.mrb[112].mxu1 %v5300_v56  ;;  %v9116_v15 = vadd.f32 %v9115_v54, %v9114_v12  ;;  %v9117_v57 = vpop.f32.mrb[82].mxu0  ;;  %v9947_v56 = vld [vmem:[%s13749_s5 + $0x84] ss:$16 sps:$4 sm:$0xff]  }
 0x33c   :  { %v9118_v26 = vpop.f32.mrb[83].mxu0 }
 0x33d   :  { %v3063_v48 = vpop.permute.xlu0 %3062  ;;  %v4342_v14 = vadd.f32 %v12642_v33, %v9116_v15  ;;  %v12681_v50 = vpop.f32.mrb[76].mxu1  ;;  %v9119_v41 = vadd.f32 %v9118_v26, %v9117_v57  ;;  %v5307_v57 = vld [vmem:[#allocation3 + $0x320] sm:$0xff] }
 0x33e   :  { %3074 = vst.msk [vmem:[#allocation3 + $0x2c8] sm:$0xff] %vm1401_vm3, %v3063_v48  ;;  %v1917_v5 = vpop.permute.xlu1 %1916  ;;  %v4512_v63 = vpop.f32.mrb[77].mxu1 }
 0x33f   :  { %1925 = vst.msk [vmem:[#allocation3 + $0x358] sm:$0xff] %vm1207_vm1, %v1917_v5  ;;  %v4345_v49 = vadd.f32 %v12642_v33, %v9119_v41  ;;  %v12685_v1 = vpop.f32.mrb[78].mxu1  ;;  %v12687_v58 = vadd.f32 %v9156_v4, %v4342_v14 }
 0x340   :  { %v4515_v29 = vpop.f32.mrb[79].mxu1 }
 0x341   :  { %v2235_v10 = vpop.permute.xlu0 %2234  ;;  %v12690_v13 = vadd.f32 %v9159_v0, %v4345_v49 }
 0x342   :  { %2244 = vst.msk [vmem:[#allocation3 + $0x328] sm:$0xff] %vm1207_vm1, %v2235_v10  ;;  %v2013_v16 = vpop.permute.xlu1 %2012  ;;  %v9176_v17 = vpop.f32.mrb[84].mxu0 }
 0x343   :  { %2021 = vst.msk [vmem:[#allocation3 + $0x358] sm:$0xff] %vm1304_vm2, %v2013_v16  ;;  %v9177_v43 = vpop.f32.mrb[85].mxu0 }
 0x344   :  { %v9178_v45 = vadd.f32 %v9177_v43, %v9176_v17  ;;  %v9179_v8 = vpop.f32.mrb[86].mxu0 }
 0x345   :  { %v2331_v55 = vpop.permute.xlu0 %2330  ;;  %v5296_v52 = vld [vmem:[#allocation3 + $0x2c8] sm:$0xff]  ;;  %v9180_v51 = vpop.f32.mrb[87].mxu0 }
 0x346   :  { %2340 = vst.msk [vmem:[#allocation3 + $0x328] sm:$0xff] %vm1304_vm2, %v2331_v55  ;;  %v2109_v34 = vpop.permute.xlu1 %2108  ;;  %5893 = vmatprep.mubr.bf16.mxu0 %v5296_v52  ;;  %v4448_v25 = vadd.f32 %v9178_v45, %v12650_v11  ;;  %v9181_v28 = vadd.f32 %v9180_v51, %v9179_v8  ;;  %v12705_v23 = vpop.f32.mrb[80].mxu1  ;;  %v9959_v52 = vld [vmem:[%s13749_s5 + $0xc4] ss:$16 sps:$4 sm:$0xff]  }
 0x347   :  { %2117 = vst.msk [vmem:[#allocation3 + $0x358] sm:$0xff] %vm1401_vm3, %v2109_v34  ;;  %5894 = vmatmul.mubr.bf16.vlgmr.msra.gmra.mrb[148].mxu0 %v5295_v31  ;;  %v12710_v32 = vpop.f32.mrb[81].mxu1  ;;  %v9957_v31 = vld [vmem:[%s13749_s5 + $0xc0] ss:$16 sps:$4 sm:$0xff]  }
 0x348   :  { %7582 = vmatpush1.bf16.msra.mxu0 %v9929_v18  ;;  %v4513_v62 = vadd.f32 %v4512_v63, %v4448_v25  ;;  %v4451_v38 = vadd.f32 %v9181_v28, %v12656_v22  ;;  %v12713_v7 = vpop.f32.mrb[82].mxu1  ;;  %v9941_v22 = vld [vmem:[%s13749_s5 + $0x64] ss:$16 sps:$4 sm:$0xff]   ;;  %v9951_v18 = vld [vmem:[%s13749_s5 + $0xa0] ss:$16 sps:$4 sm:$0xff]  }
 0x349   :  { %v2427_v24 = vpop.permute.xlu0 %2426  ;;  %7583 = vmatprep.subr.bf16.mxu0 %v9934_v2  ;;  %v12716_v61 = vpop.f32.mrb[83].mxu1 }
 0x34a   :  { %2436 = vst.msk [vmem:[#allocation3 + $0x328] sm:$0xff] %vm1401_vm3, %v2427_v24  ;;  %v2555_v11 = vpop.permute.xlu1 %2554  ;;  %v4516_v20 = vadd.f32 %v4515_v29, %v4451_v38  ;;  %v9182_v21 = vpop.f32.mrb[88].mxu0  ;;  %v4543_v37 = vmax.f32 %v4513_v62, 0.0  ;;  %v5302_v24 = vld [vmem:[#allocation3 + $0x2f8] sm:$0xff] }
 0x34b   :  { %2564 = vst.msk [vmem:[#allocation3 + $0x330] sm:$0xff] %vm1207_vm1, %v2555_v11  ;;  %v9183_v19 = vpop.f32.mrb[89].mxu0 }
 0x34c   :  { %7584 = vmatpush1.bf16.msra.mxu0 %v9932_v44  ;;  %v4544_v47 = vmax.f32 %v4516_v20, 0.0  ;;  %v9184_v36 = vadd.f32 %v9183_v19, %v9182_v21  ;;  %v9185_v40 = vpop.f32.mrb[90].mxu0 }
 0x34d   :  { %v2873_v60 = vpop.permute.xlu0 %2872  ;;  %7585 = vmatprep.subr.bf16.mxu0 %v9937_v53  ;;  %v9186_v30 = vpop.f32.mrb[91].mxu0 }
 0x34e   :  { %2883 = vst.msk [vmem:[#allocation3 + $0x300] sm:$0xff] %vm1207_vm1, %v2873_v60  ;;  %v2651_v4 = vpop.permute.xlu1 %2650  ;;  %v4456_v42 = vadd.f32 %v9184_v36, %v12663_v59  ;;  %v9187_v39 = vadd.f32 %v9186_v30, %v9185_v40  ;;  %v4551_v0 = vpack.c.bf16 %v4544_v47, %v4543_v37  ;;  %v9969_v60 = vld [vmem:[%s13749_s5 + $0x100] ss:$16 sps:$4 sm:$0xff]  }
 0x34f   :  { %2660 = vst.msk [vmem:[#allocation3 + $0x330] sm:$0xff] %vm1304_vm2, %v2651_v4 }
 0x350   :  { %7586 = vmatpush1.bf16.msra.mxu0 %v9935_v46  ;;  %v4521_v35 = vadd.f32 %v12681_v50, %v4456_v42  ;;  %v4459_v12 = vadd.f32 %v9187_v39, %v12666_v6  ;;  %4555 = vst.msk [vmem:[#allocation4 + $0x10] sm:$0xff] %vm3829_vm4, %v4551_v0  ;;  %v9945_v6 = vld [vmem:[%s13749_s5 + $0x80] ss:$16 sps:$4 sm:$0xff]   ;;  %v9971_v46 = vld [vmem:[%s13749_s5 + $0x104] ss:$16 sps:$4 sm:$0xff]  }
 0x351   :  { %v2969_v54 = vpop.permute.xlu0 %2968  ;;  %v5308_v15 = vld [vmem:[#allocation3 + $0x328] sm:$0xff]  ;;  %7587 = vmatprep.subr.bf16.mxu0 %v9941_v22  ;;  %v9977_v42 = vld [vmem:[%s13749_s5 + $0x124] ss:$16 sps:$4 sm:$0xff]   ;;  %v9975_v39 = vld [vmem:[%s13749_s5 + $0x120] ss:$16 sps:$4 sm:$0xff]  }
 0x352   :  { %2979 = vst.msk [vmem:[#allocation3 + $0x300] sm:$0xff] %vm1304_vm2, %v2969_v54  ;;  %v2747_v59 = vpop.permute.xlu1 %2746  ;;  %5844 = vmatprep.mubr.bf16.mxu1 %v5308_v15  ;;  %v4524_v48 = vadd.f32 %v12685_v1, %v4459_v12  ;;  %v9188_v26 = vpop.f32.mrb[92].mxu0  ;;  %v4545_v50 = vmax.f32 %v4521_v35, 0.0  ;;  %v9953_v1 = vld [vmem:[%s13749_s5 + $0xa4] ss:$16 sps:$4 sm:$0xff]  }
 0x353   :  { %2756 = vst.msk [vmem:[#allocation3 + $0x330] sm:$0xff] %vm1401_vm3, %v2747_v59  ;;  %5845 = vmatmul.mubr.bf16.gmra.mrb[116].mxu1 %v5307_v57  ;;  %v9189_v14 = vpop.f32.mrb[93].mxu0  ;;  %v5297_v35 = vld [vmem:[#allocation3 + $0x2d0] sm:$0xff]  ;;  %v5314_v59 = vld [vmem:[#allocation3 + $0x358] sm:$0xff] }
 0x354   :  { %7588 = vmatpush1.bf16.msra.mxu0 %v9939_v27  ;;  %v4546_v5 = vmax.f32 %v4524_v48, 0.0  ;;  %v9190_v41 = vadd.f32 %v9189_v14, %v9188_v26  ;;  %v9191_v63 = vpop.f32.mrb[94].mxu0  ;;  %v9983_v12 = vld [vmem:[%s13749_s5 + $0x144] ss:$16 sps:$4 sm:$0xff]   ;;  %v9981_v57 = vld [vmem:[%s13749_s5 + $0x140] ss:$16 sps:$4 sm:$0xff]  }
 0x355   :  { %v3065_v49 = vpop.permute.xlu0 %3064  ;;  %7589 = vmatprep.subr.bf16.mxu0 %v9947_v56  ;;  %v9192_v10 = vpop.f32.mrb[95].mxu0  ;;  %v9989_v26 = vld [vmem:[%s13749_s5 + $0x164] ss:$16 sps:$4 sm:$0xff]  }
 0x356   :  { %3075 = vst.msk [vmem:[#allocation3 + $0x300] sm:$0xff] %vm1401_vm3, %v3065_v49  ;;  %v2557_v29 = vpop.permute.xlu1 %2556  ;;  %v4552_v16 = vpack.c.bf16 %v4546_v5, %v4545_v50  ;;  %v9193_v17 = vadd.f32 %v9192_v10, %v9191_v63  ;;  %v4464_v43 = vadd.f32 %v9190_v41, %v12673_v9  ;;  %v9942_v49 = vld [vmem:[%s13749_s5 + $0x8] ss:$16 sps:$4 sm:$0xff]  }
 0x357   :  { %2565 = vst.msk [vmem:[#allocation3 + $0x368] sm:$0xff] %vm1207_vm1, %v2557_v29 }
 0x358   :  { %7590 = vmatpush1.bf16.msra.mxu0 %v9945_v6  ;;  %v4529_v45 = vadd.f32 %v12710_v32, %v4464_v43  ;;  %4557 = vrot.lane.b32.xlu1 %v4552_v16, %s10359_s15  ;;  %v4467_v55 = vadd.f32 %v9193_v17, %v12676_v3  ;;  %v9965_v3 = vld [vmem:[%s13749_s5 + $0xe4] ss:$16 sps:$4 sm:$0xff]   ;;  %v9950_v16 = vld [vmem:[%s13749_s5 + $0x2c] ss:$16 sps:$4 sm:$0xff]  }
 0x359   :  { %v2237_v8 = vpop.permute.xlu0 %2236  ;;  %7591 = vmatprep.subr.bf16.mxu0 %v9953_v1  ;;  %v5304_v1 = vld [vmem:[#allocation3 + $0x308] sm:$0xff]  ;;  %v5311_v17 = vld [vmem:[#allocation3 + $0x340] sm:$0xff] }
 0x35a   :  { %2245 = vst.msk [vmem:[#allocation3 + $0x360] sm:$0xff] %vm1207_vm1, %v2237_v8  ;;  %v2653_v9 = vpop.permute.xlu1 %2652  ;;  %v4532_v2 = vadd.f32 %v12716_v61, %v4467_v55  ;;  %v9194_v34 = vpop.f32.mrb[96].mxu0  ;;  %v4547_v44 = vmax.f32 %v4529_v45, 0.0  ;;  %v9963_v61 = vld [vmem:[%s13749_s5 + $0xe0] ss:$16 sps:$4 sm:$0xff]  }
 0x35b   :  { %2661 = vst.msk [vmem:[#allocation3 + $0x368] sm:$0xff] %vm1304_vm2, %v2653_v9  ;;  %v9195_v51 = vpop.f32.mrb[97].mxu0  ;;  %v9987_v8 = vld [vmem:[%s13749_s5 + $0x160] ss:$16 sps:$4 sm:$0xff]   ;;  %v9995_v55 = vld [vmem:[%s13749_s5 + $0x184] ss:$16 sps:$4 sm:$0xff]  }
 0x35c   :  { %7592 = vmatpush1.bf16.msra.mxu0 %v9951_v18  ;;  %v4548_v25 = vmax.f32 %v4532_v2, 0.0  ;;  %v9196_v28 = vadd.f32 %v9195_v51, %v9194_v34  ;;  %v9197_v53 = vpop.f32.mrb[98].mxu0 }
 0x35d   :  { %v2333_v32 = vpop.permute.xlu0 %2332  ;;  %v5303_v62 = vld [vmem:[#allocation3 + $0x300] sm:$0xff]  ;;  %7593 = vmatprep.subr.bf16.mxu0 %v9959_v52  ;;  %v9198_v38 = vpop.f32.mrb[99].mxu0 }
 0x35e   :  { %2341 = vst.msk [vmem:[#allocation3 + $0x360] sm:$0xff] %vm1304_vm2, %v2333_v32  ;;  %5901 = vmatprep.mubr.bf16.mxu0 %v5303_v62  ;;  %v2749_v11 = vpop.permute.xlu1 %2748  ;;  %v4553_v20 = vpack.c.bf16 %v4548_v25, %v4547_v44  ;;  %v4472_v21 = vadd.f32 %v9196_v28, %v12687_v58  ;;  %v9199_v19 = vadd.f32 %v9198_v38, %v9197_v53  ;;  %v9956_v44 = vld [vmem:[%s13749_s5 + $0x4c] ss:$16 sps:$4 sm:$0xff]  }
 0x35f   :  { %5902 = vmatmul.mubr.bf16.gmra.mrb[152].mxu0 %v5302_v24  ;;  %2757 = vst.msk [vmem:[#allocation3 + $0x368] sm:$0xff] %vm1401_vm3, %v2749_v11  ;;  %v9993_v24 = vld [vmem:[%s13749_s5 + $0x180] ss:$16 sps:$4 sm:$0xff]  }
 0x360   :  { %7594 = vmatpush1.bf16.msra.mxu0 %v9957_v31  ;;  %v4537_v22 = vadd.f32 %v12705_v23, %v4472_v21  ;;  %v4475_v37 = vadd.f32 %v9199_v19, %v12690_v13  ;;  %4561 = vst.msk [vmem:[#allocation4 + $0x18] sm:$0xff] %vm3829_vm4, %v4553_v20  ;;  %v9948_v31 = vld [vmem:[%s13749_s5 + $0x28] ss:$16 sps:$4 sm:$0xff]   ;;  %v10001_v20 = vld [vmem:[%s13749_s5 + $0x1a4] ss:$16 sps:$4 sm:$0xff]  }
 0x361   :  { %v2429_v47 = vpop.permute.xlu0 %2428  ;;  %7595 = vmatprep.subr.bf16.mxu0 %v9965_v3  ;;  %v9954_v19 = vld [vmem:[%s13749_s5 + $0x48] ss:$16 sps:$4 sm:$0xff]  }
 0x362   :  { %2437 = vst.msk [vmem:[#allocation3 + $0x360] sm:$0xff] %vm1401_vm3, %v2429_v47  ;;  %v4540_v58 = vadd.f32 %v12713_v7, %v4475_v37  ;;  %v9222_v36 = vpop.f32.mrb[100].mxu0  ;;  %v4549_v4 = vmax.f32 %v4537_v22, 0.0  ;;  %v9962_v37 = vld [vmem:[%s13749_s5 + $0x6c] ss:$16 sps:$4 sm:$0xff]  }
 0x363   :  { %v9223_v40 = vpop.f32.mrb[101].mxu0  ;;  %v9999_v47 = vld [vmem:[%s13749_s5 + $0x1a0] ss:$16 sps:$4 sm:$0xff]  }
 0x364   :  { %7596 = vmatpush1.bf16.msra.mxu0 %v9963_v61  ;;  %v4550_v30 = vmax.f32 %v4540_v58, 0.0  ;;  %v9224_v23 = vadd.f32 %v9223_v40, %v9222_v36  ;;  %v9225_v27 = vpop.f32.mrb[102].mxu0  ;;  %v5309_v61 = vld [vmem:[#allocation3 + $0x330] sm:$0xff] }
 0x365   :  { %v2875_v13 = vpop.permute.xlu0 %2874  ;;  %7597 = vmatprep.subr.bf16.mxu0 %v9971_v46  ;;  %v9226_v7 = vpop.f32.mrb[103].mxu0  ;;  %v5318_v46 = vld [vmem:[#allocation3 + $0x378] sm:$0xff]  ;;  %v10007_v58 = vld [vmem:[%s13749_s5 + $0x1c4] ss:$16 sps:$4 sm:$0xff]  }
 0x366   :  { %2884 = vst.msk [vmem:[#allocation3 + $0x338] sm:$0xff] %vm1207_vm1, %v2875_v13  ;;  %v4554_v56 = vpack.c.bf16 %v4550_v30, %v4549_v4  ;;  %v9227_v0 = vadd.f32 %v9226_v7, %v9225_v27  ;;  %v5042_v43 = vadd.f32 %v12642_v33, %v9224_v23  ;;  %v9968_v23 = vld [vmem:[%s13749_s5 + $0x8c] ss:$16 sps:$4 sm:$0xff]   ;;  %v10005_v27 = vld [vmem:[%s13749_s5 + $0x1c0] ss:$16 sps:$4 sm:$0xff]  }
 0x368   :  { %7598 = vmatpush1.bf16.msra.mxu0 %v9969_v60  ;;  %4563 = vrot.lane.b32.xlu0 %v4554_v56, %s10359_s15  ;;  %v5045_v2 = vadd.f32 %v12642_v33, %v9227_v0  ;;  %v9960_v60 = vld [vmem:[%s13749_s5 + $0x68] ss:$16 sps:$4 sm:$0xff]  }
 0x369   :  { %v2971_v54 = vpop.permute.xlu0 %2970  ;;  %v5315_v15 = vld [vmem:[#allocation3 + $0x360] sm:$0xff]  ;;  %7599 = vmatprep.subr.bf16.mxu0 %v9977_v42  ;;  %v5316_v56 = vld [vmem:[#allocation3 + $0x368] sm:$0xff] }
 0x36a   :  { %2980 = vst.msk [vmem:[#allocation3 + $0x338] sm:$0xff] %vm1304_vm2, %v2971_v54  ;;  %5852 = vmatprep.mubr.bf16.mxu1 %v5315_v15  ;;  %v9228_v48 = vpop.f32.mrb[104].mxu0  ;;  %v10013_v42 = vld [vmem:[%s13749_s5 + $0x1e4] ss:$16 sps:$4 sm:$0xff]   ;;  %v10011_v54 = vld [vmem:[%s13749_s5 + $0x1e0] ss:$16 sps:$4 sm:$0xff]  }
 0x36b   :  { %5853 = vmatmul.mubr.bf16.gmra.mrb[120].mxu1 %v5314_v59  ;;  %v9229_v14 = vpop.f32.mrb[105].mxu0 }
 0x36c   :  { %9638 = vmatprep.mubr.msk.bf16.mxu1 %vm33_vm0, %v5297_v35  ;;  %7600 = vmatpush1.bf16.msra.mxu0 %v9975_v39  ;;  %v12803_v6 = vadd.f32 %v9229_v14, %v9228_v48  ;;  %v9231_v50 = vpop.f32.mrb[106].mxu0  ;;  %v9966_v39 = vld [vmem:[%s13749_s5 + $0x88] ss:$16 sps:$4 sm:$0xff]  }
 0x36d   :  { %v3067_v5 = vpop.permute.xlu0 %3066  ;;  %7601 = vmatprep.subr.bf16.mxu0 %v9983_v12  ;;  %v9232_v41 = vpop.f32.mrb[107].mxu0  ;;  %v9974_v12 = vld [vmem:[%s13749_s5 + $0xac] ss:$16 sps:$4 sm:$0xff]  }
 0x36e   :  { %3076 = vst.msk [vmem:[#allocation3 + $0x338] sm:$0xff] %vm1401_vm3, %v3067_v5  ;;  %v9262_v63 = vpop.f32.mrb[84].mxu1  ;;  %v12809_v29 = vadd.f32 %v9232_v41, %v9231_v50  ;;  %v5050_v48 = vadd.f32 %v12642_v33, %v12803_v6  ;;  %v9972_v5 = vld [vmem:[%s13749_s5 + $0xa8] ss:$16 sps:$4 sm:$0xff]   ;;  %v12897_v41 = vld [vmem:[%s13748_s4] ss:$0 sm:$0xff] }
 0x36f   :  { %v9263_v10 = vpop.f32.mrb[85].mxu1 }
 0x370   :  { %v9264_v18 = vadd.f32 %v9263_v10, %v9262_v63  ;;  %v9265_v45 = vpop.f32.mrb[86].mxu1  ;;  %7602 = vmatpush1.bf16.msra.mxu0 %v9981_v57  ;;  %v10019_v57 = vld [vmem:[%s13749_s5 + $0x204] ss:$16 sps:$4 sm:$0xff]   ;;  %v5053_v63 = vadd.f32 %v12897_v41, %v12809_v29  ;;  %v9978_v10 = vld [vmem:[%s13749_s5 + $0xc8] ss:$16 sps:$4 sm:$0xff]  }
 0x371   :  { %v9266_v52 = vpop.f32.mrb[87].mxu1  ;;  %v2877_v9 = vpop.permute.xlu0 %2876  ;;  %7603 = vmatprep.subr.bf16.mxu0 %v9989_v26  ;;  %v9986_v29 = vld [vmem:[%s13749_s5 + $0xec] ss:$16 sps:$4 sm:$0xff]  }
 0x372   :  { %v12822_v34 = vadd.f32 %v9264_v18, %v5042_v43  ;;  %v9267_v51 = vadd.f32 %v9266_v52, %v9265_v45  ;;  %2885 = vst.msk [vmem:[#allocation3 + $0x370] sm:$0xff] %vm1207_vm1, %v2877_v9  ;;  %v9984_v45 = vld [vmem:[%s13749_s5 + $0xe8] ss:$16 sps:$4 sm:$0xff]  }
 0x373   :  { %v9234_v3 = vpop.f32.mrb[108].mxu0  ;;  %9639 = vmatmul.mubr.msk.bf16.vlgmr.msra.gmra.mrb[124].mxu1 %vm33_vm0, %v5304_v1 }
 0x374   :  { %v12832_v25 = vadd.f32 %v9267_v51, %v5045_v2  ;;  %v9235_v28 = vpop.f32.mrb[109].mxu0  ;;  %7754 = vmatpush1.bf16.msra.mxu1 %v9942_v49  ;;  %9642 = vmatprep.mubr.msk.bf16.mxu1 %vm33_vm0, %v5311_v17  ;;  %v9980_v49 = vld [vmem:[%s13749_s5 + $0xcc] ss:$16 sps:$4 sm:$0xff]   ;;  %v9990_v2 = vld [vmem:[%s13749_s5 + $0x108] ss:$16 sps:$4 sm:$0xff]  }
 0x375   :  { %v12835_v53 = vadd.f32 %v9235_v28, %v9234_v3  ;;  %v9237_v32 = vpop.f32.mrb[110].mxu0  ;;  %v2973_v62 = vpop.permute.xlu0 %2972  ;;  %v5310_v38 = vld [vmem:[#allocation3 + $0x338] sm:$0xff]  ;;  %7755 = vmatprep.subr.bf16.mxu1 %v9950_v16  ;;  %7604 = vmatpush1.bf16.msra.mxu0 %v9987_v8 }
 0x376   :  { %2981 = vst.msk [vmem:[#allocation3 + $0x370] sm:$0xff] %vm1304_vm2, %v2973_v62  ;;  %v9238_v11 = vpop.f32.mrb[111].mxu0  ;;  %5909 = vmatprep.mubr.bf16.mxu0 %v5310_v38  ;;  %7605 = vmatprep.subr.bf16.mxu0 %v9995_v55  ;;  %v9992_v55 = vld [vmem:[%s13749_s5 + $0x10c] ss:$16 sps:$4 sm:$0xff]   ;;  %v9996_v3 = vld [vmem:[%s13749_s5 + $0x128] ss:$16 sps:$4 sm:$0xff]  }
 0x377   :  { %v12844_v21 = vadd.f32 %v9238_v11, %v9237_v32  ;;  %5910 = vmatmul.mubr.bf16.gmra.mrb[156].mxu0 %v5309_v61  ;;  %v10010_v28 = vld [vmem:[%s13749_s5 + $0x16c] ss:$16 sps:$4 sm:$0xff]   ;;  %v5058_v38 = vadd.f32 %v12897_v41, %v12835_v53 }
 0x378   :  { %7756 = vmatpush1.bf16.msra.mxu1 %v9948_v31  ;;  %v9998_v31 = vld [vmem:[%s13749_s5 + $0x12c] ss:$16 sps:$4 sm:$0xff]  }
 0x379   :  { %v3069_v22 = vpop.permute.xlu0 %3068  ;;  %7757 = vmatprep.subr.bf16.mxu1 %v9956_v44  ;;  %7606 = vmatpush1.bf16.msra.mxu0 %v9993_v24  ;;  %v10002_v44 = vld [vmem:[%s13749_s5 + $0x148] ss:$16 sps:$4 sm:$0xff]   ;;  %v10016_v53 = vld [vmem:[%s13749_s5 + $0x18c] ss:$16 sps:$4 sm:$0xff]  }
 0x37a   :  { %3077 = vst.msk [vmem:[#allocation3 + $0x370] sm:$0xff] %vm1401_vm3, %v3069_v22  ;;  %7607 = vmatprep.subr.bf16.mxu0 %v10001_v20  ;;  %v10008_v20 = vld [vmem:[%s13749_s5 + $0x168] ss:$16 sps:$4 sm:$0xff]  }
 0x37b   :  { %v9240_v36 = vpop.f32.mrb[112].mxu0  ;;  %9643 = vmatmul.mubr.msk.bf16.gmra.mrb[128].mxu1 %vm33_vm0, %v5318_v46 }
 0x37c   :  { %v9241_v40 = vpop.f32.mrb[113].mxu0  ;;  %7758 = vmatpush1.bf16.msra.mxu1 %v9954_v19  ;;  %v5061_v19 = vadd.f32 %v12897_v41, %v12844_v21  ;;  %v10017_v21 = vld [vmem:[%s13749_s5 + $0x200] ss:$16 sps:$4 sm:$0xff]  }
 0x37d   :  { %v12863_v4 = vadd.f32 %v9241_v40, %v9240_v36  ;;  %v9243_v30 = vpop.f32.mrb[114].mxu0  ;;  %7759 = vmatprep.subr.bf16.mxu1 %v9962_v37  ;;  %7608 = vmatpush1.bf16.msra.mxu0 %v9999_v47  ;;  %v10014_v47 = vld [vmem:[%s13749_s5 + $0x188] ss:$16 sps:$4 sm:$0xff]  }
 0x37e   :  { %v9244_v13 = vpop.f32.mrb[115].mxu0  ;;  %7609 = vmatprep.subr.bf16.mxu0 %v10007_v58  ;;  %v10022_v58 = vld [vmem:[%s13749_s5 + $0x1ac] ss:$16 sps:$4 sm:$0xff]  }
 0x37f   :  { %v12874_v7 = vadd.f32 %v9244_v13, %v9243_v30 }
 0x380   :  { %7760 = vmatpush1.bf16.msra.mxu1 %v9960_v60  ;;  %v10025_v60 = vld [vmem:[%s13749_s5 + $0x224] ss:$16 sps:$4 sm:$0xff]  }
 0x381   :  { %v9268_v0 = vpop.f32.mrb[88].mxu1  ;;  %v5317_v35 = vld [vmem:[#allocation3 + $0x370] sm:$0xff]  ;;  %7761 = vmatprep.subr.bf16.mxu1 %v9968_v23  ;;  %7610 = vmatpush1.bf16.msra.mxu0 %v10005_v27  ;;  %v3833_v15 = vpop.permute.xlu1 %3832 }
 0x382   :  { %v9269_v59 = vpop.f32.mrb[89].mxu1  ;;  %5917 = vmatprep.mubr.bf16.mxu0 %v5317_v35  ;;  %7611 = vmatprep.subr.bf16.mxu0 %v10013_v42  ;;  %3836 = vst.msk [vmem:[#allocation4] sm:$0xff] %vm3835_vm5, %v3833_v15  ;;  %v10020_v42 = vld [vmem:[%s13749_s5 + $0x1a8] ss:$16 sps:$4 sm:$0xff]  }
 0x383   :  { %v9270_v26 = vadd.f32 %v9269_v59, %v9268_v0  ;;  %v9271_v14 = vpop.f32.mrb[90].mxu1  ;;  %5918 = vmatmul.mubr.bf16.gmra.mrb[160].mxu0 %v5316_v56  ;;  %v10023_v56 = vld [vmem:[%s13749_s5 + $0x220] ss:$16 sps:$4 sm:$0xff]   ;;  %v10028_v0 = vld [vmem:[%s13749_s5 + $0x1cc] ss:$16 sps:$4 sm:$0xff]  }
 0x384   :  { %7762 = vmatpush1.bf16.msra.mxu1 %v9966_v39  ;;  %v9272_v50 = vpop.f32.mrb[91].mxu1  ;;  %v10026_v15 = vld [vmem:[%s13749_s5 + $0x1c8] ss:$16 sps:$4 sm:$0xff]  }
 0x385   :  { %v12901_v33 = vadd.f32 %v9270_v26, %v5050_v48  ;;  %v9273_v6 = vadd.f32 %v9272_v50, %v9271_v14  ;;  %7763 = vmatprep.subr.bf16.mxu1 %v9974_v12  ;;  %7612 = vmatpush1.bf16.msra.mxu0 %v10011_v54  ;;  %v10031_v12 = vld [vmem:[%s13749_s5 + $0x244] ss:$16 sps:$4 sm:$0xff]   ;;  %v10034_v48 = vld [vmem:[%s13749_s5 + $0x1ec] ss:$16 sps:$4 sm:$0xff]   ;;  %v10032_v14 = vld [vmem:[%s13749_s5 + $0x1e8] ss:$16 sps:$4 sm:$0xff]  }
 0x386   :  { %7624 = vmatprep.subr.bf16.mxu0 %v10019_v57  ;;  %v10029_v57 = vld [vmem:[%s13749_s5 + $0x240] ss:$16 sps:$4 sm:$0xff]   ;;  %v10037_v26 = vld [vmem:[%s13749_s5 + $0x264] ss:$16 sps:$4 sm:$0xff]  }
 0x387   :  { %v12906_v1 = vadd.f32 %v9273_v6, %v5053_v63  ;;  %v10035_v50 = vld [vmem:[%s13749_s5 + $0x260] ss:$16 sps:$4 sm:$0xff]   ;;  %v10043_v63 = vld [vmem:[%s13749_s5 + $0x284] ss:$16 sps:$4 sm:$0xff]  }
 0x388   :  { %7764 = vmatpush1.bf16.msra.mxu1 %v9972_v5  ;;  %v10040_v5 = vld [vmem:[%s13749_s5 + $0x20c] ss:$16 sps:$4 sm:$0xff]  }
 0x389   :  { %7765 = vmatprep.subr.bf16.mxu1 %v9980_v49  ;;  %v6015_v23 = vld [vmem:[#allocation4] sm:$0xff] }
 0x38a   :  { %v9302_v16 = vpop.f32.mrb[116].mxu0  ;;  %v10041_v49 = vld [vmem:[%s13749_s5 + $0x280] ss:$16 sps:$4 sm:$0xff]  }
 0x38b   :  { %v9303_v17 = vpop.f32.mrb[117].mxu0 }
 0x38c   :  { %v9304_v43 = vadd.f32 %v9303_v17, %v9302_v16  ;;  %7766 = vmatpush1.bf16.msra.mxu1 %v9978_v10  ;;  %v9305_v18 = vpop.f32.mrb[118].mxu0  ;;  %v5066_v16 = vadd.f32 %v12897_v41, %v12863_v4  ;;  %v10047_v4 = vld [vmem:[%s13749_s5 + $0x2a0] ss:$16 sps:$4 sm:$0xff]  }
 0x38d   :  { %v9306_v8 = vpop.f32.mrb[119].mxu0  ;;  %7767 = vmatprep.subr.bf16.mxu1 %v9986_v29  ;;  %v10049_v29 = vld [vmem:[%s13749_s5 + $0x2a4] ss:$16 sps:$4 sm:$0xff]  }
 0x38e   :  { %v9307_v52 = vadd.f32 %v9306_v8, %v9305_v18  ;;  %v12921_v9 = vadd.f32 %v9304_v43, %v12822_v34  ;;  %v10004_v34 = vld [vmem:[%s13749_s5 + $0x14c] ss:$16 sps:$4 sm:$0xff]   ;;  %v5069_v8 = vadd.f32 %v12897_v41, %v12874_v7  ;;  %v10050_v7 = vld [vmem:[%s13749_s5 + $0x248] ss:$16 sps:$4 sm:$0xff]  }
 0x390   :  { %7768 = vmatpush1.bf16.msra.mxu1 %v9984_v45  ;;  %v12927_v51 = vadd.f32 %v9307_v52, %v12832_v25  ;;  %v10044_v45 = vld [vmem:[%s13749_s5 + $0x228] ss:$16 sps:$4 sm:$0xff]  }
 0x391   :  { %7769 = vmatprep.subr.bf16.mxu1 %v9992_v55 }
 0x394   :  { %7770 = vmatpush1.bf16.msra.mxu1 %v9990_v2  ;;  %v10052_v2 = vld [vmem:[%s13749_s5 + $0x24c] ss:$16 sps:$4 sm:$0xff]  }
 0x395   :  { %7771 = vmatprep.subr.bf16.mxu1 %v9998_v31  ;;  %v10055_v31 = vld [vmem:[%s13749_s5 + $0x2c4] ss:$16 sps:$4 sm:$0xff]  }
 0x398   :  { %7772 = vmatpush1.bf16.msra.mxu1 %v9996_v3 }
 0x399   :  { %v9274_v25 = vpop.f32.mrb[92].mxu1  ;;  %7773 = vmatprep.subr.bf16.mxu1 %v10004_v34  ;;  %v3840_v32 = vpop.permute.xlu0 %3839 }
 0x39a   :  { %v9275_v62 = vpop.f32.mrb[93].mxu1  ;;  %3842 = vst.msk [vmem:[#allocation4 + $0x8] sm:$0xff] %vm3835_vm5, %v3840_v32 }
 0x39b   :  { %v9276_v24 = vadd.f32 %v9275_v62, %v9274_v25  ;;  %v9277_v11 = vpop.f32.mrb[94].mxu1  ;;  %v10058_v25 = vld [vmem:[%s13749_s5 + $0x26c] ss:$16 sps:$4 sm:$0xff]  }
 0x39c   :  { %7774 = vmatpush1.bf16.msra.mxu1 %v10002_v44  ;;  %v9278_v61 = vpop.f32.mrb[95].mxu1  ;;  %v10053_v44 = vld [vmem:[%s13749_s5 + $0x2c0] ss:$16 sps:$4 sm:$0xff]  }
 0x39d   :  { %v12952_v46 = vadd.f32 %v9276_v24, %v5058_v38  ;;  %v9279_v22 = vadd.f32 %v9278_v61, %v9277_v11  ;;  %7775 = vmatprep.subr.bf16.mxu1 %v10010_v28  ;;  %v10061_v38 = vld [vmem:[%s13749_s5 + $0x2e4] ss:$16 sps:$4 sm:$0xff]  }
 0x39f   :  { %v12957_v37 = vadd.f32 %v9279_v22, %v5061_v19 }
 0x3a0   :  { %7776 = vmatpush1.bf16.msra.mxu1 %v10008_v20 }
 0x3a1   :  { %7777 = vmatprep.subr.bf16.mxu1 %v10016_v53  ;;  %v6016_v40 = vld [vmem:[#allocation4 + $0x8] sm:$0xff] }
 0x3a2   :  { %v9308_v36 = vpop.f32.mrb[120].mxu0  ;;  %7613 = vmatprep.mubr.bf16.mxu0 %v6016_v40  ;;  %7785 = vmatprep.mubr.bf16.mxu1 %v6016_v40 }
 0x3a3   :  { %v9309_v30 = vpop.f32.mrb[121].mxu0  ;;  %7614 = vmatmul.mubr.bf16.vlgmr.msra.gmra.mrb[164].mxu0 %v6015_v23 }
 0x3a4   :  { %v9310_v27 = vadd.f32 %v9309_v30, %v9308_v36  ;;  %7778 = vmatpush1.bf16.msra.mxu1 %v10014_v47  ;;  %v9311_v13 = vpop.f32.mrb[122].mxu0  ;;  %7625 = vmatpush1.bf16.msra.mxu0 %v10017_v21  ;;  %v10056_v47 = vld [vmem:[%s13749_s5 + $0x268] ss:$16 sps:$4 sm:$0xff]   ;;  %v10064_v36 = vld [vmem:[%s13749_s5 + $0x28c] ss:$16 sps:$4 sm:$0xff]  }
 0x3a5   :  { %v9312_v39 = vpop.f32.mrb[123].mxu0  ;;  %7779 = vmatprep.subr.bf16.mxu1 %v10022_v58  ;;  %7626 = vmatprep.subr.bf16.mxu0 %v10025_v60 }
 0x3a6   :  { %v9313_v35 = vadd.f32 %v9312_v39, %v9311_v13  ;;  %v5180_v54 = vadd.f32 %v9310_v27, %v12901_v33  ;;  %v10038_v33 = vld [vmem:[%s13749_s5 + $0x208] ss:$16 sps:$4 sm:$0xff]  }
 0x3a7   :  { %v10062_v39 = vld [vmem:[%s13749_s5 + $0x288] ss:$16 sps:$4 sm:$0xff]  }
 0x3a8   :  { %7780 = vmatpush1.bf16.msra.mxu1 %v10020_v42  ;;  %v5183_v59 = vadd.f32 %v9313_v35, %v12906_v1  ;;  %7627 = vmatpush1.bf16.msra.mxu0 %v10023_v56  ;;  %v10046_v1 = vld [vmem:[%s13749_s5 + $0x22c] ss:$16 sps:$4 sm:$0xff]  }
 0x3a9   :  { %7781 = vmatprep.subr.bf16.mxu1 %v10028_v0  ;;  %7628 = vmatprep.subr.bf16.mxu0 %v10031_v12  ;;  %v10070_v12 = vld [vmem:[%s13749_s5 + $0x2ac] ss:$16 sps:$4 sm:$0xff]  }
 0x3ac   :  { %7782 = vmatpush1.bf16.msra.mxu1 %v10026_v15  ;;  %7629 = vmatpush1.bf16.msra.mxu0 %v10029_v57 }
 0x3ad   :  { %7783 = vmatprep.subr.bf16.mxu1 %v10034_v48  ;;  %7630 = vmatprep.subr.bf16.mxu0 %v10037_v26  ;;  %v10068_v48 = vld [vmem:[%s13749_s5 + $0x2a8] ss:$16 sps:$4 sm:$0xff]  }
 0x3b0   :  { %7784 = vmatpush1.bf16.msra.mxu1 %v10032_v14  ;;  %7631 = vmatpush1.bf16.msra.mxu0 %v10035_v50  ;;  %v10071_v14 = vld [vmem:[%s13749_s5 + $0x320] ss:$16 sps:$4 sm:$0xff]   ;;  %v10076_v50 = vld [vmem:[%s13749_s5 + $0x2cc] ss:$16 sps:$4 sm:$0xff]  }
 0x3b1   :  { %v9280_v6 = vpop.f32.mrb[96].mxu1  ;;  %7796 = vmatprep.subr.bf16.mxu1 %v10040_v5  ;;  %7632 = vmatprep.subr.bf16.mxu0 %v10043_v63  ;;  %v10079_v63 = vld [vmem:[%s13749_s5 + $0x344] ss:$16 sps:$4 sm:$0xff]  }
 0x3b2   :  { %v9281_v10 = vpop.f32.mrb[97].mxu1 }
 0x3b3   :  { %v9282_v17 = vadd.f32 %v9281_v10, %v9280_v6  ;;  %7786 = vmatmul.mubr.bf16.vlgmr.msra.gmra.mrb[132].mxu1 %v6015_v23  ;;  %v9283_v43 = vpop.f32.mrb[98].mxu1 }
 0x3b4   :  { %7797 = vmatpush1.bf16.msra.mxu1 %v10038_v33  ;;  %v9284_v18 = vpop.f32.mrb[99].mxu1  ;;  %7633 = vmatpush1.bf16.msra.mxu0 %v10041_v49 }
 0x3b5   :  { %v13028_v55 = vadd.f32 %v9282_v17, %v5066_v16  ;;  %v9285_v52 = vadd.f32 %v9284_v18, %v9283_v43  ;;  %7798 = vmatprep.subr.bf16.mxu1 %v10046_v1  ;;  %7634 = vmatprep.subr.bf16.mxu0 %v10049_v29  ;;  %v10074_v29 = vld [vmem:[%s13749_s5 + $0x2c8] ss:$16 sps:$4 sm:$0xff]   ;;  %v10077_v43 = vld [vmem:[%s13749_s5 + $0x340] ss:$16 sps:$4 sm:$0xff]   ;;  %v10082_v18 = vld [vmem:[%s13749_s5 + $0x2ec] ss:$16 sps:$4 sm:$0xff]  }
 0x3b7   :  { %v13039_v3 = vadd.f32 %v9285_v52, %v5069_v8  ;;  %v10085_v52 = vld [vmem:[%s13749_s5 + $0x364] ss:$16 sps:$4 sm:$0xff]  }
 0x3b8   :  { %7799 = vmatpush1.bf16.msra.mxu1 %v10044_v45  ;;  %7635 = vmatpush1.bf16.msra.mxu0 %v10047_v4 }
 0x3b9   :  { %v9628_v34 = vpop.f32.mrb[100].mxu1  ;;  %7800 = vmatprep.subr.bf16.mxu1 %v10052_v2  ;;  %7636 = vmatprep.subr.bf16.mxu0 %v10055_v31 }
 0x3ba   :  { %v5245_v28 = vadd.f32 %v9628_v34, %v5180_v54  ;;  %v9314_v32 = vpop.f32.mrb[124].mxu0  ;;  %v5236_v62 = vpop.f32.mrb[101].mxu1  ;;  %v10088_v34 = vld [vmem:[%s13749_s5 + $0x30c] ss:$16 sps:$4 sm:$0xff]  }
 0x3bb   :  { %v5237_v24 = vadd.f32 %v5236_v62, %v12921_v9  ;;  %v9315_v11 = vpop.f32.mrb[125].mxu0  ;;  %v9629_v61 = vpop.f32.mrb[102].mxu1  ;;  %v10059_v9 = vld [vmem:[%s13749_s5 + $0x2e0] ss:$16 sps:$4 sm:$0xff]  }
 0x3bc   :  { %v9316_v20 = vadd.f32 %v9315_v11, %v9314_v32  ;;  %v5248_v19 = vadd.f32 %v9629_v61, %v5183_v59  ;;  %7801 = vmatpush1.bf16.msra.mxu1 %v10050_v7  ;;  %v9317_v22 = vpop.f32.mrb[126].mxu0  ;;  %v5239_v53 = vpop.f32.mrb[103].mxu1  ;;  %7637 = vmatpush1.bf16.msra.mxu0 %v10053_v44  ;;  %v5269_v40 = vmax.f32 %v5245_v28, 0.0  ;;  %v10080_v7 = vld [vmem:[%s13749_s5 + $0x2e8] ss:$16 sps:$4 sm:$0xff]  }
 0x3bd   :  { %v5240_v21 = vadd.f32 %v5239_v53, %v12927_v51  ;;  %v9318_v58 = vpop.f32.mrb[127].mxu0  ;;  %7802 = vmatprep.subr.bf16.mxu1 %v10058_v25  ;;  %7638 = vmatprep.subr.bf16.mxu0 %v10061_v38  ;;  %v10067_v51 = vld [vmem:[%s13749_s5 + $0x304] ss:$16 sps:$4 sm:$0xff]   ;;  %v5267_v27 = vmax.f32 %v5237_v24, 0.0  ;;  %v10086_v32 = vld [vmem:[%s13749_s5 + $0x308] ss:$16 sps:$4 sm:$0xff]  }
 0x3be   :  { %v5270_v60 = vmax.f32 %v5248_v19, 0.0  ;;  %v9319_v30 = vadd.f32 %v9318_v58, %v9317_v22  ;;  %v5188_v23 = vadd.f32 %v9316_v20, %v12952_v46  ;;  %v10065_v46 = vld [vmem:[%s13749_s5 + $0x300] ss:$16 sps:$4 sm:$0xff]   ;;  %v10094_v38 = vld [vmem:[%s13749_s5 + $0x32c] ss:$16 sps:$4 sm:$0xff]  }
 0x3bf   :  { %v5268_v13 = vmax.f32 %v5240_v21, 0.0  ;;  %v10089_v62 = vld [vmem:[%s13749_s5 + $0x380] ss:$16 sps:$4 sm:$0xff]   ;;  %v10097_v61 = vld [vmem:[%s13749_s5 + $0x3a4] ss:$16 sps:$4 sm:$0xff]  }
 0x3c0   :  { %v5276_v42 = vpack.c.bf16 %v5270_v60, %v5269_v40  ;;  %7803 = vmatpush1.bf16.msra.mxu1 %v10056_v47  ;;  %v5191_v56 = vadd.f32 %v9319_v30, %v12957_v37  ;;  %7639 = vmatpush1.bf16.msra.mxu0 %v10059_v9  ;;  %v10073_v37 = vld [vmem:[%s13749_s5 + $0x324] ss:$16 sps:$4 sm:$0xff]   ;;  %v10092_v53 = vld [vmem:[%s13749_s5 + $0x328] ss:$16 sps:$4 sm:$0xff]   ;;  %v10095_v21 = vld [vmem:[%s13749_s5 + $0x3a0] ss:$16 sps:$4 sm:$0xff]  }
 0x3c1   :  { %v5275_v0 = vpack.c.bf16 %v5268_v13, %v5267_v27  ;;  %v9632_v35 = vpop.f32.mrb[104].mxu1  ;;  %7804 = vmatprep.subr.bf16.mxu1 %v10064_v36  ;;  %7640 = vmatprep.subr.bf16.mxu0 %v10067_v51  ;;  %v10100_v58 = vld [vmem:[%s13749_s5 + $0x34c] ss:$16 sps:$4 sm:$0xff]   ;;  %v10103_v36 = vld [vmem:[%s13749_s5 + $0x3c4] ss:$16 sps:$4 sm:$0xff]  }
 0x3c2   :  { %v5252_v54 = vpop.f32.mrb[105].mxu1  ;;  %5281 = vrot.lane.b32.xlu1 %v5276_v42, %s10359_s15  ;;  %v10098_v40 = vld [vmem:[%s13749_s5 + $0x348] ss:$16 sps:$4 sm:$0xff]   ;;  %v10101_v60 = vld [vmem:[%s13749_s5 + $0x3c0] ss:$16 sps:$4 sm:$0xff]  }
 0x3c3   :  { %5279 = vst.msk [vmem:[#allocation4 + $0x20] sm:$0xff] %vm3829_vm4, %v5275_v0  ;;  %v5253_v15 = vadd.f32 %v5252_v54, %v5188_v23  ;;  %v9633_v59 = vpop.f32.mrb[106].mxu1  ;;  %v10106_v30 = vld [vmem:[%s13749_s5 + $0x36c] ss:$16 sps:$4 sm:$0xff]   ;;  %v10109_v23 = vld [vmem:[%s13749_s5 + $0x3e4] ss:$16 sps:$4 sm:$0xff]  }
 0x3c4   :  { %7805 = vmatpush1.bf16.msra.mxu1 %v10062_v39  ;;  %v5255_v57 = vpop.f32.mrb[107].mxu1  ;;  %7641 = vmatpush1.bf16.msra.mxu0 %v10065_v46  ;;  %v10104_v27 = vld [vmem:[%s13749_s5 + $0x368] ss:$16 sps:$4 sm:$0xff]   ;;  %v10107_v13 = vld [vmem:[%s13749_s5 + $0x3e0] ss:$16 sps:$4 sm:$0xff]  }
 0x3c5   :  { %v5256_v26 = vadd.f32 %v5255_v57, %v5191_v56  ;;  %7806 = vmatprep.subr.bf16.mxu1 %v10070_v12  ;;  %7642 = vmatprep.subr.bf16.mxu0 %v10073_v37  ;;  %v5271_v33 = vmax.f32 %v5253_v15, 0.0  ;;  %v10112_v42 = vld [vmem:[%s13749_s5 + $0x38c] ss:$16 sps:$4 sm:$0xff]   ;;  %v10124_v56 = vld [vmem:[%s13749_s5 + $0x404] ss:$16 sps:$4 sm:$0xff]  }
 0x3c6   :  { %v9320_v5 = vpop.f32.mrb[128].mxu0  ;;  %v10110_v12 = vld [vmem:[%s13749_s5 + $0x388] ss:$16 sps:$4 sm:$0xff]   ;;  %v10115_v15 = vld [vmem:[%s13749_s5 + $0x3ac] ss:$16 sps:$4 sm:$0xff]  }
 0x3c7   :  { %v5272_v6 = vmax.f32 %v5256_v26, 0.0  ;;  %v9321_v49 = vpop.f32.mrb[129].mxu0 }
 0x3c8   :  { %v9322_v1 = vadd.f32 %v9321_v49, %v9320_v5  ;;  %7807 = vmatpush1.bf16.msra.mxu1 %v10068_v48  ;;  %v9323_v10 = vpop.f32.mrb[130].mxu0  ;;  %7643 = vmatpush1.bf16.msra.mxu0 %v10071_v14  ;;  %v10130_v48 = vld [vmem:[%s13749_s5 + $0x424] ss:$16 sps:$4 sm:$0xff]   ;;  %v10113_v14 = vld [vmem:[%s13749_s5 + $0x3a8] ss:$16 sps:$4 sm:$0xff]  }
 0x3c9   :  { %v5277_v16 = vpack.c.bf16 %v5272_v6, %v5271_v33  ;;  %v9324_v17 = vpop.f32.mrb[131].mxu0  ;;  %7808 = vmatprep.subr.bf16.mxu1 %v10076_v50  ;;  %7644 = vmatprep.subr.bf16.mxu0 %v10079_v63  ;;  %v10118_v50 = vld [vmem:[%s13749_s5 + $0x3cc] ss:$16 sps:$4 sm:$0xff]   ;;  %v10128_v5 = vld [vmem:[%s13749_s5 + $0x420] ss:$16 sps:$4 sm:$0xff]  }
 0x3ca   :  { %v5196_v45 = vadd.f32 %v9322_v1, %v13028_v55  ;;  %v9325_v8 = vadd.f32 %v9324_v17, %v9323_v10  ;;  %v4558_v4 = vpop.permute.xlu1 %4557  ;;  %v10083_v55 = vld [vmem:[%s13749_s5 + $0x360] ss:$16 sps:$4 sm:$0xff]   ;;  %v10136_v63 = vld [vmem:[%s13749_s5 + $0x444] ss:$16 sps:$4 sm:$0xff]   ;;  %v10116_v33 = vld [vmem:[%s13749_s5 + $0x3c8] ss:$16 sps:$4 sm:$0xff]  }
 0x3cb   :  { %5285 = vst.msk [vmem:[#allocation4 + $0x28] sm:$0xff] %vm3829_vm4, %v5277_v16  ;;  %v10121_v6 = vld [vmem:[%s13749_s5 + $0x3ec] ss:$16 sps:$4 sm:$0xff]   ;;  %v10134_v1 = vld [vmem:[%s13749_s5 + $0x440] ss:$16 sps:$4 sm:$0xff]  }
 0x3cc   :  { %v5261_v2 = vadd.f32 %v9632_v35, %v5196_v45  ;;  %v5199_v31 = vadd.f32 %v9325_v8, %v13039_v3  ;;  %4560 = vst.msk [vmem:[#allocation4 + $0x10] sm:$0xff] %vm3835_vm5, %v4558_v4  ;;  %7809 = vmatpush1.bf16.msra.mxu1 %v10074_v29  ;;  %7645 = vmatpush1.bf16.msra.mxu0 %v10077_v43  ;;  %v10091_v3 = vld [vmem:[%s13749_s5 + $0x384] ss:$16 sps:$4 sm:$0xff]   ;;  %v10119_v43 = vld [vmem:[%s13749_s5 + $0x3e8] ss:$16 sps:$4 sm:$0xff]  }
 0x3cd   :  { %7810 = vmatprep.subr.bf16.mxu1 %v10082_v18  ;;  %7646 = vmatprep.subr.bf16.mxu0 %v10085_v52  ;;  %v10142_v29 = vld [vmem:[%s13749_s5 + $0x464] ss:$16 sps:$4 sm:$0xff]   ;;  %v10127_v45 = vld [vmem:[%s13749_s5 + $0x40c] ss:$16 sps:$4 sm:$0xff]   ;;  %v10140_v52 = vld [vmem:[%s13749_s5 + $0x460] ss:$16 sps:$4 sm:$0xff]  }
 0x3ce   :  { %v5264_v44 = vadd.f32 %v9633_v59, %v5199_v31  ;;  %v5273_v25 = vmax.f32 %v5261_v2, 0.0  ;;  %v10122_v59 = vld [vmem:[%s13749_s5 + $0x400] ss:$16 sps:$4 sm:$0xff]   ;;  %v10148_v4 = vld [vmem:[%s13749_s5 + $0x484] ss:$16 sps:$4 sm:$0xff]  }
 0x3cf   :  { %v10125_v2 = vld [vmem:[%s13749_s5 + $0x408] ss:$16 sps:$4 sm:$0xff]   ;;  %v10133_v31 = vld [vmem:[%s13749_s5 + $0x42c] ss:$16 sps:$4 sm:$0xff]  }
 0x3d0   :  { %v5274_v28 = vmax.f32 %v5264_v44, 0.0  ;;  %7811 = vmatpush1.bf16.msra.mxu1 %v10080_v7  ;;  %7647 = vmatpush1.bf16.msra.mxu0 %v10083_v55  ;;  %v10146_v7 = vld [vmem:[%s13749_s5 + $0x480] ss:$16 sps:$4 sm:$0xff]   ;;  %v10154_v55 = vld [vmem:[%s13749_s5 + $0x4a4] ss:$16 sps:$4 sm:$0xff]  }
 0x3d1   :  { %7812 = vmatprep.subr.bf16.mxu1 %v10088_v34  ;;  %7648 = vmatprep.subr.bf16.mxu0 %v10091_v3  ;;  %v10131_v34 = vld [vmem:[%s13749_s5 + $0x428] ss:$16 sps:$4 sm:$0xff]   ;;  %v10139_v44 = vld [vmem:[%s13749_s5 + $0x44c] ss:$16 sps:$4 sm:$0xff]   ;;  %v10152_v3 = vld [vmem:[%s13749_s5 + $0x4a0] ss:$16 sps:$4 sm:$0xff]  }
 0x3d2   :  { %v5278_v24 = vpack.c.bf16 %v5274_v28, %v5273_v25  ;;  %v9348_v11 = vpop.f32.mrb[132].mxu0  ;;  %v10160_v25 = vld [vmem:[%s13749_s5 + $0x4c4] ss:$16 sps:$4 sm:$0xff]   ;;  %v10137_v28 = vld [vmem:[%s13749_s5 + $0x448] ss:$16 sps:$4 sm:$0xff]  }
 0x3d3   :  { %v9349_v20 = vpop.f32.mrb[133].mxu0  ;;  %v6017_v26 = vld [vmem:[#allocation4 + $0x10] sm:$0xff] }
 0x3d4   :  { %v13135_v19 = vadd.f32 %v9349_v20, %v9348_v11  ;;  %7813 = vmatpush1.bf16.msra.mxu1 %v10086_v32  ;;  %v9351_v22 = vpop.f32.mrb[134].mxu0  ;;  %5287 = vrot.lane.b32.xlu0 %v5278_v24, %s10359_s15  ;;  %v10158_v24 = vld [vmem:[%s13749_s5 + $0x4c0] ss:$16 sps:$4 sm:$0xff]  }
 0x3d5   :  { %v9352_v47 = vpop.f32.mrb[135].mxu0  ;;  %7649 = vmatpush1.bf16.msra.mxu0 %v10089_v62  ;;  %7814 = vmatprep.subr.bf16.mxu1 %v10094_v38  ;;  %v10145_v62 = vld [vmem:[%s13749_s5 + $0x46c] ss:$16 sps:$4 sm:$0xff]  }
 0x3d6   :  { %v13147_v9 = vadd.f32 %v9352_v47, %v9351_v22  ;;  %7650 = vmatprep.subr.bf16.mxu0 %v10097_v61  ;;  %v5766_v11 = vadd.f32 %v12897_v41, %v13135_v19  ;;  %v10166_v22 = vld [vmem:[%s13749_s5 + $0x4e4] ss:$16 sps:$4 sm:$0xff]   ;;  %v10143_v47 = vld [vmem:[%s13749_s5 + $0x468] ss:$16 sps:$4 sm:$0xff]   ;;  %v10151_v19 = vld [vmem:[%s13749_s5 + $0x48c] ss:$16 sps:$4 sm:$0xff]  }
 0x3d8   :  { %7815 = vmatpush1.bf16.msra.mxu1 %v10092_v53 }
 0x3d9   :  { %7651 = vmatpush1.bf16.msra.mxu0 %v10095_v21  ;;  %7816 = vmatprep.subr.bf16.mxu1 %v10100_v58  ;;  %v5769_v21 = vadd.f32 %v12897_v41, %v13147_v9  ;;  %v10172_v9 = vld [vmem:[%s13749_s5 + $0x504] ss:$16 sps:$4 sm:$0xff]  }
 0x3da   :  { %7652 = vmatprep.subr.bf16.mxu0 %v10103_v36  ;;  %v4564_v51 = vpop.permute.xlu0 %4563 }
 0x3db   :  { %4566 = vst.msk [vmem:[#allocation4 + $0x18] sm:$0xff] %vm3835_vm5, %v4564_v51 }
 0x3dc   :  { %7817 = vmatpush1.bf16.msra.mxu1 %v10098_v40  ;;  %v10164_v40 = vld [vmem:[%s13749_s5 + $0x4e0] ss:$16 sps:$4 sm:$0xff]  }
 0x3dd   :  { %7653 = vmatpush1.bf16.msra.mxu0 %v10101_v60  ;;  %7818 = vmatprep.subr.bf16.mxu1 %v10106_v30  ;;  %v10149_v30 = vld [vmem:[%s13749_s5 + $0x488] ss:$16 sps:$4 sm:$0xff]  }
 0x3de   :  { %v9354_v39 = vpop.f32.mrb[136].mxu0  ;;  %7654 = vmatprep.subr.bf16.mxu0 %v10109_v23  ;;  %v10157_v23 = vld [vmem:[%s13749_s5 + $0x4ac] ss:$16 sps:$4 sm:$0xff]  }
 0x3df   :  { %v9355_v0 = vpop.f32.mrb[137].mxu0 }
 0x3e0   :  { %v13177_v35 = vadd.f32 %v9355_v0, %v9354_v39  ;;  %7819 = vmatpush1.bf16.msra.mxu1 %v10104_v27  ;;  %v9357_v46 = vpop.f32.mrb[138].mxu0  ;;  %v10170_v27 = vld [vmem:[%s13749_s5 + $0x500] ss:$16 sps:$4 sm:$0xff]   ;;  %v10155_v0 = vld [vmem:[%s13749_s5 + $0x4a8] ss:$16 sps:$4 sm:$0xff]  }
 0x3e1   :  { %v9358_v54 = vpop.f32.mrb[139].mxu0  ;;  %7655 = vmatpush1.bf16.msra.mxu0 %v10107_v13  ;;  %7820 = vmatprep.subr.bf16.mxu1 %v10112_v42  ;;  %v10178_v42 = vld [vmem:[%s13749_s5 + $0x524] ss:$16 sps:$4 sm:$0xff]  }
 0x3e2   :  { %v13182_v37 = vadd.f32 %v9358_v54, %v9357_v46  ;;  %7667 = vmatprep.subr.bf16.mxu0 %v10124_v56  ;;  %v6018_v57 = vld [vmem:[#allocation4 + $0x18] sm:$0xff] }
 0x3e3   :  { %7656 = vmatprep.mubr.bf16.mxu0 %v6018_v57  ;;  %7828 = vmatprep.mubr.bf16.mxu1 %v6018_v57  ;;  %v10161_v57 = vld [vmem:[%s13749_s5 + $0x4c8] ss:$16 sps:$4 sm:$0xff]  }
 0x3e4   :  { %7821 = vmatpush1.bf16.msra.mxu1 %v10110_v12  ;;  %7657 = vmatmul.mubr.bf16.vlgmr.msra.gmra.mrb[164].mxu0 %v6017_v26  ;;  %v10163_v12 = vld [vmem:[%s13749_s5 + $0x4cc] ss:$16 sps:$4 sm:$0xff]  }
 0x3e5   :  { %7822 = vmatprep.subr.bf16.mxu1 %v10115_v15  ;;  %7668 = vmatpush1.bf16.msra.mxu0 %v10122_v59  ;;  %v10176_v15 = vld [vmem:[%s13749_s5 + $0x520] ss:$16 sps:$4 sm:$0xff]   ;;  %v10184_v59 = vld [vmem:[%s13749_s5 + $0x544] ss:$16 sps:$4 sm:$0xff]  }
 0x3e6   :  { %7669 = vmatprep.subr.bf16.mxu0 %v10130_v48  ;;  %v10169_v48 = vld [vmem:[%s13749_s5 + $0x4ec] ss:$16 sps:$4 sm:$0xff]  }
 0x3e8   :  { %7823 = vmatpush1.bf16.msra.mxu1 %v10113_v14  ;;  %v10190_v14 = vld [vmem:[%s13749_s5 + $0x564] ss:$16 sps:$4 sm:$0xff]  }
 0x3e9   :  { %7824 = vmatprep.subr.bf16.mxu1 %v10118_v50  ;;  %7670 = vmatpush1.bf16.msra.mxu0 %v10128_v5  ;;  %v10167_v50 = vld [vmem:[%s13749_s5 + $0x4e8] ss:$16 sps:$4 sm:$0xff]   ;;  %v10175_v5 = vld [vmem:[%s13749_s5 + $0x50c] ss:$16 sps:$4 sm:$0xff]  }
 0x3ea   :  { %v9360_v49 = vpop.f32.mrb[140].mxu0  ;;  %7671 = vmatprep.subr.bf16.mxu0 %v10136_v63 }
 0x3eb   :  { %v9361_v10 = vpop.f32.mrb[141].mxu0 }
 0x3ec   :  { %v13217_v16 = vadd.f32 %v9361_v10, %v9360_v49  ;;  %7825 = vmatpush1.bf16.msra.mxu1 %v10116_v33  ;;  %v9363_v17 = vpop.f32.mrb[142].mxu0  ;;  %v10188_v33 = vld [vmem:[%s13749_s5 + $0x560] ss:$16 sps:$4 sm:$0xff]   ;;  %v10196_v49 = vld [vmem:[%s13749_s5 + $0x584] ss:$16 sps:$4 sm:$0xff]  }
 0x3ed   :  { %v9364_v18 = vpop.f32.mrb[143].mxu0  ;;  %7826 = vmatprep.subr.bf16.mxu1 %v10121_v6  ;;  %7672 = vmatpush1.bf16.msra.mxu0 %v10134_v1  ;;  %v5774_v1 = vadd.f32 %v12897_v41, %v13177_v35  ;;  %v10194_v35 = vld [vmem:[%s13749_s5 + $0x580] ss:$16 sps:$4 sm:$0xff]  }
 0x3ee   :  { %v13225_v8 = vadd.f32 %v9364_v18, %v9363_v17  ;;  %7673 = vmatprep.subr.bf16.mxu0 %v10142_v29  ;;  %v10173_v17 = vld [vmem:[%s13749_s5 + $0x508] ss:$16 sps:$4 sm:$0xff]   ;;  %v10181_v18 = vld [vmem:[%s13749_s5 + $0x52c] ss:$16 sps:$4 sm:$0xff]  }
 0x3f0   :  { %7827 = vmatpush1.bf16.msra.mxu1 %v10119_v43 }
 0x3f1   :  { %7839 = vmatprep.subr.bf16.mxu1 %v10127_v45  ;;  %7674 = vmatpush1.bf16.msra.mxu0 %v10140_v52  ;;  %v5777_v45 = vadd.f32 %v12897_v41, %v13182_v37  ;;  %v10179_v37 = vld [vmem:[%s13749_s5 + $0x528] ss:$16 sps:$4 sm:$0xff]  }
 0x3f2   :  { %7675 = vmatprep.subr.bf16.mxu0 %v10148_v4 }
 0x3f3   :  { %7829 = vmatmul.mubr.bf16.vlgmr.msra.gmra.mrb[132].mxu1 %v6017_v26  ;;  %v10182_v26 = vld [vmem:[%s13749_s5 + $0x540] ss:$16 sps:$4 sm:$0xff]  }
 0x3f4   :  { %7840 = vmatpush1.bf16.msra.mxu1 %v10125_v2  ;;  %v10202_v2 = vld [vmem:[%s13749_s5 + $0x5a4] ss:$16 sps:$4 sm:$0xff]  }
 0x3f5   :  { %7841 = vmatprep.subr.bf16.mxu1 %v10133_v31  ;;  %7676 = vmatpush1.bf16.msra.mxu0 %v10146_v7  ;;  %v10187_v7 = vld [vmem:[%s13749_s5 + $0x54c] ss:$16 sps:$4 sm:$0xff]  }
 0x3f6   :  { %7677 = vmatprep.subr.bf16.mxu0 %v10154_v55  ;;  %v10200_v55 = vld [vmem:[%s13749_s5 + $0x5a0] ss:$16 sps:$4 sm:$0xff]  }
 0x3f8   :  { %7842 = vmatpush1.bf16.msra.mxu1 %v10131_v34  ;;  %v10208_v34 = vld [vmem:[%s13749_s5 + $0x5c4] ss:$16 sps:$4 sm:$0xff]  }
 0x3f9   :  { %v9388_v32 = vpop.f32.mrb[108].mxu1  ;;  %7843 = vmatprep.subr.bf16.mxu1 %v10139_v44  ;;  %7678 = vmatpush1.bf16.msra.mxu0 %v10152_v3  ;;  %v10185_v44 = vld [vmem:[%s13749_s5 + $0x548] ss:$16 sps:$4 sm:$0xff]   ;;  %v10193_v3 = vld [vmem:[%s13749_s5 + $0x56c] ss:$16 sps:$4 sm:$0xff]  }
 0x3fa   :  { %v9389_v38 = vpop.f32.mrb[109].mxu1  ;;  %7679 = vmatprep.subr.bf16.mxu0 %v10160_v25 }
 0x3fb   :  { %v9390_v61 = vadd.f32 %v9389_v38, %v9388_v32  ;;  %v9391_v20 = vpop.f32.mrb[110].mxu1 }
 0x3fc   :  { %v9392_v53 = vpop.f32.mrb[111].mxu1  ;;  %7844 = vmatpush1.bf16.msra.mxu1 %v10137_v28  ;;  %v10206_v28 = vld [vmem:[%s13749_s5 + $0x5c0] ss:$16 sps:$4 sm:$0xff]  }
 0x3fd   :  { %v13276_v58 = vadd.f32 %v9390_v61, %v5766_v11  ;;  %v9393_v36 = vadd.f32 %v9392_v53, %v9391_v20  ;;  %7845 = vmatprep.subr.bf16.mxu1 %v10145_v62  ;;  %7680 = vmatpush1.bf16.msra.mxu0 %v10158_v24  ;;  %v10214_v62 = vld [vmem:[%s13749_s5 + $0x5e4] ss:$16 sps:$4 sm:$0xff]   ;;  %v10191_v11 = vld [vmem:[%s13749_s5 + $0x568] ss:$16 sps:$4 sm:$0xff]   ;;  %v10199_v20 = vld [vmem:[%s13749_s5 + $0x58c] ss:$16 sps:$4 sm:$0xff]  }
 0x3fe   :  { %7681 = vmatprep.subr.bf16.mxu0 %v10166_v22 }
 0x3ff   :  { %v13284_v60 = vadd.f32 %v9393_v36, %v5769_v21  ;;  %v10220_v21 = vld [vmem:[%s13749_s5 + $0x604] ss:$16 sps:$4 sm:$0xff]   ;;  %v10197_v36 = vld [vmem:[%s13749_s5 + $0x588] ss:$16 sps:$4 sm:$0xff]  }
 0x400   :  { %7846 = vmatpush1.bf16.msra.mxu1 %v10143_v47  ;;  %v10212_v47 = vld [vmem:[%s13749_s5 + $0x5e0] ss:$16 sps:$4 sm:$0xff]  }
 0x401   :  { %7847 = vmatprep.subr.bf16.mxu1 %v10151_v19  ;;  %7682 = vmatpush1.bf16.msra.mxu0 %v10164_v40  ;;  %v10203_v40 = vld [vmem:[%s13749_s5 + $0x5a8] ss:$16 sps:$4 sm:$0xff]  }
 0x402   :  { %v9366_v51 = vpop.f32.mrb[144].mxu0  ;;  %7683 = vmatprep.subr.bf16.mxu0 %v10172_v9  ;;  %v10211_v9 = vld [vmem:[%s13749_s5 + $0x5cc] ss:$16 sps:$4 sm:$0xff]  }
 0x403   :  { %v9367_v13 = vpop.f32.mrb[145].mxu0 }
 0x404   :  { %v13301_v39 = vadd.f32 %v9367_v13, %v9366_v51  ;;  %v9369_v56 = vpop.f32.mrb[146].mxu0  ;;  %7848 = vmatpush1.bf16.msra.mxu1 %v10149_v30  ;;  %v10209_v13 = vld [vmem:[%s13749_s5 + $0x5c8] ss:$16 sps:$4 sm:$0xff]  }
 0x405   :  { %v9370_v46 = vpop.f32.mrb[147].mxu0  ;;  %7849 = vmatprep.subr.bf16.mxu1 %v10157_v23  ;;  %7684 = vmatpush1.bf16.msra.mxu0 %v10170_v27 }
 0x406   :  { %v13309_v54 = vadd.f32 %v9370_v46, %v9369_v56  ;;  %7685 = vmatprep.subr.bf16.mxu0 %v10178_v42  ;;  %v10217_v56 = vld [vmem:[%s13749_s5 + $0x5ec] ss:$16 sps:$4 sm:$0xff]  }
 0x408   :  { %7850 = vmatpush1.bf16.msra.mxu1 %v10155_v0  ;;  %v5785_v0 = vadd.f32 %v12897_v41, %v13225_v8 }
 0x409   :  { %7851 = vmatprep.subr.bf16.mxu1 %v10163_v12  ;;  %7686 = vmatpush1.bf16.msra.mxu0 %v10176_v15 }
 0x40a   :  { %7687 = vmatprep.subr.bf16.mxu0 %v10184_v59  ;;  %v10223_v59 = vld [vmem:[%s13749_s5 + $0x60c] ss:$16 sps:$4 sm:$0xff]  }
 0x40c   :  { %7852 = vmatpush1.bf16.msra.mxu1 %v10161_v57 }
 0x40d   :  { %7853 = vmatprep.subr.bf16.mxu1 %v10169_v48  ;;  %7688 = vmatpush1.bf16.msra.mxu0 %v10182_v26 }
 0x40e   :  { %v9394_v63 = vpop.f32.mrb[112].mxu1  ;;  %7689 = vmatprep.subr.bf16.mxu0 %v10190_v14 }
 0x40f   :  { %v9395_v6 = vpop.f32.mrb[113].mxu1 }
 0x410   :  { %v9396_v10 = vadd.f32 %v9395_v6, %v9394_v63  ;;  %v9397_v29 = vpop.f32.mrb[114].mxu1  ;;  %7854 = vmatpush1.bf16.msra.mxu1 %v10167_v50 }
 0x411   :  { %v9398_v43 = vpop.f32.mrb[115].mxu1  ;;  %7855 = vmatprep.subr.bf16.mxu1 %v10175_v5  ;;  %7690 = vmatpush1.bf16.msra.mxu0 %v10188_v33 }
 0x412   :  { %v13351_v52 = vadd.f32 %v9396_v10, %v5774_v1  ;;  %v9399_v4 = vadd.f32 %v9398_v43, %v9397_v29  ;;  %7691 = vmatprep.subr.bf16.mxu0 %v10196_v49  ;;  %v5790_v1 = vadd.f32 %v12897_v41, %v13301_v39  ;;  %v5793_v43 = vadd.f32 %v12897_v41, %v13309_v54 }
 0x414   :  { %v13359_v31 = vadd.f32 %v9399_v4, %v5777_v45  ;;  %7856 = vmatpush1.bf16.msra.mxu1 %v10173_v17 }
 0x415   :  { %7857 = vmatprep.subr.bf16.mxu1 %v10181_v18  ;;  %7692 = vmatpush1.bf16.msra.mxu0 %v10194_v35 }
 0x416   :  { %7693 = vmatprep.subr.bf16.mxu0 %v10202_v2 }
 0x418   :  { %7858 = vmatpush1.bf16.msra.mxu1 %v10179_v37 }
 0x419   :  { %7859 = vmatprep.subr.bf16.mxu1 %v10187_v7  ;;  %7694 = vmatpush1.bf16.msra.mxu0 %v10200_v55 }
 0x41a   :  { %v9428_v25 = vpop.f32.mrb[148].mxu0  ;;  %7695 = vmatprep.subr.bf16.mxu0 %v10208_v34 }
 0x41b   :  { %v9429_v32 = vpop.f32.mrb[149].mxu0 }
 0x41c   :  { %v9430_v38 = vadd.f32 %v9429_v32, %v9428_v25  ;;  %v9431_v24 = vpop.f32.mrb[150].mxu0  ;;  %7860 = vmatpush1.bf16.msra.mxu1 %v10185_v44 }
 0x41d   :  { %v9432_v61 = vpop.f32.mrb[151].mxu0  ;;  %7861 = vmatprep.subr.bf16.mxu1 %v10193_v3  ;;  %7696 = vmatpush1.bf16.msra.mxu0 %v10206_v28 }
 0x41e   :  { %v9433_v22 = vadd.f32 %v9432_v61, %v9431_v24  ;;  %v5896_v53 = vadd.f32 %v9430_v38, %v13276_v58  ;;  %7697 = vmatprep.subr.bf16.mxu0 %v10214_v62  ;;  %v10205_v58 = vld [vmem:[%s13749_s5 + $0x5ac] ss:$16 sps:$4 sm:$0xff]  }
 0x420   :  { %7862 = vmatpush1.bf16.msra.mxu1 %v10191_v11  ;;  %v5899_v19 = vadd.f32 %v9433_v22, %v13284_v60  ;;  %v5782_v60 = vadd.f32 %v12897_v41, %v13217_v16  ;;  %v10215_v16 = vld [vmem:[%s13749_s5 + $0x5e8] ss:$16 sps:$4 sm:$0xff]   ;;  %v10218_v11 = vld [vmem:[%s13749_s5 + $0x600] ss:$16 sps:$4 sm:$0xff]  }
 0x421   :  { %7863 = vmatprep.subr.bf16.mxu1 %v10199_v20  ;;  %7698 = vmatpush1.bf16.msra.mxu0 %v10212_v47 }
 0x422   :  { %7710 = vmatprep.subr.bf16.mxu0 %v10220_v21  ;;  %v10221_v21 = vld [vmem:[%s13749_s5 + $0x608] ss:$16 sps:$4 sm:$0xff]  }
 0x424   :  { %7864 = vmatpush1.bf16.msra.mxu1 %v10197_v36  ;;  %v10226_v36 = vld [vmem:[%s13749_s5 + $0x624] ss:$16 sps:$4 sm:$0xff]  }
 0x425   :  { %7865 = vmatprep.subr.bf16.mxu1 %v10205_v58 }
 0x426   :  { %v9400_v30 = vpop.f32.mrb[116].mxu1 }
 0x427   :  { %v9401_v23 = vpop.f32.mrb[117].mxu1 }
 0x428   :  { %v9402_v51 = vadd.f32 %v9401_v23, %v9400_v30  ;;  %v9403_v27 = vpop.f32.mrb[118].mxu1  ;;  %7866 = vmatpush1.bf16.msra.mxu1 %v10203_v40  ;;  %v10229_v40 = vld [vmem:[%s13749_s5 + $0x62c] ss:$16 sps:$4 sm:$0xff]  }
 0x429   :  { %v9404_v42 = vpop.f32.mrb[119].mxu1  ;;  %7867 = vmatprep.subr.bf16.mxu1 %v10211_v9 }
 0x42a   :  { %v5847_v46 = vadd.f32 %v9402_v51, %v5782_v60  ;;  %v9405_v12 = vadd.f32 %v9404_v42, %v9403_v27  ;;  %v10224_v51 = vld [vmem:[%s13749_s5 + $0x620] ss:$16 sps:$4 sm:$0xff]   ;;  %v10232_v42 = vld [vmem:[%s13749_s5 + $0x644] ss:$16 sps:$4 sm:$0xff]  }
 0x42c   :  { %v13421_v15 = vadd.f32 %v9405_v12, %v5785_v0  ;;  %7868 = vmatpush1.bf16.msra.mxu1 %v10209_v13  ;;  %v10227_v13 = vld [vmem:[%s13749_s5 + $0x628] ss:$16 sps:$4 sm:$0xff]   ;;  %v10230_v12 = vld [vmem:[%s13749_s5 + $0x640] ss:$16 sps:$4 sm:$0xff]  }
 0x42d   :  { %7869 = vmatprep.subr.bf16.mxu1 %v10217_v56  ;;  %v10235_v56 = vld [vmem:[%s13749_s5 + $0x64c] ss:$16 sps:$4 sm:$0xff]  }
 0x430   :  { %7870 = vmatpush1.bf16.msra.mxu1 %v10215_v16 }
 0x431   :  { %7882 = vmatprep.subr.bf16.mxu1 %v10223_v59  ;;  %v10233_v59 = vld [vmem:[%s13749_s5 + $0x648] ss:$16 sps:$4 sm:$0xff]  }
 0x432   :  { %v9434_v57 = vpop.f32.mrb[152].mxu0 }
 0x433   :  { %v9435_v48 = vpop.f32.mrb[153].mxu0 }
 0x434   :  { %v9436_v26 = vadd.f32 %v9435_v48, %v9434_v57  ;;  %v9437_v8 = vpop.f32.mrb[154].mxu0  ;;  %v5282_v14 = vpop.permute.xlu1 %5281  ;;  %v10238_v57 = vld [vmem:[%s13749_s5 + $0x664] ss:$16 sps:$4 sm:$0xff]  }
 0x435   :  { %5284 = vst.msk [vmem:[#allocation4 + $0x20] sm:$0xff] %vm3835_vm5, %v5282_v14  ;;  %v9438_v50 = vpop.f32.mrb[155].mxu0 }
 0x436   :  { %v9439_v5 = vadd.f32 %v9438_v50, %v9437_v8  ;;  %v5904_v63 = vadd.f32 %v9436_v26, %v13351_v52  ;;  %v10241_v26 = vld [vmem:[%s13749_s5 + $0x66c] ss:$16 sps:$4 sm:$0xff]  }
 0x438   :  { %v5907_v33 = vadd.f32 %v9439_v5, %v13359_v31  ;;  %v10236_v5 = vld [vmem:[%s13749_s5 + $0x660] ss:$16 sps:$4 sm:$0xff]  }
 0x43c   :  { %v6019_v58 = vld [vmem:[#allocation4 + $0x20] sm:$0xff] }
 0x43e   :  { %v9406_v6 = vpop.f32.mrb[120].mxu1 }
 0x43f   :  { %v9407_v49 = vpop.f32.mrb[121].mxu1 }
 0x440   :  { %v9408_v10 = vadd.f32 %v9407_v49, %v9406_v6  ;;  %v9409_v29 = vpop.f32.mrb[122].mxu1  ;;  %v10239_v6 = vld [vmem:[%s13749_s5 + $0x668] ss:$16 sps:$4 sm:$0xff]   ;;  %v10244_v49 = vld [vmem:[%s13749_s5 + $0x684] ss:$16 sps:$4 sm:$0xff]  }
 0x441   :  { %v9410_v17 = vpop.f32.mrb[123].mxu1 }
 0x442   :  { %v13436_v18 = vadd.f32 %v9408_v10, %v5790_v1  ;;  %v9411_v45 = vadd.f32 %v9410_v17, %v9409_v29  ;;  %v10247_v1 = vld [vmem:[%s13749_s5 + $0x68c] ss:$16 sps:$4 sm:$0xff]   ;;  %v10242_v17 = vld [vmem:[%s13749_s5 + $0x680] ss:$16 sps:$4 sm:$0xff]  }
 0x444   :  { %v13438_v4 = vadd.f32 %v9411_v45, %v5793_v43  ;;  %v10250_v45 = vld [vmem:[%s13749_s5 + $0x6a4] ss:$16 sps:$4 sm:$0xff]  }
 0x446   :  { %v9640_v35 = vpop.f32.mrb[124].mxu1  ;;  %v5288_v52 = vpop.permute.xlu0 %5287 }
 0x447   :  { %v5969_v2 = vadd.f32 %v9640_v35, %v5904_v63  ;;  %5290 = vst.msk [vmem:[#allocation4 + $0x28] sm:$0xff] %vm3835_vm5, %v5288_v52  ;;  %v5960_v31 = vpop.f32.mrb[125].mxu1 }
 0x448   :  { %v5961_v37 = vadd.f32 %v5960_v31, %v5896_v53  ;;  %v9641_v7 = vpop.f32.mrb[126].mxu1  ;;  %v10251_v31 = vld [vmem:[%s13749_s5 + $0x6a8] ss:$16 sps:$4 sm:$0xff]  }
 0x449   :  { %v5972_v39 = vadd.f32 %v9641_v7, %v5907_v33  ;;  %v5963_v55 = vpop.f32.mrb[127].mxu1  ;;  %v5993_v3 = vmax.f32 %v5969_v2, 0.0  ;;  %v10248_v2 = vld [vmem:[%s13749_s5 + $0x6a0] ss:$16 sps:$4 sm:$0xff]   ;;  %v10256_v7 = vld [vmem:[%s13749_s5 + $0x6c4] ss:$16 sps:$4 sm:$0xff]  }
 0x44a   :  { %v5964_v34 = vadd.f32 %v5963_v55, %v5899_v19  ;;  %v9440_v44 = vpop.f32.mrb[156].mxu0  ;;  %v5991_v54 = vmax.f32 %v5961_v37, 0.0  ;;  %v10254_v55 = vld [vmem:[%s13749_s5 + $0x6c0] ss:$16 sps:$4 sm:$0xff]  }
 0x44b   :  { %v5994_v25 = vmax.f32 %v5972_v39, 0.0  ;;  %v9441_v41 = vpop.f32.mrb[157].mxu0  ;;  %v10259_v39 = vld [vmem:[%s13749_s5 + $0x6cc] ss:$16 sps:$4 sm:$0xff]  }
 0x44c   :  { %v5992_v28 = vmax.f32 %v5964_v34, 0.0  ;;  %v9442_v32 = vadd.f32 %v9441_v41, %v9440_v44  ;;  %v9443_v62 = vpop.f32.mrb[158].mxu0  ;;  %v10257_v34 = vld [vmem:[%s13749_s5 + $0x6c8] ss:$16 sps:$4 sm:$0xff]   ;;  %v10262_v44 = vld [vmem:[%s13749_s5 + $0x6e4] ss:$16 sps:$4 sm:$0xff]  }
 0x44d   :  { %v6000_v38 = vpack.c.bf16 %v5994_v25, %v5993_v3  ;;  %v9444_v24 = vpop.f32.mrb[159].mxu0  ;;  %v10265_v3 = vld [vmem:[%s13749_s5 + $0x6ec] ss:$16 sps:$4 sm:$0xff]   ;;  %v10260_v25 = vld [vmem:[%s13749_s5 + $0x6e0] ss:$16 sps:$4 sm:$0xff]  }
 0x44e   :  { %v5999_v61 = vpack.c.bf16 %v5992_v28, %v5991_v54  ;;  %v9445_v20 = vadd.f32 %v9444_v24, %v9443_v62  ;;  %v9644_v22 = vpop.f32.mrb[128].mxu1  ;;  %v5912_v53 = vadd.f32 %v9442_v32, %v5847_v46  ;;  %v6020_v47 = vld [vmem:[#allocation4 + $0x28] sm:$0xff]  ;;  %v10268_v54 = vld [vmem:[%s13749_s5 + $0x704] ss:$16 sps:$4 sm:$0xff]   ;;  %v10266_v32 = vld [vmem:[%s13749_s5 + $0x700] ss:$16 sps:$4 sm:$0xff]  }
 0x44f   :  { %v5976_v19 = vpop.f32.mrb[129].mxu1  ;;  %6005 = vrot.lane.b32.xlu1 %v6000_v38, %s10359_s15  ;;  %7699 = vmatprep.mubr.bf16.mxu0 %v6020_v47  ;;  %v10263_v41 = vld [vmem:[%s13749_s5 + $0x6e8] ss:$16 sps:$4 sm:$0xff]   ;;  %v10271_v28 = vld [vmem:[%s13749_s5 + $0x70c] ss:$16 sps:$4 sm:$0xff]  }
 0x450   :  { %6003 = vst.msk [vmem:[#allocation4 + $0x30] sm:$0xff] %vm3829_vm4, %v5999_v61  ;;  %v5977_v9 = vadd.f32 %v5976_v19, %v5912_v53  ;;  %7871 = vmatprep.mubr.bf16.mxu1 %v6020_v47  ;;  %v9645_v30 = vpop.f32.mrb[130].mxu1  ;;  %7700 = vmatmul.mubr.bf16.vlgmr.msra.gmra.mrb[164].mxu0 %v6019_v58  ;;  %v5915_v23 = vadd.f32 %v9445_v20, %v13421_v15  ;;  %v10269_v62 = vld [vmem:[%s13749_s5 + $0x708] ss:$16 sps:$4 sm:$0xff]   ;;  %v10274_v38 = vld [vmem:[%s13749_s5 + $0x724] ss:$16 sps:$4 sm:$0xff]  }
 0x451   :  { %7872 = vmatmul.mubr.bf16.vlgmr.msra.gmra.mrb[132].mxu1 %v6019_v58  ;;  %v5979_v60 = vpop.f32.mrb[131].mxu1  ;;  %7711 = vmatpush1.bf16.msra.mxu0 %v10218_v11  ;;  %v10277_v24 = vld [vmem:[%s13749_s5 + $0x72c] ss:$16 sps:$4 sm:$0xff]   ;;  %v10272_v11 = vld [vmem:[%s13749_s5 + $0x720] ss:$16 sps:$4 sm:$0xff]  }
 0x452   :  { %v5980_v27 = vadd.f32 %v5979_v60, %v5915_v23  ;;  %7883 = vmatpush1.bf16.msra.mxu1 %v10221_v21  ;;  %7712 = vmatprep.subr.bf16.mxu0 %v10226_v36  ;;  %v5995_v0 = vmax.f32 %v5977_v9, 0.0  ;;  %v10275_v61 = vld [vmem:[%s13749_s5 + $0x728] ss:$16 sps:$4 sm:$0xff]   ;;  %v10280_v20 = vld [vmem:[%s13749_s5 + $0x744] ss:$16 sps:$4 sm:$0xff]  }
 0x453   :  { %7884 = vmatprep.subr.bf16.mxu1 %v10229_v40  ;;  %v10278_v53 = vld [vmem:[%s13749_s5 + $0x740] ss:$16 sps:$4 sm:$0xff]   ;;  %v10281_v47 = vld [vmem:[%s13749_s5 + $0x748] ss:$16 sps:$4 sm:$0xff]   ;;  %v10286_v21 = vld [vmem:[%s13749_s5 + $0x764] ss:$16 sps:$4 sm:$0xff]  }
 0x454   :  { %v5996_v46 = vmax.f32 %v5980_v27, 0.0  ;;  %v10284_v36 = vld [vmem:[%s13749_s5 + $0x760] ss:$16 sps:$4 sm:$0xff]   ;;  %v10289_v19 = vld [vmem:[%s13749_s5 + $0x76c] ss:$16 sps:$4 sm:$0xff]  }
 0x455   :  { %7713 = vmatpush1.bf16.msra.mxu0 %v10224_v51  ;;  %v10287_v58 = vld [vmem:[%s13749_s5 + $0x768] ss:$16 sps:$4 sm:$0xff]   ;;  %v10292_v40 = vld [vmem:[%s13749_s5 + $0x784] ss:$16 sps:$4 sm:$0xff]   ;;  %v10295_v9 = vld [vmem:[%s13749_s5 + $0x78c] ss:$16 sps:$4 sm:$0xff]  }
 0x456   :  { %v6001_v15 = vpack.c.bf16 %v5996_v46, %v5995_v0  ;;  %v9446_v16 = vpop.f32.mrb[160].mxu0  ;;  %7885 = vmatpush1.bf16.msra.mxu1 %v10227_v13  ;;  %7714 = vmatprep.subr.bf16.mxu0 %v10232_v42  ;;  %v10293_v23 = vld [vmem:[%s13749_s5 + $0x788] ss:$16 sps:$4 sm:$0xff]   ;;  %v10298_v60 = vld [vmem:[%s13749_s5 + $0x7a4] ss:$16 sps:$4 sm:$0xff]  }
 0x457   :  { %v9447_v48 = vpop.f32.mrb[161].mxu0  ;;  %7886 = vmatprep.subr.bf16.mxu1 %v10235_v56  ;;  %v10301_v51 = vld [vmem:[%s13749_s5 + $0x7ac] ss:$16 sps:$4 sm:$0xff]   ;;  %v10296_v27 = vld [vmem:[%s13749_s5 + $0x7a0] ss:$16 sps:$4 sm:$0xff]  }
 0x458   :  { %6009 = vst.msk [vmem:[#allocation4 + $0x38] sm:$0xff] %vm3829_vm4, %v6001_v15  ;;  %v9448_v8 = vadd.f32 %v9447_v48, %v9446_v16  ;;  %v9449_v14 = vpop.f32.mrb[162].mxu0  ;;  %v10299_v13 = vld [vmem:[%s13749_s5 + $0x7a8] ss:$16 sps:$4 sm:$0xff]   ;;  %v10304_v42 = vld [vmem:[%s13749_s5 + $0x7c4] ss:$16 sps:$4 sm:$0xff]  }
 0x459   :  { %v9450_v50 = vpop.f32.mrb[163].mxu0  ;;  %7715 = vmatpush1.bf16.msra.mxu0 %v10230_v12  ;;  %v10307_v56 = vld [vmem:[%s13749_s5 + $0x7cc] ss:$16 sps:$4 sm:$0xff]   ;;  %v10302_v0 = vld [vmem:[%s13749_s5 + $0x7c0] ss:$16 sps:$4 sm:$0xff]  }
 0x45a   :  { %v5920_v63 = vadd.f32 %v9448_v8, %v13436_v18  ;;  %v9451_v33 = vadd.f32 %v9450_v50, %v9449_v14  ;;  %7887 = vmatpush1.bf16.msra.mxu1 %v10233_v59  ;;  %7716 = vmatprep.subr.bf16.mxu0 %v10238_v57  ;;  %v10245_v18 = vld [vmem:[%s13749_s5 + $0x688] ss:$16 sps:$4 sm:$0xff]   ;;  %v10310_v12 = vld [vmem:[%s13749_s5 + $0x7e4] ss:$16 sps:$4 sm:$0xff]   ;;  %v10313_v15 = vld [vmem:[%s13749_s5 + $0x7ec] ss:$16 sps:$4 sm:$0xff]  }
 0x45b   :  { %7888 = vmatprep.subr.bf16.mxu1 %v10241_v26  ;;  %v10305_v46 = vld [vmem:[%s13749_s5 + $0x7c8] ss:$16 sps:$4 sm:$0xff]   ;;  %v10308_v16 = vld [vmem:[%s13749_s5 + $0x7e0] ss:$16 sps:$4 sm:$0xff]  }
 0x45c   :  { %v5985_v10 = vadd.f32 %v9644_v22, %v5920_v63  ;;  %v5923_v29 = vadd.f32 %v9451_v33, %v13438_v4  ;;  %v10253_v4 = vld [vmem:[%s13749_s5 + $0x6ac] ss:$16 sps:$4 sm:$0xff]   ;;  %v10311_v59 = vld [vmem:[%s13749_s5 + $0x7e8] ss:$16 sps:$4 sm:$0xff]   ;;  %v10314_v57 = vld [vmem:[%s13750_s7 + $0x40] sm:$0xff]  }
 0x45d   :  { %7717 = vmatpush1.bf16.msra.mxu0 %v10236_v5  ;;  %v10283_v22 = vld [vmem:[%s13749_s5 + $0x74c] ss:$16 sps:$4 sm:$0xff]   ;;  %v10315_v48 = vld [vmem:[%s13750_s7 + $0xc0] sm:$0xff]  }
 0x45e   :  { %v5988_v43 = vadd.f32 %v9645_v30, %v5923_v29  ;;  %7889 = vmatpush1.bf16.msra.mxu1 %v10239_v6  ;;  %7718 = vmatprep.subr.bf16.mxu0 %v10244_v49  ;;  %v5997_v35 = vmax.f32 %v5985_v10, 0.0  ;;  %v10290_v30 = vld [vmem:[%s13749_s5 + $0x780] ss:$16 sps:$4 sm:$0xff]   ;;  %v10318_v63 = vld [vmem:[%s13750_s7 + $0x48] sm:$0xff]  }
 0x45f   :  { %7890 = vmatprep.subr.bf16.mxu1 %v10247_v1  ;;  %v10316_v14 = vld [vmem:[%s13750_s7] sm:$0xff]   ;;  %v10319_v33 = vld [vmem:[%s13750_s7 + $0xc8] sm:$0xff]   ;;  %v10322_v10 = vld [vmem:[%s13750_s7 + $0x50] sm:$0xff]  }
 0x460   :  { %v5998_v52 = vmax.f32 %v5988_v43, 0.0  ;;  %v10317_v50 = vld [vmem:[%s13750_s7 + $0x80] sm:$0xff]   ;;  %v10320_v49 = vld [vmem:[%s13750_s7 + $0x8] sm:$0xff]   ;;  %v10323_v29 = vld [vmem:[%s13750_s7 + $0xd0] sm:$0xff]  }
 0x461   :  { %7719 = vmatpush1.bf16.msra.mxu0 %v10242_v17  ;;  %v10321_v1 = vld [vmem:[%s13750_s7 + $0x88] sm:$0xff]   ;;  %v10324_v17 = vld [vmem:[%s13750_s7 + $0x10] sm:$0xff]  }
 0x462   :  { %v6002_v37 = vpack.c.bf16 %v5998_v52, %v5997_v35  ;;  %7891 = vmatpush1.bf16.msra.mxu1 %v10245_v18  ;;  %7720 = vmatprep.subr.bf16.mxu0 %v10250_v45  ;;  %v10325_v43 = vld [vmem:[%s13750_s7 + $0x90] sm:$0xff]   ;;  %v10326_v18 = vld [vmem:[%s13750_s7 + $0x58] sm:$0xff]   ;;  %v10330_v52 = vld [vmem:[%s13750_s7 + $0x60] sm:$0xff]  }
 0x463   :  { %7892 = vmatprep.subr.bf16.mxu1 %v10253_v4  ;;  %v10327_v45 = vld [vmem:[%s13750_s7 + $0xd8] sm:$0xff]  }
 0x464   :  { %6011 = vrot.lane.b32.xlu0 %v6002_v37, %s10359_s15  ;;  %v10328_v4 = vld [vmem:[%s13750_s7 + $0x18] sm:$0xff]   ;;  %v10333_v37 = vld [vmem:[%s13750_s7 + $0xa0] sm:$0xff]  }
 0x465   :  { %7721 = vmatpush1.bf16.msra.mxu0 %v10248_v2  ;;  %v10329_v35 = vld [vmem:[%s13750_s7 + $0x98] sm:$0xff]   ;;  %v10331_v2 = vld [vmem:[%s13750_s7 + $0xe0] sm:$0xff]  }
 0x466   :  { %7893 = vmatpush1.bf16.msra.mxu1 %v10251_v31  ;;  %7722 = vmatprep.subr.bf16.mxu0 %v10256_v7  ;;  %v10332_v31 = vld [vmem:[%s13750_s7 + $0x20] sm:$0xff]   ;;  %v10334_v7 = vld [vmem:[%s13750_s7 + $0x68] sm:$0xff]  }
 0x467   :  { %7894 = vmatprep.subr.bf16.mxu1 %v10259_v39  ;;  %v10335_v39 = vld [vmem:[%s13750_s7 + $0xe8] sm:$0xff]  }
 0x469   :  { %7723 = vmatpush1.bf16.msra.mxu0 %v10254_v55  ;;  %v10336_v55 = vld [vmem:[%s13750_s7 + $0x28] sm:$0xff]  }
 0x46a   :  { %7895 = vmatpush1.bf16.msra.mxu1 %v10257_v34  ;;  %7724 = vmatprep.subr.bf16.mxu0 %v10262_v44  ;;  %v10337_v34 = vld [vmem:[%s13750_s7 + $0xa8] sm:$0xff]   ;;  %v10338_v44 = vld [vmem:[%s13750_s7 + $0x70] sm:$0xff]  }
 0x46b   :  { %7896 = vmatprep.subr.bf16.mxu1 %v10265_v3  ;;  %v10339_v3 = vld [vmem:[%s13750_s7 + $0xf0] sm:$0xff]  }
 0x46d   :  { %7725 = vmatpush1.bf16.msra.mxu0 %v10260_v25  ;;  %v10340_v25 = vld [vmem:[%s13750_s7 + $0x30] sm:$0xff]  }
 0x46e   :  { %7897 = vmatpush1.bf16.msra.mxu1 %v10263_v41  ;;  %7726 = vmatprep.subr.bf16.mxu0 %v10268_v54  ;;  %v10341_v41 = vld [vmem:[%s13750_s7 + $0xb0] sm:$0xff]   ;;  %v10342_v54 = vld [vmem:[%s13750_s7 + $0x78] sm:$0xff]  }
 0x46f   :  { %7898 = vmatprep.subr.bf16.mxu1 %v10271_v28  ;;  %v10343_v28 = vld [vmem:[%s13750_s7 + $0xf8] sm:$0xff]  }
 0x471   :  { %7727 = vmatpush1.bf16.msra.mxu0 %v10266_v32  ;;  %v10344_v32 = vld [vmem:[%s13750_s7 + $0x38] sm:$0xff]  }
 0x472   :  { %7899 = vmatpush1.bf16.msra.mxu1 %v10269_v62  ;;  %7728 = vmatprep.subr.bf16.mxu0 %v10274_v38  ;;  %v10345_v62 = vld [vmem:[%s13750_s7 + $0xb8] sm:$0xff]   ;;  %v6281_v38 = vlaneseq }
 0x473   :  { %7900 = vmatprep.subr.bf16.mxu1 %v10277_v24 }
 0x474   :  { %v6282_v24 = vshrl.u32 %v6281_v38, 7 }
 0x475   :  { %7729 = vmatpush1.bf16.msra.mxu0 %v10272_v11 }
 0x476   :  { %7901 = vmatpush1.bf16.msra.mxu1 %v10275_v61  ;;  %7730 = vmatprep.subr.bf16.mxu0 %v10280_v20  ;;  %v6283_v11 = vsub.s32 0, %v6282_v24  ;;  %v6291_v61 = vsub.s32 2, %v6282_v24  ;;  %v6279_v20 = vld [vmem:[%s13751_s6] sm:$0xf] }
 0x477   :  { %7902 = vmatprep.subr.bf16.mxu1 %v10283_v22  ;;  %v6287_v22 = vsub.s32 1, %v6282_v24 }
 0x479   :  { %7731 = vmatpush1.bf16.msra.mxu0 %v10278_v53  ;;  %v6295_v53 = vsub.s32 3, %v6282_v24 }
 0x47a   :  { %7903 = vmatpush1.bf16.msra.mxu1 %v10281_v47  ;;  %7732 = vmatprep.subr.bf16.mxu0 %v10286_v21  ;;  %v6284_v47 = vrot.slane %v6279_v20, %v6283_v11  ;;  %v6292_v21 = vrot.slane %v6279_v20, %v6291_v61 }
 0x47b   :  { %7904 = vmatprep.subr.bf16.mxu1 %v10289_v19  ;;  %v6296_v19 = vrot.slane %v6279_v20, %v6295_v53 }
 0x47d   :  { %7733 = vmatpush1.bf16.msra.mxu0 %v10284_v36  ;;  %v6288_v36 = vrot.slane %v6279_v20, %v6287_v22 }
 0x47e   :  { %7905 = vmatpush1.bf16.msra.mxu1 %v10287_v58  ;;  %7734 = vmatprep.subr.bf16.mxu0 %v10292_v40 }
 0x47f   :  { %7906 = vmatprep.subr.bf16.mxu1 %v10295_v9 }
 0x481   :  { %7735 = vmatpush1.bf16.msra.mxu0 %v10290_v30 }
 0x482   :  { %7907 = vmatpush1.bf16.msra.mxu1 %v10293_v23  ;;  %7736 = vmatprep.subr.bf16.mxu0 %v10298_v60 }
 0x483   :  { %7908 = vmatprep.subr.bf16.mxu1 %v10301_v51 }
 0x485   :  { %7737 = vmatpush1.bf16.msra.mxu0 %v10296_v27 }
 0x486   :  { %7909 = vmatpush1.bf16.msra.mxu1 %v10299_v13  ;;  %7738 = vmatprep.subr.bf16.mxu0 %v10304_v42 }
 0x487   :  { %7910 = vmatprep.subr.bf16.mxu1 %v10307_v56 }
 0x489   :  { %7739 = vmatpush1.bf16.msra.mxu0 %v10302_v0 }
 0x48a   :  { %7911 = vmatpush1.bf16.msra.mxu1 %v10305_v46  ;;  %7740 = vmatprep.subr.bf16.mxu0 %v10310_v12 }
 0x48b   :  { %7912 = vmatprep.subr.bf16.mxu1 %v10313_v15 }
 0x48d   :  { %7741 = vmatpush1.bf16.msra.mxu0 %v10308_v16 }
 0x48e   :  { %7913 = vmatpush1.bf16.msra.mxu1 %v10311_v59  ;;  %9458 = vmatprep.subr.bf16.mxu0 %v10314_v57 }
 0x48f   :  { %9480 = vmatprep.subr.bf16.mxu1 %v10315_v48 }
 0x4c1   :  { %v6006_v26 = vpop.permute.xlu1 %6005 }
 0x4c2   :  { %6008 = vst.msk [vmem:[#allocation4 + $0x30] sm:$0xff] %vm3835_vm5, %v6006_v26 }
 0x4c9   :  { %v6021_v6 = vld [vmem:[#allocation4 + $0x30] sm:$0xff] }
 0x4d6   :  { %v6012_v8 = vpop.permute.xlu0 %6011 }
 0x4d7   :  { %6014 = vst.msk [vmem:[#allocation4 + $0x38] sm:$0xff] %vm3835_vm5, %v6012_v8 }
 0x4de   :  { %v6022_v5 = vld [vmem:[#allocation4 + $0x38] sm:$0xff] }
 0x4df   :  { %7742 = vmatprep.mubr.bf16.mxu0 %v6022_v5  ;;  %7914 = vmatprep.mubr.bf16.mxu1 %v6022_v5 }
 0x4e0   :  { %7743 = vmatmul.mubr.bf16.vlgmr.msra.gmra.mrb[164].mxu0 %v6021_v6  ;;  %7915 = vmatmul.mubr.bf16.vlgmr.msra.gmra.mrb[132].mxu1 %v6021_v6 }
 0x4e1   :  { %9459 = vmatpush3.bf16.msra.mxu0 %v10316_v14  ;;  %9481 = vmatpush3.bf16.msra.mxu1 %v10317_v50 }
 0x4e2   :  { %9460 = vmatprep.subr.bf16.mxu0 %v10318_v63  ;;  %9482 = vmatprep.subr.bf16.mxu1 %v10319_v33 }
 0x4e5   :  { %9461 = vmatpush3.bf16.msra.mxu0 %v10320_v49  ;;  %9483 = vmatpush3.bf16.msra.mxu1 %v10321_v1 }
 0x4e6   :  { %9462 = vmatprep.subr.bf16.mxu0 %v10322_v10  ;;  %9484 = vmatprep.subr.bf16.mxu1 %v10323_v29  ;;  %v8873_v29 = vld [vmem:[%s13752_s8] ss:$0 sm:$0xff] }
 0x4e9   :  { %9463 = vmatpush3.bf16.msra.mxu0 %v10324_v17  ;;  %9485 = vmatpush3.bf16.msra.mxu1 %v10325_v43 }
 0x4ea   :  { %9464 = vmatprep.subr.bf16.mxu0 %v10326_v18  ;;  %9486 = vmatprep.subr.bf16.mxu1 %v10327_v45  ;;  %v8283_v18 = vand.u32 127, %v6281_v38 }
 0x4ec   :  { %vm8284_vm6 = vcmp.lt.s32.totalorder %v8283_v18, 10 }
 0x4ed   :  { %9465 = vmatpush3.bf16.msra.mxu0 %v10328_v4  ;;  %9487 = vmatpush3.bf16.msra.mxu1 %v10329_v35 }
 0x4ee   :  { %9466 = vmatprep.subr.bf16.mxu0 %v10330_v52  ;;  %9488 = vmatprep.subr.bf16.mxu1 %v10331_v2 }
 0x4f1   :  { %9467 = vmatpush3.bf16.msra.mxu0 %v10332_v31  ;;  %9489 = vmatpush3.bf16.msra.mxu1 %v10333_v37 }
 0x4f2   :  { %9468 = vmatprep.subr.bf16.mxu0 %v10334_v7  ;;  %9490 = vmatprep.subr.bf16.mxu1 %v10335_v39 }
 0x4f5   :  { %9469 = vmatpush3.bf16.msra.mxu0 %v10336_v55  ;;  %9491 = vmatpush3.bf16.msra.mxu1 %v10337_v34 }
 0x4f6   :  { %9470 = vmatprep.subr.bf16.mxu0 %v10338_v44  ;;  %9492 = vmatprep.subr.bf16.mxu1 %v10339_v3 }
 0x4f9   :  { %9471 = vmatpush3.bf16.msra.mxu0 %v10340_v25  ;;  %9493 = vmatpush3.bf16.msra.mxu1 %v10341_v41 }
 0x4fa   :  { %9472 = vmatprep.subr.bf16.mxu0 %v10342_v54  ;;  %9494 = vmatprep.subr.bf16.mxu1 %v10343_v28 }
 0x4fd   :  { %9473 = vmatpush3.bf16.msra.mxu0 %v10344_v32  ;;  %9495 = vmatpush3.bf16.msra.mxu1 %v10345_v62 }
 0x5b3   :  { %v7744_v58 = vpop.f32.mrb[164].mxu0  ;;  %v7916_v40 = vpop.f32.mrb[132].mxu1 }
 0x5b4   :  { %v9646_v9 = vadd.f32 %v7744_v58, %v6284_v47  ;;  %v9650_v30 = vadd.f32 %v7916_v40, %v6292_v21  ;;  %v7746_v23 = vpop.f32.mrb[165].mxu0  ;;  %v7918_v60 = vpop.f32.mrb[133].mxu1 }
 0x5b5   :  { %v9647_v51 = vadd.f32 %v7746_v23, %v6288_v36  ;;  %v9651_v27 = vadd.f32 %v7918_v60, %v6296_v19  ;;  %v7748_v13 = vpop.f32.mrb[166].mxu0  ;;  %v7920_v42 = vpop.f32.mrb[134].mxu1 }
 0x5b6   :  { %v9648_v56 = vadd.f32 %v7748_v13, %v6284_v47  ;;  %v9652_v0 = vadd.f32 %v7920_v42, %v6292_v21  ;;  %v7750_v46 = vpop.f32.mrb[167].mxu0  ;;  %v7922_v12 = vpop.f32.mrb[135].mxu1  ;;  %v7925_v59 = vmax.f32 %v9646_v9, 0.0  ;;  %v7927_v57 = vmax.f32 %v9650_v30, 0.0 }
 0x5b7   :  { %v9649_v15 = vadd.f32 %v7750_v46, %v6288_v36  ;;  %v9653_v16 = vadd.f32 %v7922_v12, %v6296_v19  ;;  %v7926_v8 = vmax.f32 %v9647_v51, 0.0  ;;  %v7928_v14 = vmax.f32 %v9651_v27, 0.0 }
 0x5b8   :  { %v7929_v48 = vmax.f32 %v9648_v56, 0.0  ;;  %v7931_v26 = vmax.f32 %v9652_v0, 0.0 }
 0x5b9   :  { %v7930_v50 = vmax.f32 %v9649_v15, 0.0  ;;  %v7932_v5 = vmax.f32 %v9653_v16, 0.0 }
 0x5ba   :  { %v7933_v63 = vpack.c.bf16 %v7929_v48, %v7925_v59  ;;  %v7935_v33 = vpack.c.bf16 %v7931_v26, %v7927_v57 }
 0x5bb   :  { %v7934_v6 = vpack.c.bf16 %v7930_v50, %v7926_v8  ;;  %v7936_v49 = vpack.c.bf16 %v7932_v5, %v7928_v14 }
 0x5bd   :  { %8232 = vmatprep.mubr.bf16.mxu0 %v7934_v6  ;;  %8273 = vmatprep.mubr.bf16.mxu1 %v7936_v49 }
 0x5be   :  { %8233 = vmatmul.mubr.bf16.vlgmr.msra.gmra.mrb[168].mxu0 %v7933_v63  ;;  %8274 = vmatmul.mubr.bf16.vlgmr.msra.gmra.mrb[136].mxu1 %v7935_v33 }
 0x691   :  { %v9474_v1 = vpop.f32.mrb[168].mxu0  ;;  %v9496_v10 = vpop.f32.mrb[136].mxu1 }
 0x692   :  { %v9475_v17 = vpop.f32.mrb[169].mxu0  ;;  %v9497_v43 = vpop.f32.mrb[137].mxu1 }
 0x693   :  { %v9476_v45 = vadd.f32 %v9475_v17, %v9474_v1  ;;  %v9498_v4 = vadd.f32 %v9497_v43, %v9496_v10  ;;  %v9477_v35 = vpop.f32.mrb[170].mxu0  ;;  %v9499_v52 = vpop.f32.mrb[138].mxu1 }
 0x694   :  { %v9478_v2 = vpop.f32.mrb[171].mxu0  ;;  %v9500_v31 = vpop.f32.mrb[139].mxu1 }
 0x695   :  { %v8235_v37 = vadd.f32 %v9476_v45, %v8873_v29  ;;  %v9479_v7 = vadd.f32 %v9478_v2, %v9477_v35  ;;  %v9501_v39 = vadd.f32 %v9500_v31, %v9499_v52 }
 0x697   :  { %v8276_v55 = vadd.f32 %v9498_v4, %v8235_v37  ;;  %v8238_v34 = vadd.f32 %v9479_v7, %v8873_v29 }
 0x699   :  { %v8279_v44 = vadd.f32 %v9501_v39, %v8238_v34  ;;  %v8285_v3 = vsel %vm8284_vm6, %v8276_v55, -1e+30 }
 0x69a   :  { %8287 = vmax.xlane.f32.xlu0 %v8285_v3 }
 0x69b   :  { %v8286_v25 = vsel %vm8284_vm6, %v8279_v44, -1e+30 }
 0x69c   :  { %8289 = vmax.xlane.f32.xlu1 %v8286_v25 }
 0x727   :  { %v8288_v41 = vpop.xlane.xlu0 %8287 }
 0x728   :  { %v8291_v54 = vsub.f32 %v8285_v3, %v8288_v41 }
 0x729   :  { %v8290_v28 = vpop.xlane.xlu1 %8289 }
 0x72a   :  { %v8293_v32 = vmul.f32 1.442695, %v8291_v54  ;;  %v8292_v62 = vsub.f32 %v8286_v25, %v8290_v28 }
 0x72c   :  { %10346 = vpow2.f32 %v8293_v32  ;;  %v8295_v38 = vmul.f32 1.442695, %v8292_v62 }
 0x72e   :  { %10348 = vpow2.f32 %v8295_v38 }
 0x736   :  { %v10347_v24 = vpop.eup %10346 }
 0x737   :  { %8297 = vadd.xlane.f32.xlu0 %v10347_v24 }
 0x738   :  { %v10349_v11 = vpop.eup %10348 }
 0x73b   :  { %8299 = vadd.xlane.f32.xlu0 %v10349_v11 }
 0x7c4   :  { %v8298_v61 = vpop.xlane.xlu0 %8297 }
 0x7c5   :  { %10350 = vlog2.f32 %v8298_v61 }
 0x7c8   :  { %v8300_v20 = vpop.xlane.xlu0 %8299 }
 0x7c9   :  { %10352 = vlog2.f32 %v8300_v20 }
 0x7cf   :  { %v10351_v22 = vpop.eup %10350 }
 0x7d0   :  { %v8302_v53 = vmul.f32 0.6931472, %v10351_v22 }
 0x7d2   :  { %v8305_v47 = vadd.f32 %v8302_v53, %v8288_v41 }
 0x7d3   :  { %v10353_v21 = vpop.eup %10352 }
 0x7d4   :  { %v8307_v36 = vsub.f32 %v8285_v3, %v8305_v47  ;;  %v8304_v19 = vmul.f32 0.6931472, %v10353_v21 }
 0x7d6   :  { %8309 = vst [vmem:[%s13753_s9] sm:$0xff] %v8307_v36  ;;  %v8306_v58 = vadd.f32 %v8304_v19, %v8290_v28 }
 0x7d8   :  { %v8308_v40 = vsub.f32 %v8286_v25, %v8306_v58 }
 0x7da   :  { %8310 = vst [vmem:[%s13753_s9 + $0x8] sm:$0xff] %v8308_v40 }

</bundles_post_ra>
